<compile_context>
chip_gen: v7x
topology: tpu7x:2x2x1
jax: 0.10.0
libtpu: 0.0.40
codegen_flags: <defaults>
</compile_context>

<pallas_src>
import math

import numpy as np
import jax
import jax.numpy as jnp
from jax import lax
from jax.experimental import pallas as pl
from jax.experimental.pallas import tpu as pltpu


# ----------------------------------------------------------------------------
# Host-side construction of the selection / band matrices (pure numpy)
# ----------------------------------------------------------------------------
def _round8(x):
    return ((x + 7) // 8) * 8


def _col_sel(n_in, n_out, stride, k):
    """(n_in, n_out) 0/1 matrix: column o selects input index stride*o + k - 1."""
    s = np.zeros((n_in, n_out), np.float32)
    for o in range(n_out):
        i = stride * o + k - 1
        if 0 <= i < n_in:
            s[i, o] = 1.0
    return s


def _row_sel(hin, hin_pad, hout, hout_pad, stride):
    """(3, hout_pad, hin_pad) row-selection matrices R_kh (zero rows/cols = padding)."""
    r = np.zeros((3, hout_pad, hin_pad), np.float32)
    for k in range(3):
        for o in range(hout):
            i = stride * o + k - 1
            if 0 <= i < hin:
                r[k, o, i] = 1.0
    return r


def _fold_bias_bn(cout, bias=None, bn=None):
    """Fold conv bias + eval-mode BatchNorm into per-channel (scale, shift) numpy vectors."""
    b = np.zeros((cout,), np.float32) if bias is None else np.asarray(bias, np.float32)
    if bn is None:
        return np.ones((cout,), np.float32), b
    gamma = np.asarray(bn["gamma"], np.float32)
    beta = np.asarray(bn["beta"], np.float32)
    mean = np.asarray(bn["mean"], np.float32)
    var = np.asarray(bn["var"], np.float32)
    scale = gamma / np.sqrt(var + bn["eps"])
    shift = scale * (b - mean) + beta
    return scale, shift


def _branch_M_tap(w, scale_c, win, wout, stride, kh):
    """Per-image banded conv matrix for one kh tap: (win*cin, wout*cout), scale folded in."""
    w = np.asarray(w, np.float32)
    cin, cout = int(w.shape[2]), int(w.shape[3])
    M = np.zeros((win * cin, wout * cout), np.float32)
    for kw in range(3):
        sel = _col_sel(win, wout, stride, kw)                      # (win, wout)
        M += np.einsum("io,cd->icod", sel, w[kh, kw]).reshape(win * cin, wout * cout)
    M *= np.tile(scale_c, wout)[None, :]                           # fold BN/bias scale
    return M


def _conv_layer(branches, hin, hin_pad, win, stride, G):
    """Constants for a fused group of 3x3 / pad-1 convs sharing the same input & stride.

    branches: list of (w(3,3,cin,cout), scale(cout), shift(cout)) numpy triples.
    Returns:
      (R, M, shift) jnp constants where
        R     : (3, hout_pad, hin_pad)                 row selection (tap/stride/zero-pad)
        M     : (3*G*win*cin, sum_b G*wout*cout_b)     kh taps stacked along rows,
                block-diag across the G lane-batched images, branch columns concatenated
        shift : (1, sum_b G*wout*cout_b)
      output geometry (hout, hout_pad, wout) and per-branch column counts.
    """
    hout = (hin - 1) // stride + 1
    wout = (win - 1) // stride + 1
    hout_pad = _round8(hout)

    R = _row_sel(hin, hin_pad, hout, hout_pad, stride)

    eye_g = np.eye(G, dtype=np.float32)
    taps = []
    for kh in range(3):
        cols = [np.kron(eye_g, _branch_M_tap(w, sc, win, wout, stride, kh))
                for (w, sc, _) in branches]
        taps.append(np.concatenate(cols, axis=1))
    M = np.concatenate(taps, axis=0)

    shift = np.concatenate([np.tile(np.tile(sh, wout), G) for (_, _, sh) in branches])[None, :]
    ncols = [G * wout * int(w.shape[3]) for (w, _, _) in branches]
    return ((jnp.asarray(R), jnp.asarray(M), jnp.asarray(shift)),
            hout, hout_pad, wout, ncols)


def _pool_layer(hin, hin_pad, win, c, G):
    """Constants for 3x3 / stride-2 / pad-1 max pooling on a (H, G*W*C) activation."""
    hout = (hin - 1) // 2 + 1
    wout = (win - 1) // 2 + 1
    hout_pad = _round8(hout)
    R = _row_sel(hin, hin_pad, hout, hout_pad, 2)
    eye_c = np.eye(c, dtype=np.float32)
    eye_g = np.eye(G, dtype=np.float32)
    S = np.stack([np.kron(eye_g, np.kron(_col_sel(win, wout, 2, k), eye_c)) for k in range(3)])
    return (jnp.asarray(R), jnp.asarray(S)), hout, hout_pad, wout


# ----------------------------------------------------------------------------
# Wrapper: builds constants, defines the fused kernel, calls pallas_call
# ----------------------------------------------------------------------------
def residual_ds16_sw(label_mask, params, G=4, use_final_relu=True):
    """label_mask: (B, S, H, W) -> (label_enc, sample_w), each (B, S, d3, H/16, W/16)."""
    assert label_mask.ndim == 4
    B, S, H, W = map(int, label_mask.shape)
    n = B * S
    G = max(1, min(int(G), n))
    n_pad = -(-n // G) * G
    steps = n_pad // G

    x = label_mask.reshape(n, H, W).astype(jnp.float32)
    if n_pad != n:
        x = jnp.concatenate([x, jnp.zeros((n_pad - n, H, W), jnp.float32)], axis=0)
    # lane-pack G images per grid step: (steps, H, G*W), image g at lanes [g*W, (g+1)*W)
    x = x.reshape(steps, G, H, W).transpose(0, 2, 1, 3).reshape(steps, H, G * W)

    p = params
    d0 = int(p["conv0_w"].shape[3])
    d3 = int(p["lp_w"].shape[3])

    def branch(w, bias=None, bn=None):
        sc, sh = _fold_bias_bn(int(w.shape[3]), bias, bn)
        return (np.asarray(w, np.float32), sc, sh)

    # conv_block: 1 -> d0, stride 2, conv-bias + BN (+ ReLU in kernel)
    (c0_R, c0_M, c0_sh), h, hp, w_, _ = _conv_layer(
        [branch(p["conv0_w"], p["conv0_b"], p["conv0_bn"])], H, H, W, 2, G)
    # max pool 3x3 / s2 / p1
    (pool_R, pool_S), h, hp, w_ = _pool_layer(h, hp, w_, d0, G)
    # res1: fused [conv1+bn1 | downsample(+bias)] stride 2, then conv2+bn2 stride 1
    (r1_R, r1_M, r1_sh), h, hp, w_, nc1 = _conv_layer(
        [branch(p["res1_w1"], None, p["res1_bn1"]),
         branch(p["res1_wd"], p["res1_bd"], None)], h, hp, w_, 2, G)
    (r1b_R, r1b_M, r1b_sh), h, hp, w_, _ = _conv_layer(
        [branch(p["res1_w2"], None, p["res1_bn2"])], h, hp, w_, 1, G)
    # res2
    (r2_R, r2_M, r2_sh), h, hp, w_, nc2 = _conv_layer(
        [branch(p["res2_w1"], None, p["res2_bn1"]),
         branch(p["res2_wd"], p["res2_bd"], None)], h, hp, w_, 2, G)
    (r2b_R, r2b_M, r2b_sh), h, hp, w_, _ = _conv_layer(
        [branch(p["res2_w2"], None, p["res2_bn2"])], h, hp, w_, 1, G)
    # fused prediction head: [label_pred (bias+BN, ReLU) | samp_w_pred (bias)]
    (hd_R, hd_M, hd_sh), ho, ho_pad, wo, nch = _conv_layer(
        [branch(p["lp_w"], p["lp_b"], p["lp_bn"]),
         branch(p["sw_w"], p["sw_b"], None)], h, hp, w_, 1, G)

    split1, split2 = nc1[0], nc2[0]
    n_lab = nch[0]
    n_out = nch[0] + nch[1]

    # use_final_relu applies only to the label_pred lane block (full-shape host mask)
    relu_mask = np.zeros((ho_pad, n_out), np.float32)
    if use_final_relu:
        relu_mask[:, :n_lab] = 1.0
    relu_mask = jnp.asarray(relu_mask)

    # ----------------------------- the fused kernel ---------------------------
    def kernel(x_ref,
               c0_R, c0_M, c0_sh,
               pool_R, pool_S,
               r1_R, r1_M, r1_sh, r1b_R, r1b_M, r1b_sh,
               r2_R, r2_M, r2_sh, r2b_R, r2b_M, r2b_sh,
               hd_R, hd_M, hd_sh, relu_mask_ref,
               out_ref):

        def mm(a, b):
            return jnp.dot(a, b, preferred_element_type=jnp.float32)

        def conv(a, R, M, sh, relu):
            # 3x3 conv (+ stride + zero padding):
            #   3 row-selection matmuls, lane-concat over kh taps, ONE big MXU matmul
            t = jnp.concatenate([mm(R[0], a), mm(R[1], a), mm(R[2], a)], axis=-1)
            y = mm(t, M[...]) + sh[...]                 # folded conv-bias / eval-mode BN
            return jnp.maximum(y, 0.0) if relu else y

        def max_pool(a, R, S):
            # 3x3/s2/p1 max pool; input is post-ReLU so zero padding == -inf padding.
            r = jnp.maximum(jnp.maximum(mm(R[0], a), mm(R[1], a)), mm(R[2], a))
            return jnp.maximum(jnp.maximum(mm(r, S[0]), mm(r, S[1])), mm(r, S[2]))

        def basic_block(a, Rf, Mf, shf, Rb, Mb, shb, split):
            y = conv(a, Rf, Mf, shf, relu=False)        # fused [conv1+bn1 | downsample]
            a1 = jnp.maximum(y[:, :split], 0.0)         # conv1 branch + ReLU
            res = y[:, split:]                          # downsample branch (+bias)
            out = conv(a1, Rb, Mb, shb, relu=False)     # conv2 + bn2
            return jnp.maximum(out + res, 0.0)

        a = x_ref[0]                                    # (H, G*W), Cin = 1
        a = conv(a, c0_R, c0_M, c0_sh, relu=True)       # conv_block
        a = max_pool(a, pool_R, pool_S)
        a = basic_block(a, r1_R, r1_M, r1_sh, r1b_R, r1b_M, r1b_sh, split1)
        a = basic_block(a, r2_R, r2_M, r2_sh, r2b_R, r2b_M, r2b_sh, split2)
        y = conv(a, hd_R, hd_M, hd_sh, relu=False)      # fused [label_pred | samp_w_pred]
        y = jnp.where(relu_mask_ref[...] > 0.5, jnp.maximum(y, 0.0), y)
        out_ref[0] = y

    consts = [c0_R, c0_M, c0_sh, pool_R, pool_S,
              r1_R, r1_M, r1_sh, r1b_R, r1b_M, r1b_sh,
              r2_R, r2_M, r2_sh, r2b_R, r2b_M, r2b_sh,
              hd_R, hd_M, hd_sh, relu_mask]

    in_specs = [pl.BlockSpec((1, H, G * W), lambda i: (i, 0, 0))]
    for c in consts:
        in_specs.append(pl.BlockSpec(c.shape, lambda i, nd=c.ndim: (0,) * nd))

    out = pl.pallas_call(
        kernel,
        out_shape=jax.ShapeDtypeStruct((steps, ho_pad, n_out), jnp.float32),
        grid=(steps,),
        in_specs=in_specs,
        out_specs=pl.BlockSpec((1, ho_pad, n_out), lambda i: (i, 0, 0)),
        compiler_params=pltpu.CompilerParams(
            # batch-of-images axis is embarrassingly parallel (v7x megacore splits it)
            dimension_semantics=("parallel",),
            # block-diag constants ~8 MiB (double-buffered ~17 MiB) > v5e 16 MiB default
            vmem_limit_bytes=48 * 1024 * 1024,
        ),
    )(x, *consts)

    # drop row padding, split heads, un-pack lane batching, NHWC -> (B, S, d3, ho, wo)
    lab = out[:, :ho, :n_lab].reshape(steps, ho, G, wo, d3)
    smp = out[:, :ho, n_lab:].reshape(steps, ho, G, wo, d3)

    def finish(t):
        t = t.transpose(0, 2, 4, 1, 3).reshape(n_pad, d3, ho, wo)[:n]
        return t.reshape(B, S, d3, ho, wo)

    return finish(lab), finish(smp)


# ----------------------------------------------------------------------------
# Deterministic parameter init (matches module __init__ shapes / special fills)
# ----------------------------------------------------------------------------
def init_params(key, layer_dims, eps=1e-5):
    d0, d1, d2, d3 = layer_dims
    ks = jax.random.split(key, 12)

    def w_init(k, cin, cout):
        nf = 3 * 3 * cout
        return jax.random.normal(k, (3, 3, cin, cout), jnp.float32) * math.sqrt(2.0 / nf)

    def b_init(k, cin, cout):
        bound = 1.0 / math.sqrt(cin * 9)
        return jax.random.uniform(k, (cout,), jnp.float32, -bound, bound)

    def bn_init(c):  # freshly-initialised BatchNorm2d (eval mode)
        return {"gamma": jnp.ones((c,), jnp.float32), "beta": jnp.zeros((c,), jnp.float32),
                "mean": jnp.zeros((c,), jnp.float32), "var": jnp.ones((c,), jnp.float32),
                "eps": eps}

    return {
        "conv0_w": w_init(ks[0], 1, d0), "conv0_b": b_init(ks[1], 1, d0), "conv0_bn": bn_init(d0),
        "res1_w1": w_init(ks[2], d0, d1), "res1_bn1": bn_init(d1),
        "res1_w2": w_init(ks[3], d1, d1), "res1_bn2": bn_init(d1),
        "res1_wd": w_init(ks[4], d0, d1), "res1_bd": b_init(ks[5], d0, d1),
        "res2_w1": w_init(ks[6], d1, d2), "res2_bn1": bn_init(d2),
        "res2_w2": w_init(ks[7], d2, d2), "res2_bn2": bn_init(d2),
        "res2_wd": w_init(ks[8], d1, d2), "res2_bd": b_init(ks[9], d1, d2),
        "lp_w": w_init(ks[10], d2, d3), "lp_b": b_init(ks[11], d2, d3), "lp_bn": bn_init(d3),
        # samp_w_pred: weight filled with 0, bias filled with 1 (as in the module)
        "sw_w": jnp.zeros((3, 3, d2, d3), jnp.float32),
        "sw_b": jnp.ones((d3,), jnp.float32),
    }


# ----------------------------------------------------------------------------
# Pure-JAX (XLA conv) reference of the same forward pass, for self-checking
# ----------------------------------------------------------------------------
def _ref_conv(x, w, bias, stride):
    y = lax.conv_general_dilated(
        x, w, window_strides=(stride, stride), padding=((1, 1), (1, 1)),
        dimension_numbers=("NCHW", "HWIO", "NCHW"), precision=lax.Precision.HIGHEST)
    if bias is not None:
        y = y + bias[None, :, None, None]
    return y


def _ref_bn(x, bn):
    scale = bn["gamma"] / jnp.sqrt(bn["var"] + bn["eps"])
    shift = bn["beta"] - bn["mean"] * scale
    return x * scale[None, :, None, None] + shift[None, :, None, None]


def _ref_maxpool(x):
    return lax.reduce_window(x, -jnp.inf, lax.max, (1, 1, 3, 3), (1, 1, 2, 2),
                             ((0, 0), (0, 0), (1, 1), (1, 1)))


def _ref_forward(label_mask, p):
    B, S, H, W = label_mask.shape
    x = label_mask.reshape(B * S, 1, H, W).astype(jnp.float32)
    o = jax.nn.relu(_ref_bn(_ref_conv(x, p["conv0_w"], p["conv0_b"], 2), p["conv0_bn"]))
    o = _ref_maxpool(o)

    def block(o, w1, bn1, w2, bn2, wd, bd):
        out = jax.nn.relu(_ref_bn(_ref_conv(o, w1, None, 2), bn1))
        out = _ref_bn(_ref_conv(out, w2, None, 1), bn2)
        res = _ref_conv(o, wd, bd, 2)
        return jax.nn.relu(out + res)

    o = block(o, p["res1_w1"], p["res1_bn1"], p["res1_w2"], p["res1_bn2"],
              p["res1_wd"], p["res1_bd"])
    o = block(o, p["res2_w1"], p["res2_bn1"], p["res2_w2"], p["res2_bn2"],
              p["res2_wd"], p["res2_bd"])
    label = jax.nn.relu(_ref_bn(_ref_conv(o, p["lp_w"], p["lp_b"], 1), p["lp_bn"]))
    samp = _ref_conv(o, p["sw_w"], p["sw_b"], 1)
    d3, ho, wo = label.shape[1], label.shape[2], label.shape[3]
    return label.reshape(B, S, d3, ho, wo), samp.reshape(B, S, d3, ho, wo)


if __name__ == "__main__":
    key = jax.random.PRNGKey(0)
    kp, kx = jax.random.split(key)

    layer_dims = (4, 8, 16, 4)
    params = init_params(kp, layer_dims)

    B, S, H, W = 2, 4, 64, 64                       # n = 8 images, G = 4 -> grid of 2 steps
    label_mask = (jax.random.uniform(kx, (B, S, H, W)) > 0.5).astype(jnp.float32)

    label_enc, sample_w = residual_ds16_sw(label_mask, params, G=4)
    jax.block_until_ready((label_enc, sample_w))

    d3 = layer_dims[3]
    assert label_enc.shape == (B, S, d3, H // 16, W // 16), label_enc.shape
    assert sample_w.shape == (B, S, d3, H // 16, W // 16), sample_w.shape

    # Self-check against a pure-JAX reference of the same network.
    ref_label, ref_samp = _ref_forward(label_mask, params)
    assert bool(jnp.allclose(sample_w, 1.0, atol=1e-4)), "samp_w_pred (w=0, b=1) must be all ones"
    assert bool(jnp.allclose(sample_w, ref_samp, atol=1e-4))
    assert bool(jnp.allclose(label_enc, ref_label, atol=5e-2, rtol=5e-2)), (
        float(jnp.max(jnp.abs(label_enc - ref_label))))

    print("KERNEL_OK")
</pallas_src>

<mosaic_0001>
module attributes {stable_mosaic.version = 11 : i64} {
  func.func @kernel(%arg0: i32, %arg1: memref<1x64x256xf32, #tpu.memory_space<vmem>>, %arg2: memref<3x32x64xf32, #tpu.memory_space<vmem>>, %arg3: memref<768x512xf32, #tpu.memory_space<vmem>>, %arg4: memref<1x512xf32, #tpu.memory_space<vmem>>, %arg5: memref<3x16x32xf32, #tpu.memory_space<vmem>>, %arg6: memref<3x512x256xf32, #tpu.memory_space<vmem>>, %arg7: memref<3x8x16xf32, #tpu.memory_space<vmem>>, %arg8: memref<768x512xf32, #tpu.memory_space<vmem>>, %arg9: memref<1x512xf32, #tpu.memory_space<vmem>>, %arg10: memref<3x8x8xf32, #tpu.memory_space<vmem>>, %arg11: memref<768x256xf32, #tpu.memory_space<vmem>>, %arg12: memref<1x256xf32, #tpu.memory_space<vmem>>, %arg13: memref<3x8x8xf32, #tpu.memory_space<vmem>>, %arg14: memref<768x512xf32, #tpu.memory_space<vmem>>, %arg15: memref<1x512xf32, #tpu.memory_space<vmem>>, %arg16: memref<3x8x8xf32, #tpu.memory_space<vmem>>, %arg17: memref<768x256xf32, #tpu.memory_space<vmem>>, %arg18: memref<1x256xf32, #tpu.memory_space<vmem>>, %arg19: memref<3x8x8xf32, #tpu.memory_space<vmem>>, %arg20: memref<768x128xf32, #tpu.memory_space<vmem>>, %arg21: memref<1x128xf32, #tpu.memory_space<vmem>>, %arg22: memref<8x128xf32, #tpu.memory_space<vmem>>, %arg23: memref<1x8x128xf32, #tpu.memory_space<vmem>>) attributes {dimension_semantics = [#tpu.dimension_semantics<parallel>], iteration_bounds = array<i64: 2>, scalar_prefetch = 0 : i64, scratch_operands = 0 : i64, tpu.core_type = #tpu.core_type<tc>, window_params = [{transform_indices = @transform_0, window_bounds = array<i64: 1, 64, 256>}, {pipeline_mode = #tpu.pipeline_mode<synchronous>, transform_indices = @transform_1, window_bounds = array<i64: 3, 32, 64>}, {pipeline_mode = #tpu.pipeline_mode<synchronous>, transform_indices = @transform_2, window_bounds = array<i64: 768, 512>}, {pipeline_mode = #tpu.pipeline_mode<synchronous>, transform_indices = @transform_3, window_bounds = array<i64: 1, 512>}, {pipeline_mode = #tpu.pipeline_mode<synchronous>, transform_indices = @transform_4, window_bounds = array<i64: 3, 16, 32>}, {pipeline_mode = #tpu.pipeline_mode<synchronous>, transform_indices = @transform_5, window_bounds = array<i64: 3, 512, 256>}, {pipeline_mode = #tpu.pipeline_mode<synchronous>, transform_indices = @transform_6, window_bounds = array<i64: 3, 8, 16>}, {pipeline_mode = #tpu.pipeline_mode<synchronous>, transform_indices = @transform_7, window_bounds = array<i64: 768, 512>}, {pipeline_mode = #tpu.pipeline_mode<synchronous>, transform_indices = @transform_8, window_bounds = array<i64: 1, 512>}, {pipeline_mode = #tpu.pipeline_mode<synchronous>, transform_indices = @transform_9, window_bounds = array<i64: 3, 8, 8>}, {pipeline_mode = #tpu.pipeline_mode<synchronous>, transform_indices = @transform_10, window_bounds = array<i64: 768, 256>}, {pipeline_mode = #tpu.pipeline_mode<synchronous>, transform_indices = @transform_11, window_bounds = array<i64: 1, 256>}, {pipeline_mode = #tpu.pipeline_mode<synchronous>, transform_indices = @transform_12, window_bounds = array<i64: 3, 8, 8>}, {pipeline_mode = #tpu.pipeline_mode<synchronous>, transform_indices = @transform_13, window_bounds = array<i64: 768, 512>}, {pipeline_mode = #tpu.pipeline_mode<synchronous>, transform_indices = @transform_14, window_bounds = array<i64: 1, 512>}, {pipeline_mode = #tpu.pipeline_mode<synchronous>, transform_indices = @transform_15, window_bounds = array<i64: 3, 8, 8>}, {pipeline_mode = #tpu.pipeline_mode<synchronous>, transform_indices = @transform_16, window_bounds = array<i64: 768, 256>}, {pipeline_mode = #tpu.pipeline_mode<synchronous>, transform_indices = @transform_17, window_bounds = array<i64: 1, 256>}, {pipeline_mode = #tpu.pipeline_mode<synchronous>, transform_indices = @transform_18, window_bounds = array<i64: 3, 8, 8>}, {pipeline_mode = #tpu.pipeline_mode<synchronous>, transform_indices = @transform_19, window_bounds = array<i64: 768, 128>}, {pipeline_mode = #tpu.pipeline_mode<synchronous>, transform_indices = @transform_20, window_bounds = array<i64: 1, 128>}, {pipeline_mode = #tpu.pipeline_mode<synchronous>, transform_indices = @transform_21, window_bounds = array<i64: 8, 128>}, {transform_indices = @transform_22, window_bounds = array<i64: 1, 8, 128>}]} {
    %c0 = arith.constant 0 : index
    %c0_0 = arith.constant 0 : index
    %c0_1 = arith.constant 0 : index
    %0 = vector.load %arg1[%c0, %c0_0, %c0_1] : memref<1x64x256xf32, #tpu.memory_space<vmem>>, vector<1x64x256xf32>
    %1 = vector.shape_cast %0 : vector<1x64x256xf32> to vector<64x256xf32>
    %c0_2 = arith.constant 0 : index
    %c0_3 = arith.constant 0 : index
    %c0_4 = arith.constant 0 : index
    %2 = vector.load %arg2[%c0_2, %c0_3, %c0_4] : memref<3x32x64xf32, #tpu.memory_space<vmem>>, vector<1x32x64xf32>
    %3 = vector.shape_cast %2 : vector<1x32x64xf32> to vector<32x64xf32>
    %cst = arith.constant dense<0.000000e+00> : vector<32x256xf32>
    %4 = tpu.matmul %3, %1, %cst {dimension_numbers = #tpu.dot_dimension_numbers<[1], [0], [0], [1], [0, 0, 1, 1], [], []>} : vector<32x64xf32>, vector<64x256xf32>, vector<32x256xf32> -> vector<32x256xf32>
    %c1 = arith.constant 1 : index
    %c0_5 = arith.constant 0 : index
    %c0_6 = arith.constant 0 : index
    %5 = vector.load %arg2[%c1, %c0_5, %c0_6] : memref<3x32x64xf32, #tpu.memory_space<vmem>>, vector<1x32x64xf32>
    %6 = vector.shape_cast %5 : vector<1x32x64xf32> to vector<32x64xf32>
    %cst_7 = arith.constant dense<0.000000e+00> : vector<32x256xf32>
    %7 = tpu.matmul %6, %1, %cst_7 {dimension_numbers = #tpu.dot_dimension_numbers<[1], [0], [0], [1], [0, 0, 1, 1], [], []>} : vector<32x64xf32>, vector<64x256xf32>, vector<32x256xf32> -> vector<32x256xf32>
    %c2 = arith.constant 2 : index
    %c0_8 = arith.constant 0 : index
    %c0_9 = arith.constant 0 : index
    %8 = vector.load %arg2[%c2, %c0_8, %c0_9] : memref<3x32x64xf32, #tpu.memory_space<vmem>>, vector<1x32x64xf32>
    %9 = vector.shape_cast %8 : vector<1x32x64xf32> to vector<32x64xf32>
    %cst_10 = arith.constant dense<0.000000e+00> : vector<32x256xf32>
    %10 = tpu.matmul %9, %1, %cst_10 {dimension_numbers = #tpu.dot_dimension_numbers<[1], [0], [0], [1], [0, 0, 1, 1], [], []>} : vector<32x64xf32>, vector<64x256xf32>, vector<32x256xf32> -> vector<32x256xf32>
    %11 = tpu.concatenate %4, %7, %10 in 1 : vector<32x256xf32>, vector<32x256xf32>, vector<32x256xf32> -> vector<32x768xf32>
    %c0_11 = arith.constant 0 : index
    %c0_12 = arith.constant 0 : index
    %12 = vector.load %arg3[%c0_11, %c0_12] : memref<768x512xf32, #tpu.memory_space<vmem>>, vector<768x512xf32>
    %cst_13 = arith.constant dense<0.000000e+00> : vector<32x512xf32>
    %13 = tpu.matmul %11, %12, %cst_13 {dimension_numbers = #tpu.dot_dimension_numbers<[1], [0], [0], [1], [0, 0, 1, 1], [], []>} : vector<32x768xf32>, vector<768x512xf32>, vector<32x512xf32> -> vector<32x512xf32>
    %c0_14 = arith.constant 0 : index
    %c0_15 = arith.constant 0 : index
    %14 = vector.load %arg4[%c0_14, %c0_15] : memref<1x512xf32, #tpu.memory_space<vmem>>, vector<1x512xf32>
    %15 = vector.broadcast %14 : vector<1x512xf32> to vector<32x512xf32>
    %16 = arith.addf %13, %15 : vector<32x512xf32>
    %cst_16 = arith.constant 0.000000e+00 : f32
    %17 = vector.broadcast %cst_16 : f32 to vector<32x512xf32>
    %18 = arith.maximumf %16, %17 : vector<32x512xf32>
    %c0_17 = arith.constant 0 : index
    %c0_18 = arith.constant 0 : index
    %c0_19 = arith.constant 0 : index
    %19 = vector.load %arg5[%c0_17, %c0_18, %c0_19] : memref<3x16x32xf32, #tpu.memory_space<vmem>>, vector<1x16x32xf32>
    %20 = vector.shape_cast %19 : vector<1x16x32xf32> to vector<16x32xf32>
    %cst_20 = arith.constant dense<0.000000e+00> : vector<16x512xf32>
    %21 = tpu.matmul %20, %18, %cst_20 {dimension_numbers = #tpu.dot_dimension_numbers<[1], [0], [0], [1], [0, 0, 1, 1], [], []>} : vector<16x32xf32>, vector<32x512xf32>, vector<16x512xf32> -> vector<16x512xf32>
    %c1_21 = arith.constant 1 : index
    %c0_22 = arith.constant 0 : index
    %c0_23 = arith.constant 0 : index
    %22 = vector.load %arg5[%c1_21, %c0_22, %c0_23] : memref<3x16x32xf32, #tpu.memory_space<vmem>>, vector<1x16x32xf32>
    %23 = vector.shape_cast %22 : vector<1x16x32xf32> to vector<16x32xf32>
    %cst_24 = arith.constant dense<0.000000e+00> : vector<16x512xf32>
    %24 = tpu.matmul %23, %18, %cst_24 {dimension_numbers = #tpu.dot_dimension_numbers<[1], [0], [0], [1], [0, 0, 1, 1], [], []>} : vector<16x32xf32>, vector<32x512xf32>, vector<16x512xf32> -> vector<16x512xf32>
    %25 = arith.maximumf %21, %24 : vector<16x512xf32>
    %c2_25 = arith.constant 2 : index
    %c0_26 = arith.constant 0 : index
    %c0_27 = arith.constant 0 : index
    %26 = vector.load %arg5[%c2_25, %c0_26, %c0_27] : memref<3x16x32xf32, #tpu.memory_space<vmem>>, vector<1x16x32xf32>
    %27 = vector.shape_cast %26 : vector<1x16x32xf32> to vector<16x32xf32>
    %cst_28 = arith.constant dense<0.000000e+00> : vector<16x512xf32>
    %28 = tpu.matmul %27, %18, %cst_28 {dimension_numbers = #tpu.dot_dimension_numbers<[1], [0], [0], [1], [0, 0, 1, 1], [], []>} : vector<16x32xf32>, vector<32x512xf32>, vector<16x512xf32> -> vector<16x512xf32>
    %29 = arith.maximumf %25, %28 : vector<16x512xf32>
    %c0_29 = arith.constant 0 : index
    %c0_30 = arith.constant 0 : index
    %c0_31 = arith.constant 0 : index
    %30 = vector.load %arg6[%c0_29, %c0_30, %c0_31] : memref<3x512x256xf32, #tpu.memory_space<vmem>>, vector<1x512x256xf32>
    %31 = vector.shape_cast %30 : vector<1x512x256xf32> to vector<512x256xf32>
    %cst_32 = arith.constant dense<0.000000e+00> : vector<16x256xf32>
    %32 = tpu.matmul %29, %31, %cst_32 {dimension_numbers = #tpu.dot_dimension_numbers<[1], [0], [0], [1], [0, 0, 1, 1], [], []>} : vector<16x512xf32>, vector<512x256xf32>, vector<16x256xf32> -> vector<16x256xf32>
    %c1_33 = arith.constant 1 : index
    %c0_34 = arith.constant 0 : index
    %c0_35 = arith.constant 0 : index
    %33 = vector.load %arg6[%c1_33, %c0_34, %c0_35] : memref<3x512x256xf32, #tpu.memory_space<vmem>>, vector<1x512x256xf32>
    %34 = vector.shape_cast %33 : vector<1x512x256xf32> to vector<512x256xf32>
    %cst_36 = arith.constant dense<0.000000e+00> : vector<16x256xf32>
    %35 = tpu.matmul %29, %34, %cst_36 {dimension_numbers = #tpu.dot_dimension_numbers<[1], [0], [0], [1], [0, 0, 1, 1], [], []>} : vector<16x512xf32>, vector<512x256xf32>, vector<16x256xf32> -> vector<16x256xf32>
    %36 = arith.maximumf %32, %35 : vector<16x256xf32>
    %c2_37 = arith.constant 2 : index
    %c0_38 = arith.constant 0 : index
    %c0_39 = arith.constant 0 : index
    %37 = vector.load %arg6[%c2_37, %c0_38, %c0_39] : memref<3x512x256xf32, #tpu.memory_space<vmem>>, vector<1x512x256xf32>
    %38 = vector.shape_cast %37 : vector<1x512x256xf32> to vector<512x256xf32>
    %cst_40 = arith.constant dense<0.000000e+00> : vector<16x256xf32>
    %39 = tpu.matmul %29, %38, %cst_40 {dimension_numbers = #tpu.dot_dimension_numbers<[1], [0], [0], [1], [0, 0, 1, 1], [], []>} : vector<16x512xf32>, vector<512x256xf32>, vector<16x256xf32> -> vector<16x256xf32>
    %40 = arith.maximumf %36, %39 : vector<16x256xf32>
    %c0_41 = arith.constant 0 : index
    %c0_42 = arith.constant 0 : index
    %c0_43 = arith.constant 0 : index
    %41 = vector.load %arg7[%c0_41, %c0_42, %c0_43] : memref<3x8x16xf32, #tpu.memory_space<vmem>>, vector<1x8x16xf32>
    %42 = vector.shape_cast %41 : vector<1x8x16xf32> to vector<8x16xf32>
    %cst_44 = arith.constant dense<0.000000e+00> : vector<8x256xf32>
    %43 = tpu.matmul %42, %40, %cst_44 {dimension_numbers = #tpu.dot_dimension_numbers<[1], [0], [0], [1], [0, 0, 1, 1], [], []>} : vector<8x16xf32>, vector<16x256xf32>, vector<8x256xf32> -> vector<8x256xf32>
    %c1_45 = arith.constant 1 : index
    %c0_46 = arith.constant 0 : index
    %c0_47 = arith.constant 0 : index
    %44 = vector.load %arg7[%c1_45, %c0_46, %c0_47] : memref<3x8x16xf32, #tpu.memory_space<vmem>>, vector<1x8x16xf32>
    %45 = vector.shape_cast %44 : vector<1x8x16xf32> to vector<8x16xf32>
    %cst_48 = arith.constant dense<0.000000e+00> : vector<8x256xf32>
    %46 = tpu.matmul %45, %40, %cst_48 {dimension_numbers = #tpu.dot_dimension_numbers<[1], [0], [0], [1], [0, 0, 1, 1], [], []>} : vector<8x16xf32>, vector<16x256xf32>, vector<8x256xf32> -> vector<8x256xf32>
    %c2_49 = arith.constant 2 : index
    %c0_50 = arith.constant 0 : index
    %c0_51 = arith.constant 0 : index
    %47 = vector.load %arg7[%c2_49, %c0_50, %c0_51] : memref<3x8x16xf32, #tpu.memory_space<vmem>>, vector<1x8x16xf32>
    %48 = vector.shape_cast %47 : vector<1x8x16xf32> to vector<8x16xf32>
    %cst_52 = arith.constant dense<0.000000e+00> : vector<8x256xf32>
    %49 = tpu.matmul %48, %40, %cst_52 {dimension_numbers = #tpu.dot_dimension_numbers<[1], [0], [0], [1], [0, 0, 1, 1], [], []>} : vector<8x16xf32>, vector<16x256xf32>, vector<8x256xf32> -> vector<8x256xf32>
    %50 = tpu.concatenate %43, %46, %49 in 1 : vector<8x256xf32>, vector<8x256xf32>, vector<8x256xf32> -> vector<8x768xf32>
    %c0_53 = arith.constant 0 : index
    %c0_54 = arith.constant 0 : index
    %51 = vector.load %arg8[%c0_53, %c0_54] : memref<768x512xf32, #tpu.memory_space<vmem>>, vector<768x512xf32>
    %cst_55 = arith.constant dense<0.000000e+00> : vector<8x512xf32>
    %52 = tpu.matmul %50, %51, %cst_55 {dimension_numbers = #tpu.dot_dimension_numbers<[1], [0], [0], [1], [0, 0, 1, 1], [], []>} : vector<8x768xf32>, vector<768x512xf32>, vector<8x512xf32> -> vector<8x512xf32>
    %c0_56 = arith.constant 0 : index
    %c0_57 = arith.constant 0 : index
    %53 = vector.load %arg9[%c0_56, %c0_57] : memref<1x512xf32, #tpu.memory_space<vmem>>, vector<1x512xf32>
    %54 = vector.broadcast %53 : vector<1x512xf32> to vector<8x512xf32>
    %55 = arith.addf %52, %54 : vector<8x512xf32>
    %56 = vector.extract_strided_slice %55 {offsets = [0, 0], sizes = [8, 256], strides = [1, 1]} : vector<8x512xf32> to vector<8x256xf32>
    %cst_58 = arith.constant 0.000000e+00 : f32
    %57 = vector.broadcast %cst_58 : f32 to vector<8x256xf32>
    %58 = arith.maximumf %56, %57 : vector<8x256xf32>
    %59 = vector.extract_strided_slice %55 {offsets = [0, 256], sizes = [8, 256], strides = [1, 1]} : vector<8x512xf32> to vector<8x256xf32>
    %c0_59 = arith.constant 0 : index
    %c0_60 = arith.constant 0 : index
    %c0_61 = arith.constant 0 : index
    %60 = vector.load %arg10[%c0_59, %c0_60, %c0_61] : memref<3x8x8xf32, #tpu.memory_space<vmem>>, vector<1x8x8xf32>
    %61 = vector.shape_cast %60 : vector<1x8x8xf32> to vector<8x8xf32>
    %cst_62 = arith.constant dense<0.000000e+00> : vector<8x256xf32>
    %62 = tpu.matmul %61, %58, %cst_62 {dimension_numbers = #tpu.dot_dimension_numbers<[1], [0], [0], [1], [0, 0, 1, 1], [], []>} : vector<8x8xf32>, vector<8x256xf32>, vector<8x256xf32> -> vector<8x256xf32>
    %c1_63 = arith.constant 1 : index
    %c0_64 = arith.constant 0 : index
    %c0_65 = arith.constant 0 : index
    %63 = vector.load %arg10[%c1_63, %c0_64, %c0_65] : memref<3x8x8xf32, #tpu.memory_space<vmem>>, vector<1x8x8xf32>
    %64 = vector.shape_cast %63 : vector<1x8x8xf32> to vector<8x8xf32>
    %cst_66 = arith.constant dense<0.000000e+00> : vector<8x256xf32>
    %65 = tpu.matmul %64, %58, %cst_66 {dimension_numbers = #tpu.dot_dimension_numbers<[1], [0], [0], [1], [0, 0, 1, 1], [], []>} : vector<8x8xf32>, vector<8x256xf32>, vector<8x256xf32> -> vector<8x256xf32>
    %c2_67 = arith.constant 2 : index
    %c0_68 = arith.constant 0 : index
    %c0_69 = arith.constant 0 : index
    %66 = vector.load %arg10[%c2_67, %c0_68, %c0_69] : memref<3x8x8xf32, #tpu.memory_space<vmem>>, vector<1x8x8xf32>
    %67 = vector.shape_cast %66 : vector<1x8x8xf32> to vector<8x8xf32>
    %cst_70 = arith.constant dense<0.000000e+00> : vector<8x256xf32>
    %68 = tpu.matmul %67, %58, %cst_70 {dimension_numbers = #tpu.dot_dimension_numbers<[1], [0], [0], [1], [0, 0, 1, 1], [], []>} : vector<8x8xf32>, vector<8x256xf32>, vector<8x256xf32> -> vector<8x256xf32>
    %69 = tpu.concatenate %62, %65, %68 in 1 : vector<8x256xf32>, vector<8x256xf32>, vector<8x256xf32> -> vector<8x768xf32>
    %c0_71 = arith.constant 0 : index
    %c0_72 = arith.constant 0 : index
    %70 = vector.load %arg11[%c0_71, %c0_72] : memref<768x256xf32, #tpu.memory_space<vmem>>, vector<768x256xf32>
    %cst_73 = arith.constant dense<0.000000e+00> : vector<8x256xf32>
    %71 = tpu.matmul %69, %70, %cst_73 {dimension_numbers = #tpu.dot_dimension_numbers<[1], [0], [0], [1], [0, 0, 1, 1], [], []>} : vector<8x768xf32>, vector<768x256xf32>, vector<8x256xf32> -> vector<8x256xf32>
    %c0_74 = arith.constant 0 : index
    %c0_75 = arith.constant 0 : index
    %72 = vector.load %arg12[%c0_74, %c0_75] : memref<1x256xf32, #tpu.memory_space<vmem>>, vector<1x256xf32>
    %73 = vector.broadcast %72 : vector<1x256xf32> to vector<8x256xf32>
    %74 = arith.addf %71, %73 : vector<8x256xf32>
    %75 = arith.addf %74, %59 : vector<8x256xf32>
    %cst_76 = arith.constant 0.000000e+00 : f32
    %76 = vector.broadcast %cst_76 : f32 to vector<8x256xf32>
    %77 = arith.maximumf %75, %76 : vector<8x256xf32>
    %c0_77 = arith.constant 0 : index
    %c0_78 = arith.constant 0 : index
    %c0_79 = arith.constant 0 : index
    %78 = vector.load %arg13[%c0_77, %c0_78, %c0_79] : memref<3x8x8xf32, #tpu.memory_space<vmem>>, vector<1x8x8xf32>
    %79 = vector.shape_cast %78 : vector<1x8x8xf32> to vector<8x8xf32>
    %cst_80 = arith.constant dense<0.000000e+00> : vector<8x256xf32>
    %80 = tpu.matmul %79, %77, %cst_80 {dimension_numbers = #tpu.dot_dimension_numbers<[1], [0], [0], [1], [0, 0, 1, 1], [], []>} : vector<8x8xf32>, vector<8x256xf32>, vector<8x256xf32> -> vector<8x256xf32>
    %c1_81 = arith.constant 1 : index
    %c0_82 = arith.constant 0 : index
    %c0_83 = arith.constant 0 : index
    %81 = vector.load %arg13[%c1_81, %c0_82, %c0_83] : memref<3x8x8xf32, #tpu.memory_space<vmem>>, vector<1x8x8xf32>
    %82 = vector.shape_cast %81 : vector<1x8x8xf32> to vector<8x8xf32>
    %cst_84 = arith.constant dense<0.000000e+00> : vector<8x256xf32>
    %83 = tpu.matmul %82, %77, %cst_84 {dimension_numbers = #tpu.dot_dimension_numbers<[1], [0], [0], [1], [0, 0, 1, 1], [], []>} : vector<8x8xf32>, vector<8x256xf32>, vector<8x256xf32> -> vector<8x256xf32>
    %c2_85 = arith.constant 2 : index
    %c0_86 = arith.constant 0 : index
    %c0_87 = arith.constant 0 : index
    %84 = vector.load %arg13[%c2_85, %c0_86, %c0_87] : memref<3x8x8xf32, #tpu.memory_space<vmem>>, vector<1x8x8xf32>
    %85 = vector.shape_cast %84 : vector<1x8x8xf32> to vector<8x8xf32>
    %cst_88 = arith.constant dense<0.000000e+00> : vector<8x256xf32>
    %86 = tpu.matmul %85, %77, %cst_88 {dimension_numbers = #tpu.dot_dimension_numbers<[1], [0], [0], [1], [0, 0, 1, 1], [], []>} : vector<8x8xf32>, vector<8x256xf32>, vector<8x256xf32> -> vector<8x256xf32>
    %87 = tpu.concatenate %80, %83, %86 in 1 : vector<8x256xf32>, vector<8x256xf32>, vector<8x256xf32> -> vector<8x768xf32>
    %c0_89 = arith.constant 0 : index
    %c0_90 = arith.constant 0 : index
    %88 = vector.load %arg14[%c0_89, %c0_90] : memref<768x512xf32, #tpu.memory_space<vmem>>, vector<768x512xf32>
    %cst_91 = arith.constant dense<0.000000e+00> : vector<8x512xf32>
    %89 = tpu.matmul %87, %88, %cst_91 {dimension_numbers = #tpu.dot_dimension_numbers<[1], [0], [0], [1], [0, 0, 1, 1], [], []>} : vector<8x768xf32>, vector<768x512xf32>, vector<8x512xf32> -> vector<8x512xf32>
    %c0_92 = arith.constant 0 : index
    %c0_93 = arith.constant 0 : index
    %90 = vector.load %arg15[%c0_92, %c0_93] : memref<1x512xf32, #tpu.memory_space<vmem>>, vector<1x512xf32>
    %91 = vector.broadcast %90 : vector<1x512xf32> to vector<8x512xf32>
    %92 = arith.addf %89, %91 : vector<8x512xf32>
    %93 = vector.extract_strided_slice %92 {offsets = [0, 0], sizes = [8, 256], strides = [1, 1]} : vector<8x512xf32> to vector<8x256xf32>
    %cst_94 = arith.constant 0.000000e+00 : f32
    %94 = vector.broadcast %cst_94 : f32 to vector<8x256xf32>
    %95 = arith.maximumf %93, %94 : vector<8x256xf32>
    %96 = vector.extract_strided_slice %92 {offsets = [0, 256], sizes = [8, 256], strides = [1, 1]} : vector<8x512xf32> to vector<8x256xf32>
    %c0_95 = arith.constant 0 : index
    %c0_96 = arith.constant 0 : index
    %c0_97 = arith.constant 0 : index
    %97 = vector.load %arg16[%c0_95, %c0_96, %c0_97] : memref<3x8x8xf32, #tpu.memory_space<vmem>>, vector<1x8x8xf32>
    %98 = vector.shape_cast %97 : vector<1x8x8xf32> to vector<8x8xf32>
    %cst_98 = arith.constant dense<0.000000e+00> : vector<8x256xf32>
    %99 = tpu.matmul %98, %95, %cst_98 {dimension_numbers = #tpu.dot_dimension_numbers<[1], [0], [0], [1], [0, 0, 1, 1], [], []>} : vector<8x8xf32>, vector<8x256xf32>, vector<8x256xf32> -> vector<8x256xf32>
    %c1_99 = arith.constant 1 : index
    %c0_100 = arith.constant 0 : index
    %c0_101 = arith.constant 0 : index
    %100 = vector.load %arg16[%c1_99, %c0_100, %c0_101] : memref<3x8x8xf32, #tpu.memory_space<vmem>>, vector<1x8x8xf32>
    %101 = vector.shape_cast %100 : vector<1x8x8xf32> to vector<8x8xf32>
    %cst_102 = arith.constant dense<0.000000e+00> : vector<8x256xf32>
    %102 = tpu.matmul %101, %95, %cst_102 {dimension_numbers = #tpu.dot_dimension_numbers<[1], [0], [0], [1], [0, 0, 1, 1], [], []>} : vector<8x8xf32>, vector<8x256xf32>, vector<8x256xf32> -> vector<8x256xf32>
    %c2_103 = arith.constant 2 : index
    %c0_104 = arith.constant 0 : index
    %c0_105 = arith.constant 0 : index
    %103 = vector.load %arg16[%c2_103, %c0_104, %c0_105] : memref<3x8x8xf32, #tpu.memory_space<vmem>>, vector<1x8x8xf32>
    %104 = vector.shape_cast %103 : vector<1x8x8xf32> to vector<8x8xf32>
    %cst_106 = arith.constant dense<0.000000e+00> : vector<8x256xf32>
    %105 = tpu.matmul %104, %95, %cst_106 {dimension_numbers = #tpu.dot_dimension_numbers<[1], [0], [0], [1], [0, 0, 1, 1], [], []>} : vector<8x8xf32>, vector<8x256xf32>, vector<8x256xf32> -> vector<8x256xf32>
    %106 = tpu.concatenate %99, %102, %105 in 1 : vector<8x256xf32>, vector<8x256xf32>, vector<8x256xf32> -> vector<8x768xf32>
    %c0_107 = arith.constant 0 : index
    %c0_108 = arith.constant 0 : index
    %107 = vector.load %arg17[%c0_107, %c0_108] : memref<768x256xf32, #tpu.memory_space<vmem>>, vector<768x256xf32>
    %cst_109 = arith.constant dense<0.000000e+00> : vector<8x256xf32>
    %108 = tpu.matmul %106, %107, %cst_109 {dimension_numbers = #tpu.dot_dimension_numbers<[1], [0], [0], [1], [0, 0, 1, 1], [], []>} : vector<8x768xf32>, vector<768x256xf32>, vector<8x256xf32> -> vector<8x256xf32>
    %c0_110 = arith.constant 0 : index
    %c0_111 = arith.constant 0 : index
    %109 = vector.load %arg18[%c0_110, %c0_111] : memref<1x256xf32, #tpu.memory_space<vmem>>, vector<1x256xf32>
    %110 = vector.broadcast %109 : vector<1x256xf32> to vector<8x256xf32>
    %111 = arith.addf %108, %110 : vector<8x256xf32>
    %112 = arith.addf %111, %96 : vector<8x256xf32>
    %cst_112 = arith.constant 0.000000e+00 : f32
    %113 = vector.broadcast %cst_112 : f32 to vector<8x256xf32>
    %114 = arith.maximumf %112, %113 : vector<8x256xf32>
    %c0_113 = arith.constant 0 : index
    %c0_114 = arith.constant 0 : index
    %c0_115 = arith.constant 0 : index
    %115 = vector.load %arg19[%c0_113, %c0_114, %c0_115] : memref<3x8x8xf32, #tpu.memory_space<vmem>>, vector<1x8x8xf32>
    %116 = vector.shape_cast %115 : vector<1x8x8xf32> to vector<8x8xf32>
    %cst_116 = arith.constant dense<0.000000e+00> : vector<8x256xf32>
    %117 = tpu.matmul %116, %114, %cst_116 {dimension_numbers = #tpu.dot_dimension_numbers<[1], [0], [0], [1], [0, 0, 1, 1], [], []>} : vector<8x8xf32>, vector<8x256xf32>, vector<8x256xf32> -> vector<8x256xf32>
    %c1_117 = arith.constant 1 : index
    %c0_118 = arith.constant 0 : index
    %c0_119 = arith.constant 0 : index
    %118 = vector.load %arg19[%c1_117, %c0_118, %c0_119] : memref<3x8x8xf32, #tpu.memory_space<vmem>>, vector<1x8x8xf32>
    %119 = vector.shape_cast %118 : vector<1x8x8xf32> to vector<8x8xf32>
    %cst_120 = arith.constant dense<0.000000e+00> : vector<8x256xf32>
    %120 = tpu.matmul %119, %114, %cst_120 {dimension_numbers = #tpu.dot_dimension_numbers<[1], [0], [0], [1], [0, 0, 1, 1], [], []>} : vector<8x8xf32>, vector<8x256xf32>, vector<8x256xf32> -> vector<8x256xf32>
    %c2_121 = arith.constant 2 : index
    %c0_122 = arith.constant 0 : index
    %c0_123 = arith.constant 0 : index
    %121 = vector.load %arg19[%c2_121, %c0_122, %c0_123] : memref<3x8x8xf32, #tpu.memory_space<vmem>>, vector<1x8x8xf32>
    %122 = vector.shape_cast %121 : vector<1x8x8xf32> to vector<8x8xf32>
    %cst_124 = arith.constant dense<0.000000e+00> : vector<8x256xf32>
    %123 = tpu.matmul %122, %114, %cst_124 {dimension_numbers = #tpu.dot_dimension_numbers<[1], [0], [0], [1], [0, 0, 1, 1], [], []>} : vector<8x8xf32>, vector<8x256xf32>, vector<8x256xf32> -> vector<8x256xf32>
    %124 = tpu.concatenate %117, %120, %123 in 1 : vector<8x256xf32>, vector<8x256xf32>, vector<8x256xf32> -> vector<8x768xf32>
    %c0_125 = arith.constant 0 : index
    %c0_126 = arith.constant 0 : index
    %125 = vector.load %arg20[%c0_125, %c0_126] : memref<768x128xf32, #tpu.memory_space<vmem>>, vector<768x128xf32>
    %cst_127 = arith.constant dense<0.000000e+00> : vector<8x128xf32>
    %126 = tpu.matmul %124, %125, %cst_127 {dimension_numbers = #tpu.dot_dimension_numbers<[1], [0], [0], [1], [0, 0, 1, 1], [], []>} : vector<8x768xf32>, vector<768x128xf32>, vector<8x128xf32> -> vector<8x128xf32>
    %c0_128 = arith.constant 0 : index
    %c0_129 = arith.constant 0 : index
    %127 = vector.load %arg21[%c0_128, %c0_129] : memref<1x128xf32, #tpu.memory_space<vmem>>, vector<1x128xf32>
    %128 = vector.broadcast %127 : vector<1x128xf32> to vector<8x128xf32>
    %129 = arith.addf %126, %128 : vector<8x128xf32>
    %c0_130 = arith.constant 0 : index
    %c0_131 = arith.constant 0 : index
    %130 = vector.load %arg22[%c0_130, %c0_131] : memref<8x128xf32, #tpu.memory_space<vmem>>, vector<8x128xf32>
    %cst_132 = arith.constant 5.000000e-01 : f32
    %131 = vector.broadcast %cst_132 : f32 to vector<8x128xf32>
    %132 = arith.cmpf ogt, %130, %131 : vector<8x128xf32>
    %cst_133 = arith.constant 0.000000e+00 : f32
    %133 = vector.broadcast %cst_133 : f32 to vector<8x128xf32>
    %134 = arith.maximumf %129, %133 : vector<8x128xf32>
    %135 = arith.select %132, %134, %129 : vector<8x128xi1>, vector<8x128xf32>
    %c0_134 = arith.constant 0 : index
    %c0_135 = arith.constant 0 : index
    %c0_136 = arith.constant 0 : index
    %136 = vector.load %arg23[%c0_134, %c0_135, %c0_136] : memref<1x8x128xf32, #tpu.memory_space<vmem>>, vector<1x8x128xf32>
    %137 = vector.shape_cast %136 : vector<1x8x128xf32> to vector<8x128xf32>
    %138 = vector.shape_cast %135 : vector<8x128xf32> to vector<1x8x128xf32>
    tpu.vector_store %arg23[%c0_134, %c0_135, %c0_136], %138 {strides = array<i32>} : memref<1x8x128xf32, #tpu.memory_space<vmem>>, vector<1x8x128xf32>,
    return
  }
  func.func @transform_0(%arg0: i32) -> (i32, i32, i32) {
    %c0_i32 = arith.constant 0 : i32
    %c0_i32_0 = arith.constant 0 : i32
    %c0_i32_1 = arith.constant 0 : i32
    return %arg0, %c0_i32, %c0_i32_0 : i32, i32, i32
  }
  func.func @transform_1(%arg0: i32) -> (i32, i32, i32) {
    %c0_i32 = arith.constant 0 : i32
    %c0_i32_0 = arith.constant 0 : i32
    %c0_i32_1 = arith.constant 0 : i32
    %c0_i32_2 = arith.constant 0 : i32
    return %c0_i32, %c0_i32_0, %c0_i32_1 : i32, i32, i32
  }
  func.func @transform_2(%arg0: i32) -> (i32, i32) {
    %c0_i32 = arith.constant 0 : i32
    %c0_i32_0 = arith.constant 0 : i32
    %c0_i32_1 = arith.constant 0 : i32
    return %c0_i32, %c0_i32_0 : i32, i32
  }
  func.func @transform_3(%arg0: i32) -> (i32, i32) {
    %c0_i32 = arith.constant 0 : i32
    %c0_i32_0 = arith.constant 0 : i32
    %c0_i32_1 = arith.constant 0 : i32
    return %c0_i32, %c0_i32_0 : i32, i32
  }
  func.func @transform_4(%arg0: i32) -> (i32, i32, i32) {
    %c0_i32 = arith.constant 0 : i32
    %c0_i32_0 = arith.constant 0 : i32
    %c0_i32_1 = arith.constant 0 : i32
    %c0_i32_2 = arith.constant 0 : i32
    return %c0_i32, %c0_i32_0, %c0_i32_1 : i32, i32, i32
  }
  func.func @transform_5(%arg0: i32) -> (i32, i32, i32) {
    %c0_i32 = arith.constant 0 : i32
    %c0_i32_0 = arith.constant 0 : i32
    %c0_i32_1 = arith.constant 0 : i32
    %c0_i32_2 = arith.constant 0 : i32
    return %c0_i32, %c0_i32_0, %c0_i32_1 : i32, i32, i32
  }
  func.func @transform_6(%arg0: i32) -> (i32, i32, i32) {
    %c0_i32 = arith.constant 0 : i32
    %c0_i32_0 = arith.constant 0 : i32
    %c0_i32_1 = arith.constant 0 : i32
    %c0_i32_2 = arith.constant 0 : i32
    return %c0_i32, %c0_i32_0, %c0_i32_1 : i32, i32, i32
  }
  func.func @transform_7(%arg0: i32) -> (i32, i32) {
    %c0_i32 = arith.constant 0 : i32
    %c0_i32_0 = arith.constant 0 : i32
    %c0_i32_1 = arith.constant 0 : i32
    return %c0_i32, %c0_i32_0 : i32, i32
  }
  func.func @transform_8(%arg0: i32) -> (i32, i32) {
    %c0_i32 = arith.constant 0 : i32
    %c0_i32_0 = arith.constant 0 : i32
    %c0_i32_1 = arith.constant 0 : i32
    return %c0_i32, %c0_i32_0 : i32, i32
  }
  func.func @transform_9(%arg0: i32) -> (i32, i32, i32) {
    %c0_i32 = arith.constant 0 : i32
    %c0_i32_0 = arith.constant 0 : i32
    %c0_i32_1 = arith.constant 0 : i32
    %c0_i32_2 = arith.constant 0 : i32
    return %c0_i32, %c0_i32_0, %c0_i32_1 : i32, i32, i32
  }
  func.func @transform_10(%arg0: i32) -> (i32, i32) {
    %c0_i32 = arith.constant 0 : i32
    %c0_i32_0 = arith.constant 0 : i32
    %c0_i32_1 = arith.constant 0 : i32
    return %c0_i32, %c0_i32_0 : i32, i32
  }
  func.func @transform_11(%arg0: i32) -> (i32, i32) {
    %c0_i32 = arith.constant 0 : i32
    %c0_i32_0 = arith.constant 0 : i32
    %c0_i32_1 = arith.constant 0 : i32
    return %c0_i32, %c0_i32_0 : i32, i32
  }
  func.func @transform_12(%arg0: i32) -> (i32, i32, i32) {
    %c0_i32 = arith.constant 0 : i32
    %c0_i32_0 = arith.constant 0 : i32
    %c0_i32_1 = arith.constant 0 : i32
    %c0_i32_2 = arith.constant 0 : i32
    return %c0_i32, %c0_i32_0, %c0_i32_1 : i32, i32, i32
  }
  func.func @transform_13(%arg0: i32) -> (i32, i32) {
    %c0_i32 = arith.constant 0 : i32
    %c0_i32_0 = arith.constant 0 : i32
    %c0_i32_1 = arith.constant 0 : i32
    return %c0_i32, %c0_i32_0 : i32, i32
  }
  func.func @transform_14(%arg0: i32) -> (i32, i32) {
    %c0_i32 = arith.constant 0 : i32
    %c0_i32_0 = arith.constant 0 : i32
    %c0_i32_1 = arith.constant 0 : i32
    return %c0_i32, %c0_i32_0 : i32, i32
  }
  func.func @transform_15(%arg0: i32) -> (i32, i32, i32) {
    %c0_i32 = arith.constant 0 : i32
    %c0_i32_0 = arith.constant 0 : i32
    %c0_i32_1 = arith.constant 0 : i32
    %c0_i32_2 = arith.constant 0 : i32
    return %c0_i32, %c0_i32_0, %c0_i32_1 : i32, i32, i32
  }
  func.func @transform_16(%arg0: i32) -> (i32, i32) {
    %c0_i32 = arith.constant 0 : i32
    %c0_i32_0 = arith.constant 0 : i32
    %c0_i32_1 = arith.constant 0 : i32
    return %c0_i32, %c0_i32_0 : i32, i32
  }
  func.func @transform_17(%arg0: i32) -> (i32, i32) {
    %c0_i32 = arith.constant 0 : i32
    %c0_i32_0 = arith.constant 0 : i32
    %c0_i32_1 = arith.constant 0 : i32
    return %c0_i32, %c0_i32_0 : i32, i32
  }
  func.func @transform_18(%arg0: i32) -> (i32, i32, i32) {
    %c0_i32 = arith.constant 0 : i32
    %c0_i32_0 = arith.constant 0 : i32
    %c0_i32_1 = arith.constant 0 : i32
    %c0_i32_2 = arith.constant 0 : i32
    return %c0_i32, %c0_i32_0, %c0_i32_1 : i32, i32, i32
  }
  func.func @transform_19(%arg0: i32) -> (i32, i32) {
    %c0_i32 = arith.constant 0 : i32
    %c0_i32_0 = arith.constant 0 : i32
    %c0_i32_1 = arith.constant 0 : i32
    return %c0_i32, %c0_i32_0 : i32, i32
  }
  func.func @transform_20(%arg0: i32) -> (i32, i32) {
    %c0_i32 = arith.constant 0 : i32
    %c0_i32_0 = arith.constant 0 : i32
    %c0_i32_1 = arith.constant 0 : i32
    return %c0_i32, %c0_i32_0 : i32, i32
  }
  func.func @transform_21(%arg0: i32) -> (i32, i32) {
    %c0_i32 = arith.constant 0 : i32
    %c0_i32_0 = arith.constant 0 : i32
    %c0_i32_1 = arith.constant 0 : i32
    return %c0_i32, %c0_i32_0 : i32, i32
  }
  func.func @transform_22(%arg0: i32) -> (i32, i32, i32) {
    %c0_i32 = arith.constant 0 : i32
    %c0_i32_0 = arith.constant 0 : i32
    %c0_i32_1 = arith.constant 0 : i32
    return %arg0, %c0_i32, %c0_i32_0 : i32, i32, i32
  }
}

</mosaic_0001>

<bundles_post_ra>
// kernel: tpu_custom_call.1
= control target key start
LH: loop header
LB: loop body
LE: loop exit
PB: predicated region body
PF: predicated region fallthrough
CT: control target
= control target key end

     0   :  { %s12558_s0 = inlined_call_operand.hbm [shape: f32[2,64,256], index: 0, kind: input, shape index: {}]   ;;  %s12559_s1 = inlined_call_operand.hbm [shape: f32[3,32,64], index: 1, kind: input, shape index: {}]   ;;  %s12560_s2 = inlined_call_operand.hbm [shape: f32[768,512], index: 2, kind: input, shape index: {}]   ;;  %s12561_s3 = inlined_call_operand.hbm [shape: f32[1,512], index: 3, kind: input, shape index: {}]   ;;  %s12562_s4 = inlined_call_operand.hbm [shape: f32[3,16,32], index: 4, kind: input, shape index: {}]   ;;  %s12563_s5 = inlined_call_operand.hbm [shape: f32[3,512,256], index: 5, kind: input, shape index: {}]   ;;  %s12564_s6 = inlined_call_operand.hbm [shape: f32[3,8,16], index: 6, kind: input, shape index: {}]   ;;  %s12565_s7 = inlined_call_operand.hbm [shape: f32[768,512], index: 7, kind: input, shape index: {}]   ;;  %s12566_s8 = inlined_call_operand.hbm [shape: f32[1,512], index: 8, kind: input, shape index: {}]   ;;  %s12567_s9 = inlined_call_operand.hbm [shape: f32[3,8,8], index: 9, kind: input, shape index: {}]   ;;  %s12568_s10 = inlined_call_operand.hbm [shape: f32[768,256], index: 10, kind: input, shape index: {}]   ;;  %s12569_s11 = inlined_call_operand.hbm [shape: f32[1,256], index: 11, kind: input, shape index: {}]   ;;  %s12570_s12 = inlined_call_operand.hbm [shape: f32[3,8,8], index: 12, kind: input, shape index: {}]   ;;  %s12571_s13 = inlined_call_operand.hbm [shape: f32[768,512], index: 13, kind: input, shape index: {}]   ;;  %s12572_s14 = inlined_call_operand.hbm [shape: f32[1,512], index: 14, kind: input, shape index: {}]   ;;  %s12573_s15 = inlined_call_operand.hbm [shape: f32[3,8,8], index: 15, kind: input, shape index: {}]   ;;  %s12574_s16 = inlined_call_operand.hbm [shape: f32[768,256], index: 16, kind: input, shape index: {}]   ;;  %s12575_s17 = inlined_call_operand.hbm [shape: f32[1,256], index: 17, kind: input, shape index: {}]   ;;  %s12576_s18 = inlined_call_operand.hbm [shape: f32[3,8,8], index: 18, kind: input, shape index: {}]   ;;  %s12577_s19 = inlined_call_operand.hbm [shape: f32[768,128], index: 19, kind: input, shape index: {}]   ;;  %s12578_s20 = inlined_call_operand.hbm [shape: f32[1,128], index: 20, kind: input, shape index: {}]   ;;  %s12579_s21 = inlined_call_operand.hbm [shape: f32[8,128], index: 21, kind: input, shape index: {}]   ;;  %s12580_s22 = inlined_call_operand.hbm [shape: f32[2,8,128], index: 22, kind: output, shape index: {}]  }
   0x1   :  { %12618 = sst [smem:[#allocation57_spill]] %s12558_s0 }
   0x2   :  { %12619 = sst [smem:[#allocation58_spill]] %s12559_s1 }
   0x3   :  { %12620 = sst [smem:[#allocation59_spill]] %s12560_s2 }
   0x4   :  { %12621 = sst [smem:[#allocation60_spill]] %s12561_s3 }
   0x5   :  { %12622 = sst [smem:[#allocation61_spill]] %s12562_s4 }
   0x6   :  { %12623 = sst [smem:[#allocation62_spill]] %s12563_s5 }
   0x7   :  { %12624 = sst [smem:[#allocation63_spill]] %s12564_s6 }
   0x8   :  { %12625 = sst [smem:[#allocation64_spill]] %s12565_s7 }
   0x9   :  { %12626 = sst [smem:[#allocation65_spill]] %s12566_s8 }
   0xa   :  { %12627 = sst [smem:[#allocation66_spill]] %s12567_s9 }
   0xb   :  { %12628 = sst [smem:[#allocation67_spill]] %s12569_s11 }
   0xc   :  { %12629 = sst [smem:[#allocation68_spill]] %s12576_s18 }
   0xd   :  { %12630 = sst [smem:[#allocation69_spill]] %s12578_s20 }
   0xe   :  { %12631 = sst [smem:[#allocation70_spill]] %s12579_s21 }
   0xf   :  { %12632 = sst [smem:[#allocation71_spill]] %s12580_s22 }
  0x10   :  { %27 = vsyncpa [#allocation3], 0 }
  0x11   :  { %29 = vsyncpa [#allocation3 + $0x1], 0 }
  0x12   :  { %30 = vsyncpa [#allocation6], 0 }
  0x13   :  { %31 = vsyncpa [#allocation9], 0 }
  0x14   :  { %32 = vsyncpa [#allocation12], 0 }
  0x15   :  { %33 = vsyncpa [#allocation15], 0 }
  0x16   :  { %34 = vsyncpa [#allocation18], 0 }
  0x17   :  { %35 = vsyncpa [#allocation21], 0 }
  0x18   :  { %36 = vsyncpa [#allocation24], 0 }
  0x19   :  { %37 = vsyncpa [#allocation27], 0 }
  0x1a   :  { %38 = vsyncpa [#allocation30], 0 }
  0x1b   :  { %39 = vsyncpa [#allocation33], 0 }
  0x1c   :  { %40 = vsyncpa [#allocation36], 0 }
  0x1d   :  { %41 = vsyncpa [#allocation4], 0 }
  0x1e   :  { %43 = vsyncpa [#allocation4 + $0x1], 0  ;;  %s11457_s3 = smov 0   ;;  %s11459_s28 = smov 0  }
  0x1f   :  { %s11461_s29 = smov 0   ;;  %s11463_s30 = smov 0  }
  0x20 LB: > { %12633 = sst [smem:[#allocation51_spill]] %s11298_s3  ;;  %s11312_s4 = smov [#allocation5]   ;;  %s11310_s30 = sphi %s11463_s30, %s12708_s30   ;;  %s11306_s29 = sphi %s11461_s29, %s11957_s29   ;;  %s11302_s28 = sphi %s11459_s28, %s12707_s28   ;;  %s11298_s3 = sphi %s11457_s3, %s12706_s3  }
  0x21   : > { %12634 = sst [smem:[#allocation52_spill]] %s11302_s28  ;;  %s559_s0 = sshll.u32 %s11312_s4, 4  ;;  %s11483_s0 = int_to_ptr.vmem [resolvable:$true] %s559_s0 }
  0x22   : > { %12635 = sst [smem:[#allocation53_spill]] %s11306_s29  ;;  %s11478_s23 = sadd.s32 4294967295, %s11310_s30  }
  0x23   : > { %12636 = sst [smem:[#allocation54_spill]] %s11310_s30  ;;  %p7894_p0 = scmp.ge.s32.totalorder %s11310_s30, 1 }
  0x24   : > { %12637 = sst [smem:[#allocation55_spill]] %s11478_s23  ;;  %p12606_p1 = scmp.eq.s32.totalorder %s11478_s23, 0 }
  0x25   : > { %p547_p2 = scmp.lt.s32.totalorder %s11310_s30, 3  ;;  %s11313_s5 = smov [#allocation8]  }
  0x26   : > { %s586_s24 = sshll.u32 %s11313_s5, 4  ;;  %s11314_s25 = smov [#allocation11]   ;;  %s11498_s24 = int_to_ptr.vmem [resolvable:$true] %s586_s24 }
  0x27   : > { %p11485_p3 = pnand %p7894_p0, %p547_p2  ;;  %s609_s26 = sshll.u32 %s11314_s25, 4  ;;  %s11500_s26 = int_to_ptr.vmem [resolvable:$true] %s609_s26 }
  0x28   : > { %s12641_s4 = sld [smem:[#allocation58_spill]] }
  0x29   : > { %s12638_s1 = scalar_select %p11485_p3, 1, 0 }
  0x2a   : > { %p10406_p5 = pneg %p11485_p3 }
  0x2b   : > { %12639 = sst [smem:[#allocation56_spill]] %s12638_s1 }
  0x2c   : > { %p11494_p6 = pnand %p10406_p5, %p12606_p1 }
  0x2e   : > { %s10582_s22 = scalar_lea.hbm %s12641_s4, 1536  ;;  %p11510_p8 = pneg %p11494_p6 }
  0x2f   : > { %p10583_p7 = scmp.ne.s32.totalorder %s12641_s4, %s10582_s22  ;;  %p10589_p11 = scmp.lt.u32.totalorder %s10582_s22, %s12641_s4 }
  0x31   : > { %p10585_p9 = pnand %p11510_p8, %p10583_p7 }
  0x33   : > { %p10586_p10 = pneg %p10585_p9 }
  0x35   : > { %p10591_p12 = pnand %p10589_p11, %p10586_p10 }
  0x37   : > { %10594 = shalt.err (!%p10591_p12)
}
  0x38   : > { %s10595_s3 = scalar_lea.vmem %s11483_s0, 1536  ;;  %p10603_p5 = scmp.lt.s32.totalorder %s11483_s0, %s11483_s0 }
  0x39   : > { %p10596_p13 = scmp.ne.s32.totalorder %s11483_s0, %s10595_s3  ;;  %p10604_p4 = scmp.lt.s32.totalorder %s10595_s3, %s10595_s3 }
  0x3b   : > { %p10598_p0 = pnand %p10596_p13, %p11510_p8  ;;  %p10605_p7 = por %p10604_p4, %p10603_p5 }
  0x3d   : > { %p10599_p2 = pneg %p10598_p0 }
  0x3f   : > { %p10606_p9 = pnand %p10605_p7, %p10599_p2 }
  0x41   : > { %10609 = shalt.err (!%p10606_p9)
}
  0x42   : > { %s12600_s1 = smov 128   ;;  %s12602_s22 = smov 8  }
  0x43   : > { %10409 = dma.hbm_to_vmem [thread:$0]  (!%p11494_p6), %s12641_s4, 1536, %s11483_s0, [#allocation6], %s12600_s1, %s12600_s1, %s12602_s22  }
  0x44   : > { %s12643_s28 = sld [smem:[#allocation60_spill]] }
  0x4a   : > { %s12644_s21 = smov %s12643_s28  ;;  %s10610_s3 = scalar_lea.hbm %s12643_s28, 64 }
  0x4b   : > { %p10611_p4 = scmp.ne.s32.totalorder %s12644_s21, %s10610_s3  ;;  %p10617_p12 = scmp.lt.u32.totalorder %s10610_s3, %s12644_s21 }
  0x4d   : > { %p10613_p10 = pnand %p10611_p4, %p11510_p8 }
  0x4f   : > { %p10614_p11 = pneg %p10613_p10 }
  0x51   : > { %p10619_p13 = pnand %p10617_p12, %p10614_p11 }
  0x53   : > { %10622 = shalt.err (!%p10619_p13)
}
  0x54   : > { %s10623_s0 = scalar_lea.vmem %s11498_s24, 64  ;;  %p10631_p7 = scmp.lt.s32.totalorder %s11498_s24, %s11498_s24 }
  0x55   : > { %p10624_p0 = scmp.ne.s32.totalorder %s11498_s24, %s10623_s0  ;;  %p10632_p9 = scmp.lt.s32.totalorder %s10623_s0, %s10623_s0 }
  0x57   : > { %p10626_p2 = pnand %p10624_p0, %p11510_p8  ;;  %p10633_p4 = por %p10632_p9, %p10631_p7 }
  0x59   : > { %p10627_p5 = pneg %p10626_p2 }
  0x5b   : > { %p10634_p10 = pnand %p10633_p4, %p10627_p5 }
  0x5d   : > { %10637 = shalt.err (!%p10634_p10)
}
  0x5e   : > { %10415 = dma.hbm_to_vmem [thread:$0]  (!%p11494_p6), %s12644_s21, 64, %s11498_s24, [#allocation9]  }
  0x5f   : > { %s12645_s30 = sld [smem:[#allocation62_spill]] }
  0x65   : > { %s12646_s23 = smov %s12645_s30  ;;  %s10638_s2 = scalar_lea.hbm %s12645_s30, 49152 }
  0x66   : > { %p10639_p11 = scmp.ne.s32.totalorder %s12646_s23, %s10638_s2  ;;  %p10645_p0 = scmp.lt.u32.totalorder %s10638_s2, %s12646_s23 }
  0x68   : > { %p10641_p12 = pnand %p10639_p11, %p11510_p8 }
  0x6a   : > { %p10642_p13 = pneg %p10641_p12 }
  0x6c   : > { %p10647_p2 = pnand %p10645_p0, %p10642_p13 }
  0x6e   : > { %10650 = shalt.err (!%p10647_p2)
}
  0x6f   : > { %s10651_s24 = scalar_lea.vmem %s11500_s26, 49152  ;;  %p10659_p4 = scmp.lt.s32.totalorder %s11500_s26, %s11500_s26 }
  0x70   : > { %p10652_p5 = scmp.ne.s32.totalorder %s11500_s26, %s10651_s24  ;;  %p10660_p10 = scmp.lt.s32.totalorder %s10651_s24, %s10651_s24 }
  0x72   : > { %p10654_p7 = pnand %p10652_p5, %p11510_p8  ;;  %p10661_p11 = por %p10660_p10, %p10659_p4 }
  0x74   : > { %p10655_p9 = pneg %p10654_p7 }
  0x76   : > { %p10662_p12 = pnand %p10661_p11, %p10655_p9 }
  0x78   : > { %10665 = shalt.err (!%p10662_p12)
}
  0x79   : > { %s12608_s18 = smov 256   ;;  %s12610_s20 = smov 16  }
  0x7a   : > { %10421 = dma.hbm_to_vmem [thread:$0]  (!%p11494_p6), %s12646_s23, 49152, %s11500_s26, [#allocation12], %s12608_s18, %s12608_s18, %s12610_s20  }
  0x7b   : > { %s11319_s30 = smov [#allocation14]   ;;  %s11320_s27 = smov [#allocation17]  }
  0x7c   : > { %s635_s2 = sshll.u32 %s11319_s30, 4  ;;  %s659_s25 = sshll.u32 %s11320_s27, 4  ;;  %s636_s2 = int_to_ptr.vmem [resolvable:$true] %s635_s2  ;;  %s660_s25 = int_to_ptr.vmem [resolvable:$true] %s659_s25 }
  0x7d   : > { %s12647_s7 = sld [smem:[#allocation64_spill]] }
  0x83   : > { %s10666_s24 = scalar_lea.hbm %s12647_s7, 49152 }
  0x84   : > { %p10667_p13 = scmp.ne.s32.totalorder %s12647_s7, %s10666_s24  ;;  %p10673_p5 = scmp.lt.u32.totalorder %s10666_s24, %s12647_s7 }
  0x86   : > { %p10669_p0 = pnand %p10667_p13, %p11510_p8 }
  0x88   : > { %p10670_p2 = pneg %p10669_p0 }
  0x8a   : > { %p10675_p7 = pnand %p10673_p5, %p10670_p2 }
  0x8c   : > { %10678 = shalt.err (!%p10675_p7)
}
  0x8d   : > { %s10679_s26 = scalar_lea.vmem %s636_s2, 49152  ;;  %p10687_p11 = scmp.lt.s32.totalorder %s636_s2, %s636_s2 }
  0x8e   : > { %p10680_p9 = scmp.ne.s32.totalorder %s636_s2, %s10679_s26  ;;  %p10688_p12 = scmp.lt.s32.totalorder %s10679_s26, %s10679_s26 }
  0x90   : > { %p10682_p4 = pnand %p10680_p9, %p11510_p8  ;;  %p10689_p1 = por %p10688_p12, %p10687_p11 }
  0x92   : > { %p10683_p10 = pneg %p10682_p4 }
  0x94   : > { %p10690_p3 = pnand %p10689_p1, %p10683_p10 }
  0x96   : > { %10693 = shalt.err (!%p10690_p3)
}
  0x97   : > { %s12612_s1 = smov 512   ;;  %s11322_s22 = smov 32  }
  0x98   : > { %10427 = dma.hbm_to_vmem [thread:$0]  (!%p11494_p6), %s12647_s7, 49152, %s636_s2, [#allocation15], %s12612_s1, %s12612_s1, %s11322_s22  }
  0x99   : > { %s12648_s9 = sld [smem:[#allocation66_spill]] }
  0x9f   : > { %s10694_s30 = scalar_lea.hbm %s12648_s9, 384 }
  0xa0   : > { %p10695_p1 = scmp.ne.s32.totalorder %s12648_s9, %s10694_s30  ;;  %p10701_p0 = scmp.lt.u32.totalorder %s10694_s30, %s12648_s9 }
  0xa2   : > { %p10697_p3 = pnand %p10695_p1, %p11510_p8 }
  0xa4   : > { %p10698_p13 = pneg %p10697_p3 }
  0xa6   : > { %p10703_p2 = pnand %p10701_p0, %p10698_p13 }
  0xa8   : > { %10706 = shalt.err (!%p10703_p2)
}
  0xa9   : > { %s10707_s26 = scalar_lea.vmem %s660_s25, 384  ;;  %p10715_p4 = scmp.lt.s32.totalorder %s660_s25, %s660_s25 }
  0xaa   : > { %p10708_p5 = scmp.ne.s32.totalorder %s660_s25, %s10707_s26  ;;  %p10716_p10 = scmp.lt.s32.totalorder %s10707_s26, %s10707_s26 }
  0xac   : > { %p10710_p7 = pnand %p10708_p5, %p11510_p8  ;;  %p10717_p11 = por %p10716_p10, %p10715_p4 }
  0xae   : > { %p10711_p9 = pneg %p10710_p7 }
  0xb0   : > { %p10718_p12 = pnand %p10717_p11, %p10711_p9 }
  0xb2   : > { %10721 = shalt.err (!%p10718_p12)
}
  0xb3   : > { %s12649_s2 = smov 8   ;;  %s12650_s21 = smov 128  }
  0xb4   : > { %10433 = dma.hbm_to_vmem [thread:$0]  (!%p11494_p6), %s12648_s9, 384, %s660_s25, [#allocation18], %s12650_s21, %s12650_s21, %s12649_s2  }
  0xb5   : > { %s11323_s29 = smov [#allocation20]   ;;  %s11324_s27 = smov [#allocation23]  }
  0xb6   : > { %s686_s30 = sshll.u32 %s11323_s29, 4  ;;  %s709_s3 = sshll.u32 %s11324_s27, 4  ;;  %s687_s30 = int_to_ptr.vmem [resolvable:$true] %s686_s30  ;;  %s710_s3 = int_to_ptr.vmem [resolvable:$true] %s709_s3 }
  0xb7   : > { %s12651_s11 = sld [smem:[#allocation67_spill]] }
  0xbd   : > { %s10722_s26 = scalar_lea.hbm %s12651_s11, 32 }
  0xbe   : > { %p10723_p1 = scmp.ne.s32.totalorder %s12651_s11, %s10722_s26  ;;  %p10729_p0 = scmp.lt.u32.totalorder %s10722_s26, %s12651_s11 }
  0xc0   : > { %p10725_p3 = pnand %p10723_p1, %p11510_p8 }
  0xc2   : > { %p10726_p13 = pneg %p10725_p3 }
  0xc4   : > { %p10731_p2 = pnand %p10729_p0, %p10726_p13 }
  0xc6   : > { %10734 = shalt.err (!%p10731_p2)
}
  0xc7   : > { %s10735_s25 = scalar_lea.vmem %s687_s30, 32  ;;  %p10743_p4 = scmp.lt.s32.totalorder %s687_s30, %s687_s30 }
  0xc8   : > { %p10736_p5 = scmp.ne.s32.totalorder %s687_s30, %s10735_s25  ;;  %p10744_p10 = scmp.lt.s32.totalorder %s10735_s25, %s10735_s25 }
  0xca   : > { %p10738_p7 = pnand %p10736_p5, %p11510_p8  ;;  %p10745_p11 = por %p10744_p10, %p10743_p4 }
  0xcc   : > { %p10739_p9 = pneg %p10738_p7 }
  0xce   : > { %p10746_p12 = pnand %p10745_p11, %p10739_p9 }
  0xd0   : > { %10749 = shalt.err (!%p10746_p12)
}
  0xd1   : > { %10439 = dma.hbm_to_vmem [thread:$0]  (!%p11494_p6), %s12651_s11, 32, %s687_s30, [#allocation21]  }
  0xd2   : > { %s10750_s29 = scalar_lea.hbm %s12571_s13, 49152 }
  0xd3   : > { %p10751_p1 = scmp.ne.s32.totalorder %s12571_s13, %s10750_s29  ;;  %p10757_p0 = scmp.lt.u32.totalorder %s10750_s29, %s12571_s13 }
  0xd5   : > { %p10753_p3 = pnand %p10751_p1, %p11510_p8 }
  0xd7   : > { %p10754_p13 = pneg %p10753_p3 }
  0xd9   : > { %p10759_p2 = pnand %p10757_p0, %p10754_p13 }
  0xdb   : > { %10762 = shalt.err (!%p10759_p2)
}
  0xdc   : > { %s10763_s4 = scalar_lea.vmem %s710_s3, 49152  ;;  %p10771_p4 = scmp.lt.s32.totalorder %s710_s3, %s710_s3 }
  0xdd   : > { %p10764_p5 = scmp.ne.s32.totalorder %s710_s3, %s10763_s4  ;;  %p10772_p10 = scmp.lt.s32.totalorder %s10763_s4, %s10763_s4 }
  0xdf   : > { %p10766_p7 = pnand %p10764_p5, %p11510_p8  ;;  %p10773_p11 = por %p10772_p10, %p10771_p4 }
  0xe1   : > { %p10767_p9 = pneg %p10766_p7 }
  0xe3   : > { %p10774_p12 = pnand %p10773_p11, %p10767_p9 }
  0xe5   : > { %10777 = shalt.err (!%p10774_p12)
}
  0xe6   : > { %s12652_s30 = smov 512   ;;  %s11325_s20 = smov [#allocation26]  }
  0xe7   : > { %10445 = dma.hbm_to_vmem [thread:$0]  (!%p11494_p6), %s12571_s13, 49152, %s710_s3, [#allocation24], %s12652_s30, %s12652_s30, %s11322_s22  }
  0xe8   : > { %s733_s1 = sshll.u32 %s11325_s20, 4  ;;  %s11326_s28 = smov [#allocation29]   ;;  %s734_s1 = int_to_ptr.vmem [resolvable:$true] %s733_s1 }
  0xe9   : > { %s760_s29 = sshll.u32 %s11326_s28, 4  ;;  %s10778_s24 = scalar_lea.hbm %s12573_s15, 384  ;;  %s761_s29 = int_to_ptr.vmem [resolvable:$true] %s760_s29 }
  0xea   : > { %p10779_p1 = scmp.ne.s32.totalorder %s12573_s15, %s10778_s24  ;;  %p10785_p0 = scmp.lt.u32.totalorder %s10778_s24, %s12573_s15 }
  0xec   : > { %p10781_p3 = pnand %p10779_p1, %p11510_p8 }
  0xee   : > { %p10782_p13 = pneg %p10781_p3 }
  0xf0   : > { %p10787_p2 = pnand %p10785_p0, %p10782_p13 }
  0xf2   : > { %10790 = shalt.err (!%p10787_p2)
}
  0xf3   : > { %s10791_s3 = scalar_lea.vmem %s734_s1, 384  ;;  %p10799_p4 = scmp.lt.s32.totalorder %s734_s1, %s734_s1 }
  0xf4   : > { %p10792_p5 = scmp.ne.s32.totalorder %s734_s1, %s10791_s3  ;;  %p10800_p10 = scmp.lt.s32.totalorder %s10791_s3, %s10791_s3 }
  0xf6   : > { %p10794_p7 = pnand %p10792_p5, %p11510_p8  ;;  %p10801_p11 = por %p10800_p10, %p10799_p4 }
  0xf8   : > { %p10795_p9 = pneg %p10794_p7 }
  0xfa   : > { %p10802_p12 = pnand %p10801_p11, %p10795_p9 }
  0xfc   : > { %10805 = shalt.err (!%p10802_p12)
}
  0xfd   : > { %10451 = dma.hbm_to_vmem [thread:$0]  (!%p11494_p6), %s12573_s15, 384, %s734_s1, [#allocation27], %s12650_s21, %s12650_s21, %s12649_s2  }
  0xfe   : > { %s10806_s27 = scalar_lea.hbm %s12575_s17, 32 }
  0xff   : > { %p10807_p1 = scmp.ne.s32.totalorder %s12575_s17, %s10806_s27  ;;  %p10813_p0 = scmp.lt.u32.totalorder %s10806_s27, %s12575_s17 }
 0x101   : > { %p10809_p3 = pnand %p10807_p1, %p11510_p8 }
 0x103   : > { %p10810_p13 = pneg %p10809_p3 }
 0x105   : > { %p10815_p2 = pnand %p10813_p0, %p10810_p13 }
 0x107   : > { %10818 = shalt.err (!%p10815_p2)
}
 0x108   : > { %s10819_s25 = scalar_lea.vmem %s761_s29, 32  ;;  %p10827_p4 = scmp.lt.s32.totalorder %s761_s29, %s761_s29 }
 0x109   : > { %p10820_p5 = scmp.ne.s32.totalorder %s761_s29, %s10819_s25  ;;  %p10828_p10 = scmp.lt.s32.totalorder %s10819_s25, %s10819_s25 }
 0x10b   : > { %p10822_p7 = pnand %p10820_p5, %p11510_p8  ;;  %p10829_p11 = por %p10828_p10, %p10827_p4 }
 0x10d   : > { %p10823_p9 = pneg %p10822_p7 }
 0x10f   : > { %p10830_p12 = pnand %p10829_p11, %p10823_p9 }
 0x111   : > { %10833 = shalt.err (!%p10830_p12)
}
 0x112   : > { %10457 = dma.hbm_to_vmem [thread:$0]  (!%p11494_p6), %s12575_s17, 32, %s761_s29, [#allocation30]  }
 0x113   : > { %s11327_s7 = smov [#allocation32]   ;;  %s11328_s20 = smov [#allocation7]  }
 0x114   : > { %s783_s18 = sshll.u32 %s11327_s7, 4  ;;  %s572_s28 = sshll.u32 %s11328_s20, 4  ;;  %s784_s18 = int_to_ptr.vmem [resolvable:$true] %s783_s18  ;;  %s573_s28 = int_to_ptr.vmem [resolvable:$true] %s572_s28 }
 0x115   : > { %s10834_s24 = scalar_lea.hbm %s12577_s19, 12288 }
 0x116   : > { %p10835_p1 = scmp.ne.s32.totalorder %s12577_s19, %s10834_s24  ;;  %p10841_p0 = scmp.lt.u32.totalorder %s10834_s24, %s12577_s19 }
 0x118   : > { %p10837_p3 = pnand %p10835_p1, %p11510_p8 }
 0x11a   : > { %p10838_p13 = pneg %p10837_p3 }
 0x11c   : > { %p10843_p2 = pnand %p10841_p0, %p10838_p13 }
 0x11e   : > { %10846 = shalt.err (!%p10843_p2)
}
 0x11f   : > { %s10847_s29 = scalar_lea.vmem %s784_s18, 12288  ;;  %p10855_p4 = scmp.lt.s32.totalorder %s784_s18, %s784_s18 }
 0x120   : > { %p10848_p5 = scmp.ne.s32.totalorder %s784_s18, %s10847_s29  ;;  %p10856_p10 = scmp.lt.s32.totalorder %s10847_s29, %s10847_s29 }
 0x122   : > { %p10850_p7 = pnand %p10848_p5, %p11510_p8  ;;  %p10857_p11 = por %p10856_p10, %p10855_p4 }
 0x124   : > { %p10851_p9 = pneg %p10850_p7 }
 0x126   : > { %p10858_p12 = pnand %p10857_p11, %p10851_p9 }
 0x128   : > { %10861 = shalt.err (!%p10858_p12)
}
 0x129   : > { %10463 = dma.hbm_to_vmem [thread:$0]  (!%p11494_p6), %s12577_s19, 12288, %s784_s18, [#allocation33], %s12650_s21, %s12650_s21, %s12649_s2  }
 0x12a   : > { %s12653_s0 = sld [smem:[#allocation59_spill]] }
 0x130   : > { %s10862_s24 = scalar_lea.hbm %s12653_s0, 49152 }
 0x131   : > { %p10863_p1 = scmp.ne.s32.totalorder %s12653_s0, %s10862_s24  ;;  %p10869_p0 = scmp.lt.u32.totalorder %s10862_s24, %s12653_s0 }
 0x133   : > { %p10865_p3 = pnand %p10863_p1, %p11510_p8 }
 0x135   : > { %p10866_p13 = pneg %p10865_p3 }
 0x137   : > { %p10871_p2 = pnand %p10869_p0, %p10866_p13 }
 0x139   : > { %10874 = shalt.err (!%p10871_p2)
}
 0x13a   : > { %s10875_s29 = scalar_lea.vmem %s573_s28, 49152  ;;  %p10883_p4 = scmp.lt.s32.totalorder %s573_s28, %s573_s28 }
 0x13b   : > { %p10876_p5 = scmp.ne.s32.totalorder %s573_s28, %s10875_s29  ;;  %p10884_p10 = scmp.lt.s32.totalorder %s10875_s29, %s10875_s29 }
 0x13d   : > { %p10878_p7 = pnand %p10876_p5, %p11510_p8  ;;  %p10885_p11 = por %p10884_p10, %p10883_p4 }
 0x13f   : > { %p10879_p9 = pneg %p10878_p7 }
 0x141   : > { %p10886_p12 = pnand %p10885_p11, %p10879_p9 }
 0x143   : > { %10889 = shalt.err (!%p10886_p12)
}
 0x144   : > { %10412 = dma.hbm_to_vmem [thread:$0]  (!%p11494_p6), %s12653_s0, 49152, %s573_s28, [#allocation6], %s12652_s30, %s12652_s30, %s11322_s22  }
 0x145   : > { %s11329_s7 = smov [#allocation10]   ;;  %s11330_s27 = smov [#allocation13]  }
 0x146   : > { %s596_s20 = sshll.u32 %s11329_s7, 4  ;;  %s622_s24 = sshll.u32 %s11330_s27, 4  ;;  %s597_s20 = int_to_ptr.vmem [resolvable:$true] %s596_s20  ;;  %s623_s24 = int_to_ptr.vmem [resolvable:$true] %s622_s24 }
 0x147   : > { %s12654_s25 = sld [smem:[#allocation61_spill]] }
 0x14d   : > { %s10890_s1 = scalar_lea.hbm %s12654_s25, 768 }
 0x14e   : > { %p10891_p1 = scmp.ne.s32.totalorder %s12654_s25, %s10890_s1  ;;  %p10897_p0 = scmp.lt.u32.totalorder %s10890_s1, %s12654_s25 }
 0x150   : > { %p10893_p3 = pnand %p10891_p1, %p11510_p8 }
 0x152   : > { %p10894_p13 = pneg %p10893_p3 }
 0x154   : > { %p10899_p2 = pnand %p10897_p0, %p10894_p13 }
 0x156   : > { %10902 = shalt.err (!%p10899_p2)
}
 0x157   : > { %s10903_s22 = scalar_lea.vmem %s597_s20, 768  ;;  %p10911_p4 = scmp.lt.s32.totalorder %s597_s20, %s597_s20 }
 0x158   : > { %p10904_p5 = scmp.ne.s32.totalorder %s597_s20, %s10903_s22  ;;  %p10912_p10 = scmp.lt.s32.totalorder %s10903_s22, %s10903_s22 }
 0x15a   : > { %p10906_p7 = pnand %p10904_p5, %p11510_p8  ;;  %p10913_p11 = por %p10912_p10, %p10911_p4 }
 0x15c   : > { %p10907_p9 = pneg %p10906_p7 }
 0x15e   : > { %p10914_p12 = pnand %p10913_p11, %p10907_p9 }
 0x160   : > { %10917 = shalt.err (!%p10914_p12)
}
 0x161   : > { %10418 = dma.hbm_to_vmem [thread:$0]  (!%p11494_p6), %s12654_s25, 768, %s597_s20, [#allocation9], %s12650_s21, %s12650_s21, %s12649_s2  }
 0x162   : > { %s12655_s3 = sld [smem:[#allocation63_spill]] }
 0x168   : > { %s12656_s7 = smov %s12655_s3  ;;  %s10918_s27 = scalar_lea.hbm %s12655_s3, 384 }
 0x169   : > { %p10919_p1 = scmp.ne.s32.totalorder %s12656_s7, %s10918_s27  ;;  %p10925_p0 = scmp.lt.u32.totalorder %s10918_s27, %s12656_s7 }
 0x16b   : > { %p10921_p3 = pnand %p10919_p1, %p11510_p8 }
 0x16d   : > { %p10922_p13 = pneg %p10921_p3 }
 0x16f   : > { %p10927_p2 = pnand %p10925_p0, %p10922_p13 }
 0x171   : > { %10930 = shalt.err (!%p10927_p2)
}
 0x172   : > { %s10931_s18 = scalar_lea.vmem %s623_s24, 384  ;;  %p10939_p4 = scmp.lt.s32.totalorder %s623_s24, %s623_s24 }
 0x173   : > { %p10932_p5 = scmp.ne.s32.totalorder %s623_s24, %s10931_s18  ;;  %p10940_p10 = scmp.lt.s32.totalorder %s10931_s18, %s10931_s18 }
 0x175   : > { %p10934_p7 = pnand %p10932_p5, %p11510_p8  ;;  %p10941_p11 = por %p10940_p10, %p10939_p4 }
 0x177   : > { %p10935_p9 = pneg %p10934_p7 }
 0x179   : > { %p10942_p12 = pnand %p10941_p11, %p10935_p9 }
 0x17b   : > { %10945 = shalt.err (!%p10942_p12)
}
 0x17c   : > { %10424 = dma.hbm_to_vmem [thread:$0]  (!%p11494_p6), %s12656_s7, 384, %s623_s24, [#allocation12], %s12650_s21, %s12650_s21, %s12649_s2  }
 0x17d   : > { %s11331_s9 = smov [#allocation16]   ;;  %s11332_s30 = smov [#allocation19]  }
 0x17e   : > { %s649_s11 = sshll.u32 %s11331_s9, 4  ;;  %s672_s28 = sshll.u32 %s11332_s30, 4  ;;  %s650_s11 = int_to_ptr.vmem [resolvable:$true] %s649_s11  ;;  %s673_s28 = int_to_ptr.vmem [resolvable:$true] %s672_s28 }
 0x17f   : > { %s12657_s8 = sld [smem:[#allocation65_spill]] }
 0x185   : > { %s10946_s26 = scalar_lea.hbm %s12657_s8, 64 }
 0x186   : > { %p10947_p1 = scmp.ne.s32.totalorder %s12657_s8, %s10946_s26  ;;  %p10953_p0 = scmp.lt.u32.totalorder %s10946_s26, %s12657_s8 }
 0x188   : > { %p10949_p3 = pnand %p10947_p1, %p11510_p8 }
 0x18a   : > { %p10950_p13 = pneg %p10949_p3 }
 0x18c   : > { %p10955_p2 = pnand %p10953_p0, %p10950_p13 }
 0x18e   : > { %10958 = shalt.err (!%p10955_p2)
}
 0x18f   : > { %s10959_s24 = scalar_lea.vmem %s650_s11, 64  ;;  %p10967_p4 = scmp.lt.s32.totalorder %s650_s11, %s650_s11 }
 0x190   : > { %p10960_p5 = scmp.ne.s32.totalorder %s650_s11, %s10959_s24  ;;  %p10968_p10 = scmp.lt.s32.totalorder %s10959_s24, %s10959_s24 }
 0x192   : > { %p10962_p7 = pnand %p10960_p5, %p11510_p8  ;;  %p10969_p11 = por %p10968_p10, %p10967_p4 }
 0x194   : > { %p10963_p9 = pneg %p10962_p7 }
 0x196   : > { %p10970_p12 = pnand %p10969_p11, %p10963_p9 }
 0x198   : > { %10973 = shalt.err (!%p10970_p12)
}
 0x199   : > { %10430 = dma.hbm_to_vmem [thread:$0]  (!%p11494_p6), %s12657_s8, 64, %s650_s11, [#allocation15]  }
 0x19a   : > { %s10974_s3 = scalar_lea.hbm %s12568_s10, 24576 }
 0x19b   : > { %p10975_p1 = scmp.ne.s32.totalorder %s12568_s10, %s10974_s3  ;;  %p10981_p0 = scmp.lt.u32.totalorder %s10974_s3, %s12568_s10 }
 0x19d   : > { %p10977_p3 = pnand %p10975_p1, %p11510_p8 }
 0x19f   : > { %p10978_p13 = pneg %p10977_p3 }
 0x1a1   : > { %p10983_p2 = pnand %p10981_p0, %p10978_p13 }
 0x1a3   : > { %10986 = shalt.err (!%p10983_p2)
}
 0x1a4   : > { %s10987_s29 = scalar_lea.vmem %s673_s28, 24576  ;;  %p10995_p4 = scmp.lt.s32.totalorder %s673_s28, %s673_s28 }
 0x1a5   : > { %p10988_p5 = scmp.ne.s32.totalorder %s673_s28, %s10987_s29  ;;  %p10996_p10 = scmp.lt.s32.totalorder %s10987_s29, %s10987_s29 }
 0x1a7   : > { %p10990_p7 = pnand %p10988_p5, %p11510_p8  ;;  %p10997_p11 = por %p10996_p10, %p10995_p4 }
 0x1a9   : > { %p10991_p9 = pneg %p10990_p7 }
 0x1ab   : > { %p10998_p12 = pnand %p10997_p11, %p10991_p9 }
 0x1ad   : > { %11001 = shalt.err (!%p10998_p12)
}
 0x1ae   : > { %s12658_s11 = smov 16   ;;  %s12659_s18 = smov 256  }
 0x1af   : > { %10436 = dma.hbm_to_vmem [thread:$0]  (!%p11494_p6), %s12568_s10, 24576, %s673_s28, [#allocation18], %s12659_s18, %s12659_s18, %s12658_s11  }
 0x1b0   : > { %s11333_s22 = smov [#allocation22]   ;;  %s11334_s30 = smov [#allocation25]  }
 0x1b1   : > { %s696_s9 = sshll.u32 %s11333_s22, 4  ;;  %s723_s3 = sshll.u32 %s11334_s30, 4  ;;  %s697_s9 = int_to_ptr.vmem [resolvable:$true] %s696_s9  ;;  %s724_s3 = int_to_ptr.vmem [resolvable:$true] %s723_s3 }
 0x1b2   : > { %s11002_s4 = scalar_lea.hbm %s12570_s12, 384 }
 0x1b3   : > { %p11003_p1 = scmp.ne.s32.totalorder %s12570_s12, %s11002_s4  ;;  %p11009_p0 = scmp.lt.u32.totalorder %s11002_s4, %s12570_s12 }
 0x1b5   : > { %p11005_p3 = pnand %p11003_p1, %p11510_p8 }
 0x1b7   : > { %p11006_p13 = pneg %p11005_p3 }
 0x1b9   : > { %p11011_p2 = pnand %p11009_p0, %p11006_p13 }
 0x1bb   : > { %11014 = shalt.err (!%p11011_p2)
}
 0x1bc   : > { %s11015_s28 = scalar_lea.vmem %s697_s9, 384  ;;  %p11023_p4 = scmp.lt.s32.totalorder %s697_s9, %s697_s9 }
 0x1bd   : > { %p11016_p5 = scmp.ne.s32.totalorder %s697_s9, %s11015_s28  ;;  %p11024_p10 = scmp.lt.s32.totalorder %s11015_s28, %s11015_s28 }
 0x1bf   : > { %p11018_p7 = pnand %p11016_p5, %p11510_p8  ;;  %p11025_p11 = por %p11024_p10, %p11023_p4 }
 0x1c1   : > { %p11019_p9 = pneg %p11018_p7 }
 0x1c3   : > { %p11026_p12 = pnand %p11025_p11, %p11019_p9 }
 0x1c5   : > { %11029 = shalt.err (!%p11026_p12)
}
 0x1c6   : > { %10442 = dma.hbm_to_vmem [thread:$0]  (!%p11494_p6), %s12570_s12, 384, %s697_s9, [#allocation21], %s12650_s21, %s12650_s21, %s12649_s2  }
 0x1c7   : > { %s11030_s27 = scalar_lea.hbm %s12572_s14, 64 }
 0x1c8   : > { %p11031_p1 = scmp.ne.s32.totalorder %s12572_s14, %s11030_s27  ;;  %p11037_p0 = scmp.lt.u32.totalorder %s11030_s27, %s12572_s14 }
 0x1ca   : > { %p11033_p3 = pnand %p11031_p1, %p11510_p8 }
 0x1cc   : > { %p11034_p13 = pneg %p11033_p3 }
 0x1ce   : > { %p11039_p2 = pnand %p11037_p0, %p11034_p13 }
 0x1d0   : > { %11042 = shalt.err (!%p11039_p2)
}
 0x1d1   : > { %s11043_s24 = scalar_lea.vmem %s724_s3, 64  ;;  %p11051_p4 = scmp.lt.s32.totalorder %s724_s3, %s724_s3 }
 0x1d2   : > { %p11044_p5 = scmp.ne.s32.totalorder %s724_s3, %s11043_s24  ;;  %p11052_p10 = scmp.lt.s32.totalorder %s11043_s24, %s11043_s24 }
 0x1d4   : > { %p11046_p7 = pnand %p11044_p5, %p11510_p8  ;;  %p11053_p11 = por %p11052_p10, %p11051_p4 }
 0x1d6   : > { %p11047_p9 = pneg %p11046_p7 }
 0x1d8   : > { %p11054_p12 = pnand %p11053_p11, %p11047_p9 }
 0x1da   : > { %11057 = shalt.err (!%p11054_p12)
}
 0x1db   : > { %10448 = dma.hbm_to_vmem [thread:$0]  (!%p11494_p6), %s12572_s14, 64, %s724_s3, [#allocation24]  }
 0x1dc   : > { %s11335_s0 = smov [#allocation28]   ;;  %s11336_s22 = smov [#allocation31]  }
 0x1dd   : > { %s746_s20 = sshll.u32 %s11335_s0, 4  ;;  %s770_s30 = sshll.u32 %s11336_s22, 4  ;;  %s747_s20 = int_to_ptr.vmem [resolvable:$true] %s746_s20  ;;  %s771_s30 = int_to_ptr.vmem [resolvable:$true] %s770_s30 }
 0x1de   : > { %s11058_s4 = scalar_lea.hbm %s12574_s16, 24576 }
 0x1df   : > { %p11059_p1 = scmp.ne.s32.totalorder %s12574_s16, %s11058_s4  ;;  %p11065_p0 = scmp.lt.u32.totalorder %s11058_s4, %s12574_s16 }
 0x1e1   : > { %p11061_p3 = pnand %p11059_p1, %p11510_p8 }
 0x1e3   : > { %p11062_p13 = pneg %p11061_p3 }
 0x1e5   : > { %p11067_p2 = pnand %p11065_p0, %p11062_p13 }
 0x1e7   : > { %11070 = shalt.err (!%p11067_p2)
}
 0x1e8   : > { %s11071_s3 = scalar_lea.vmem %s747_s20, 24576  ;;  %p11079_p4 = scmp.lt.s32.totalorder %s747_s20, %s747_s20 }
 0x1e9   : > { %p11072_p5 = scmp.ne.s32.totalorder %s747_s20, %s11071_s3  ;;  %p11080_p10 = scmp.lt.s32.totalorder %s11071_s3, %s11071_s3 }
 0x1eb   : > { %p11074_p7 = pnand %p11072_p5, %p11510_p8  ;;  %p11081_p11 = por %p11080_p10, %p11079_p4 }
 0x1ed   : > { %p11075_p9 = pneg %p11074_p7 }
 0x1ef   : > { %p11082_p12 = pnand %p11081_p11, %p11075_p9 }
 0x1f1   : > { %11085 = shalt.err (!%p11082_p12)
}
 0x1f2   : > { %10454 = dma.hbm_to_vmem [thread:$0]  (!%p11494_p6), %s12574_s16, 24576, %s747_s20, [#allocation27], %s12659_s18, %s12659_s18, %s12658_s11  }
 0x1f3   : > { %s12660_s26 = sld [smem:[#allocation68_spill]] }
 0x1f9   : > { %s11086_s4 = scalar_lea.hbm %s12660_s26, 384 }
 0x1fa   : > { %p11087_p1 = scmp.ne.s32.totalorder %s12660_s26, %s11086_s4  ;;  %p11093_p0 = scmp.lt.u32.totalorder %s11086_s4, %s12660_s26 }
 0x1fc   : > { %p11089_p3 = pnand %p11087_p1, %p11510_p8 }
 0x1fe   : > { %p11090_p13 = pneg %p11089_p3 }
 0x200   : > { %p11095_p2 = pnand %p11093_p0, %p11090_p13 }
 0x202   : > { %11098 = shalt.err (!%p11095_p2)
}
 0x203   : > { %s11099_s3 = scalar_lea.vmem %s771_s30, 384  ;;  %p11107_p4 = scmp.lt.s32.totalorder %s771_s30, %s771_s30 }
 0x204   : > { %p11100_p5 = scmp.ne.s32.totalorder %s771_s30, %s11099_s3  ;;  %p11108_p10 = scmp.lt.s32.totalorder %s11099_s3, %s11099_s3 }
 0x206   : > { %p11102_p7 = pnand %p11100_p5, %p11510_p8  ;;  %p11109_p11 = por %p11108_p10, %p11107_p4 }
 0x208   : > { %p11103_p9 = pneg %p11102_p7 }
 0x20a   : > { %p11110_p12 = pnand %p11109_p11, %p11103_p9 }
 0x20c   : > { %11113 = shalt.err (!%p11110_p12)
}
 0x20d   : > { %10460 = dma.hbm_to_vmem [thread:$0]  (!%p11494_p6), %s12660_s26, 384, %s771_s30, [#allocation30], %s12650_s21, %s12650_s21, %s12649_s2  }
 0x20e   : > { %s11337_s0 = smov [#allocation34]   ;;  %s11338_s27 = smov [#allocation35]  }
 0x20f   : > { %s797_s22 = sshll.u32 %s11337_s0, 4  ;;  %s808_s4 = sshll.u32 %s11338_s27, 4  ;;  %s798_s22 = int_to_ptr.vmem [resolvable:$true] %s797_s22  ;;  %s809_s4 = int_to_ptr.vmem [resolvable:$true] %s808_s4 }
 0x210   : > { %s12661_s24 = sld [smem:[#allocation69_spill]] }
 0x216   : > { %s11114_s9 = scalar_lea.hbm %s12661_s24, 16 }
 0x217   : > { %p11115_p1 = scmp.ne.s32.totalorder %s12661_s24, %s11114_s9  ;;  %p11121_p0 = scmp.lt.u32.totalorder %s11114_s9, %s12661_s24 }
 0x219   : > { %p11117_p3 = pnand %p11115_p1, %p11510_p8 }
 0x21b   : > { %p11118_p13 = pneg %p11117_p3 }
 0x21d   : > { %p11123_p2 = pnand %p11121_p0, %p11118_p13 }
 0x21f   : > { %11126 = shalt.err (!%p11123_p2)
}
 0x220   : > { %s11127_s2 = scalar_lea.vmem %s798_s22, 16  ;;  %s11134_s21 = scalar_lea.vmem %s798_s22, 32 }
 0x221   : > { %p11128_p5 = scmp.ne.s32.totalorder %s798_s22, %s11127_s2  ;;  %p11135_p4 = scmp.lt.s32.totalorder %s798_s22, %s798_s22 }
 0x222   : > { %p11136_p10 = scmp.lt.s32.totalorder %s11134_s21, %s11127_s2 }
 0x223   : > { %p11130_p7 = pnand %p11128_p5, %p11510_p8 }
 0x224   : > { %p11137_p11 = por %p11136_p10, %p11135_p4 }
 0x225   : > { %p11131_p9 = pneg %p11130_p7 }
 0x227   : > { %p11138_p12 = pnand %p11137_p11, %p11131_p9 }
 0x229   : > { %11141 = shalt.err (!%p11138_p12)
}
 0x22a   : > { %10466 = dma.hbm_to_vmem [thread:$0]  (!%p11494_p6), %s12661_s24, 16, %s798_s22, [#allocation33]  }
 0x22b   : > { %s12662_s0 = sld [smem:[#allocation70_spill]] }
 0x231   : > { %s11142_s27 = scalar_lea.hbm %s12662_s0, 128 }
 0x232   : > { %p11143_p1 = scmp.ne.s32.totalorder %s12662_s0, %s11142_s27  ;;  %p11149_p0 = scmp.lt.u32.totalorder %s11142_s27, %s12662_s0 }
 0x234   : > { %p11145_p3 = pnand %p11143_p1, %p11510_p8 }
 0x236   : > { %p11146_p13 = pneg %p11145_p3 }
 0x238   : > { %p11151_p2 = pnand %p11149_p0, %p11146_p13 }
 0x23a   : > { %11154 = shalt.err (!%p11151_p2)
}
 0x23b   : > { %s11155_s20 = scalar_lea.vmem %s809_s4, 128  ;;  %p11163_p4 = scmp.lt.s32.totalorder %s809_s4, %s809_s4 }
 0x23c   : > { %p11156_p5 = scmp.ne.s32.totalorder %s809_s4, %s11155_s20  ;;  %p11164_p10 = scmp.lt.s32.totalorder %s11155_s20, %s11155_s20 }
 0x23e   : > { %p11158_p7 = pnand %p11156_p5, %p11510_p8  ;;  %p11165_p11 = por %p11164_p10, %p11163_p4 }
 0x240   : > { %p11159_p9 = pneg %p11158_p7 }
 0x242   : > { %p11166_p12 = pnand %p11165_p11, %p11159_p9 }
 0x244   : > { %11169 = shalt.err (!%p11166_p12)
}
 0x245   : > { %s12663_s21 = sld [smem:[#allocation54_spill]]  ;;  %s12664_s7 = sld [smem:[#allocation53_spill]] }
 0x246   : > { %s12665_s30 = sld [smem:[#allocation52_spill]]  ;;  %s12666_s5 = sld [smem:[#allocation51_spill]] }
 0x247   : > { %s12667_s8 = sld [smem:[#allocation55_spill]] }
 0x248   : > { %10469 = dma.hbm_to_vmem [thread:$0]  (!%p11494_p6), %s12662_s0, 128, %s809_s4, [#allocation36]  }
 0x24b   : > { %s7893_s28 = sadd.s32 4294967294, %s12663_s21   ;;  %s11945_s6 = sadd.s32 1, %s12663_s21  }
 0x24c   : > { %s56_s27 = sadd.s32 1, %s12664_s7  ;;  %s53_s1 = ssub.s32 %s12663_s21, %s11945_s6 }
 0x24d   : > { %p63_p8 = scmp.ne.s32.totalorder %s12664_s7, %s12665_s30  ;;  %p54_p1 = scmp.eq.s32.totalorder %s53_s1, 0 }
 0x24e   : > { %p64_p3 = scmp.eq.s32.totalorder %s12663_s21, 0  ;;  %p69_p13 = scmp.ne.s32.totalorder %s12665_s30, %s12666_s5 }
 0x24f   : > { %p534_p0 = scmp.eq.s32.totalorder %s12667_s8, 1  ;;  %p12668_p5 = scmp.eq.s32.totalorder %s12667_s8, 0 }
 0x250   : > { %s11957_s29 = scalar_select %p54_p1, %s12664_s7, %s56_s27  }
 0x251   : > { %p65_p2 = por %p64_p3, %p63_p8  ;;  %p11961_p7 = por %p12668_p5, %p69_p13 }
 0x252   : > { %p11965_p6 = por %p534_p0, %p63_p8  ;;  %p540_p9 = scmp.eq.s32.totalorder %s7893_s28, 1 }
 0x253   : > { %p10499_p4 = scmp.lt.s32.totalorder %s12663_s21, 2  ;;  %s819_s3 = sand.u32 1, %s12664_s7  }
 0x254   : > { %s12670_s4 = scalar_select %p11965_p6, 1, 0 }
 0x255   : > { %p11971_p10 = por %p540_p9, %p69_p13  ;;  %s7917_s22 = sshll.u32 %s819_s3, 7 }
 0x256   : > { %s7988_s2 = sshll.u32 %s12663_s21, 11  ;;  %s12672_s8 = sld [smem:[#allocation57_spill]] }
 0x257   : > { %s12671_s20 = scalar_select %p11971_p10, 1, 0 }
 0x258   : > { %s823_s1 = scalar_lea.vmem [#allocation2], %s7917_s22  ;;  %p11981_p11 = pnand %p10499_p4, %p65_p2 }
 0x259   : > { %s830_s0 = sshll.u32 %s823_s1, 4  ;;  %s11987_s21 = scalar_lea.sflag [#allocation3], %s819_s3  ;;  %s11985_s0 = int_to_ptr.vmem [resolvable:$true] %s830_s0 }
 0x25a   : > { %p11172_p8 = pneg %p11981_p11 }
 0x25c   : > { %s11979_s27 = scalar_lea.hbm %s12672_s8, %s7988_s2  ;;  %s11175_s30 = scalar_lea.hbm %s12672_s8, 4096 }
 0x25d   : > { %s11170_s7 = scalar_lea.hbm %s11979_s27, 2048  ;;  %p11176_p13 = scmp.lt.u32.totalorder %s11979_s27, %s12672_s8 }
 0x25e   : > { %p11171_p12 = scmp.ne.s32.totalorder %s11979_s27, %s11170_s7  ;;  %p11177_p0 = scmp.lt.u32.totalorder %s11175_s30, %s11170_s7 }
 0x25f   : > { %p11179_p5 = scmp.lt.u32.totalorder %s11170_s7, %s11979_s27 }
 0x260   : > { %p11173_p1 = pnand %p11172_p8, %p11171_p12  ;;  %p11178_p2 = por %p11177_p0, %p11176_p13 }
 0x262   : > { %p11174_p3 = pneg %p11173_p1  ;;  %p11180_p9 = por %p11179_p5, %p11178_p2 }
 0x264   : > { %p11181_p4 = pnand %p11180_p9, %p11174_p3 }
 0x266   : > { %11184 = shalt.err (!%p11181_p4)
}
 0x267   : > { %s11185_s3 = scalar_lea.vmem %s11985_s0, 2048  ;;  %s11339_s22 = smov [#allocation2]  }
 0x268   : > { %p11186_p12 = scmp.ne.s32.totalorder %s11985_s0, %s11185_s3  ;;  %s11190_s2 = sshll.u32 %s11339_s22, 4  ;;  %s11191_s2 = int_to_ptr.vmem [resolvable:$false] %s11190_s2 }
 0x269   : > { %s11192_s5 = scalar_lea.vmem %s11191_s2, 4096  ;;  %p11193_p6 = scmp.lt.s32.totalorder %s11985_s0, %s11191_s2 }
 0x26a   : > { %p11188_p1 = pnand %p11186_p12, %p11172_p8  ;;  %p11194_p13 = scmp.lt.s32.totalorder %s11192_s5, %s11185_s3 }
 0x26c   : > { %p11189_p10 = pneg %p11188_p1  ;;  %p11195_p0 = por %p11194_p13, %p11193_p6 }
 0x26e   : > { %p11196_p2 = pnand %p11195_p0, %p11189_p10 }
 0x270   : > { %11199 = shalt.err (!%p11196_p2)
}
 0x271   : > { %10473 = dma.hbm_to_vmem [thread:$0]  (!%p11981_p11), %s11979_s27, 2048, %s11985_s0, %s11987_s21, %s12659_s18, %s12659_s18, %s12658_s11  }
 0x272   : > { %s12674_s7 = sld [smem:[#allocation56_spill]] }
 0x278   : > { %p12675_p8 = scmp.ne.s32.totalorder %s12674_s7, 0 }
 0x279   : > { %s12676_s30 = sld [smem:[#allocation52_spill]] (!%p12675_p8) }
 0x27a   : > { %842 = sbr.rel (%p12675_p8) target bundleno = 4685 (0x124d), region = 108 }
 0x27f   : > { %s12021_s1 = sand.u32 (!%p12675_p8), 1, %s12676_s30  }
 0x280   : > { %s7921_s3 = sshll.u32 (!%p12675_p8), %s12021_s1, 7  ;;  %s845_s22 = scalar_lea.sflag (!%p12675_p8), [#allocation3], %s12021_s1 }
 0x281   : > { %s12025_s2 = scalar_lea.vmem [#allocation2], %s7921_s3 }
 0x282   : > { %11245 = dma.done.wait (%p11961_p7), %s845_s22, 2048  }
 0x283   : > { %11247 = vsyncadd (%p11961_p7), %s845_s22, 4294965248  ;;  %s12677_s28 = sld [smem:[#allocation55_spill]] }
 0x289   : > { %p12678_p6 = scmp.eq.s32.totalorder %s12677_s28, 0 }
 0x28b   : > { %11249 = dma.done.wait (%p12678_p6), [#allocation6], 50688   ;;  %p12679_p10 = pmov %p12678_p6 }
 0x28c   : > { %p12680_p11 = pmov %p12678_p6 }
 0x28d   : > { %11251 = vsyncadd (%p12679_p10), [#allocation6], 4294916608 }
 0x28e   : > { %11253 = dma.done.wait (%p12680_p11), [#allocation9], 832   ;;  %p12681_p3 = pmov %p12678_p6 }
 0x290   : > { %11255 = vsyncadd (%p12681_p3), [#allocation9], 4294966464  ;;  %p12682_p5 = pmov %p12681_p3 }
 0x291   : > { %p12683_p9 = pmov %p12681_p3 }
 0x292   : > { %11257 = dma.done.wait (%p12682_p5), [#allocation12], 49536  }
 0x293   : > { %11259 = vsyncadd (%p12683_p9), [#allocation12], 4294917760  ;;  %p12684_p7 = pmov %p12681_p3 }
 0x294   : > { %p12685_p4 = pmov %p12681_p3 }
 0x295   : > { %11261 = dma.done.wait (%p12684_p7), [#allocation15], 49216  }
 0x296   : > { %11263 = vsyncadd (%p12685_p4), [#allocation15], 4294918080  ;;  %p12686_p12 = pmov %p12681_p3 }
 0x297   : > { %p12687_p1 = pmov %p12681_p3 }
 0x298   : > { %11265 = dma.done.wait (%p12686_p12), [#allocation18], 24960  }
 0x299   : > { %11267 = vsyncadd (%p12687_p1), [#allocation18], 4294942336  ;;  %p12688_p13 = pmov %p12687_p1 }
 0x29a   : > { %p12689_p0 = pmov %p12687_p1 }
 0x29b   : > { %11269 = dma.done.wait (%p12688_p13), [#allocation21], 416  }
 0x29c   : > { %11271 = vsyncadd (%p12689_p0), [#allocation21], 4294966880  ;;  %p12690_p2 = pmov %p12689_p0 }
 0x29d   : > { %p12691_p8 = pmov %p12689_p0 }
 0x29e   : > { %11273 = dma.done.wait (%p12690_p2), [#allocation24], 49216  }
 0x29f   : > { %11275 = vsyncadd (%p12691_p8), [#allocation24], 4294918080  ;;  %p12692_p6 = pmov %p12689_p0 }
 0x2a0   : > { %p12693_p10 = pmov %p12689_p0 }
 0x2a1   : > { %11277 = dma.done.wait (%p12692_p6), [#allocation27], 24960  }
 0x2a2   : > { %11279 = vsyncadd (%p12693_p10), [#allocation27], 4294942336  ;;  %p12694_p11 = pmov %p12689_p0 }
 0x2a3   : > { %p12695_p3 = pmov %p12689_p0 }
 0x2a4   : > { %11281 = dma.done.wait (%p12694_p11), [#allocation30], 416  }
 0x2a5   : > { %11283 = vsyncadd (%p12695_p3), [#allocation30], 4294966880  ;;  %p12696_p5 = pmov %p12689_p0 }
 0x2a6   : > { %p12697_p9 = pmov %p12689_p0 }
 0x2a7   : > { %11285 = dma.done.wait (%p12696_p5), [#allocation33], 12304  }
 0x2a8   : > { %11287 = vsyncadd (%p12697_p9), [#allocation33], 4294954992  ;;  %p12698_p7 = pmov %p12689_p0 }
 0x2a9   : > { %p12699_p4 = pmov %p12689_p0 }
 0x2aa   : > { %11289 = dma.done.wait (%p12698_p7), [#allocation36], 128  }
 0x2ab   : > { %11291 = vsyncadd (%p12699_p4), [#allocation36], 4294967168  ;;  %v11340_v0 = vmov 0.0   ;;  %v994_v1 = vld [vmem:[%s12025_s2 + $0x8] sm:$0xff]  ;;  %v996_v2 = vld [vmem:[%s12025_s2 + $0x18] sm:$0xff]  ;;  %vm1013_vm0 = vcmask 523264  }
 0x2ac   : > { %1090 = vmatprep.mubr.f32.mxu0 %v11340_v0  ;;  %v993_v3 = vld [vmem:[%s12025_s2] sm:$0xff]  ;;  %v12079_v4 = vpack.c.bf16 %v996_v2, %v994_v1  ;;  %v995_v5 = vld [vmem:[%s12025_s2 + $0x10] sm:$0xff]  ;;  %v998_v6 = vld [vmem:[%s12025_s2 + $0x28] sm:$0xff]  ;;  %vm2285_vm1 = vcmask 261120   ;;  %vm3645_vm2 = vcmask 130048   ;;  %vm4707_vm3 = vcmask 64512  }
 0x2ad   : > { %v1000_v7 = vld [vmem:[%s12025_s2 + $0x38] sm:$0xff]  ;;  %v12084_v8 = vpack.c.bf16 %v995_v5, %v993_v3  ;;  %v997_v10 = vld [vmem:[%s12025_s2 + $0x20] sm:$0xff]  ;;  %v999_v11 = vld [vmem:[%s12025_s2 + $0x30] sm:$0xff]  ;;  %s7943_s11 = sshll.u32 %s12021_s1, 3  ;;  %s7985_s18 = sshll.u32 %s12677_s28, 7 }
 0x2ae   : > { %v12086_v9 = vpack.c.bf16 %v1000_v7, %v998_v6  ;;  %v1002_v12 = vld [vmem:[%s12025_s2 + $0x48] sm:$0xff]  ;;  %8095 = vmatprep.subr.bf16.mxu0 %v12079_v4  ;;  %v1004_v13 = vld [vmem:[%s12025_s2 + $0x58] sm:$0xff]  ;;  %v12094_v14 = vpack.c.bf16 %v999_v11, %v997_v10  ;;  %v1001_v16 = vld [vmem:[%s12025_s2 + $0x40] sm:$0xff]  ;;  %s992_s0 = scalar_lea.vmem [#allocation37], %s7943_s11  ;;  %s12700_s5 = sld [smem:[#allocation71_spill]] }
 0x2af   : > { %8097 = vmatpush1.bf16.msra.mxu0 %v12084_v8  ;;  %v12097_v15 = vpack.c.bf16 %v1004_v13, %v1002_v12  ;;  %v1003_v17 = vld [vmem:[%s12025_s2 + $0x50] sm:$0xff]  ;;  %v1006_v18 = vld [vmem:[%s12025_s2 + $0x68] sm:$0xff]  ;;  %v1008_v19 = vld [vmem:[%s12025_s2 + $0x78] sm:$0xff]  ;;  %s7623_s9 = sshll.u32 %s992_s0, 4  ;;  %s7610_s30 = scalar_lea.sflag [#allocation4], %s12021_s1  ;;  %s12516_s9 = int_to_ptr.vmem [resolvable:$true] %s7623_s9 }
 0x2b0   : > { %8099 = vmatprep.subr.bf16.mxu0 %v12086_v9  ;;  %v12104_v20 = vpack.c.bf16 %v1003_v17, %v1001_v16  ;;  %v12107_v21 = vpack.c.bf16 %v1008_v19, %v1006_v18  ;;  %v1005_v22 = vld [vmem:[%s12025_s2 + $0x60] sm:$0xff]  ;;  %v1007_v23 = vld [vmem:[%s12025_s2 + $0x70] sm:$0xff]  ;;  %v1456_v25 = vld [vmem:[#allocation7 + $0x408] sm:$0xff]  ;;  %s11200_s3 = scalar_lea.vmem %s12516_s9, 128  ;;  %p12701_p1 = scmp.ne.s32.totalorder %s12670_s4, 0 }
 0x2b1   : > { %v12112_v24 = vpack.c.bf16 %v1007_v23, %v1005_v22  ;;  %v1460_v26 = vld [vmem:[#allocation7 + $0x428] sm:$0xff]  ;;  %v1009_v27 = vld [vmem:[#allocation5] sm:$0xff]  ;;  %v1011_v46 = vld [vmem:[#allocation5 + $0x10] sm:$0xff]  ;;  %p11201_p12 = scmp.ne.s32.totalorder %s12516_s9, %s11200_s3  ;;  %s11341_s22 = smov [#allocation37]  }
 0x2b2   : > { %v8206_v28 = vpack.c.bf16 %v1460_v26, %v1456_v25  ;;  %v1455_v29 = vld [vmem:[#allocation7 + $0x400] sm:$0xff]  ;;  %v1464_v32 = vld [vmem:[#allocation7 + $0x448] sm:$0xff]  ;;  %v1012_v53 = vld [vmem:[#allocation5 + $0x18] sm:$0xff]  ;;  %s11204_s2 = sshll.u32 %s11341_s22, 4  ;;  %s11205_s2 = int_to_ptr.vmem [resolvable:$false] %s11204_s2 }
 0x2b3   : > { %8101 = vmatpush1.bf16.msra.mxu0 %v12094_v14  ;;  %v1459_v30 = vld [vmem:[#allocation7 + $0x420] sm:$0xff]  ;;  %v1468_v33 = vld [vmem:[#allocation7 + $0x468] sm:$0xff]  ;;  %p11202_p13 = pnand %p11201_p12, %p12701_p1  ;;  %s11206_s28 = scalar_lea.vmem %s11205_s2, 256 }
 0x2b4   : > { %8103 = vmatprep.subr.bf16.mxu0 %v12097_v15  ;;  %8207 = vmatprep.subr.bf16.mxu1 %v8206_v28  ;;  %v8208_v31 = vpack.c.bf16 %v1459_v30, %v1455_v29  ;;  %v8210_v34 = vpack.c.bf16 %v1468_v33, %v1464_v32  ;;  %v1463_v35 = vld [vmem:[#allocation7 + $0x440] sm:$0xff]  ;;  %v1010_v37 = vld [vmem:[#allocation5 + $0x8] sm:$0xff]  ;;  %s12514_s7 = scalar_lea.hbm %s12700_s5, %s7985_s18  ;;  %p11207_p2 = scmp.lt.s32.totalorder %s12516_s9, %s11205_s2 }
 0x2b5   : > { %v1467_v36 = vld [vmem:[#allocation7 + $0x460] sm:$0xff]  ;;  %v1472_v38 = vld [vmem:[#allocation7 + $0x488] sm:$0xff]  ;;  %p11203_p0 = pneg %p11202_p13  ;;  %p11208_p8 = scmp.lt.s32.totalorder %s11206_s28, %s11200_s3 }
 0x2b6   : > { %8209 = vmatpush1.bf16.msra.mxu1 %v8208_v31  ;;  %v8212_v39 = vpack.c.bf16 %v1467_v36, %v1463_v35  ;;  %v1476_v40 = vld [vmem:[#allocation7 + $0x4a8] sm:$0xff]  ;;  %v1471_v42 = vld [vmem:[#allocation7 + $0x480] sm:$0xff] }
 0x2b7   : > { %8105 = vmatpush1.bf16.msra.mxu0 %v12104_v20  ;;  %8211 = vmatprep.subr.bf16.mxu1 %v8210_v34  ;;  %v8214_v41 = vpack.c.bf16 %v1476_v40, %v1472_v38  ;;  %v1475_v43 = vld [vmem:[#allocation7 + $0x4a0] sm:$0xff]  ;;  %v1480_v44 = vld [vmem:[#allocation7 + $0x4c8] sm:$0xff]  ;;  %p11209_p6 = por %p11208_p8, %p11207_p2 }
 0x2b8   : > { %8107 = vmatprep.subr.bf16.mxu0 %v12107_v21  ;;  %v1484_v45 = vld [vmem:[#allocation7 + $0x4e8] sm:$0xff]  ;;  %v8216_v47 = vpack.c.bf16 %v1475_v43, %v1471_v42  ;;  %v1479_v49 = vld [vmem:[#allocation7 + $0x4c0] sm:$0xff] }
 0x2b9   : > { %v8218_v48 = vpack.c.bf16 %v1484_v45, %v1480_v44  ;;  %v1483_v50 = vld [vmem:[#allocation7 + $0x4e0] sm:$0xff]  ;;  %v1488_v51 = vld [vmem:[#allocation7 + $0x508] sm:$0xff]  ;;  %p11210_p10 = pnand %p11209_p6, %p11203_p0 }
 0x2ba   : > { %8213 = vmatpush1.bf16.msra.mxu1 %v8212_v39  ;;  %v1492_v52 = vld [vmem:[#allocation7 + $0x528] sm:$0xff]  ;;  %v8220_v54 = vpack.c.bf16 %v1483_v50, %v1479_v49  ;;  %v1487_v56 = vld [vmem:[#allocation7 + $0x500] sm:$0xff] }
 0x2bb   : > { %8109 = vmatpush1.bf16.msra.mxu0 %v12112_v24  ;;  %8215 = vmatprep.subr.bf16.mxu1 %v8214_v41  ;;  %v8222_v55 = vpack.c.bf16 %v1492_v52, %v1488_v51  ;;  %v1491_v57 = vld [vmem:[#allocation7 + $0x520] sm:$0xff]  ;;  %v1496_v58 = vld [vmem:[#allocation7 + $0x548] sm:$0xff] }
 0x2bc   : > { %8111 = vmatprep.subr.bf16.mxu0 %v12079_v4  ;;  %v1500_v59 = vld [vmem:[#allocation7 + $0x568] sm:$0xff]  ;;  %v1116_v60 = vld [vmem:[#allocation5 + $0x20] sm:$0xff]  ;;  %v8224_v61 = vpack.c.bf16 %v1491_v57, %v1487_v56 }
 0x2bd   : > { %v8226_v62 = vpack.c.bf16 %v1500_v59, %v1496_v58  ;;  %v1495_v63 = vld [vmem:[#allocation7 + $0x540] sm:$0xff]  ;;  %v1504_v2 = vld [vmem:[#allocation7 + $0x588] sm:$0xff]  ;;  %v1224_v58 = vld [vmem:[#allocation5 + $0x50] sm:$0xff] }
 0x2be   : > { %7944 = vmatmul.mubr.msk.f32.vlgmr.msra.gmra.mrb[0].mxu0 %vm1013_vm0, %v1009_v27  ;;  %8217 = vmatpush1.bf16.msra.mxu1 %v8216_v47  ;;  %v1499_v1 = vld [vmem:[#allocation7 + $0x560] sm:$0xff]  ;;  %v1508_v3 = vld [vmem:[#allocation7 + $0x5a8] sm:$0xff] }
 0x2bf   : > { %8113 = vmatpush1.bf16.msra.mxu0 %v12084_v8  ;;  %1096 = vmatprep.mubr.f32.mxu0 %v11340_v0  ;;  %v1117_v5 = vld [vmem:[#allocation5 + $0x28] sm:$0xff]  ;;  %v8228_v6 = vpack.c.bf16 %v1499_v1, %v1495_v63  ;;  %v1503_v7 = vld [vmem:[#allocation7 + $0x580] sm:$0xff] }
 0x2c0   : > { %8115 = vmatprep.subr.bf16.mxu0 %v12086_v9  ;;  %8219 = vmatprep.subr.bf16.mxu1 %v8218_v48  ;;  %v1507_v10 = vld [vmem:[#allocation7 + $0x5a0] sm:$0xff]  ;;  %v1512_v11 = vld [vmem:[#allocation7 + $0x5c8] sm:$0xff] }
 0x2c1   : > { %v1516_v12 = vld [vmem:[#allocation7 + $0x5e8] sm:$0xff]  ;;  %v1511_v18 = vld [vmem:[#allocation7 + $0x5c0] sm:$0xff] }
 0x2c2   : > { %7945 = vmatmul.mubr.msk.f32.gmra.mrb[2].mxu0 %vm1013_vm0, %v1010_v37  ;;  %8221 = vmatpush1.bf16.msra.mxu1 %v8220_v54  ;;  %v1328_v13 = vld [vmem:[#allocation7 + $0x8] sm:$0xff]  ;;  %v8234_v17 = vpack.c.bf16 %v1516_v12, %v1512_v11  ;;  %v1515_v19 = vld [vmem:[#allocation7 + $0x5e0] sm:$0xff] }
 0x2c3   : > { %8117 = vmatpush1.bf16.msra.mxu0 %v12094_v14  ;;  %1102 = vmatprep.mubr.f32.mxu0 %v11340_v0  ;;  %v1332_v16 = vld [vmem:[#allocation7 + $0x28] sm:$0xff]  ;;  %v1327_v25 = vld [vmem:[#allocation7] sm:$0xff]  ;;  %v8236_v28 = vpack.c.bf16 %v1515_v19, %v1511_v18 }
 0x2c4   : > { %8119 = vmatprep.subr.bf16.mxu0 %v12097_v15  ;;  %8223 = vmatprep.subr.bf16.mxu1 %v8222_v55  ;;  %v1520_v22 = vld [vmem:[#allocation7 + $0x608] sm:$0xff]  ;;  %v1331_v26 = vld [vmem:[#allocation7 + $0x20] sm:$0xff] }
 0x2c5   : > { %v1524_v23 = vld [vmem:[#allocation7 + $0x628] sm:$0xff]  ;;  %v1519_v31 = vld [vmem:[#allocation7 + $0x600] sm:$0xff]  ;;  %v8144_v34 = vpack.c.bf16 %v1331_v26, %v1327_v25 }
 0x2c6   : > { %7946 = vmatmul.mubr.msk.f32.gmra.mrb[4].mxu0 %vm1013_vm0, %v1011_v46  ;;  %8225 = vmatpush1.bf16.msra.mxu1 %v8224_v61  ;;  %v1336_v27 = vld [vmem:[#allocation7 + $0x48] sm:$0xff]  ;;  %v8238_v30 = vpack.c.bf16 %v1524_v23, %v1520_v22  ;;  %v1523_v32 = vld [vmem:[#allocation7 + $0x620] sm:$0xff] }
 0x2c7   : > { %8121 = vmatpush1.bf16.msra.mxu0 %v12104_v20  ;;  %1108 = vmatprep.mubr.f32.mxu0 %v11340_v0  ;;  %v1340_v29 = vld [vmem:[#allocation7 + $0x68] sm:$0xff]  ;;  %v1335_v36 = vld [vmem:[#allocation7 + $0x40] sm:$0xff]  ;;  %v8240_v39 = vpack.c.bf16 %v1523_v32, %v1519_v31 }
 0x2c8   : > { %8123 = vmatprep.subr.bf16.mxu0 %v12107_v21  ;;  %8227 = vmatprep.subr.bf16.mxu1 %v8226_v62  ;;  %v1528_v33 = vld [vmem:[#allocation7 + $0x648] sm:$0xff]  ;;  %v8146_v35 = vpack.c.bf16 %v1340_v29, %v1336_v27  ;;  %v1339_v37 = vld [vmem:[#allocation7 + $0x60] sm:$0xff] }
 0x2c9   : > { %v1344_v38 = vld [vmem:[#allocation7 + $0x88] sm:$0xff]  ;;  %v1527_v42 = vld [vmem:[#allocation7 + $0x640] sm:$0xff]  ;;  %v8148_v46 = vpack.c.bf16 %v1339_v37, %v1335_v36 }
 0x2ca   : > { %7947 = vmatmul.mubr.msk.f32.gmra.mrb[6].mxu0 %vm1013_vm0, %v1012_v53  ;;  %8229 = vmatpush1.bf16.msra.mxu1 %v8228_v6  ;;  %v1348_v40 = vld [vmem:[#allocation7 + $0xa8] sm:$0xff]  ;;  %v1531_v43 = vld [vmem:[#allocation7 + $0x660] sm:$0xff] }
 0x2cb   : > { %8125 = vmatpush1.bf16.msra.mxu0 %v12112_v24  ;;  %1196 = vmatprep.mubr.f32.mxu0 %v11340_v0  ;;  %v1536_v44 = vld [vmem:[#allocation7 + $0x688] sm:$0xff]  ;;  %v8150_v47 = vpack.c.bf16 %v1348_v40, %v1344_v38  ;;  %v1343_v48 = vld [vmem:[#allocation7 + $0x80] sm:$0xff]  ;;  %v8244_v51 = vpack.c.bf16 %v1531_v43, %v1527_v42 }
 0x2cc   : > { %8127 = vmatprep.subr.bf16.mxu0 %v12079_v4  ;;  %v8230_v4 = vpack.c.bf16 %v1508_v3, %v1504_v2  ;;  %v1223_v45 = vld [vmem:[#allocation5 + $0x48] sm:$0xff]  ;;  %v1347_v49 = vld [vmem:[#allocation7 + $0xa0] sm:$0xff] }
 0x2cd   : > { %v1352_v50 = vld [vmem:[#allocation7 + $0xc8] sm:$0xff]  ;;  %v1535_v54 = vld [vmem:[#allocation7 + $0x680] sm:$0xff]  ;;  %v8152_v59 = vpack.c.bf16 %v1347_v49, %v1343_v48 }
 0x2ce   : > { %7948 = vmatmul.mubr.msk.f32.vlgmr.msra.gmra.mrb[8].mxu0 %vm1013_vm0, %v1116_v60  ;;  %8231 = vmatprep.subr.bf16.mxu1 %v8230_v4  ;;  %v1356_v52 = vld [vmem:[#allocation7 + $0xe8] sm:$0xff]  ;;  %v1539_v55 = vld [vmem:[#allocation7 + $0x6a0] sm:$0xff]  ;;  %v1225_v4 = vld [vmem:[#allocation5 + $0x58] sm:$0xff] }
 0x2cf   : > { %8129 = vmatpush1.bf16.msra.mxu0 %v12084_v8  ;;  %1202 = vmatprep.mubr.f32.mxu0 %v11340_v0  ;;  %v1118_v8 = vld [vmem:[#allocation5 + $0x30] sm:$0xff]  ;;  %v1544_v56 = vld [vmem:[#allocation7 + $0x6c8] sm:$0xff]  ;;  %v8154_v60 = vpack.c.bf16 %v1356_v52, %v1352_v50  ;;  %v1351_v61 = vld [vmem:[#allocation7 + $0xc0] sm:$0xff]  ;;  %v8248_v1 = vpack.c.bf16 %v1539_v55, %v1535_v54 }
 0x2d0   : > { %8131 = vmatprep.subr.bf16.mxu0 %v12086_v9  ;;  %v8232_v9 = vpack.c.bf16 %v1507_v10, %v1503_v7  ;;  %v1548_v57 = vld [vmem:[#allocation7 + $0x6e8] sm:$0xff]  ;;  %v1355_v62 = vld [vmem:[#allocation7 + $0xe0] sm:$0xff] }
 0x2d1   : > { %v1360_v63 = vld [vmem:[#allocation7 + $0x108] sm:$0xff]  ;;  %v8250_v3 = vpack.c.bf16 %v1548_v57, %v1544_v56  ;;  %v1547_v6 = vld [vmem:[#allocation7 + $0x6e0] sm:$0xff]  ;;  %v8156_v7 = vpack.c.bf16 %v1355_v62, %v1351_v61 }
 0x2d2   : > { %7949 = vmatmul.mubr.msk.f32.gmra.mrb[10].mxu0 %vm1013_vm0, %v1117_v5  ;;  %8233 = vmatpush1.bf16.msra.mxu1 %v8232_v9  ;;  %v1364_v2 = vld [vmem:[#allocation7 + $0x128] sm:$0xff]  ;;  %v1543_v5 = vld [vmem:[#allocation7 + $0x6c0] sm:$0xff] }
 0x2d3   : > { %8133 = vmatpush1.bf16.msra.mxu0 %v12094_v14  ;;  %1208 = vmatprep.mubr.f32.mxu0 %v11340_v0  ;;  %v1119_v14 = vld [vmem:[#allocation5 + $0x38] sm:$0xff]  ;;  %v8158_v10 = vpack.c.bf16 %v1364_v2, %v1360_v63  ;;  %v1359_v11 = vld [vmem:[#allocation7 + $0x100] sm:$0xff]  ;;  %v1372_v9 = vld [vmem:[#allocation7 + $0x168] sm:$0xff] }
 0x2d4   : > { %8135 = vmatprep.subr.bf16.mxu0 %v12097_v15  ;;  %v8142_v15 = vpack.c.bf16 %v1332_v16, %v1328_v13  ;;  %8235 = vmatprep.subr.bf16.mxu1 %v8234_v17  ;;  %v1363_v12 = vld [vmem:[#allocation7 + $0x120] sm:$0xff]  ;;  %v1368_v13 = vld [vmem:[#allocation7 + $0x148] sm:$0xff] }
 0x2d5   : > { %v8160_v16 = vpack.c.bf16 %v1363_v12, %v1359_v11  ;;  %v8162_v17 = vpack.c.bf16 %v1372_v9, %v1368_v13  ;;  %v1367_v18 = vld [vmem:[#allocation7 + $0x140] sm:$0xff]  ;;  %v1376_v22 = vld [vmem:[#allocation7 + $0x188] sm:$0xff] }
 0x2d6   : > { %7950 = vmatmul.mubr.msk.f32.gmra.mrb[12].mxu0 %vm1013_vm0, %v1118_v8  ;;  %8237 = vmatpush1.bf16.msra.mxu1 %v8236_v28  ;;  %v8252_v8 = vpack.c.bf16 %v1547_v6, %v1543_v5  ;;  %v1371_v19 = vld [vmem:[#allocation7 + $0x160] sm:$0xff]  ;;  %v1380_v23 = vld [vmem:[#allocation7 + $0x1a8] sm:$0xff] }
 0x2d7   : > { %8137 = vmatpush1.bf16.msra.mxu0 %v12104_v20  ;;  %1214 = vmatprep.mubr.f32.mxu0 %v11340_v0  ;;  %v1532_v20 = vld [vmem:[#allocation7 + $0x668] sm:$0xff]  ;;  %v1375_v25 = vld [vmem:[#allocation7 + $0x180] sm:$0xff] }
 0x2d8   : > { %8139 = vmatprep.subr.bf16.mxu0 %v12107_v21  ;;  %v1222_v21 = vld [vmem:[#allocation5 + $0x40] sm:$0xff]  ;;  %8239 = vmatprep.subr.bf16.mxu1 %v8238_v30  ;;  %v8242_v41 = vpack.c.bf16 %v1532_v20, %v1528_v33  ;;  %v1384_v27 = vld [vmem:[#allocation7 + $0x1c8] sm:$0xff] }
 0x2d9   : > { %v1379_v26 = vld [vmem:[#allocation7 + $0x1a0] sm:$0xff]  ;;  %v1388_v28 = vld [vmem:[#allocation7 + $0x1e8] sm:$0xff] }
 0x2da   : > { %7951 = vmatmul.mubr.msk.f32.gmra.mrb[14].mxu0 %vm1013_vm0, %v1119_v14  ;;  %8241 = vmatpush1.bf16.msra.mxu1 %v8240_v39  ;;  %v8164_v14 = vpack.c.bf16 %v1371_v19, %v1367_v18  ;;  %v8168_v29 = vpack.c.bf16 %v1379_v26, %v1375_v25  ;;  %v8170_v30 = vpack.c.bf16 %v1388_v28, %v1384_v27  ;;  %v1383_v31 = vld [vmem:[#allocation7 + $0x1c0] sm:$0xff]  ;;  %v1392_v33 = vld [vmem:[#allocation7 + $0x208] sm:$0xff]  ;;  %v1334_v25 = vld [vmem:[#allocation7 + $0x38] sm:$0xff] }
 0x2db   : > { %8141 = vmatpush1.bf16.msra.mxu0 %v12112_v24  ;;  %1302 = vmatprep.mubr.f32.mxu0 %v11340_v0  ;;  %v1540_v24 = vld [vmem:[#allocation7 + $0x6a8] sm:$0xff]  ;;  %v1387_v32 = vld [vmem:[#allocation7 + $0x1e0] sm:$0xff] }
 0x2dc   : > { %8143 = vmatprep.subr.bf16.mxu0 %v8142_v15  ;;  %8243 = vmatprep.subr.bf16.mxu1 %v8242_v41  ;;  %v8246_v53 = vpack.c.bf16 %v1540_v24, %v1536_v44  ;;  %v8166_v15 = vpack.c.bf16 %v1380_v23, %v1376_v22  ;;  %v1396_v20 = vld [vmem:[#allocation7 + $0x228] sm:$0xff]  ;;  %v1395_v36 = vld [vmem:[#allocation7 + $0x220] sm:$0xff] }
 0x2dd   : > { %v1400_v37 = vld [vmem:[#allocation7 + $0x248] sm:$0xff]  ;;  %v1399_v41 = vld [vmem:[#allocation7 + $0x240] sm:$0xff] }
 0x2de   : > { %7952 = vmatmul.mubr.msk.f32.vlgmr.msra.gmra.mrb[16].mxu0 %vm1013_vm0, %v1222_v21  ;;  %8245 = vmatpush1.bf16.msra.mxu1 %v8244_v51  ;;  %v8172_v21 = vpack.c.bf16 %v1387_v32, %v1383_v31  ;;  %v1404_v38 = vld [vmem:[#allocation7 + $0x268] sm:$0xff]  ;;  %v1403_v42 = vld [vmem:[#allocation7 + $0x260] sm:$0xff] }
 0x2df   : > { %1308 = vmatprep.mubr.f32.mxu0 %v11340_v0  ;;  %8145 = vmatpush1.bf16.msra.mxu0 %v8144_v34  ;;  %v8174_v34 = vpack.c.bf16 %v1396_v20, %v1392_v33  ;;  %v8178_v40 = vpack.c.bf16 %v1404_v38, %v1400_v37  ;;  %v1408_v43 = vld [vmem:[#allocation7 + $0x288] sm:$0xff]  ;;  %v8180_v24 = vpack.c.bf16 %v1403_v42, %v1399_v41  ;;  %v1415_v52 = vld [vmem:[#allocation7 + $0x2c0] sm:$0xff] }
 0x2e0   : > { %8147 = vmatprep.subr.bf16.mxu0 %v8146_v35  ;;  %8247 = vmatprep.subr.bf16.mxu1 %v8246_v53  ;;  %v1391_v35 = vld [vmem:[#allocation7 + $0x200] sm:$0xff]  ;;  %v1412_v44 = vld [vmem:[#allocation7 + $0x2a8] sm:$0xff] }
 0x2e1   : > { %v8176_v39 = vpack.c.bf16 %v1395_v36, %v1391_v35  ;;  %v1416_v48 = vld [vmem:[#allocation7 + $0x2c8] sm:$0xff]  ;;  %v1419_v53 = vld [vmem:[#allocation7 + $0x2e0] sm:$0xff] }
 0x2e2   : > { %7953 = vmatmul.mubr.msk.f32.gmra.mrb[18].mxu0 %vm1013_vm0, %v1223_v45  ;;  %8249 = vmatpush1.bf16.msra.mxu1 %v8248_v1  ;;  %v8182_v45 = vpack.c.bf16 %v1412_v44, %v1408_v43  ;;  %v1420_v49 = vld [vmem:[#allocation7 + $0x2e8] sm:$0xff]  ;;  %v8188_v56 = vpack.c.bf16 %v1419_v53, %v1415_v52  ;;  %v1431_v1 = vld [vmem:[#allocation7 + $0x340] sm:$0xff] }
 0x2e3   : > { %1314 = vmatprep.mubr.f32.mxu0 %v11340_v0  ;;  %8149 = vmatpush1.bf16.msra.mxu0 %v8148_v46  ;;  %v1407_v46 = vld [vmem:[#allocation7 + $0x280] sm:$0xff]  ;;  %v8186_v51 = vpack.c.bf16 %v1420_v49, %v1416_v48  ;;  %v1424_v54 = vld [vmem:[#allocation7 + $0x308] sm:$0xff]  ;;  %v1338_v48 = vld [vmem:[#allocation7 + $0x58] sm:$0xff] }
 0x2e4   : > { %8151 = vmatprep.subr.bf16.mxu0 %v8150_v47  ;;  %8251 = vmatprep.subr.bf16.mxu1 %v8250_v3  ;;  %v1411_v47 = vld [vmem:[#allocation7 + $0x2a0] sm:$0xff]  ;;  %v1428_v55 = vld [vmem:[#allocation7 + $0x328] sm:$0xff]  ;;  %v1342_v49 = vld [vmem:[#allocation7 + $0x78] sm:$0xff] }
 0x2e5   : > { %v8184_v50 = vpack.c.bf16 %v1411_v47, %v1407_v46  ;;  %v8190_v57 = vpack.c.bf16 %v1428_v55, %v1424_v54  ;;  %v1436_v61 = vld [vmem:[#allocation7 + $0x368] sm:$0xff]  ;;  %v1435_v2 = vld [vmem:[#allocation7 + $0x360] sm:$0xff]  ;;  %v1329_v46 = vld [vmem:[#allocation7 + $0x10] sm:$0xff]  ;;  %v8338_v53 = vpack.c.bf16 %v1342_v49, %v1338_v48 }
 0x2e6   : > { %7954 = vmatmul.mubr.msk.f32.gmra.mrb[20].mxu0 %vm1013_vm0, %v1224_v58  ;;  %8253 = vmatpush1.bf16.msra.mxu1 %v8252_v8  ;;  %v1423_v58 = vld [vmem:[#allocation7 + $0x300] sm:$0xff]  ;;  %v1440_v3 = vld [vmem:[#allocation7 + $0x388] sm:$0xff]  ;;  %v8196_v6 = vpack.c.bf16 %v1435_v2, %v1431_v1  ;;  %v1333_v47 = vld [vmem:[#allocation7 + $0x30] sm:$0xff] }
 0x2e7   : > { %1320 = vmatprep.mubr.f32.mxu0 %v11340_v0  ;;  %8153 = vmatpush1.bf16.msra.mxu0 %v8152_v59  ;;  %v1427_v59 = vld [vmem:[#allocation7 + $0x320] sm:$0xff]  ;;  %v1444_v5 = vld [vmem:[#allocation7 + $0x3a8] sm:$0xff]  ;;  %v1337_v54 = vld [vmem:[#allocation7 + $0x50] sm:$0xff] }
 0x2e8   : > { %8155 = vmatprep.subr.bf16.mxu0 %v8154_v60  ;;  %v1432_v60 = vld [vmem:[#allocation7 + $0x348] sm:$0xff]  ;;  %v8192_v62 = vpack.c.bf16 %v1427_v59, %v1423_v58  ;;  %v1447_v23 = vld [vmem:[#allocation7 + $0x3c0] sm:$0xff]  ;;  %v1341_v55 = vld [vmem:[#allocation7 + $0x70] sm:$0xff] }
 0x2e9   : > { %v8194_v63 = vpack.c.bf16 %v1436_v61, %v1432_v60  ;;  %v1448_v11 = vld [vmem:[#allocation7 + $0x3c8] sm:$0xff]  ;;  %v1567_v35 = vld [vmem:[#allocation7 + $0x780] sm:$0xff]  ;;  %v8340_v59 = vpack.c.bf16 %v1341_v55, %v1337_v54  ;;  %v1354_v1 = vld [vmem:[#allocation7 + $0xd8] sm:$0xff] }
 0x2ea   : > { %7955 = vmatmul.mubr.msk.f32.gmra.mrb[22].mxu0 %vm1013_vm0, %v1225_v4  ;;  %v1439_v4 = vld [vmem:[#allocation7 + $0x380] sm:$0xff]  ;;  %v1552_v12 = vld [vmem:[#allocation7 + $0x708] sm:$0xff]  ;;  %v1358_v2 = vld [vmem:[#allocation7 + $0xf8] sm:$0xff] }
 0x2eb   : > { %8157 = vmatpush1.bf16.msra.mxu0 %v8156_v7  ;;  %v1443_v7 = vld [vmem:[#allocation7 + $0x3a0] sm:$0xff]  ;;  %v1556_v8 = vld [vmem:[#allocation7 + $0x728] sm:$0xff]  ;;  %v1386_v49 = vld [vmem:[#allocation7 + $0x1d8] sm:$0xff] }
 0x2ec   : > { %8159 = vmatprep.subr.bf16.mxu0 %v8158_v10  ;;  %v8198_v10 = vpack.c.bf16 %v1444_v5, %v1440_v3  ;;  %v1452_v13 = vld [vmem:[#allocation7 + $0x3e8] sm:$0xff]  ;;  %v8254_v9 = vpack.c.bf16 %v1556_v8, %v1552_v12  ;;  %v8200_v19 = vpack.c.bf16 %v1443_v7, %v1439_v4  ;;  %v1571_v36 = vld [vmem:[#allocation7 + $0x7a0] sm:$0xff]  ;;  %v8346_v4 = vpack.c.bf16 %v1358_v2, %v1354_v1  ;;  %v1353_v7 = vld [vmem:[#allocation7 + $0xd0] sm:$0xff] }
 0x2ed   : > { %v8202_v22 = vpack.c.bf16 %v1452_v13, %v1448_v11  ;;  %v1560_v26 = vld [vmem:[#allocation7 + $0x748] sm:$0xff]  ;;  %v8264_v37 = vpack.c.bf16 %v1571_v36, %v1567_v35  ;;  %v1575_v41 = vld [vmem:[#allocation7 + $0x7c0] sm:$0xff]  ;;  %v1362_v11 = vld [vmem:[#allocation7 + $0x118] sm:$0xff] }
 0x2ee   : > { %8255 = vmatprep.subr.bf16.mxu1 %v8254_v9  ;;  %v1564_v27 = vld [vmem:[#allocation7 + $0x768] sm:$0xff]  ;;  %v1579_v42 = vld [vmem:[#allocation7 + $0x7e0] sm:$0xff]  ;;  %v1366_v12 = vld [vmem:[#allocation7 + $0x138] sm:$0xff] }
 0x2ef   : > { %8161 = vmatpush1.bf16.msra.mxu0 %v8160_v16  ;;  %v1551_v16 = vld [vmem:[#allocation7 + $0x700] sm:$0xff]  ;;  %v8258_v28 = vpack.c.bf16 %v1564_v27, %v1560_v26  ;;  %v1568_v20 = vld [vmem:[#allocation7 + $0x788] sm:$0xff]  ;;  %v8268_v43 = vpack.c.bf16 %v1579_v42, %v1575_v41  ;;  %v1378_v36 = vld [vmem:[#allocation7 + $0x198] sm:$0xff] }
 0x2f0   : > { %8163 = vmatprep.subr.bf16.mxu0 %v8162_v17  ;;  %v1555_v17 = vld [vmem:[#allocation7 + $0x720] sm:$0xff]  ;;  %v1576_v38 = vld [vmem:[#allocation7 + $0x7c8] sm:$0xff] }
 0x2f1   : > { %v8256_v18 = vpack.c.bf16 %v1555_v17, %v1551_v16  ;;  %v1584_v44 = vld [vmem:[#allocation7 + $0x808] sm:$0xff]  ;;  %v1583_v9 = vld [vmem:[#allocation7 + $0x800] sm:$0xff] }
 0x2f2   : > { %v1587_v16 = vld [vmem:[#allocation7 + $0x820] sm:$0xff]  ;;  %v1604_v35 = vld [vmem:[#allocation7 + $0x8a8] sm:$0xff] }
 0x2f3   : > { %8165 = vmatpush1.bf16.msra.mxu0 %v8164_v14  ;;  %v1451_v14 = vld [vmem:[#allocation7 + $0x3e0] sm:$0xff]  ;;  %8257 = vmatpush1.bf16.msra.mxu1 %v8256_v18  ;;  %v8350_v18 = vpack.c.bf16 %v1366_v12, %v1362_v11  ;;  %v8272_v27 = vpack.c.bf16 %v1587_v16, %v1583_v9  ;;  %v1612_v48 = vld [vmem:[#allocation7 + $0x8e8] sm:$0xff] }
 0x2f4   : > { %8167 = vmatprep.subr.bf16.mxu0 %v8166_v15  ;;  %v1330_v15 = vld [vmem:[#allocation7 + $0x18] sm:$0xff]  ;;  %v8204_v31 = vpack.c.bf16 %v1451_v14, %v1447_v23  ;;  %8259 = vmatprep.subr.bf16.mxu1 %v8258_v28  ;;  %v1592_v23 = vld [vmem:[#allocation7 + $0x848] sm:$0xff]  ;;  %v1603_v41 = vld [vmem:[#allocation7 + $0x8a0] sm:$0xff] }
 0x2f5   : > { %v8334_v33 = vpack.c.bf16 %v1334_v25, %v1330_v15  ;;  %v1596_v14 = vld [vmem:[#allocation7 + $0x868] sm:$0xff]  ;;  %v1370_v15 = vld [vmem:[#allocation7 + $0x158] sm:$0xff]  ;;  %v1607_v54 = vld [vmem:[#allocation7 + $0x8c0] sm:$0xff] }
 0x2f6   : > { %v1374_v25 = vld [vmem:[#allocation7 + $0x178] sm:$0xff]  ;;  %v1611_v55 = vld [vmem:[#allocation7 + $0x8e0] sm:$0xff]  ;;  %v1620_v2 = vld [vmem:[#allocation7 + $0x928] sm:$0xff] }
 0x2f7   : > { %8169 = vmatpush1.bf16.msra.mxu0 %v8168_v29  ;;  %v1559_v29 = vld [vmem:[#allocation7 + $0x740] sm:$0xff] }
 0x2f8   : > { %8171 = vmatprep.subr.bf16.mxu0 %v8170_v30  ;;  %v1563_v30 = vld [vmem:[#allocation7 + $0x760] sm:$0xff] }
 0x2f9   : > { %v8260_v32 = vpack.c.bf16 %v1563_v30, %v1559_v29  ;;  %v1591_v29 = vld [vmem:[#allocation7 + $0x840] sm:$0xff] }
 0x2fa   : > { %v1595_v30 = vld [vmem:[#allocation7 + $0x860] sm:$0xff] }
 0x2fb   : > { %8173 = vmatpush1.bf16.msra.mxu0 %v8172_v21  ;;  %8261 = vmatpush1.bf16.msra.mxu1 %v8260_v32  ;;  %v1572_v21 = vld [vmem:[#allocation7 + $0x7a8] sm:$0xff]  ;;  %v8274_v32 = vpack.c.bf16 %v1596_v14, %v1592_v23  ;;  %v1615_v11 = vld [vmem:[#allocation7 + $0x900] sm:$0xff] }
 0x2fc   : > { %8175 = vmatprep.subr.bf16.mxu0 %v8174_v34  ;;  %v8262_v34 = vpack.c.bf16 %v1572_v21, %v1568_v20  ;;  %v1369_v20 = vld [vmem:[#allocation7 + $0x150] sm:$0xff]  ;;  %v1619_v12 = vld [vmem:[#allocation7 + $0x920] sm:$0xff]  ;;  %v1628_v14 = vld [vmem:[#allocation7 + $0x968] sm:$0xff] }
 0x2fd   : > { %v1373_v21 = vld [vmem:[#allocation7 + $0x170] sm:$0xff] }
 0x2fe   : > { %8263 = vmatprep.subr.bf16.mxu1 %v8262_v34  ;;  %v1600_v34 = vld [vmem:[#allocation7 + $0x888] sm:$0xff] }
 0x2ff   : > { %8177 = vmatpush1.bf16.msra.mxu0 %v8176_v39  ;;  %8265 = vmatpush1.bf16.msra.mxu1 %v8264_v37  ;;  %v1580_v39 = vld [vmem:[#allocation7 + $0x7e8] sm:$0xff]  ;;  %v1382_v37 = vld [vmem:[#allocation7 + $0x1b8] sm:$0xff] }
 0x300   : > { %8179 = vmatprep.subr.bf16.mxu0 %v8178_v40  ;;  %v8266_v40 = vpack.c.bf16 %v1580_v39, %v1576_v38  ;;  %v8276_v38 = vpack.c.bf16 %v1595_v30, %v1591_v29  ;;  %v8356_v39 = vpack.c.bf16 %v1373_v21, %v1369_v20  ;;  %v1623_v29 = vld [vmem:[#allocation7 + $0x940] sm:$0xff]  ;;  %v1401_v21 = vld [vmem:[#allocation7 + $0x250] sm:$0xff] }
 0x301   : > { %v1627_v30 = vld [vmem:[#allocation7 + $0x960] sm:$0xff] }
 0x302   : > { %8267 = vmatprep.subr.bf16.mxu1 %v8266_v40  ;;  %v1599_v40 = vld [vmem:[#allocation7 + $0x880] sm:$0xff] }
 0x303   : > { %8181 = vmatpush1.bf16.msra.mxu0 %v8180_v24  ;;  %8269 = vmatpush1.bf16.msra.mxu1 %v8268_v43  ;;  %v1588_v24 = vld [vmem:[#allocation7 + $0x828] sm:$0xff]  ;;  %v8278_v43 = vpack.c.bf16 %v1604_v35, %v1600_v34  ;;  %v1405_v34 = vld [vmem:[#allocation7 + $0x270] sm:$0xff] }
 0x304   : > { %8183 = vmatprep.subr.bf16.mxu0 %v8182_v45  ;;  %v8270_v45 = vpack.c.bf16 %v1588_v24, %v1584_v44  ;;  %v8358_v44 = vpack.c.bf16 %v1382_v37, %v1378_v36  ;;  %v1377_v24 = vld [vmem:[#allocation7 + $0x190] sm:$0xff]  ;;  %v1632_v35 = vld [vmem:[#allocation7 + $0x988] sm:$0xff] }
 0x305   : > { %v1636_v37 = vld [vmem:[#allocation7 + $0x9a8] sm:$0xff] }
 0x306   : > { %8271 = vmatprep.subr.bf16.mxu1 %v8270_v45  ;;  %v1381_v45 = vld [vmem:[#allocation7 + $0x1b0] sm:$0xff] }
 0x307   : > { %8185 = vmatpush1.bf16.msra.mxu0 %v8184_v50 }
 0x308   : > { %8187 = vmatprep.subr.bf16.mxu0 %v8186_v51  ;;  %v8336_v51 = vpack.c.bf16 %v1333_v47, %v1329_v46  ;;  %v1608_v46 = vld [vmem:[#allocation7 + $0x8c8] sm:$0xff] }
 0x30b   : > { %8189 = vmatpush1.bf16.msra.mxu0 %v8188_v56  ;;  %v1346_v56 = vld [vmem:[#allocation7 + $0x98] sm:$0xff] }
 0x30c   : > { %8191 = vmatprep.subr.bf16.mxu0 %v8190_v57  ;;  %v1350_v57 = vld [vmem:[#allocation7 + $0xb8] sm:$0xff] }
 0x30d   : > { %v8342_v61 = vpack.c.bf16 %v1350_v57, %v1346_v56  ;;  %v8282_v57 = vpack.c.bf16 %v1612_v48, %v1608_v46  ;;  %v1409_v48 = vld [vmem:[#allocation7 + $0x290] sm:$0xff] }
 0x30f   : > { %8193 = vmatpush1.bf16.msra.mxu0 %v8192_v62  ;;  %v1345_v62 = vld [vmem:[#allocation7 + $0x90] sm:$0xff] }
 0x310   : > { %8195 = vmatprep.subr.bf16.mxu0 %v8194_v63  ;;  %v1349_v63 = vld [vmem:[#allocation7 + $0xb0] sm:$0xff] }
 0x311   : > { %v8344_v5 = vpack.c.bf16 %v1349_v63, %v1345_v62  ;;  %v1389_v62 = vld [vmem:[#allocation7 + $0x1f0] sm:$0xff]  ;;  %v1616_v63 = vld [vmem:[#allocation7 + $0x908] sm:$0xff] }
 0x312   : > { %v8286_v9 = vpack.c.bf16 %v1620_v2, %v1616_v63 }
 0x313   : > { %8197 = vmatpush1.bf16.msra.mxu0 %v8196_v6 }
 0x314   : > { %8199 = vmatprep.subr.bf16.mxu0 %v8198_v10  ;;  %v1357_v10 = vld [vmem:[#allocation7 + $0xf0] sm:$0xff] }
 0x315   : > { %v8348_v13 = vpack.c.bf16 %v1357_v10, %v1353_v7  ;;  %v8284_v7 = vpack.c.bf16 %v1611_v55, %v1607_v54  ;;  %v1418_v54 = vld [vmem:[#allocation7 + $0x2d8] sm:$0xff] }
 0x316   : > { %v1422_v55 = vld [vmem:[#allocation7 + $0x2f8] sm:$0xff] }
 0x317   : > { %8201 = vmatpush1.bf16.msra.mxu0 %v8200_v19  ;;  %v1361_v19 = vld [vmem:[#allocation7 + $0x110] sm:$0xff] }
 0x318   : > { %8203 = vmatprep.subr.bf16.mxu0 %v8202_v22  ;;  %v1365_v22 = vld [vmem:[#allocation7 + $0x130] sm:$0xff] }
 0x319   : > { %v8352_v28 = vpack.c.bf16 %v1365_v22, %v1361_v19  ;;  %v1397_v19 = vld [vmem:[#allocation7 + $0x230] sm:$0xff]  ;;  %v1624_v22 = vld [vmem:[#allocation7 + $0x948] sm:$0xff] }
 0x31b   : > { %8205 = vmatpush1.bf16.msra.mxu0 %v8204_v31 }
 0x31c   : > { %8335 = vmatprep.subr.bf16.mxu0 %v8334_v33  ;;  %v8354_v33 = vpack.c.bf16 %v1374_v25, %v1370_v15  ;;  %v1402_v15 = vld [vmem:[#allocation7 + $0x258] sm:$0xff] }
 0x31d   : > { %v1406_v25 = vld [vmem:[#allocation7 + $0x278] sm:$0xff] }
 0x31e   : > { %v8370_v20 = vpack.c.bf16 %v1406_v25, %v1402_v15 }
 0x391   : > { %v12155_v50 = vpop.f32.mrb[0].mxu0 }
 0x392   : > { %v1094_v52 = vpop.f32.mrb[1].mxu0 }
 0x393   : > { %1797 = vmatprep.mubr.f32.mxu0 %v1094_v52 }
 0x394   : > { %1798 = vmatmul.mubr.f32.vlgmr.msra.gmra.mrb[24].mxu0 %v12155_v50 }
 0x395   : > { %8337 = vmatpush1.bf16.msra.mxu0 %v8336_v51  ;;  %v12158_v58 = vpop.f32.mrb[2].mxu0  ;;  %v1390_v51 = vld [vmem:[#allocation7 + $0x1f8] sm:$0xff] }
 0x396   : > { %v12160_v60 = vpop.f32.mrb[3].mxu0  ;;  %8339 = vmatprep.subr.bf16.mxu0 %v8338_v53  ;;  %v8360_v53 = vpack.c.bf16 %v1381_v45, %v1377_v24  ;;  %v8294_v45 = vpack.c.bf16 %v1636_v37, %v1632_v35 }
 0x397   : > { %1803 = vmatprep.mubr.f32.mxu0 %v12160_v60 }
 0x398   : > { %1804 = vmatmul.mubr.f32.gmra.mrb[26].mxu0 %v12158_v58 }
 0x399   : > { %8341 = vmatpush1.bf16.msra.mxu0 %v8340_v59  ;;  %v12164_v3 = vpop.f32.mrb[4].mxu0  ;;  %v8362_v59 = vpack.c.bf16 %v1390_v51, %v1386_v49  ;;  %v1413_v49 = vld [vmem:[#allocation7 + $0x2b0] sm:$0xff]  ;;  %v1640_v51 = vld [vmem:[#allocation7 + $0x9c8] sm:$0xff] }
 0x39a   : > { %v12166_v6 = vpop.f32.mrb[5].mxu0  ;;  %8343 = vmatprep.subr.bf16.mxu0 %v8342_v61  ;;  %v1385_v61 = vld [vmem:[#allocation7 + $0x1d0] sm:$0xff] }
 0x39b   : > { %1809 = vmatprep.mubr.f32.mxu0 %v12166_v6  ;;  %v8364_v10 = vpack.c.bf16 %v1389_v62, %v1385_v61  ;;  %v1639_v61 = vld [vmem:[#allocation7 + $0x9c0] sm:$0xff] }
 0x39c   : > { %1810 = vmatmul.mubr.f32.gmra.mrb[28].mxu0 %v12164_v3  ;;  %v1643_v62 = vld [vmem:[#allocation7 + $0x9e0] sm:$0xff] }
 0x39d   : > { %8345 = vmatpush1.bf16.msra.mxu0 %v8344_v5  ;;  %v12170_v8 = vpop.f32.mrb[6].mxu0  ;;  %v1394_v5 = vld [vmem:[#allocation7 + $0x218] sm:$0xff] }
 0x39e   : > { %v12172_v17 = vpop.f32.mrb[7].mxu0  ;;  %8347 = vmatprep.subr.bf16.mxu0 %v8346_v4  ;;  %v1398_v4 = vld [vmem:[#allocation7 + $0x238] sm:$0xff] }
 0x39f   : > { %1815 = vmatprep.mubr.f32.mxu0 %v12172_v17  ;;  %v8366_v16 = vpack.c.bf16 %v1398_v4, %v1394_v5  ;;  %v8378_v5 = vpack.c.bf16 %v1422_v55, %v1418_v54  ;;  %v1417_v4 = vld [vmem:[#allocation7 + $0x2d0] sm:$0xff]  ;;  %v1663_v54 = vld [vmem:[#allocation7 + $0xa80] sm:$0xff] }
 0x3a0   : > { %1816 = vmatmul.mubr.f32.gmra.mrb[30].mxu0 %v12170_v8  ;;  %v1667_v55 = vld [vmem:[#allocation7 + $0xaa0] sm:$0xff] }
 0x3a1   : > { %8349 = vmatpush1.bf16.msra.mxu0 %v8348_v13  ;;  %v12176_v26 = vpop.f32.mrb[8].mxu0  ;;  %2064 = vmatprep.mubr.f32.mxu0 %v1094_v52  ;;  %v8280_v52 = vpack.c.bf16 %v1603_v41, %v1599_v40  ;;  %v8292_v40 = vpack.c.bf16 %v1627_v30, %v1623_v29  ;;  %v8372_v41 = vpack.c.bf16 %v1405_v34, %v1401_v21  ;;  %v1429_v29 = vld [vmem:[#allocation7 + $0x330] sm:$0xff]  ;;  %v1656_v30 = vld [vmem:[#allocation7 + $0xa48] sm:$0xff]  ;;  %v1434_v21 = vld [vmem:[#allocation7 + $0x358] sm:$0xff] }
 0x3a2   : > { %v12178_v31 = vpop.f32.mrb[9].mxu0  ;;  %8351 = vmatprep.subr.bf16.mxu0 %v8350_v18  ;;  %v1393_v18 = vld [vmem:[#allocation7 + $0x210] sm:$0xff]  ;;  %v1438_v34 = vld [vmem:[#allocation7 + $0x378] sm:$0xff] }
 0x3a3   : > { %1886 = vmatprep.mubr.f32.mxu1 %v12178_v31 }
 0x3a4   : > { %1887 = vmatmul.mubr.f32.vlgmr.msra.gmra.mrb[0].mxu1 %v12176_v26 }
 0x3a5   : > { %8273 = vmatpush1.bf16.msra.mxu1 %v8272_v27  ;;  %8353 = vmatpush1.bf16.msra.mxu0 %v8352_v28  ;;  %v12182_v42 = vpop.f32.mrb[10].mxu0  ;;  %v8288_v27 = vpack.c.bf16 %v1619_v12, %v1615_v11  ;;  %v8368_v28 = vpack.c.bf16 %v1397_v19, %v1393_v18  ;;  %v1652_v12 = vld [vmem:[#allocation7 + $0xa28] sm:$0xff]  ;;  %v8300_v18 = vpack.c.bf16 %v1643_v62, %v1639_v61  ;;  %v1441_v61 = vld [vmem:[#allocation7 + $0x390] sm:$0xff] }
 0x3a6   : > { %8275 = vmatprep.subr.bf16.mxu1 %v8274_v32  ;;  %8355 = vmatprep.subr.bf16.mxu0 %v8354_v33  ;;  %v12184_v47 = vpop.f32.mrb[11].mxu0  ;;  %v8290_v33 = vpack.c.bf16 %v1628_v14, %v1624_v22  ;;  %v1647_v22 = vld [vmem:[#allocation7 + $0xa00] sm:$0xff]  ;;  %v1445_v62 = vld [vmem:[#allocation7 + $0x3b0] sm:$0xff] }
 0x3a7   : > { %1892 = vmatprep.mubr.f32.mxu1 %v12184_v47  ;;  %v1651_v14 = vld [vmem:[#allocation7 + $0xa20] sm:$0xff] }
 0x3a8   : > { %1893 = vmatmul.mubr.f32.gmra.mrb[2].mxu1 %v12182_v42  ;;  %v8304_v35 = vpack.c.bf16 %v1651_v14, %v1647_v22  ;;  %v1449_v22 = vld [vmem:[#allocation7 + $0x3d0] sm:$0xff] }
 0x3a9   : > { %8277 = vmatpush1.bf16.msra.mxu1 %v8276_v38  ;;  %8357 = vmatpush1.bf16.msra.mxu0 %v8356_v39  ;;  %v12188_v56 = vpop.f32.mrb[12].mxu0  ;;  %v1410_v38 = vld [vmem:[#allocation7 + $0x298] sm:$0xff]  ;;  %v1453_v14 = vld [vmem:[#allocation7 + $0x3f0] sm:$0xff] }
 0x3aa   : > { %8279 = vmatprep.subr.bf16.mxu1 %v8278_v43  ;;  %8359 = vmatprep.subr.bf16.mxu0 %v8358_v44  ;;  %v12190_v1 = vpop.f32.mrb[13].mxu0  ;;  %v1414_v39 = vld [vmem:[#allocation7 + $0x2b8] sm:$0xff]  ;;  %v1631_v43 = vld [vmem:[#allocation7 + $0x980] sm:$0xff] }
 0x3ab   : > { %1898 = vmatprep.mubr.f32.mxu1 %v12190_v1  ;;  %v1635_v44 = vld [vmem:[#allocation7 + $0x9a0] sm:$0xff]  ;;  %v8374_v46 = vpack.c.bf16 %v1414_v39, %v1410_v38 }
 0x3ac   : > { %1899 = vmatmul.mubr.f32.gmra.mrb[4].mxu1 %v12188_v56  ;;  %v1655_v38 = vld [vmem:[#allocation7 + $0xa40] sm:$0xff] }
 0x3ad   : > { %8281 = vmatpush1.bf16.msra.mxu1 %v8280_v52  ;;  %8361 = vmatpush1.bf16.msra.mxu0 %v8360_v53  ;;  %v12194_v13 = vpop.f32.mrb[14].mxu0  ;;  %v1644_v53 = vld [vmem:[#allocation7 + $0x9e8] sm:$0xff]  ;;  %v1659_v39 = vld [vmem:[#allocation7 + $0xa60] sm:$0xff] }
 0x3ae   : > { %8283 = vmatprep.subr.bf16.mxu1 %v8282_v57  ;;  %8363 = vmatprep.subr.bf16.mxu0 %v8362_v59  ;;  %v12196_v23 = vpop.f32.mrb[15].mxu0  ;;  %v8296_v57 = vpack.c.bf16 %v1635_v44, %v1631_v43  ;;  %v8376_v59 = vpack.c.bf16 %v1413_v49, %v1409_v48  ;;  %v8298_v2 = vpack.c.bf16 %v1644_v53, %v1640_v51  ;;  %v1433_v43 = vld [vmem:[#allocation7 + $0x350] sm:$0xff]  ;;  %v1442_v48 = vld [vmem:[#allocation7 + $0x398] sm:$0xff] }
 0x3af   : > { %1904 = vmatprep.mubr.f32.mxu1 %v12196_v23  ;;  %v1437_v44 = vld [vmem:[#allocation7 + $0x370] sm:$0xff]  ;;  %v1446_v49 = vld [vmem:[#allocation7 + $0x3b8] sm:$0xff]  ;;  %v8308_v51 = vpack.c.bf16 %v1659_v39, %v1655_v38 }
 0x3b0   : > { %1905 = vmatmul.mubr.f32.gmra.mrb[6].mxu1 %v12194_v13  ;;  %v8388_v53 = vpack.c.bf16 %v1437_v44, %v1433_v43  ;;  %v1457_v38 = vld [vmem:[#allocation7 + $0x410] sm:$0xff]  ;;  %v1466_v43 = vld [vmem:[#allocation7 + $0x458] sm:$0xff] }
 0x3b1   : > { %8285 = vmatpush1.bf16.msra.mxu1 %v8284_v7  ;;  %8365 = vmatpush1.bf16.msra.mxu0 %v8364_v10  ;;  %v12200_v32 = vpop.f32.mrb[16].mxu0  ;;  %v1421_v7 = vld [vmem:[#allocation7 + $0x2f0] sm:$0xff]  ;;  %v1648_v10 = vld [vmem:[#allocation7 + $0xa08] sm:$0xff]  ;;  %v1470_v44 = vld [vmem:[#allocation7 + $0x478] sm:$0xff] }
 0x3b2   : > { %8287 = vmatprep.subr.bf16.mxu1 %v8286_v9  ;;  %8367 = vmatprep.subr.bf16.mxu0 %v8366_v16  ;;  %v12202_v36 = vpop.f32.mrb[17].mxu0  ;;  %v1426_v9 = vld [vmem:[#allocation7 + $0x318] sm:$0xff]  ;;  %v8380_v19 = vpack.c.bf16 %v1421_v7, %v1417_v4  ;;  %v8302_v25 = vpack.c.bf16 %v1652_v12, %v1648_v10  ;;  %v8312_v10 = vpack.c.bf16 %v1667_v55, %v1663_v54  ;;  %v1461_v39 = vld [vmem:[#allocation7 + $0x430] sm:$0xff] }
 0x3b3   : > { %1975 = vmatprep.mubr.f32.mxu1 %v12202_v36  ;;  %v1430_v16 = vld [vmem:[#allocation7 + $0x338] sm:$0xff]  ;;  %v8392_v12 = vpack.c.bf16 %v1445_v62, %v1441_v61  ;;  %v8402_v54 = vpack.c.bf16 %v1470_v44, %v1466_v43  ;;  %v1469_v55 = vld [vmem:[#allocation7 + $0x470] sm:$0xff] }
 0x3b4   : > { %v1450_v4 = vld [vmem:[#allocation7 + $0x3d8] sm:$0xff]  ;;  %v1501_v43 = vld [vmem:[#allocation7 + $0x570] sm:$0xff] }
 0x3b5   : > { %8289 = vmatpush1.bf16.msra.mxu1 %v8288_v27  ;;  %8369 = vmatpush1.bf16.msra.mxu0 %v8368_v28  ;;  %v12205_v24 = vpop.f32.mrb[18].mxu0  ;;  %v8382_v27 = vpack.c.bf16 %v1430_v16, %v1426_v9  ;;  %v1425_v28 = vld [vmem:[#allocation7 + $0x310] sm:$0xff]  ;;  %v1454_v7 = vld [vmem:[#allocation7 + $0x3f8] sm:$0xff]  ;;  %v1671_v9 = vld [vmem:[#allocation7 + $0xac0] sm:$0xff] }
 0x3b6   : > { %8291 = vmatprep.subr.bf16.mxu1 %v8290_v33  ;;  %8371 = vmatprep.subr.bf16.mxu0 %v8370_v20  ;;  %v12207_v52 = vpop.f32.mrb[19].mxu0  ;;  %v1660_v20 = vld [vmem:[#allocation7 + $0xa68] sm:$0xff]  ;;  %v8384_v37 = vpack.c.bf16 %v1429_v29, %v1425_v28  ;;  %v1675_v16 = vld [vmem:[#allocation7 + $0xae0] sm:$0xff]  ;;  %v1458_v28 = vld [vmem:[#allocation7 + $0x418] sm:$0xff] }
 0x3b7   : > { %v1462_v29 = vld [vmem:[#allocation7 + $0x438] sm:$0xff] }
 0x3b8   : > { %v1474_v61 = vld [vmem:[#allocation7 + $0x498] sm:$0xff] }
 0x3b9   : > { %8293 = vmatpush1.bf16.msra.mxu1 %v8292_v40  ;;  %8373 = vmatpush1.bf16.msra.mxu0 %v8372_v41  ;;  %v12209_v63 = vpop.f32.mrb[20].mxu0  ;;  %v8306_v40 = vpack.c.bf16 %v1660_v20, %v1656_v30  ;;  %v8386_v41 = vpack.c.bf16 %v1438_v34, %v1434_v21  ;;  %v8316_v30 = vpack.c.bf16 %v1675_v16, %v1671_v9  ;;  %v1478_v62 = vld [vmem:[#allocation7 + $0x4b8] sm:$0xff]  ;;  %v1477_v16 = vld [vmem:[#allocation7 + $0x4b0] sm:$0xff] }
 0x3ba   : > { %8295 = vmatprep.subr.bf16.mxu1 %v8294_v45  ;;  %8375 = vmatprep.subr.bf16.mxu0 %v8374_v46  ;;  %v12211_v11 = vpop.f32.mrb[21].mxu0  ;;  %v1664_v45 = vld [vmem:[#allocation7 + $0xa88] sm:$0xff]  ;;  %v8396_v20 = vpack.c.bf16 %v1453_v14, %v1449_v22  ;;  %v8398_v34 = vpack.c.bf16 %v1462_v29, %v1458_v28  ;;  %v8406_v9 = vpack.c.bf16 %v1478_v62, %v1474_v61  ;;  %v1486_v22 = vld [vmem:[#allocation7 + $0x4f8] sm:$0xff]  ;;  %v1707_v28 = vld [vmem:[#allocation7 + $0xbe0] sm:$0xff] }
 0x3bb   : > { %v1668_v46 = vld [vmem:[#allocation7 + $0xaa8] sm:$0xff]  ;;  %v1506_v44 = vld [vmem:[#allocation7 + $0x598] sm:$0xff] }
 0x3bc   : > { %v1526_v61 = vld [vmem:[#allocation7 + $0x638] sm:$0xff] }
 0x3bd   : > { %8297 = vmatpush1.bf16.msra.mxu1 %v8296_v57  ;;  %8377 = vmatpush1.bf16.msra.mxu0 %v8376_v59  ;;  %v12213_v15 = vpop.f32.mrb[22].mxu0  ;;  %v8310_v57 = vpack.c.bf16 %v1668_v46, %v1664_v45  ;;  %v8390_v59 = vpack.c.bf16 %v1446_v49, %v1442_v48  ;;  %v8400_v46 = vpack.c.bf16 %v1461_v39, %v1457_v38  ;;  %v1687_v49 = vld [vmem:[#allocation7 + $0xb40] sm:$0xff]  ;;  %v1493_v38 = vld [vmem:[#allocation7 + $0x530] sm:$0xff]  ;;  %v1498_v39 = vld [vmem:[#allocation7 + $0x558] sm:$0xff] }
 0x3be   : > { %8299 = vmatprep.subr.bf16.mxu1 %v8298_v2  ;;  %8379 = vmatprep.subr.bf16.mxu0 %v8378_v5  ;;  %v12215_v33 = vpop.f32.mrb[23].mxu0  ;;  %v1672_v2 = vld [vmem:[#allocation7 + $0xac8] sm:$0xff] }
 0x3bf   : > { %v1676_v5 = vld [vmem:[#allocation7 + $0xae8] sm:$0xff] }
 0x3c1   : > { %8301 = vmatpush1.bf16.msra.mxu1 %v8300_v18  ;;  %8381 = vmatpush1.bf16.msra.mxu0 %v8380_v19  ;;  %v8314_v18 = vpack.c.bf16 %v1676_v5, %v1672_v2  ;;  %v8394_v19 = vpack.c.bf16 %v1454_v7, %v1450_v4  ;;  %v1695_v7 = vld [vmem:[#allocation7 + $0xb80] sm:$0xff] }
 0x3c2   : > { %8303 = vmatprep.subr.bf16.mxu1 %v8302_v25  ;;  %8383 = vmatprep.subr.bf16.mxu0 %v8382_v27  ;;  %v1680_v25 = vld [vmem:[#allocation7 + $0xb08] sm:$0xff] }
 0x3c3   : > { %v1684_v27 = vld [vmem:[#allocation7 + $0xb28] sm:$0xff] }
 0x3c4   : > { %v8318_v21 = vpack.c.bf16 %v1684_v27, %v1680_v25  ;;  %v1703_v27 = vld [vmem:[#allocation7 + $0xbc0] sm:$0xff] }
 0x3c5   : > { %8305 = vmatpush1.bf16.msra.mxu1 %v8304_v35  ;;  %8385 = vmatpush1.bf16.msra.mxu0 %v8384_v37  ;;  %v1679_v35 = vld [vmem:[#allocation7 + $0xb00] sm:$0xff] }
 0x3c6   : > { %8307 = vmatprep.subr.bf16.mxu1 %v8306_v40  ;;  %8387 = vmatprep.subr.bf16.mxu0 %v8386_v41  ;;  %v1683_v37 = vld [vmem:[#allocation7 + $0xb20] sm:$0xff]  ;;  %v1688_v40 = vld [vmem:[#allocation7 + $0xb48] sm:$0xff] }
 0x3c7   : > { %v1692_v41 = vld [vmem:[#allocation7 + $0xb68] sm:$0xff]  ;;  %v8320_v45 = vpack.c.bf16 %v1683_v37, %v1679_v35  ;;  %v1489_v37 = vld [vmem:[#allocation7 + $0x510] sm:$0xff] }
 0x3c8   : > { %v8322_v48 = vpack.c.bf16 %v1692_v41, %v1688_v40  ;;  %v1502_v40 = vld [vmem:[#allocation7 + $0x578] sm:$0xff] }
 0x3c9   : > { %8309 = vmatpush1.bf16.msra.mxu1 %v8308_v51  ;;  %8389 = vmatpush1.bf16.msra.mxu0 %v8388_v53  ;;  %v1691_v51 = vld [vmem:[#allocation7 + $0xb60] sm:$0xff]  ;;  %v1465_v53 = vld [vmem:[#allocation7 + $0x450] sm:$0xff]  ;;  %v8418_v41 = vpack.c.bf16 %v1502_v40, %v1498_v39  ;;  %v1562_v39 = vld [vmem:[#allocation7 + $0x758] sm:$0xff] }
 0x3ca   : > { %8311 = vmatprep.subr.bf16.mxu1 %v8310_v57  ;;  %8391 = vmatprep.subr.bf16.mxu0 %v8390_v59  ;;  %v1696_v57 = vld [vmem:[#allocation7 + $0xb88] sm:$0xff]  ;;  %v8324_v2 = vpack.c.bf16 %v1691_v51, %v1687_v49  ;;  %v8404_v5 = vpack.c.bf16 %v1469_v55, %v1465_v53  ;;  %v1509_v49 = vld [vmem:[#allocation7 + $0x5b0] sm:$0xff]  ;;  %v1518_v51 = vld [vmem:[#allocation7 + $0x5f8] sm:$0xff] }
 0x3cb   : > { %v1700_v59 = vld [vmem:[#allocation7 + $0xba8] sm:$0xff]  ;;  %v1513_v55 = vld [vmem:[#allocation7 + $0x5d0] sm:$0xff]  ;;  %v1566_v40 = vld [vmem:[#allocation7 + $0x778] sm:$0xff] }
 0x3cc   : > { %v8326_v4 = vpack.c.bf16 %v1700_v59, %v1696_v57  ;;  %v1517_v57 = vld [vmem:[#allocation7 + $0x5f0] sm:$0xff]  ;;  %v1522_v59 = vld [vmem:[#allocation7 + $0x618] sm:$0xff] }
 0x3cd   : > { %8313 = vmatpush1.bf16.msra.mxu1 %v8312_v10  ;;  %8393 = vmatpush1.bf16.msra.mxu0 %v8392_v12  ;;  %v1699_v10 = vld [vmem:[#allocation7 + $0xba0] sm:$0xff]  ;;  %v1473_v12 = vld [vmem:[#allocation7 + $0x490] sm:$0xff]  ;;  %v8428_v62 = vpack.c.bf16 %v1517_v57, %v1513_v55 }
 0x3ce   : > { %8315 = vmatprep.subr.bf16.mxu1 %v8314_v18  ;;  %8395 = vmatprep.subr.bf16.mxu0 %v8394_v19  ;;  %v1704_v18 = vld [vmem:[#allocation7 + $0xbc8] sm:$0xff]  ;;  %v8408_v14 = vpack.c.bf16 %v1477_v16, %v1473_v12  ;;  %v1529_v16 = vld [vmem:[#allocation7 + $0x650] sm:$0xff] }
 0x3cf   : > { %v1708_v19 = vld [vmem:[#allocation7 + $0xbe8] sm:$0xff]  ;;  %v1577_v55 = vld [vmem:[#allocation7 + $0x7d0] sm:$0xff] }
 0x3d0   : > { %v8330_v25 = vpack.c.bf16 %v1708_v19, %v1704_v18  ;;  %v1533_v18 = vld [vmem:[#allocation7 + $0x670] sm:$0xff]  ;;  %v1538_v19 = vld [vmem:[#allocation7 + $0x698] sm:$0xff] }
 0x3d1   : > { %8317 = vmatpush1.bf16.msra.mxu1 %v8316_v30  ;;  %8397 = vmatpush1.bf16.msra.mxu0 %v8396_v20  ;;  %v1481_v30 = vld [vmem:[#allocation7 + $0x4d0] sm:$0xff] }
 0x3d2   : > { %8319 = vmatprep.subr.bf16.mxu1 %v8318_v21  ;;  %8399 = vmatprep.subr.bf16.mxu0 %v8398_v34  ;;  %v1485_v20 = vld [vmem:[#allocation7 + $0x4f0] sm:$0xff]  ;;  %v1490_v21 = vld [vmem:[#allocation7 + $0x518] sm:$0xff]  ;;  %v8332_v34 = vpack.c.bf16 %v1707_v28, %v1703_v27 }
 0x3d3   : > { %v1546_v27 = vld [vmem:[#allocation7 + $0x6d8] sm:$0xff]  ;;  %v1581_v57 = vld [vmem:[#allocation7 + $0x7f0] sm:$0xff] }
 0x3d4   : > { %2065 = vmatmul.mubr.f32.vlgmr.msra.gmra.mrb[32].mxu0 %v12155_v50  ;;  %v1482_v50 = vld [vmem:[#allocation7 + $0x4d8] sm:$0xff] }
 0x3d5   : > { %8321 = vmatpush1.bf16.msra.mxu1 %v8320_v45  ;;  %2070 = vmatprep.mubr.f32.mxu0 %v12160_v60  ;;  %v8328_v60 = vpack.c.bf16 %v1699_v10, %v1695_v7  ;;  %v8410_v29 = vpack.c.bf16 %v1486_v22, %v1482_v50  ;;  %v1510_v45 = vld [vmem:[#allocation7 + $0x5b8] sm:$0xff]  ;;  %v8436_v22 = vpack.c.bf16 %v1533_v18, %v1529_v16  ;;  %v1593_v16 = vld [vmem:[#allocation7 + $0x850] sm:$0xff] }
 0x3d6   : > { %8401 = vmatpush1.bf16.msra.mxu0 %v8400_v46  ;;  %8323 = vmatprep.subr.bf16.mxu1 %v8322_v48  ;;  %v1505_v48 = vld [vmem:[#allocation7 + $0x590] sm:$0xff]  ;;  %v1530_v7 = vld [vmem:[#allocation7 + $0x658] sm:$0xff] }
 0x3d7   : > { %8403 = vmatprep.subr.bf16.mxu0 %v8402_v54  ;;  %v8424_v53 = vpack.c.bf16 %v1509_v49, %v1505_v48  ;;  %v1534_v10 = vld [vmem:[#allocation7 + $0x678] sm:$0xff]  ;;  %v1569_v48 = vld [vmem:[#allocation7 + $0x790] sm:$0xff] }
 0x3d8   : > { %2071 = vmatmul.mubr.f32.gmra.mrb[34].mxu0 %v12158_v58  ;;  %v1494_v58 = vld [vmem:[#allocation7 + $0x538] sm:$0xff]  ;;  %v1573_v49 = vld [vmem:[#allocation7 + $0x7b0] sm:$0xff] }
 0x3d9   : > { %8325 = vmatpush1.bf16.msra.mxu1 %v8324_v2  ;;  %2076 = vmatprep.mubr.f32.mxu0 %v12166_v6  ;;  %v8412_v6 = vpack.c.bf16 %v1485_v20, %v1481_v30  ;;  %v8414_v35 = vpack.c.bf16 %v1494_v58, %v1490_v21  ;;  %v8430_v2 = vpack.c.bf16 %v1526_v61, %v1522_v59  ;;  %v1542_v50 = vld [vmem:[#allocation7 + $0x6b8] sm:$0xff]  ;;  %v1545_v20 = vld [vmem:[#allocation7 + $0x6d0] sm:$0xff] }
 0x3da   : > { %8405 = vmatpush1.bf16.msra.mxu0 %v8404_v5  ;;  %8327 = vmatprep.subr.bf16.mxu1 %v8326_v4  ;;  %v1521_v5 = vld [vmem:[#allocation7 + $0x610] sm:$0xff]  ;;  %v1550_v28 = vld [vmem:[#allocation7 + $0x6f8] sm:$0xff] }
 0x3db   : > { %8407 = vmatprep.subr.bf16.mxu0 %v8406_v9  ;;  %v1525_v4 = vld [vmem:[#allocation7 + $0x630] sm:$0xff]  ;;  %v8434_v9 = vpack.c.bf16 %v1534_v10, %v1530_v7  ;;  %v8442_v30 = vpack.c.bf16 %v1550_v28, %v1546_v27  ;;  %v1554_v58 = vld [vmem:[#allocation7 + $0x718] sm:$0xff] }
 0x3dc   : > { %2077 = vmatmul.mubr.f32.gmra.mrb[36].mxu0 %v12164_v3  ;;  %v8416_v3 = vpack.c.bf16 %v1493_v38, %v1489_v37  ;;  %v8432_v12 = vpack.c.bf16 %v1525_v4, %v1521_v5  ;;  %v1549_v21 = vld [vmem:[#allocation7 + $0x6f0] sm:$0xff]  ;;  %v1586_v59 = vld [vmem:[#allocation7 + $0x818] sm:$0xff] }
 0x3dd   : > { %8329 = vmatpush1.bf16.msra.mxu1 %v8328_v60  ;;  %2082 = vmatprep.mubr.f32.mxu0 %v12172_v17  ;;  %v1497_v17 = vld [vmem:[#allocation7 + $0x550] sm:$0xff]  ;;  %v8438_v60 = vpack.c.bf16 %v1542_v50, %v1538_v19  ;;  %v1590_v61 = vld [vmem:[#allocation7 + $0x838] sm:$0xff] }
 0x3de   : > { %8409 = vmatpush1.bf16.msra.mxu0 %v8408_v14  ;;  %8331 = vmatprep.subr.bf16.mxu1 %v8330_v25  ;;  %v8420_v46 = vpack.c.bf16 %v1501_v43, %v1497_v17  ;;  %v1537_v14 = vld [vmem:[#allocation7 + $0x690] sm:$0xff]  ;;  %v1594_v7 = vld [vmem:[#allocation7 + $0x858] sm:$0xff] }
 0x3df   : > { %8411 = vmatprep.subr.bf16.mxu0 %v8410_v29  ;;  %v1541_v25 = vld [vmem:[#allocation7 + $0x6b0] sm:$0xff]  ;;  %v1598_v10 = vld [vmem:[#allocation7 + $0x878] sm:$0xff] }
 0x3e0   : > { %2083 = vmatmul.mubr.f32.gmra.mrb[38].mxu0 %v12170_v8  ;;  %v8422_v8 = vpack.c.bf16 %v1510_v45, %v1506_v44  ;;  %v8440_v29 = vpack.c.bf16 %v1541_v25, %v1537_v14  ;;  %v1553_v37 = vld [vmem:[#allocation7 + $0x710] sm:$0xff]  ;;  %v1570_v44 = vld [vmem:[#allocation7 + $0x798] sm:$0xff] }
 0x3e1   : > { %8333 = vmatpush1.bf16.msra.mxu1 %v8332_v34  ;;  %2153 = vmatprep.mubr.f32.mxu0 %v12178_v31  ;;  %v1514_v31 = vld [vmem:[#allocation7 + $0x5d8] sm:$0xff]  ;;  %v1557_v38 = vld [vmem:[#allocation7 + $0x730] sm:$0xff] }
 0x3e2   : > { %8413 = vmatpush1.bf16.msra.mxu0 %v8412_v6  ;;  %v8426_v54 = vpack.c.bf16 %v1518_v51, %v1514_v31  ;;  %v1558_v34 = vld [vmem:[#allocation7 + $0x738] sm:$0xff]  ;;  %v8444_v6 = vpack.c.bf16 %v1549_v21, %v1545_v20  ;;  %v1561_v17 = vld [vmem:[#allocation7 + $0x750] sm:$0xff] }
 0x3e3   : > { %8415 = vmatprep.subr.bf16.mxu0 %v8414_v35  ;;  %v8446_v35 = vpack.c.bf16 %v1558_v34, %v1554_v58  ;;  %v1565_v43 = vld [vmem:[#allocation7 + $0x770] sm:$0xff]  ;;  %v1574_v45 = vld [vmem:[#allocation7 + $0x7b8] sm:$0xff] }
 0x3e4   : > { %1976 = vmatmul.mubr.f32.vlgmr.msra.gmra.mrb[0].mxu1 %v12200_v32  ;;  %v1578_v31 = vld [vmem:[#allocation7 + $0x7d8] sm:$0xff]  ;;  %v1585_v5 = vld [vmem:[#allocation7 + $0x810] sm:$0xff] }
 0x3e5   : > { %1981 = vmatprep.mubr.f32.mxu1 %v12207_v52  ;;  %v1582_v51 = vld [vmem:[#allocation7 + $0x7f8] sm:$0xff]  ;;  %v1589_v4 = vld [vmem:[#allocation7 + $0x830] sm:$0xff] }
 0x3e6   : > { %8417 = vmatpush1.bf16.msra.mxu0 %v8416_v3  ;;  %v8448_v3 = vpack.c.bf16 %v1557_v38, %v1553_v37  ;;  %v1597_v18 = vld [vmem:[#allocation7 + $0x870] sm:$0xff]  ;;  %v1602_v19 = vld [vmem:[#allocation7 + $0x898] sm:$0xff] }
 0x3e7   : > { %8419 = vmatprep.subr.bf16.mxu0 %v8418_v41  ;;  %v8450_v41 = vpack.c.bf16 %v1566_v40, %v1562_v39  ;;  %v1606_v50 = vld [vmem:[#allocation7 + $0x8b8] sm:$0xff]  ;;  %v1601_v14 = vld [vmem:[#allocation7 + $0x890] sm:$0xff] }
 0x3e8   : > { %1982 = vmatmul.mubr.f32.gmra.mrb[2].mxu1 %v12205_v24  ;;  %v1605_v25 = vld [vmem:[#allocation7 + $0x8b0] sm:$0xff]  ;;  %v1610_v27 = vld [vmem:[#allocation7 + $0x8d8] sm:$0xff] }
 0x3e9   : > { %1987 = vmatprep.mubr.f32.mxu1 %v12211_v11  ;;  %v1614_v28 = vld [vmem:[#allocation7 + $0x8f8] sm:$0xff]  ;;  %v1609_v20 = vld [vmem:[#allocation7 + $0x8d0] sm:$0xff] }
 0x3ea   : > { %8421 = vmatpush1.bf16.msra.mxu0 %v8420_v46  ;;  %v8452_v46 = vpack.c.bf16 %v1565_v43, %v1561_v17  ;;  %v1618_v21 = vld [vmem:[#allocation7 + $0x918] sm:$0xff]  ;;  %v1625_v39 = vld [vmem:[#allocation7 + $0x950] sm:$0xff] }
 0x3eb   : > { %8423 = vmatprep.subr.bf16.mxu0 %v8422_v8  ;;  %v8454_v8 = vpack.c.bf16 %v1574_v45, %v1570_v44  ;;  %v1634_v40 = vld [vmem:[#allocation7 + $0x998] sm:$0xff]  ;;  %v1633_v17 = vld [vmem:[#allocation7 + $0x990] sm:$0xff] }
 0x3ec   : > { %1988 = vmatmul.mubr.f32.gmra.mrb[4].mxu1 %v12209_v63  ;;  %v1637_v43 = vld [vmem:[#allocation7 + $0x9b0] sm:$0xff]  ;;  %v1642_v44 = vld [vmem:[#allocation7 + $0x9d8] sm:$0xff] }
 0x3ed   : > { %1993 = vmatprep.mubr.f32.mxu1 %v12215_v33  ;;  %v1646_v45 = vld [vmem:[#allocation7 + $0x9f8] sm:$0xff] }
 0x3ee   : > { %8425 = vmatpush1.bf16.msra.mxu0 %v8424_v53  ;;  %v8456_v53 = vpack.c.bf16 %v1573_v49, %v1569_v48  ;;  %v1650_v48 = vld [vmem:[#allocation7 + $0xa18] sm:$0xff] }
 0x3ef   : > { %8427 = vmatprep.subr.bf16.mxu0 %v8426_v54  ;;  %v8458_v54 = vpack.c.bf16 %v1582_v51, %v1578_v31  ;;  %v1654_v49 = vld [vmem:[#allocation7 + $0xa38] sm:$0xff] }
 0x3f0   : > { %1994 = vmatmul.mubr.f32.gmra.mrb[6].mxu1 %v12213_v15  ;;  %v8494_v51 = vpack.c.bf16 %v1654_v49, %v1650_v48 }
 0x3f1   : > { %2433 = vmatprep.mubr.f32.mxu1 %v11340_v0 }
 0x3f2   : > { %8429 = vmatpush1.bf16.msra.mxu0 %v8428_v62  ;;  %v8460_v62 = vpack.c.bf16 %v1581_v57, %v1577_v55  ;;  %v1658_v55 = vld [vmem:[#allocation7 + $0xa58] sm:$0xff] }
 0x3f3   : > { %8431 = vmatprep.subr.bf16.mxu0 %v8430_v2  ;;  %v8462_v2 = vpack.c.bf16 %v1590_v61, %v1586_v59  ;;  %v1662_v57 = vld [vmem:[#allocation7 + $0xa78] sm:$0xff] }
 0x3f4   : > { %v8498_v61 = vpack.c.bf16 %v1662_v57, %v1658_v55 }
 0x3f6   : > { %8433 = vmatpush1.bf16.msra.mxu0 %v8432_v12  ;;  %v8464_v12 = vpack.c.bf16 %v1589_v4, %v1585_v5  ;;  %v1666_v5 = vld [vmem:[#allocation7 + $0xa98] sm:$0xff] }
 0x3f7   : > { %8435 = vmatprep.subr.bf16.mxu0 %v8434_v9  ;;  %v8466_v9 = vpack.c.bf16 %v1598_v10, %v1594_v7  ;;  %v1670_v4 = vld [vmem:[#allocation7 + $0xab8] sm:$0xff] }
 0x3f8   : > { %v8502_v10 = vpack.c.bf16 %v1670_v4, %v1666_v5 }
 0x3fa   : > { %8437 = vmatpush1.bf16.msra.mxu0 %v8436_v22  ;;  %v8468_v22 = vpack.c.bf16 %v1597_v18, %v1593_v16  ;;  %v1674_v16 = vld [vmem:[#allocation7 + $0xad8] sm:$0xff] }
 0x3fb   : > { %8439 = vmatprep.subr.bf16.mxu0 %v8438_v60  ;;  %v8470_v60 = vpack.c.bf16 %v1606_v50, %v1602_v19  ;;  %v1678_v18 = vld [vmem:[#allocation7 + $0xaf8] sm:$0xff] }
 0x3fc   : > { %v8506_v50 = vpack.c.bf16 %v1678_v18, %v1674_v16 }
 0x3fe   : > { %8441 = vmatpush1.bf16.msra.mxu0 %v8440_v29  ;;  %v8472_v29 = vpack.c.bf16 %v1605_v25, %v1601_v14  ;;  %v1682_v14 = vld [vmem:[#allocation7 + $0xb18] sm:$0xff] }
 0x3ff   : > { %8443 = vmatprep.subr.bf16.mxu0 %v8442_v30  ;;  %v8474_v30 = vpack.c.bf16 %v1614_v28, %v1610_v27  ;;  %v1686_v25 = vld [vmem:[#allocation7 + $0xb38] sm:$0xff] }
 0x400   : > { %v8510_v28 = vpack.c.bf16 %v1686_v25, %v1682_v14 }
 0x402   : > { %8445 = vmatpush1.bf16.msra.mxu0 %v8444_v6  ;;  %v1617_v6 = vld [vmem:[#allocation7 + $0x910] sm:$0xff] }
 0x403   : > { %8447 = vmatprep.subr.bf16.mxu0 %v8446_v35  ;;  %v1626_v35 = vld [vmem:[#allocation7 + $0x958] sm:$0xff] }
 0x406   : > { %8449 = vmatpush1.bf16.msra.mxu0 %v8448_v3 }
 0x407   : > { %8451 = vmatprep.subr.bf16.mxu0 %v8450_v41 }
 0x40a   : > { %8453 = vmatpush1.bf16.msra.mxu0 %v8452_v46  ;;  %v8490_v46 = vpack.c.bf16 %v1646_v45, %v1642_v44 }
 0x40b   : > { %8455 = vmatprep.subr.bf16.mxu0 %v8454_v8  ;;  %v1645_v8 = vld [vmem:[#allocation7 + $0x9f0] sm:$0xff] }
 0x40e   : > { %8457 = vmatpush1.bf16.msra.mxu0 %v8456_v53  ;;  %v1649_v53 = vld [vmem:[#allocation7 + $0xa10] sm:$0xff] }
 0x40f   : > { %8459 = vmatprep.subr.bf16.mxu0 %v8458_v54  ;;  %v1653_v54 = vld [vmem:[#allocation7 + $0xa30] sm:$0xff] }
 0x410   : > { %v8496_v59 = vpack.c.bf16 %v1653_v54, %v1649_v53 }
 0x412   : > { %8461 = vmatpush1.bf16.msra.mxu0 %v8460_v62  ;;  %v1657_v62 = vld [vmem:[#allocation7 + $0xa50] sm:$0xff] }
 0x413   : > { %8463 = vmatprep.subr.bf16.mxu0 %v8462_v2  ;;  %v1661_v2 = vld [vmem:[#allocation7 + $0xa70] sm:$0xff] }
 0x414   : > { %v8500_v7 = vpack.c.bf16 %v1661_v2, %v1657_v62 }
 0x415   : > { %2154 = vmatmul.mubr.f32.vlgmr.msra.gmra.mrb[32].mxu0 %v12176_v26  ;;  %v1613_v26 = vld [vmem:[#allocation7 + $0x8f0] sm:$0xff] }
 0x416   : > { %2159 = vmatprep.mubr.f32.mxu0 %v12184_v47  ;;  %8465 = vmatpush1.bf16.msra.mxu0 %v8464_v12  ;;  %v1622_v47 = vld [vmem:[#allocation7 + $0x938] sm:$0xff]  ;;  %v8476_v58 = vpack.c.bf16 %v1613_v26, %v1609_v20  ;;  %v1665_v12 = vld [vmem:[#allocation7 + $0xa90] sm:$0xff] }
 0x417   : > { %8467 = vmatprep.subr.bf16.mxu0 %v8466_v9  ;;  %v8478_v34 = vpack.c.bf16 %v1622_v47, %v1618_v21  ;;  %v1669_v9 = vld [vmem:[#allocation7 + $0xab0] sm:$0xff]  ;;  %v1690_v20 = vld [vmem:[#allocation7 + $0xb58] sm:$0xff] }
 0x418   : > { %v8504_v19 = vpack.c.bf16 %v1669_v9, %v1665_v12  ;;  %v1694_v26 = vld [vmem:[#allocation7 + $0xb78] sm:$0xff] }
 0x419   : > { %2160 = vmatmul.mubr.f32.gmra.mrb[34].mxu0 %v12182_v42  ;;  %v1621_v42 = vld [vmem:[#allocation7 + $0x930] sm:$0xff]  ;;  %v8514_v47 = vpack.c.bf16 %v1694_v26, %v1690_v20 }
 0x41a   : > { %2165 = vmatprep.mubr.f32.mxu0 %v12190_v1  ;;  %8469 = vmatpush1.bf16.msra.mxu0 %v8468_v22  ;;  %v1630_v1 = vld [vmem:[#allocation7 + $0x978] sm:$0xff]  ;;  %v8480_v37 = vpack.c.bf16 %v1621_v42, %v1617_v6  ;;  %v1673_v22 = vld [vmem:[#allocation7 + $0xad0] sm:$0xff] }
 0x41b   : > { %8471 = vmatprep.subr.bf16.mxu0 %v8470_v60  ;;  %v8482_v38 = vpack.c.bf16 %v1630_v1, %v1626_v35  ;;  %v1677_v60 = vld [vmem:[#allocation7 + $0xaf0] sm:$0xff]  ;;  %v1698_v6 = vld [vmem:[#allocation7 + $0xb98] sm:$0xff] }
 0x41c   : > { %v8508_v27 = vpack.c.bf16 %v1677_v60, %v1673_v22  ;;  %v1702_v42 = vld [vmem:[#allocation7 + $0xbb8] sm:$0xff] }
 0x41d   : > { %2166 = vmatmul.mubr.f32.gmra.mrb[36].mxu0 %v12188_v56  ;;  %v1629_v56 = vld [vmem:[#allocation7 + $0x970] sm:$0xff]  ;;  %v8518_v1 = vpack.c.bf16 %v1702_v42, %v1698_v6  ;;  %v12263_v42 = vld [vmem:[#allocation10] sm:$0xff] }
 0x41e   : > { %2171 = vmatprep.mubr.f32.mxu0 %v12196_v23  ;;  %8473 = vmatpush1.bf16.msra.mxu0 %v8472_v29  ;;  %v1638_v23 = vld [vmem:[#allocation7 + $0x9b8] sm:$0xff]  ;;  %v8484_v3 = vpack.c.bf16 %v1629_v56, %v1625_v39  ;;  %v1681_v29 = vld [vmem:[#allocation7 + $0xb10] sm:$0xff] }
 0x41f   : > { %8475 = vmatprep.subr.bf16.mxu0 %v8474_v30  ;;  %v8486_v41 = vpack.c.bf16 %v1638_v23, %v1634_v40  ;;  %v1685_v30 = vld [vmem:[#allocation7 + $0xb30] sm:$0xff]  ;;  %v1706_v39 = vld [vmem:[#allocation7 + $0xbd8] sm:$0xff] }
 0x420   : > { %v8512_v21 = vpack.c.bf16 %v1685_v30, %v1681_v29  ;;  %v1710_v56 = vld [vmem:[#allocation7 + $0xbf8] sm:$0xff] }
 0x421   : > { %2172 = vmatmul.mubr.f32.gmra.mrb[38].mxu0 %v12194_v13  ;;  %v8488_v13 = vpack.c.bf16 %v1637_v43, %v1633_v17  ;;  %v8522_v23 = vpack.c.bf16 %v1710_v56, %v1706_v39  ;;  %v12278_v39 = vld [vmem:[#allocation10 + $0x18] sm:$0xff] }
 0x422   : > { %8477 = vmatpush1.bf16.msra.mxu0 %v8476_v58  ;;  %2242 = vmatprep.mubr.f32.mxu0 %v12202_v36  ;;  %v1641_v36 = vld [vmem:[#allocation7 + $0x9d0] sm:$0xff] }
 0x423   : > { %8479 = vmatprep.subr.bf16.mxu0 %v8478_v34  ;;  %v8492_v31 = vpack.c.bf16 %v1645_v8, %v1641_v36  ;;  %v1689_v58 = vld [vmem:[#allocation7 + $0xb50] sm:$0xff]  ;;  %v1713_v8 = vlaneseq }
 0x424   : > { %v1693_v34 = vld [vmem:[#allocation7 + $0xb70] sm:$0xff] }
 0x425   : > { %v8516_v35 = vpack.c.bf16 %v1693_v34, %v1689_v58 }
 0x426   : > { %8481 = vmatpush1.bf16.msra.mxu0 %v8480_v37  ;;  %v1697_v37 = vld [vmem:[#allocation7 + $0xb90] sm:$0xff] }
 0x427   : > { %8483 = vmatprep.subr.bf16.mxu0 %v8482_v38  ;;  %v1701_v38 = vld [vmem:[#allocation7 + $0xbb0] sm:$0xff] }
 0x428   : > { %v8520_v40 = vpack.c.bf16 %v1701_v38, %v1697_v37  ;;  %v2789_v37 = vld [vmem:[#allocation11 + $0x8] sm:$0xff]  ;;  %v2791_v38 = vld [vmem:[#allocation11 + $0x18] sm:$0xff] }
 0x429   : > { %v8574_v56 = vpack.c.bf16 %v2791_v38, %v2789_v37  ;;  %v2825_v37 = vld [vmem:[#allocation11 + $0x128] sm:$0xff]  ;;  %v2827_v38 = vld [vmem:[#allocation11 + $0x138] sm:$0xff] }
 0x42a   : > { %8485 = vmatpush1.bf16.msra.mxu0 %v8484_v3  ;;  %v1705_v3 = vld [vmem:[#allocation7 + $0xbd0] sm:$0xff] }
 0x42b   : > { %8487 = vmatprep.subr.bf16.mxu0 %v8486_v41  ;;  %v1709_v41 = vld [vmem:[#allocation7 + $0xbf0] sm:$0xff] }
 0x42c   : > { %v8524_v17 = vpack.c.bf16 %v1709_v41, %v1705_v3  ;;  %v2793_v3 = vld [vmem:[#allocation11 + $0x28] sm:$0xff]  ;;  %v2795_v41 = vld [vmem:[#allocation11 + $0x38] sm:$0xff] }
 0x42e   : > { %8489 = vmatpush1.bf16.msra.mxu0 %v8488_v13 }
 0x42f   : > { %8491 = vmatprep.subr.bf16.mxu0 %v8490_v46 }
 0x432   : > { %8493 = vmatpush1.bf16.msra.mxu0 %v8492_v31 }
 0x433   : > { %8495 = vmatprep.subr.bf16.mxu0 %v8494_v51 }
 0x436   : > { %8497 = vmatpush1.bf16.msra.mxu0 %v8496_v59 }
 0x437   : > { %8499 = vmatprep.subr.bf16.mxu0 %v8498_v61 }
 0x43a   : > { %8501 = vmatpush1.bf16.msra.mxu0 %v8500_v7 }
 0x43b   : > { %8503 = vmatprep.subr.bf16.mxu0 %v8502_v10 }
 0x43e   : > { %8505 = vmatpush1.bf16.msra.mxu0 %v8504_v19 }
 0x43f   : > { %8507 = vmatprep.subr.bf16.mxu0 %v8506_v50 }
 0x442   : > { %8509 = vmatpush1.bf16.msra.mxu0 %v8508_v27 }
 0x443   : > { %8511 = vmatprep.subr.bf16.mxu0 %v8510_v28 }
 0x446   : > { %8513 = vmatpush1.bf16.msra.mxu0 %v8512_v21 }
 0x447   : > { %8515 = vmatprep.subr.bf16.mxu0 %v8514_v47 }
 0x44a   : > { %8517 = vmatpush1.bf16.msra.mxu0 %v8516_v35  ;;  %v12268_v35 = vld [vmem:[#allocation10 + $0x8] sm:$0xff] }
 0x44b   : > { %8519 = vmatprep.subr.bf16.mxu0 %v8518_v1  ;;  %v12273_v1 = vld [vmem:[#allocation10 + $0x10] sm:$0xff] }
 0x44e   : > { %8521 = vmatpush1.bf16.msra.mxu0 %v8520_v40  ;;  %v2788_v40 = vld [vmem:[#allocation11] sm:$0xff] }
 0x44f   : > { %8523 = vmatprep.subr.bf16.mxu0 %v8522_v23  ;;  %v2790_v23 = vld [vmem:[#allocation11 + $0x10] sm:$0xff] }
 0x452   : > { %8525 = vmatpush1.bf16.msra.mxu0 %v8524_v17  ;;  %v12283_v17 = vld [vmem:[#allocation10 + $0x20] sm:$0xff] }
 0x455   : > { %2243 = vmatmul.mubr.f32.vlgmr.msra.gmra.mrb[32].mxu0 %v12200_v32 }
 0x456   : > { %2248 = vmatprep.mubr.f32.mxu0 %v12207_v52 }
 0x459   : > { %2249 = vmatmul.mubr.f32.gmra.mrb[34].mxu0 %v12205_v24  ;;  %v12249_v24 = vshrl.u32 %v1713_v8, 7 }
 0x45a   : > { %2254 = vmatprep.mubr.f32.mxu0 %v12211_v11 }
 0x45b   : > { %v12252_v11 = vsub.s32 0, %v12249_v24 }
 0x45d   : > { %2255 = vmatmul.mubr.f32.gmra.mrb[36].mxu0 %v12209_v63  ;;  %v12254_v63 = vld [vmem:[#allocation8] sm:$0xf] }
 0x45e   : > { %2260 = vmatprep.mubr.f32.mxu0 %v12215_v33  ;;  %v1716_v33 = vrot.slane %v12254_v63, %v12252_v11 }
 0x461   : > { %2261 = vmatmul.mubr.f32.gmra.mrb[38].mxu0 %v12213_v15  ;;  %v12257_v15 = vsub.s32 1, %v12249_v24 }
 0x462   : > { %2356 = vmatprep.mubr.f32.mxu0 %v11340_v0 }
 0x463   : > { %v1720_v48 = vrot.slane %v12254_v63, %v12257_v15 }
 0x467   : > { %v1799_v43 = vpop.f32.mrb[24].mxu0 }
 0x468   : > { %v1801_v44 = vpop.f32.mrb[25].mxu0  ;;  %v1800_v49 = vadd.f32 %v1799_v43, %v1716_v33  ;;  %v8576_v43 = vpack.c.bf16 %v2790_v23, %v2788_v40  ;;  %v8610_v40 = vpack.c.bf16 %v2827_v38, %v2825_v37  ;;  %v2824_v23 = vld [vmem:[#allocation11 + $0x120] sm:$0xff] }
 0x469   : > { %v1802_v31 = vadd.f32 %v1801_v44, %v1720_v48  ;;  %v8578_v44 = vpack.c.bf16 %v2795_v41, %v2793_v3  ;;  %v2826_v3 = vld [vmem:[#allocation11 + $0x130] sm:$0xff]  ;;  %v2829_v41 = vld [vmem:[#allocation11 + $0x148] sm:$0xff] }
 0x46b   : > { %v1805_v45 = vpop.f32.mrb[26].mxu0 }
 0x46c   : > { %v1807_v13 = vpop.f32.mrb[27].mxu0  ;;  %v1806_v57 = vadd.f32 %v1805_v45, %v1716_v33  ;;  %v2792_v45 = vld [vmem:[#allocation11 + $0x20] sm:$0xff] }
 0x46d   : > { %v1808_v59 = vadd.f32 %v1807_v13, %v1720_v48  ;;  %v2794_v13 = vld [vmem:[#allocation11 + $0x30] sm:$0xff] }
 0x46f   : > { %v1811_v46 = vpop.f32.mrb[28].mxu0 }
 0x470   : > { %v1813_v32 = vpop.f32.mrb[29].mxu0  ;;  %v1812_v4 = vadd.f32 %v1811_v46, %v1716_v33  ;;  %v2797_v46 = vld [vmem:[#allocation11 + $0x48] sm:$0xff] }
 0x471   : > { %v1814_v12 = vadd.f32 %v1813_v32, %v1720_v48  ;;  %v2799_v32 = vld [vmem:[#allocation11 + $0x58] sm:$0xff] }
 0x472   : > { %v8582_v8 = vpack.c.bf16 %v2799_v32, %v2797_v46  ;;  %v2830_v46 = vld [vmem:[#allocation11 + $0x150] sm:$0xff]  ;;  %v2833_v32 = vld [vmem:[#allocation11 + $0x168] sm:$0xff] }
 0x473   : > { %v1817_v36 = vpop.f32.mrb[30].mxu0 }
 0x474   : > { %v1819_v52 = vpop.f32.mrb[31].mxu0  ;;  %v1818_v25 = vadd.f32 %v1817_v36, %v1716_v33  ;;  %v12288_v36 = vld [vmem:[#allocation10 + $0x28] sm:$0xff]  ;;  %v2796_v33 = vld [vmem:[#allocation11 + $0x40] sm:$0xff] }
 0x475   : > { %v1820_v27 = vadd.f32 %v1819_v52, %v1720_v48  ;;  %v8580_v52 = vpack.c.bf16 %v2794_v13, %v2792_v45  ;;  %v2798_v48 = vld [vmem:[#allocation11 + $0x50] sm:$0xff]  ;;  %v2828_v13 = vld [vmem:[#allocation11 + $0x140] sm:$0xff] }
 0x4b7   : > { %v1977_v51 = vpop.f32.mrb[0].mxu1 }
 0x4b8   : > { %v10219_v53 = vadd.f32 %v1977_v51, %v1800_v49  ;;  %v1979_v54 = vpop.f32.mrb[1].mxu1  ;;  %v2801_v49 = vld [vmem:[#allocation11 + $0x68] sm:$0xff]  ;;  %v8584_v51 = vpack.c.bf16 %v2798_v48, %v2796_v33  ;;  %v2832_v48 = vld [vmem:[#allocation11 + $0x160] sm:$0xff] }
 0x4b9   : > { %v10221_v55 = vadd.f32 %v1979_v54, %v1802_v31  ;;  %v2803_v31 = vld [vmem:[#allocation11 + $0x78] sm:$0xff]  ;;  %v2800_v54 = vld [vmem:[#allocation11 + $0x60] sm:$0xff] }
 0x4ba   : > { %v2267_v7 = vmax.f32 %v10219_v53, 0.0  ;;  %v8586_v53 = vpack.c.bf16 %v2803_v31, %v2801_v49  ;;  %v2834_v49 = vld [vmem:[#allocation11 + $0x170] sm:$0xff]  ;;  %v2837_v31 = vld [vmem:[#allocation11 + $0x188] sm:$0xff] }
 0x4bb   : > { %v1983_v61 = vpop.f32.mrb[2].mxu1  ;;  %v2268_v9 = vmax.f32 %v10221_v55, 0.0  ;;  %v2802_v55 = vld [vmem:[#allocation11 + $0x70] sm:$0xff] }
 0x4bc   : > { %v10223_v62 = vadd.f32 %v1983_v61, %v1806_v57  ;;  %v1985_v2 = vpop.f32.mrb[3].mxu1  ;;  %v2805_v57 = vld [vmem:[#allocation11 + $0x88] sm:$0xff]  ;;  %v8588_v61 = vpack.c.bf16 %v2802_v55, %v2800_v54  ;;  %v2836_v55 = vld [vmem:[#allocation11 + $0x180] sm:$0xff] }
 0x4bd   : > { %v10225_v5 = vadd.f32 %v1985_v2, %v1808_v59  ;;  %v2807_v59 = vld [vmem:[#allocation11 + $0x98] sm:$0xff]  ;;  %v2804_v2 = vld [vmem:[#allocation11 + $0x80] sm:$0xff] }
 0x4be   : > { %v2271_v10 = vmax.f32 %v10223_v62, 0.0  ;;  %v8590_v62 = vpack.c.bf16 %v2807_v59, %v2805_v57  ;;  %v2838_v57 = vld [vmem:[#allocation11 + $0x190] sm:$0xff] }
 0x4bf   : > { %v2272_v16 = vmax.f32 %v10225_v5, 0.0  ;;  %v1989_v18 = vpop.f32.mrb[4].mxu1  ;;  %v2806_v5 = vld [vmem:[#allocation11 + $0x90] sm:$0xff]  ;;  %v8624_v59 = vpack.c.bf16 %v2838_v57, %v2836_v55  ;;  %v3072_v57 = vld [vmem:[#allocation11 + $0x408] sm:$0xff] }
 0x4c0   : > { %v8528_v19 = vpack.c.bf16 %v2271_v10, %v2267_v7  ;;  %v10227_v50 = vadd.f32 %v1989_v18, %v1812_v4  ;;  %v1991_v22 = vpop.f32.mrb[5].mxu1  ;;  %v2809_v4 = vld [vmem:[#allocation11 + $0xa8] sm:$0xff]  ;;  %v2811_v7 = vld [vmem:[#allocation11 + $0xb8] sm:$0xff]  ;;  %v8592_v10 = vpack.c.bf16 %v2806_v5, %v2804_v2  ;;  %v12296_v5 = vsub.s32 3, %v12249_v24 }
 0x4c1   : > { %v8526_v60 = vpack.c.bf16 %v2272_v16, %v2268_v9  ;;  %v10229_v14 = vadd.f32 %v1991_v22, %v1814_v12  ;;  %v8594_v12 = vpack.c.bf16 %v2811_v7, %v2809_v4  ;;  %v2808_v9 = vld [vmem:[#allocation11 + $0xa0] sm:$0xff]  ;;  %v2810_v16 = vld [vmem:[#allocation11 + $0xb0] sm:$0xff]  ;;  %v2813_v18 = vld [vmem:[#allocation11 + $0xc8] sm:$0xff] }
 0x4c2   : > { %v2275_v26 = vmax.f32 %v10227_v50, 0.0  ;;  %v8596_v50 = vpack.c.bf16 %v2810_v16, %v2808_v9  ;;  %v2843_v2 = vld [vmem:[#allocation11 + $0x1b8] sm:$0xff]  ;;  %v2840_v7 = vld [vmem:[#allocation11 + $0x1a0] sm:$0xff] }
 0x4c3   : > { %v1995_v28 = vpop.f32.mrb[6].mxu1  ;;  %8527 = vmatprep.subr.bf16.mxu0 %v8526_v60  ;;  %v2276_v47 = vmax.f32 %v10229_v14, 0.0  ;;  %v2814_v14 = vld [vmem:[#allocation11 + $0xd0] sm:$0xff] }
 0x4c4   : > { %v10231_v29 = vadd.f32 %v1995_v28, %v1818_v25  ;;  %v1997_v30 = vpop.f32.mrb[7].mxu1  ;;  %8529 = vmatpush1.bf16.msra.mxu0 %v8528_v19  ;;  %v2817_v25 = vld [vmem:[#allocation11 + $0xe8] sm:$0xff] }
 0x4c5   : > { %v10233_v20 = vadd.f32 %v1997_v30, %v1820_v27  ;;  %v2819_v27 = vld [vmem:[#allocation11 + $0xf8] sm:$0xff]  ;;  %v2816_v30 = vld [vmem:[#allocation11 + $0xe0] sm:$0xff] }
 0x4c6   : > { %v2279_v21 = vmax.f32 %v10231_v29, 0.0  ;;  %v8602_v29 = vpack.c.bf16 %v2819_v27, %v2817_v25 }
 0x4c7   : > { %v2280_v58 = vmax.f32 %v10233_v20, 0.0  ;;  %v2818_v20 = vld [vmem:[#allocation11 + $0xf0] sm:$0xff] }
 0x4c8   : > { %v8532_v34 = vpack.c.bf16 %v2279_v21, %v2275_v26  ;;  %v2821_v26 = vld [vmem:[#allocation11 + $0x108] sm:$0xff]  ;;  %v2823_v21 = vld [vmem:[#allocation11 + $0x118] sm:$0xff] }
 0x4c9   : > { %v8530_v6 = vpack.c.bf16 %v2280_v58, %v2276_v47  ;;  %v8604_v47 = vpack.c.bf16 %v2818_v20, %v2816_v30  ;;  %v8606_v58 = vpack.c.bf16 %v2823_v21, %v2821_v26  ;;  %v2844_v26 = vld [vmem:[#allocation11 + $0x1c0] sm:$0xff]  ;;  %v2846_v21 = vld [vmem:[#allocation11 + $0x1d0] sm:$0xff] }
 0x4cb   : > { %8531 = vmatprep.subr.bf16.mxu0 %v8530_v6 }
 0x4cc   : > { %8533 = vmatpush1.bf16.msra.mxu0 %v8532_v34 }
 0x4cd   : > { %8543 = vmatprep.subr.bf16.mxu0 %v8526_v60 }
 0x4cf   : > { %7956 = vmatmul.mubr.msk.f32.vlgmr.msra.gmra.mrb[40].mxu0 %vm2285_vm1, %v12263_v42 }
 0x4d0   : > { %8545 = vmatpush1.bf16.msra.mxu0 %v8528_v19  ;;  %2362 = vmatprep.mubr.f32.mxu0 %v11340_v0 }
 0x4d1   : > { %8547 = vmatprep.subr.bf16.mxu0 %v8530_v6 }
 0x4d3   : > { %7957 = vmatmul.mubr.msk.f32.gmra.mrb[42].mxu0 %vm2285_vm1, %v12268_v35 }
 0x4d4   : > { %8549 = vmatpush1.bf16.msra.mxu0 %v8532_v34  ;;  %2519 = vmatprep.mubr.f32.mxu0 %v11340_v0 }
 0x4d5   : > { %8559 = vmatprep.subr.bf16.mxu0 %v8526_v60  ;;  %v2812_v60 = vld [vmem:[#allocation11 + $0xc0] sm:$0xff] }
 0x4d6   : > { %v8600_v28 = vpack.c.bf16 %v2814_v14, %v2812_v60  ;;  %v2845_v14 = vld [vmem:[#allocation11 + $0x1c8] sm:$0xff] }
 0x4d7   : > { %7960 = vmatmul.mubr.msk.f32.vlgmr.msra.gmra.mrb[44].mxu0 %vm2285_vm1, %v12273_v1 }
 0x4d8   : > { %8561 = vmatpush1.bf16.msra.mxu0 %v8528_v19  ;;  %2525 = vmatprep.mubr.f32.mxu0 %v11340_v0  ;;  %v2815_v19 = vld [vmem:[#allocation11 + $0xd8] sm:$0xff] }
 0x4d9   : > { %8563 = vmatprep.subr.bf16.mxu0 %v8530_v6  ;;  %v8598_v22 = vpack.c.bf16 %v2815_v19, %v2813_v18  ;;  %v2822_v6 = vld [vmem:[#allocation11 + $0x110] sm:$0xff]  ;;  %v1728_v18 = vrot.slane %v12254_v63, %v12296_v5 }
 0x4db   : > { %7961 = vmatmul.mubr.msk.f32.gmra.mrb[46].mxu0 %vm2285_vm1, %v12278_v39 }
 0x4dc   : > { %8565 = vmatpush1.bf16.msra.mxu0 %v8532_v34  ;;  %2690 = vmatprep.mubr.f32.mxu0 %v11340_v0  ;;  %v2820_v34 = vld [vmem:[#allocation11 + $0x100] sm:$0xff] }
 0x4dd   : > { %8575 = vmatprep.subr.bf16.mxu0 %v8574_v56  ;;  %v8608_v56 = vpack.c.bf16 %v2822_v6, %v2820_v34 }
 0x4df   : > { %7964 = vmatmul.mubr.msk.f32.vlgmr.msra.gmra.mrb[48].mxu0 %vm2285_vm1, %v12283_v17 }
 0x4e0   : > { %2696 = vmatprep.mubr.f32.mxu0 %v11340_v0  ;;  %8577 = vmatpush1.bf16.msra.mxu0 %v8576_v43  ;;  %v2831_v43 = vld [vmem:[#allocation11 + $0x158] sm:$0xff] }
 0x4e1   : > { %8579 = vmatprep.subr.bf16.mxu0 %v8578_v44  ;;  %v8612_v44 = vpack.c.bf16 %v2826_v3, %v2824_v23  ;;  %v8614_v45 = vpack.c.bf16 %v2831_v43, %v2829_v41  ;;  %v2849_v3 = vld [vmem:[#allocation11 + $0x1e8] sm:$0xff]  ;;  %v2851_v41 = vld [vmem:[#allocation11 + $0x1f8] sm:$0xff] }
 0x4e3   : > { %7965 = vmatmul.mubr.msk.f32.gmra.mrb[50].mxu0 %vm2285_vm1, %v12288_v36 }
 0x4e4   : > { %8581 = vmatpush1.bf16.msra.mxu0 %v8580_v52  ;;  %v2835_v52 = vld [vmem:[#allocation11 + $0x178] sm:$0xff] }
 0x4e5   : > { %8583 = vmatprep.subr.bf16.mxu0 %v8582_v8  ;;  %v8616_v8 = vpack.c.bf16 %v2830_v46, %v2828_v13  ;;  %v8618_v33 = vpack.c.bf16 %v2835_v52, %v2833_v32  ;;  %v2848_v13 = vld [vmem:[#allocation11 + $0x1e0] sm:$0xff]  ;;  %v2850_v46 = vld [vmem:[#allocation11 + $0x1f0] sm:$0xff] }
 0x4e6   : > { %v8636_v52 = vpack.c.bf16 %v2850_v46, %v2848_v13  ;;  %v3101_v13 = vld [vmem:[#allocation11 + $0x4f0] sm:$0xff]  ;;  %v3104_v46 = vld [vmem:[#allocation11 + $0x508] sm:$0xff] }
 0x4e8   : > { %8585 = vmatpush1.bf16.msra.mxu0 %v8584_v51  ;;  %v2839_v51 = vld [vmem:[#allocation11 + $0x198] sm:$0xff] }
 0x4e9   : > { %8587 = vmatprep.subr.bf16.mxu0 %v8586_v53  ;;  %v8620_v53 = vpack.c.bf16 %v2834_v49, %v2832_v48  ;;  %v8622_v54 = vpack.c.bf16 %v2839_v51, %v2837_v31 }
 0x4ec   : > { %8589 = vmatpush1.bf16.msra.mxu0 %v8588_v61  ;;  %v12293_v61 = vsub.s32 2, %v12249_v24  ;;  %v2847_v24 = vld [vmem:[#allocation11 + $0x1d8] sm:$0xff] }
 0x4ed   : > { %8591 = vmatprep.subr.bf16.mxu0 %v8590_v62  ;;  %v2841_v62 = vld [vmem:[#allocation11 + $0x1a8] sm:$0xff] }
 0x4ee   : > { %v8626_v4 = vpack.c.bf16 %v2843_v2, %v2841_v62  ;;  %v3071_v62 = vld [vmem:[#allocation11 + $0x400] sm:$0xff]  ;;  %v3073_v2 = vld [vmem:[#allocation11 + $0x410] sm:$0xff] }
 0x4f0   : > { %8593 = vmatpush1.bf16.msra.mxu0 %v8592_v10  ;;  %v2842_v10 = vld [vmem:[#allocation11 + $0x1b0] sm:$0xff] }
 0x4f1   : > { %8595 = vmatprep.subr.bf16.mxu0 %v8594_v12  ;;  %v1724_v12 = vrot.slane %v12254_v63, %v12293_v61  ;;  %v8628_v9 = vpack.c.bf16 %v2842_v10, %v2840_v7  ;;  %v8632_v63 = vpack.c.bf16 %v2846_v21, %v2844_v26  ;;  %v3078_v7 = vld [vmem:[#allocation11 + $0x438] sm:$0xff]  ;;  %v3089_v26 = vld [vmem:[#allocation11 + $0x490] sm:$0xff]  ;;  %v3092_v21 = vld [vmem:[#allocation11 + $0x4a8] sm:$0xff] }
 0x4f4   : > { %8597 = vmatpush1.bf16.msra.mxu0 %v8596_v50 }
 0x4f5   : > { %8599 = vmatprep.subr.bf16.mxu0 %v8598_v22 }
 0x4f8   : > { %8601 = vmatpush1.bf16.msra.mxu0 %v8600_v28  ;;  %v8630_v28 = vpack.c.bf16 %v2847_v24, %v2845_v14 }
 0x4f9   : > { %8603 = vmatprep.subr.bf16.mxu0 %v8602_v29 }
 0x4fc   : > { %8605 = vmatpush1.bf16.msra.mxu0 %v8604_v47 }
 0x4fd   : > { %8607 = vmatprep.subr.bf16.mxu0 %v8606_v58 }
 0x500   : > { %8609 = vmatpush1.bf16.msra.mxu0 %v8608_v56 }
 0x501   : > { %8611 = vmatprep.subr.bf16.mxu0 %v8610_v40 }
 0x504   : > { %8613 = vmatpush1.bf16.msra.mxu0 %v8612_v44 }
 0x505   : > { %8615 = vmatprep.subr.bf16.mxu0 %v8614_v45  ;;  %v8634_v45 = vpack.c.bf16 %v2851_v41, %v2849_v3  ;;  %v3100_v3 = vld [vmem:[#allocation11 + $0x4e8] sm:$0xff]  ;;  %v3102_v41 = vld [vmem:[#allocation11 + $0x4f8] sm:$0xff] }
 0x508   : > { %8617 = vmatpush1.bf16.msra.mxu0 %v8616_v8 }
 0x509   : > { %8619 = vmatprep.subr.bf16.mxu0 %v8618_v33 }
 0x50c   : > { %8621 = vmatpush1.bf16.msra.mxu0 %v8620_v53  ;;  %v2853_v53 = vld [vmem:[#allocation11 + $0x208] sm:$0xff] }
 0x50d   : > { %8623 = vmatprep.subr.bf16.mxu0 %v8622_v54  ;;  %v2855_v54 = vld [vmem:[#allocation11 + $0x218] sm:$0xff] }
 0x50e   : > { %v8638_v55 = vpack.c.bf16 %v2855_v54, %v2853_v53  ;;  %v3107_v54 = vld [vmem:[#allocation11 + $0x520] sm:$0xff] }
 0x510   : > { %8625 = vmatpush1.bf16.msra.mxu0 %v8624_v59  ;;  %v3074_v59 = vld [vmem:[#allocation11 + $0x418] sm:$0xff] }
 0x511   : > { %8627 = vmatprep.subr.bf16.mxu0 %v8626_v4  ;;  %v3076_v4 = vld [vmem:[#allocation11 + $0x428] sm:$0xff] }
 0x512   : > { %v8706_v10 = vpack.c.bf16 %v3078_v7, %v3076_v4  ;;  %v3113_v4 = vld [vmem:[#allocation11 + $0x550] sm:$0xff]  ;;  %v3116_v7 = vld [vmem:[#allocation11 + $0x568] sm:$0xff] }
 0x514   : > { %8629 = vmatpush1.bf16.msra.mxu0 %v8628_v9  ;;  %v3080_v9 = vld [vmem:[#allocation11 + $0x448] sm:$0xff] }
 0x515   : > { %8631 = vmatprep.subr.bf16.mxu0 %v8630_v28  ;;  %v3090_v28 = vld [vmem:[#allocation11 + $0x498] sm:$0xff] }
 0x518   : > { %8633 = vmatpush1.bf16.msra.mxu0 %v8632_v63  ;;  %v3093_v63 = vld [vmem:[#allocation11 + $0x4b0] sm:$0xff] }
 0x519   : > { %8635 = vmatprep.subr.bf16.mxu0 %v8634_v45  ;;  %v3099_v45 = vld [vmem:[#allocation11 + $0x4e0] sm:$0xff] }
 0x51c   : > { %8637 = vmatpush1.bf16.msra.mxu0 %v8636_v52  ;;  %v8732_v52 = vpack.c.bf16 %v3101_v13, %v3099_v45 }
 0x51d   : > { %8639 = vmatprep.subr.bf16.mxu0 %v8638_v55  ;;  %v3109_v55 = vld [vmem:[#allocation11 + $0x530] sm:$0xff] }
 0x528   : > { %v2244_v16 = vpop.f32.mrb[32].mxu0 }
 0x529   : > { %v2246_v19 = vpop.f32.mrb[33].mxu0  ;;  %v10234_v50 = vadd.f32 %v2244_v16, %v1724_v12  ;;  %v3082_v16 = vld [vmem:[#allocation11 + $0x458] sm:$0xff] }
 0x52a   : > { %v10235_v22 = vadd.f32 %v2246_v19, %v1728_v18  ;;  %v8710_v19 = vpack.c.bf16 %v3082_v16, %v3080_v9  ;;  %v3117_v9 = vld [vmem:[#allocation11 + $0x570] sm:$0xff]  ;;  %v3120_v16 = vld [vmem:[#allocation11 + $0x588] sm:$0xff] }
 0x52b   : > { %v2269_v30 = vmax.f32 %v10234_v50, 0.0  ;;  %v3081_v50 = vld [vmem:[#allocation11 + $0x450] sm:$0xff] }
 0x52c   : > { %v2250_v60 = vpop.f32.mrb[34].mxu0  ;;  %v2270_v47 = vmax.f32 %v10235_v22, 0.0  ;;  %v3084_v22 = vld [vmem:[#allocation11 + $0x468] sm:$0xff] }
 0x52d   : > { %v10236_v25 = vadd.f32 %v2250_v60, %v1724_v12  ;;  %v2252_v27 = vpop.f32.mrb[35].mxu0  ;;  %v3086_v60 = vld [vmem:[#allocation11 + $0x478] sm:$0xff] }
 0x52e   : > { %v10237_v29 = vadd.f32 %v2252_v27, %v1728_v18  ;;  %v8714_v24 = vpack.c.bf16 %v3086_v60, %v3084_v22  ;;  %v3085_v27 = vld [vmem:[#allocation11 + $0x470] sm:$0xff]  ;;  %v3124_v60 = vld [vmem:[#allocation11 + $0x5a8] sm:$0xff] }
 0x52f   : > { %v2273_v20 = vmax.f32 %v10236_v25, 0.0  ;;  %v3083_v25 = vld [vmem:[#allocation11 + $0x460] sm:$0xff]  ;;  %v3121_v22 = vld [vmem:[#allocation11 + $0x590] sm:$0xff] }
 0x530   : > { %v2274_v58 = vmax.f32 %v10237_v29, 0.0  ;;  %v2256_v34 = vpop.f32.mrb[36].mxu0  ;;  %v8716_v29 = vpack.c.bf16 %v3085_v27, %v3083_v25  ;;  %v3123_v27 = vld [vmem:[#allocation11 + $0x5a0] sm:$0xff] }
 0x531   : > { %v8536_v6 = vpack.c.bf16 %v2273_v20, %v2269_v30  ;;  %v2258_v37 = vpop.f32.mrb[37].mxu0  ;;  %v10238_v56 = vadd.f32 %v2256_v34, %v1724_v12  ;;  %v3087_v20 = vld [vmem:[#allocation11 + $0x480] sm:$0xff] }
 0x532   : > { %v8534_v38 = vpack.c.bf16 %v2274_v58, %v2270_v47  ;;  %v10239_v40 = vadd.f32 %v2258_v37, %v1728_v18  ;;  %v3094_v47 = vld [vmem:[#allocation11 + $0x4b8] sm:$0xff]  ;;  %v8720_v58 = vpack.c.bf16 %v3089_v26, %v3087_v20  ;;  %v3091_v34 = vld [vmem:[#allocation11 + $0x4a0] sm:$0xff] }
 0x533   : > { %v2277_v8 = vmax.f32 %v10238_v56, 0.0  ;;  %v3098_v37 = vld [vmem:[#allocation11 + $0x4d8] sm:$0xff]  ;;  %v3127_v26 = vld [vmem:[#allocation11 + $0x5c0] sm:$0xff] }
 0x534   : > { %v2262_v23 = vpop.f32.mrb[38].mxu0  ;;  %8535 = vmatprep.subr.bf16.mxu1 %v8534_v38  ;;  %v2278_v48 = vmax.f32 %v10239_v40, 0.0  ;;  %v3095_v40 = vld [vmem:[#allocation11 + $0x4c0] sm:$0xff] }
 0x535   : > { %v10240_v43 = vadd.f32 %v2262_v23, %v1724_v12  ;;  %v2264_v44 = vpop.f32.mrb[39].mxu0  ;;  %8537 = vmatpush1.bf16.msra.mxu1 %v8536_v6  ;;  %v3075_v12 = vld [vmem:[#allocation11 + $0x420] sm:$0xff]  ;;  %v3097_v23 = vld [vmem:[#allocation11 + $0x4d0] sm:$0xff] }
 0x536   : > { %v10241_v32 = vadd.f32 %v2264_v44, %v1728_v18  ;;  %v8730_v44 = vpack.c.bf16 %v3102_v41, %v3100_v3 }
 0x537   : > { %v2281_v33 = vmax.f32 %v10240_v43, 0.0  ;;  %v8728_v43 = vpack.c.bf16 %v3097_v23, %v3095_v40 }
 0x538   : > { %v2282_v49 = vmax.f32 %v10241_v32, 0.0  ;;  %v3106_v32 = vld [vmem:[#allocation11 + $0x518] sm:$0xff] }
 0x539   : > { %v8540_v31 = vpack.c.bf16 %v2281_v33, %v2277_v8  ;;  %v8734_v8 = vpack.c.bf16 %v3106_v32, %v3104_v46  ;;  %v3103_v33 = vld [vmem:[#allocation11 + $0x500] sm:$0xff] }
 0x53a   : > { %v8538_v51 = vpack.c.bf16 %v2282_v49, %v2278_v48  ;;  %v3105_v48 = vld [vmem:[#allocation11 + $0x510] sm:$0xff]  ;;  %v3108_v49 = vld [vmem:[#allocation11 + $0x528] sm:$0xff] }
 0x53c   : > { %8539 = vmatprep.subr.bf16.mxu1 %v8538_v51 }
 0x53d   : > { %8541 = vmatpush1.bf16.msra.mxu1 %v8540_v31 }
 0x53e   : > { %8551 = vmatprep.subr.bf16.mxu1 %v8534_v38 }
 0x540   : > { %7958 = vmatmul.mubr.msk.f32.vlgmr.msra.gmra.mrb[8].mxu1 %vm2285_vm1, %v12263_v42  ;;  %v8702_v42 = vpack.c.bf16 %v3074_v59, %v3072_v57  ;;  %v3112_v57 = vld [vmem:[#allocation11 + $0x548] sm:$0xff]  ;;  %v3114_v59 = vld [vmem:[#allocation11 + $0x558] sm:$0xff] }
 0x541   : > { %8553 = vmatpush1.bf16.msra.mxu1 %v8536_v6  ;;  %2439 = vmatprep.mubr.f32.mxu1 %v11340_v0 }
 0x542   : > { %8555 = vmatprep.subr.bf16.mxu1 %v8538_v51 }
 0x544   : > { %7959 = vmatmul.mubr.msk.f32.gmra.mrb[10].mxu1 %vm2285_vm1, %v12268_v35  ;;  %v8704_v35 = vpack.c.bf16 %v3073_v2, %v3071_v62  ;;  %v8742_v62 = vpack.c.bf16 %v3114_v59, %v3112_v57  ;;  %v3111_v2 = vld [vmem:[#allocation11 + $0x540] sm:$0xff]  ;;  %v3140_v57 = vld [vmem:[#allocation11 + $0x628] sm:$0xff]  ;;  %v3142_v59 = vld [vmem:[#allocation11 + $0x638] sm:$0xff] }
 0x545   : > { %8557 = vmatpush1.bf16.msra.mxu1 %v8540_v31  ;;  %2596 = vmatprep.mubr.f32.mxu1 %v11340_v0 }
 0x546   : > { %8567 = vmatprep.subr.bf16.mxu1 %v8534_v38  ;;  %v8724_v38 = vpack.c.bf16 %v3093_v63, %v3091_v34  ;;  %v3131_v63 = vld [vmem:[#allocation11 + $0x5e0] sm:$0xff] }
 0x548   : > { %7962 = vmatmul.mubr.msk.f32.vlgmr.msra.gmra.mrb[12].mxu1 %vm2285_vm1, %v12273_v1  ;;  %v3077_v1 = vld [vmem:[#allocation11 + $0x430] sm:$0xff] }
 0x549   : > { %8569 = vmatpush1.bf16.msra.mxu1 %v8536_v6  ;;  %2602 = vmatprep.mubr.f32.mxu1 %v11340_v0  ;;  %v8708_v18 = vpack.c.bf16 %v3077_v1, %v3075_v12  ;;  %v3096_v6 = vld [vmem:[#allocation11 + $0x4c8] sm:$0xff]  ;;  %v3115_v1 = vld [vmem:[#allocation11 + $0x560] sm:$0xff] }
 0x54a   : > { %8571 = vmatprep.subr.bf16.mxu1 %v8538_v51  ;;  %v8726_v56 = vpack.c.bf16 %v3098_v37, %v3096_v6  ;;  %v8736_v51 = vpack.c.bf16 %v3105_v48, %v3103_v33  ;;  %v3133_v6 = vld [vmem:[#allocation11 + $0x5f0] sm:$0xff]  ;;  %v3136_v37 = vld [vmem:[#allocation11 + $0x608] sm:$0xff]  ;;  %v2852_v48 = vld [vmem:[#allocation11 + $0x200] sm:$0xff] }
 0x54c   : > { %7963 = vmatmul.mubr.msk.f32.gmra.mrb[14].mxu1 %vm2285_vm1, %v12278_v39  ;;  %v3079_v39 = vld [vmem:[#allocation11 + $0x440] sm:$0xff] }
 0x54d   : > { %8573 = vmatpush1.bf16.msra.mxu1 %v8540_v31  ;;  %2767 = vmatprep.mubr.f32.mxu1 %v11340_v0  ;;  %v8712_v14 = vpack.c.bf16 %v3081_v50, %v3079_v39  ;;  %v3110_v31 = vld [vmem:[#allocation11 + $0x538] sm:$0xff]  ;;  %v3119_v50 = vld [vmem:[#allocation11 + $0x580] sm:$0xff] }
 0x54e   : > { %8703 = vmatprep.subr.bf16.mxu1 %v8702_v42  ;;  %v8738_v53 = vpack.c.bf16 %v3110_v31, %v3108_v49  ;;  %v8740_v42 = vpack.c.bf16 %v3109_v55, %v3107_v54  ;;  %v2854_v49 = vld [vmem:[#allocation11 + $0x210] sm:$0xff]  ;;  %v3135_v31 = vld [vmem:[#allocation11 + $0x600] sm:$0xff]  ;;  %v2859_v55 = vld [vmem:[#allocation11 + $0x238] sm:$0xff] }
 0x550   : > { %7966 = vmatmul.mubr.msk.f32.vlgmr.msra.gmra.mrb[16].mxu1 %vm2285_vm1, %v12283_v17  ;;  %v3088_v17 = vld [vmem:[#allocation11 + $0x488] sm:$0xff] }
 0x551   : > { %2773 = vmatprep.mubr.f32.mxu1 %v11340_v0  ;;  %8705 = vmatpush1.bf16.msra.mxu1 %v8704_v35  ;;  %v8718_v30 = vpack.c.bf16 %v3090_v28, %v3088_v17  ;;  %v3118_v35 = vld [vmem:[#allocation11 + $0x578] sm:$0xff]  ;;  %v3125_v17 = vld [vmem:[#allocation11 + $0x5b0] sm:$0xff]  ;;  %v3128_v28 = vld [vmem:[#allocation11 + $0x5c8] sm:$0xff] }
 0x552   : > { %8707 = vmatprep.subr.bf16.mxu1 %v8706_v10  ;;  %v8744_v10 = vpack.c.bf16 %v3113_v4, %v3111_v2  ;;  %v8746_v12 = vpack.c.bf16 %v3118_v35, %v3116_v7  ;;  %v8640_v4 = vpack.c.bf16 %v2854_v49, %v2852_v48  ;;  %v2856_v35 = vld [vmem:[#allocation11 + $0x220] sm:$0xff]  ;;  %v3153_v48 = vld [vmem:[#allocation11 + $0x690] sm:$0xff]  ;;  %v2873_v49 = vld [vmem:[#allocation11 + $0x2a8] sm:$0xff] }
 0x554   : > { %7967 = vmatmul.mubr.msk.f32.gmra.mrb[18].mxu1 %vm2285_vm1, %v12288_v36  ;;  %v8722_v36 = vpack.c.bf16 %v3094_v47, %v3092_v21  ;;  %v3129_v21 = vld [vmem:[#allocation11 + $0x5d0] sm:$0xff]  ;;  %v3132_v47 = vld [vmem:[#allocation11 + $0x5e8] sm:$0xff] }
 0x555   : > { %8709 = vmatpush1.bf16.msra.mxu1 %v8708_v18  ;;  %v3122_v18 = vld [vmem:[#allocation11 + $0x598] sm:$0xff] }
 0x556   : > { %8711 = vmatprep.subr.bf16.mxu1 %v8710_v19  ;;  %v8748_v19 = vpack.c.bf16 %v3117_v9, %v3115_v1  ;;  %v8750_v39 = vpack.c.bf16 %v3122_v18, %v3120_v16  ;;  %v8770_v1 = vpack.c.bf16 %v3142_v59, %v3140_v57  ;;  %v3139_v9 = vld [vmem:[#allocation11 + $0x620] sm:$0xff]  ;;  %v3141_v16 = vld [vmem:[#allocation11 + $0x630] sm:$0xff]  ;;  %v2861_v18 = vld [vmem:[#allocation11 + $0x248] sm:$0xff] }
 0x557   : > { %v2872_v57 = vld [vmem:[#allocation11 + $0x2a0] sm:$0xff]  ;;  %v2874_v59 = vld [vmem:[#allocation11 + $0x2b0] sm:$0xff] }
 0x559   : > { %8713 = vmatpush1.bf16.msra.mxu1 %v8712_v14  ;;  %v3126_v14 = vld [vmem:[#allocation11 + $0x5b8] sm:$0xff] }
 0x55a   : > { %8715 = vmatprep.subr.bf16.mxu1 %v8714_v24  ;;  %v8752_v24 = vpack.c.bf16 %v3121_v22, %v3119_v50  ;;  %v8754_v25 = vpack.c.bf16 %v3126_v14, %v3124_v60  ;;  %v3144_v50 = vld [vmem:[#allocation11 + $0x648] sm:$0xff]  ;;  %v3146_v22 = vld [vmem:[#allocation11 + $0x658] sm:$0xff] }
 0x55d   : > { %8717 = vmatpush1.bf16.msra.mxu1 %v8716_v29  ;;  %v3130_v29 = vld [vmem:[#allocation11 + $0x5d8] sm:$0xff] }
 0x55e   : > { %8719 = vmatprep.subr.bf16.mxu1 %v8718_v30  ;;  %v8756_v30 = vpack.c.bf16 %v3125_v17, %v3123_v27  ;;  %v8758_v20 = vpack.c.bf16 %v3130_v29, %v3128_v28  ;;  %v8772_v27 = vpack.c.bf16 %v3141_v16, %v3139_v9  ;;  %v2860_v17 = vld [vmem:[#allocation11 + $0x240] sm:$0xff]  ;;  %v2862_v28 = vld [vmem:[#allocation11 + $0x250] sm:$0xff]  ;;  %v3162_v9 = vld [vmem:[#allocation11 + $0x6d8] sm:$0xff]  ;;  %v8660_v16 = vpack.c.bf16 %v2874_v59, %v2872_v57 }
 0x55f   : > { %v2895_v57 = vld [vmem:[#allocation11 + $0x358] sm:$0xff]  ;;  %v3176_v59 = vld [vmem:[#allocation11 + $0x748] sm:$0xff] }
 0x561   : > { %8721 = vmatpush1.bf16.msra.mxu1 %v8720_v58  ;;  %v3134_v58 = vld [vmem:[#allocation11 + $0x5f8] sm:$0xff] }
 0x562   : > { %8723 = vmatprep.subr.bf16.mxu1 %v8722_v36  ;;  %v8760_v36 = vpack.c.bf16 %v3129_v21, %v3127_v26  ;;  %v8762_v34 = vpack.c.bf16 %v3134_v58, %v3132_v47  ;;  %v3145_v26 = vld [vmem:[#allocation11 + $0x650] sm:$0xff]  ;;  %v2865_v21 = vld [vmem:[#allocation11 + $0x268] sm:$0xff]  ;;  %v2867_v47 = vld [vmem:[#allocation11 + $0x278] sm:$0xff] }
 0x563   : > { %v3148_v58 = vld [vmem:[#allocation11 + $0x668] sm:$0xff] }
 0x565   : > { %8725 = vmatpush1.bf16.msra.mxu1 %v8724_v38  ;;  %v3138_v38 = vld [vmem:[#allocation11 + $0x618] sm:$0xff] }
 0x566   : > { %8727 = vmatprep.subr.bf16.mxu1 %v8726_v56  ;;  %v8764_v56 = vpack.c.bf16 %v3133_v6, %v3131_v63  ;;  %v8766_v40 = vpack.c.bf16 %v3138_v38, %v3136_v37  ;;  %v2864_v6 = vld [vmem:[#allocation11 + $0x260] sm:$0xff]  ;;  %v2866_v37 = vld [vmem:[#allocation11 + $0x270] sm:$0xff]  ;;  %v8650_v38 = vpack.c.bf16 %v2867_v47, %v2865_v21 }
 0x567   : > { %v2882_v21 = vld [vmem:[#allocation11 + $0x2f0] sm:$0xff] }
 0x569   : > { %8729 = vmatpush1.bf16.msra.mxu1 %v8728_v43 }
 0x56a   : > { %8731 = vmatprep.subr.bf16.mxu1 %v8730_v44 }
 0x56d   : > { %8733 = vmatpush1.bf16.msra.mxu1 %v8732_v52 }
 0x56e   : > { %8735 = vmatprep.subr.bf16.mxu1 %v8734_v8 }
 0x571   : > { %8737 = vmatpush1.bf16.msra.mxu1 %v8736_v51  ;;  %v3137_v51 = vld [vmem:[#allocation11 + $0x610] sm:$0xff] }
 0x572   : > { %8739 = vmatprep.subr.bf16.mxu1 %v8738_v53  ;;  %v2857_v53 = vld [vmem:[#allocation11 + $0x228] sm:$0xff]  ;;  %v8768_v7 = vpack.c.bf16 %v3137_v51, %v3135_v31  ;;  %v2875_v31 = vld [vmem:[#allocation11 + $0x2b8] sm:$0xff] }
 0x573   : > { %v3156_v51 = vld [vmem:[#allocation11 + $0x6a8] sm:$0xff] }
 0x575   : > { %8741 = vmatpush1.bf16.msra.mxu1 %v8740_v42 }
 0x576   : > { %8743 = vmatprep.subr.bf16.mxu1 %v8742_v62 }
 0x579   : > { %8745 = vmatpush1.bf16.msra.mxu1 %v8744_v10  ;;  %v2858_v10 = vld [vmem:[#allocation11 + $0x230] sm:$0xff] }
 0x57a   : > { %8747 = vmatprep.subr.bf16.mxu1 %v8746_v12  ;;  %v8642_v12 = vpack.c.bf16 %v2859_v55, %v2857_v53  ;;  %v3158_v53 = vld [vmem:[#allocation11 + $0x6b8] sm:$0xff] }
 0x57d   : > { %8749 = vmatpush1.bf16.msra.mxu1 %v8748_v19 }
 0x57e   : > { %8751 = vmatprep.subr.bf16.mxu1 %v8750_v39  ;;  %v2863_v39 = vld [vmem:[#allocation11 + $0x258] sm:$0xff] }
 0x57f   : > { %v8646_v29 = vpack.c.bf16 %v2863_v39, %v2861_v18  ;;  %v2878_v39 = vld [vmem:[#allocation11 + $0x2d0] sm:$0xff] }
 0x581   : > { %8753 = vmatpush1.bf16.msra.mxu1 %v8752_v24 }
 0x582   : > { %8755 = vmatprep.subr.bf16.mxu1 %v8754_v25  ;;  %v8644_v25 = vpack.c.bf16 %v2858_v10, %v2856_v35  ;;  %v3157_v35 = vld [vmem:[#allocation11 + $0x6b0] sm:$0xff]  ;;  %v2877_v10 = vld [vmem:[#allocation11 + $0x2c8] sm:$0xff] }
 0x585   : > { %8757 = vmatpush1.bf16.msra.mxu1 %v8756_v30  ;;  %v8774_v30 = vpack.c.bf16 %v3146_v22, %v3144_v50 }
 0x586   : > { %8759 = vmatprep.subr.bf16.mxu1 %v8758_v20  ;;  %v3143_v20 = vld [vmem:[#allocation11 + $0x640] sm:$0xff] }
 0x587   : > { %v8776_v63 = vpack.c.bf16 %v3145_v26, %v3143_v20  ;;  %v2880_v26 = vld [vmem:[#allocation11 + $0x2e0] sm:$0xff] }
 0x589   : > { %8761 = vmatpush1.bf16.msra.mxu1 %v8760_v36  ;;  %v3150_v36 = vld [vmem:[#allocation11 + $0x678] sm:$0xff] }
 0x58a   : > { %8763 = vmatprep.subr.bf16.mxu1 %v8762_v34  ;;  %v8648_v34 = vpack.c.bf16 %v2862_v28, %v2860_v17  ;;  %v2883_v17 = vld [vmem:[#allocation11 + $0x2f8] sm:$0xff]  ;;  %v3164_v28 = vld [vmem:[#allocation11 + $0x6e8] sm:$0xff] }
 0x58d   : > { %8765 = vmatpush1.bf16.msra.mxu1 %v8764_v56  ;;  %v8778_v56 = vpack.c.bf16 %v3150_v36, %v3148_v58  ;;  %v3163_v36 = vld [vmem:[#allocation11 + $0x6e0] sm:$0xff] }
 0x58e   : > { %8767 = vmatprep.subr.bf16.mxu1 %v8766_v40  ;;  %v3147_v40 = vld [vmem:[#allocation11 + $0x660] sm:$0xff] }
 0x5a2   : > { %v2358_v23 = vpop.f32.mrb[40].mxu0 }
 0x5a3   : > { %v2360_v3 = vpop.f32.mrb[41].mxu0 }
 0x5a6   : > { %v2364_v41 = vpop.f32.mrb[42].mxu0 }
 0x5a7   : > { %v2366_v43 = vpop.f32.mrb[43].mxu0 }
 0x5aa   : > { %v2521_v44 = vpop.f32.mrb[44].mxu0 }
 0x5ab   : > { %v2609_v45 = vmax.f32 %v2358_v23, %v2521_v44  ;;  %v2523_v13 = vpop.f32.mrb[45].mxu0  ;;  %v3149_v23 = vld [vmem:[#allocation11 + $0x670] sm:$0xff]  ;;  %v3154_v44 = vld [vmem:[#allocation11 + $0x698] sm:$0xff] }
 0x5ac   : > { %v2610_v46 = vmax.f32 %v2360_v3, %v2523_v13  ;;  %v2869_v3 = vld [vmem:[#allocation11 + $0x288] sm:$0xff]  ;;  %v8780_v13 = vpack.c.bf16 %v3149_v23, %v3147_v40  ;;  %v2884_v23 = vld [vmem:[#allocation11 + $0x300] sm:$0xff] }
 0x5ae   : > { %v2527_v32 = vpop.f32.mrb[46].mxu0 }
 0x5af   : > { %v2613_v52 = vmax.f32 %v2364_v41, %v2527_v32  ;;  %v2529_v8 = vpop.f32.mrb[47].mxu0  ;;  %v2871_v41 = vld [vmem:[#allocation11 + $0x298] sm:$0xff]  ;;  %v2870_v32 = vld [vmem:[#allocation11 + $0x290] sm:$0xff] }
 0x5b0   : > { %v2614_v33 = vmax.f32 %v2366_v43, %v2529_v8  ;;  %v3152_v43 = vld [vmem:[#allocation11 + $0x688] sm:$0xff] }
 0x5b1   : > { %v8782_v8 = vpack.c.bf16 %v3154_v44, %v3152_v43  ;;  %v3167_v44 = vld [vmem:[#allocation11 + $0x700] sm:$0xff] }
 0x5b2   : > { %v2692_v54 = vpop.f32.mrb[48].mxu0 }
 0x5b3   : > { %v12319_v42 = vmax.f32 %v2609_v45, %v2692_v54  ;;  %v2694_v62 = vpop.f32.mrb[49].mxu0  ;;  %v8652_v45 = vpack.c.bf16 %v2866_v37, %v2864_v6  ;;  %v2887_v6 = vld [vmem:[#allocation11 + $0x318] sm:$0xff]  ;;  %v3168_v37 = vld [vmem:[#allocation11 + $0x708] sm:$0xff] }
 0x5b4   : > { %v12321_v2 = vmax.f32 %v2610_v46, %v2694_v62  ;;  %v2868_v46 = vld [vmem:[#allocation11 + $0x280] sm:$0xff]  ;;  %v8658_v62 = vpack.c.bf16 %v2875_v31, %v2873_v49  ;;  %v2890_v49 = vld [vmem:[#allocation11 + $0x330] sm:$0xff] }
 0x5b5   : > { %v8656_v54 = vpack.c.bf16 %v2870_v32, %v2868_v46  ;;  %v2891_v46 = vld [vmem:[#allocation11 + $0x338] sm:$0xff]  ;;  %v3172_v32 = vld [vmem:[#allocation11 + $0x728] sm:$0xff] }
 0x5b6   : > { %v2698_v19 = vpop.f32.mrb[50].mxu0  ;;  %2980 = vmatprep.mubr.f32.mxu0 %v12321_v2  ;;  %3263 = vmatprep.mubr.f32.mxu1 %v12321_v2 }
 0x5b7   : > { %v12325_v60 = vmax.f32 %v2613_v52, %v2698_v19  ;;  %v2700_v14 = vpop.f32.mrb[51].mxu0  ;;  %2981 = vmatmul.mubr.f32.vlgmr.msra.gmra.mrb[52].mxu0 %v12319_v42  ;;  %3264 = vmatmul.mubr.f32.vlgmr.msra.gmra.mrb[20].mxu1 %v12319_v42  ;;  %v8654_v52 = vpack.c.bf16 %v2871_v41, %v2869_v3  ;;  %v2876_v19 = vld [vmem:[#allocation11 + $0x2c0] sm:$0xff]  ;;  %v2886_v3 = vld [vmem:[#allocation11 + $0x310] sm:$0xff] }
 0x5b8   : > { %v12329_v24 = vmax.f32 %v2614_v33, %v2700_v14  ;;  %8641 = vmatpush1.bf16.msra.mxu0 %v8640_v4  ;;  %8769 = vmatpush1.bf16.msra.mxu1 %v8768_v7  ;;  %v3151_v33 = vld [vmem:[#allocation11 + $0x680] sm:$0xff]  ;;  %v8786_v4 = vpack.c.bf16 %v3158_v53, %v3156_v51 }
 0x5b9   : > { %8643 = vmatprep.subr.bf16.mxu0 %v8642_v12  ;;  %8771 = vmatprep.subr.bf16.mxu1 %v8770_v1  ;;  %v8784_v55 = vpack.c.bf16 %v3153_v48, %v3151_v33  ;;  %v3155_v7 = vld [vmem:[#allocation11 + $0x6a0] sm:$0xff]  ;;  %v2879_v12 = vld [vmem:[#allocation11 + $0x2d8] sm:$0xff]  ;;  %v3160_v1 = vld [vmem:[#allocation11 + $0x6c8] sm:$0xff] }
 0x5ba   : > { %2986 = vmatprep.mubr.f32.mxu0 %v12329_v24  ;;  %3269 = vmatprep.mubr.f32.mxu1 %v12329_v24  ;;  %v8788_v18 = vpack.c.bf16 %v3157_v35, %v3155_v7  ;;  %v8662_v50 = vpack.c.bf16 %v2879_v12, %v2877_v10  ;;  %v8790_v22 = vpack.c.bf16 %v3162_v9, %v3160_v1  ;;  %v3159_v14 = vld [vmem:[#allocation11 + $0x6c0] sm:$0xff]  ;;  %v2894_v10 = vld [vmem:[#allocation11 + $0x350] sm:$0xff] }
 0x5bb   : > { %2987 = vmatmul.mubr.f32.gmra.mrb[54].mxu0 %v12325_v60  ;;  %3270 = vmatmul.mubr.f32.gmra.mrb[22].mxu1 %v12325_v60  ;;  %v2888_v48 = vld [vmem:[#allocation11 + $0x320] sm:$0xff] }
 0x5bc   : > { %8645 = vmatpush1.bf16.msra.mxu0 %v8644_v25  ;;  %8773 = vmatpush1.bf16.msra.mxu1 %v8772_v27  ;;  %v3161_v25 = vld [vmem:[#allocation11 + $0x6d0] sm:$0xff]  ;;  %v2881_v27 = vld [vmem:[#allocation11 + $0x2e8] sm:$0xff]  ;;  %v3171_v53 = vld [vmem:[#allocation11 + $0x720] sm:$0xff] }
 0x5bd   : > { %8647 = vmatprep.subr.bf16.mxu0 %v8646_v29  ;;  %8775 = vmatprep.subr.bf16.mxu1 %v8774_v30  ;;  %v3166_v29 = vld [vmem:[#allocation11 + $0x6f8] sm:$0xff]  ;;  %v8664_v30 = vpack.c.bf16 %v2878_v39, %v2876_v19  ;;  %v8792_v20 = vpack.c.bf16 %v3161_v25, %v3159_v14  ;;  %v8666_v47 = vpack.c.bf16 %v2883_v17, %v2881_v27  ;;  %v2892_v35 = vld [vmem:[#allocation11 + $0x340] sm:$0xff]  ;;  %v3180_v39 = vld [vmem:[#allocation11 + $0x768] sm:$0xff] }
 0x5be   : > { %v8794_v58 = vpack.c.bf16 %v3166_v29, %v3164_v28  ;;  %v3175_v9 = vld [vmem:[#allocation11 + $0x740] sm:$0xff]  ;;  %v2899_v19 = vld [vmem:[#allocation11 + $0x378] sm:$0xff]  ;;  %v2898_v27 = vld [vmem:[#allocation11 + $0x370] sm:$0xff] }
 0x5bf   : > { %v2896_v25 = vld [vmem:[#allocation11 + $0x360] sm:$0xff] }
 0x5c0   : > { %8649 = vmatpush1.bf16.msra.mxu0 %v8648_v34  ;;  %8777 = vmatpush1.bf16.msra.mxu1 %v8776_v63  ;;  %v3165_v34 = vld [vmem:[#allocation11 + $0x6f0] sm:$0xff]  ;;  %v2885_v63 = vld [vmem:[#allocation11 + $0x308] sm:$0xff]  ;;  %v3179_v29 = vld [vmem:[#allocation11 + $0x760] sm:$0xff] }
 0x5c1   : > { %8651 = vmatprep.subr.bf16.mxu0 %v8650_v38  ;;  %8779 = vmatprep.subr.bf16.mxu1 %v8778_v56  ;;  %v3170_v38 = vld [vmem:[#allocation11 + $0x718] sm:$0xff]  ;;  %v8668_v56 = vpack.c.bf16 %v2882_v21, %v2880_v26  ;;  %v8796_v40 = vpack.c.bf16 %v3165_v34, %v3163_v36  ;;  %v8670_v41 = vpack.c.bf16 %v2887_v6, %v2885_v63  ;;  %v3184_v21 = vld [vmem:[#allocation11 + $0x788] sm:$0xff]  ;;  %v2900_v34 = vld [vmem:[#allocation11 + $0x380] sm:$0xff] }
 0x5c2   : > { %v8798_v43 = vpack.c.bf16 %v3170_v38, %v3168_v37  ;;  %v2903_v26 = vld [vmem:[#allocation11 + $0x398] sm:$0xff]  ;;  %v2902_v63 = vld [vmem:[#allocation11 + $0x390] sm:$0xff]  ;;  %v3183_v38 = vld [vmem:[#allocation11 + $0x780] sm:$0xff] }
 0x5c4   : > { %8653 = vmatpush1.bf16.msra.mxu0 %v8652_v45  ;;  %8781 = vmatpush1.bf16.msra.mxu1 %v8780_v13  ;;  %v3169_v45 = vld [vmem:[#allocation11 + $0x710] sm:$0xff]  ;;  %v2889_v13 = vld [vmem:[#allocation11 + $0x328] sm:$0xff] }
 0x5c5   : > { %8655 = vmatprep.subr.bf16.mxu0 %v8654_v52  ;;  %8783 = vmatprep.subr.bf16.mxu1 %v8782_v8  ;;  %v3174_v52 = vld [vmem:[#allocation11 + $0x738] sm:$0xff]  ;;  %v8672_v8 = vpack.c.bf16 %v2886_v3, %v2884_v23  ;;  %v8800_v33 = vpack.c.bf16 %v3169_v45, %v3167_v44  ;;  %v8674_v31 = vpack.c.bf16 %v2891_v46, %v2889_v13  ;;  %v3188_v3 = vld [vmem:[#allocation11 + $0x7a8] sm:$0xff]  ;;  %v2904_v45 = vld [vmem:[#allocation11 + $0x3a0] sm:$0xff] }
 0x5c6   : > { %v8802_v51 = vpack.c.bf16 %v3174_v52, %v3172_v32  ;;  %v2907_v23 = vld [vmem:[#allocation11 + $0x3b8] sm:$0xff]  ;;  %v2906_v13 = vld [vmem:[#allocation11 + $0x3b0] sm:$0xff]  ;;  %v3187_v52 = vld [vmem:[#allocation11 + $0x7a0] sm:$0xff] }
 0x5c8   : > { %8657 = vmatpush1.bf16.msra.mxu0 %v8656_v54  ;;  %8785 = vmatpush1.bf16.msra.mxu1 %v8784_v55  ;;  %v3173_v54 = vld [vmem:[#allocation11 + $0x730] sm:$0xff]  ;;  %v2893_v55 = vld [vmem:[#allocation11 + $0x348] sm:$0xff] }
 0x5c9   : > { %8659 = vmatprep.subr.bf16.mxu0 %v8658_v62  ;;  %8787 = vmatprep.subr.bf16.mxu1 %v8786_v4  ;;  %v3178_v62 = vld [vmem:[#allocation11 + $0x758] sm:$0xff]  ;;  %v8676_v4 = vpack.c.bf16 %v2890_v49, %v2888_v48  ;;  %v8804_v7 = vpack.c.bf16 %v3173_v54, %v3171_v53  ;;  %v8678_v12 = vpack.c.bf16 %v2895_v57, %v2893_v55  ;;  %v3192_v49 = vld [vmem:[#allocation11 + $0x7c8] sm:$0xff]  ;;  %v2908_v54 = vld [vmem:[#allocation11 + $0x3c0] sm:$0xff] }
 0x5ca   : > { %v8806_v1 = vpack.c.bf16 %v3178_v62, %v3176_v59  ;;  %v2911_v48 = vld [vmem:[#allocation11 + $0x3d8] sm:$0xff]  ;;  %v2910_v55 = vld [vmem:[#allocation11 + $0x3d0] sm:$0xff]  ;;  %v3191_v62 = vld [vmem:[#allocation11 + $0x7c0] sm:$0xff] }
 0x5cc   : > { %8661 = vmatpush1.bf16.msra.mxu0 %v8660_v16  ;;  %8789 = vmatpush1.bf16.msra.mxu1 %v8788_v18  ;;  %v3177_v16 = vld [vmem:[#allocation11 + $0x750] sm:$0xff]  ;;  %v2897_v18 = vld [vmem:[#allocation11 + $0x368] sm:$0xff] }
 0x5cd   : > { %8663 = vmatprep.subr.bf16.mxu0 %v8662_v50  ;;  %8791 = vmatprep.subr.bf16.mxu1 %v8790_v22  ;;  %v3182_v50 = vld [vmem:[#allocation11 + $0x778] sm:$0xff]  ;;  %v8680_v22 = vpack.c.bf16 %v2894_v10, %v2892_v35  ;;  %v8808_v14 = vpack.c.bf16 %v3177_v16, %v3175_v9  ;;  %v8682_v17 = vpack.c.bf16 %v2899_v19, %v2897_v18  ;;  %v3196_v10 = vld [vmem:[#allocation11 + $0x7e8] sm:$0xff]  ;;  %v2912_v16 = vld [vmem:[#allocation11 + $0x3e0] sm:$0xff] }
 0x5ce   : > { %v8810_v28 = vpack.c.bf16 %v3182_v50, %v3180_v39  ;;  %v2915_v35 = vld [vmem:[#allocation11 + $0x3f8] sm:$0xff]  ;;  %v2914_v19 = vld [vmem:[#allocation11 + $0x3f0] sm:$0xff]  ;;  %v3195_v50 = vld [vmem:[#allocation11 + $0x7e0] sm:$0xff] }
 0x5d0   : > { %8665 = vmatpush1.bf16.msra.mxu0 %v8664_v30  ;;  %8793 = vmatpush1.bf16.msra.mxu1 %v8792_v20  ;;  %v3181_v30 = vld [vmem:[#allocation11 + $0x770] sm:$0xff]  ;;  %v2901_v20 = vld [vmem:[#allocation11 + $0x388] sm:$0xff] }
 0x5d1   : > { %8667 = vmatprep.subr.bf16.mxu0 %v8666_v47  ;;  %8795 = vmatprep.subr.bf16.mxu1 %v8794_v58  ;;  %v3186_v47 = vld [vmem:[#allocation11 + $0x798] sm:$0xff]  ;;  %v8684_v58 = vpack.c.bf16 %v2898_v27, %v2896_v25  ;;  %v8812_v36 = vpack.c.bf16 %v3181_v30, %v3179_v29  ;;  %v8686_v6 = vpack.c.bf16 %v2903_v26, %v2901_v20 }
 0x5d2   : > { %v8814_v37 = vpack.c.bf16 %v3186_v47, %v3184_v21  ;;  %v3361_v25 = vld [vmem:[#allocation11 + $0x818] sm:$0xff]  ;;  %v8700_v27 = vpack.c.bf16 %v2914_v19, %v2912_v16  ;;  %v3374_v16 = vld [vmem:[#allocation11 + $0x880] sm:$0xff]  ;;  %v3379_v19 = vld [vmem:[#allocation11 + $0x8a8] sm:$0xff] }
 0x5d4   : > { %8669 = vmatpush1.bf16.msra.mxu0 %v8668_v56  ;;  %8797 = vmatpush1.bf16.msra.mxu1 %v8796_v40  ;;  %v3185_v56 = vld [vmem:[#allocation11 + $0x790] sm:$0xff]  ;;  %v2905_v40 = vld [vmem:[#allocation11 + $0x3a8] sm:$0xff] }
 0x5d5   : > { %8671 = vmatprep.subr.bf16.mxu0 %v8670_v41  ;;  %8799 = vmatprep.subr.bf16.mxu1 %v8798_v43  ;;  %v3190_v41 = vld [vmem:[#allocation11 + $0x7b8] sm:$0xff]  ;;  %v8688_v43 = vpack.c.bf16 %v2902_v63, %v2900_v34  ;;  %v8816_v44 = vpack.c.bf16 %v3185_v56, %v3183_v38  ;;  %v8690_v46 = vpack.c.bf16 %v2907_v23, %v2905_v40  ;;  %v3358_v38 = vld [vmem:[#allocation11 + $0x800] sm:$0xff]  ;;  %v3360_v56 = vld [vmem:[#allocation11 + $0x810] sm:$0xff] }
 0x5d6   : > { %v8818_v32 = vpack.c.bf16 %v3190_v41, %v3188_v3  ;;  %v3363_v23 = vld [vmem:[#allocation11 + $0x828] sm:$0xff]  ;;  %v3365_v3 = vld [vmem:[#allocation11 + $0x838] sm:$0xff] }
 0x5d8   : > { %8673 = vmatpush1.bf16.msra.mxu0 %v8672_v8  ;;  %8801 = vmatpush1.bf16.msra.mxu1 %v8800_v33  ;;  %v3189_v8 = vld [vmem:[#allocation11 + $0x7b0] sm:$0xff]  ;;  %v2909_v33 = vld [vmem:[#allocation11 + $0x3c8] sm:$0xff] }
 0x5d9   : > { %8675 = vmatprep.subr.bf16.mxu0 %v8674_v31  ;;  %8803 = vmatprep.subr.bf16.mxu1 %v8802_v51  ;;  %v3194_v31 = vld [vmem:[#allocation11 + $0x7d8] sm:$0xff]  ;;  %v8692_v51 = vpack.c.bf16 %v2906_v13, %v2904_v45  ;;  %v8820_v53 = vpack.c.bf16 %v3189_v8, %v3187_v52  ;;  %v8694_v57 = vpack.c.bf16 %v2911_v48, %v2909_v33  ;;  %v3367_v8 = vld [vmem:[#allocation11 + $0x848] sm:$0xff] }
 0x5da   : > { %v8822_v59 = vpack.c.bf16 %v3194_v31, %v3192_v49  ;;  %v8832_v45 = vpack.c.bf16 %v3360_v56, %v3358_v38  ;;  %v8834_v13 = vpack.c.bf16 %v3365_v3, %v3363_v23  ;;  %v3369_v33 = vld [vmem:[#allocation11 + $0x858] sm:$0xff]  ;;  %v3390_v38 = vld [vmem:[#allocation11 + $0x900] sm:$0xff]  ;;  %v3392_v56 = vld [vmem:[#allocation11 + $0x910] sm:$0xff] }
 0x5db   : > { %v3397_v23 = vld [vmem:[#allocation11 + $0x938] sm:$0xff]  ;;  %v8864_v3 = vpack.c.bf16 %v3392_v56, %v3390_v38 }
 0x5dc   : > { %8677 = vmatpush1.bf16.msra.mxu0 %v8676_v4  ;;  %8805 = vmatpush1.bf16.msra.mxu1 %v8804_v7  ;;  %v3193_v4 = vld [vmem:[#allocation11 + $0x7d0] sm:$0xff]  ;;  %v2913_v7 = vld [vmem:[#allocation11 + $0x3e8] sm:$0xff] }
 0x5dd   : > { %8679 = vmatprep.subr.bf16.mxu0 %v8678_v12  ;;  %8807 = vmatprep.subr.bf16.mxu1 %v8806_v1  ;;  %v3198_v12 = vld [vmem:[#allocation11 + $0x7f8] sm:$0xff]  ;;  %v8696_v1 = vpack.c.bf16 %v2910_v55, %v2908_v54  ;;  %v8824_v9 = vpack.c.bf16 %v3193_v4, %v3191_v62  ;;  %v8698_v18 = vpack.c.bf16 %v2915_v35, %v2913_v7  ;;  %v3366_v54 = vld [vmem:[#allocation11 + $0x840] sm:$0xff]  ;;  %v3368_v55 = vld [vmem:[#allocation11 + $0x850] sm:$0xff] }
 0x5de   : > { %v8826_v39 = vpack.c.bf16 %v3198_v12, %v3196_v10  ;;  %v8840_v62 = vpack.c.bf16 %v3368_v55, %v3366_v54  ;;  %v3370_v7 = vld [vmem:[#allocation11 + $0x860] sm:$0xff]  ;;  %v3372_v35 = vld [vmem:[#allocation11 + $0x870] sm:$0xff]  ;;  %v3375_v10 = vld [vmem:[#allocation11 + $0x888] sm:$0xff] }
 0x5df   : > { %v3377_v12 = vld [vmem:[#allocation11 + $0x898] sm:$0xff] }
 0x5e0   : > { %8681 = vmatpush1.bf16.msra.mxu0 %v8680_v22  ;;  %8809 = vmatpush1.bf16.msra.mxu1 %v8808_v14  ;;  %v3197_v22 = vld [vmem:[#allocation11 + $0x7f0] sm:$0xff]  ;;  %v3359_v14 = vld [vmem:[#allocation11 + $0x808] sm:$0xff] }
 0x5e1   : > { %8683 = vmatprep.subr.bf16.mxu0 %v8682_v17  ;;  %8811 = vmatprep.subr.bf16.mxu1 %v8810_v28  ;;  %v8828_v17 = vpack.c.bf16 %v3197_v22, %v3195_v50  ;;  %v8830_v28 = vpack.c.bf16 %v3361_v25, %v3359_v14  ;;  %v3378_v22 = vld [vmem:[#allocation11 + $0x8a0] sm:$0xff]  ;;  %v3380_v14 = vld [vmem:[#allocation11 + $0x8b0] sm:$0xff]  ;;  %v3383_v25 = vld [vmem:[#allocation11 + $0x8c8] sm:$0xff] }
 0x5e4   : > { %8685 = vmatpush1.bf16.msra.mxu0 %v8684_v58  ;;  %8813 = vmatpush1.bf16.msra.mxu1 %v8812_v36 }
 0x5e5   : > { %8687 = vmatprep.subr.bf16.mxu0 %v8686_v6  ;;  %8815 = vmatprep.subr.bf16.mxu1 %v8814_v37 }
 0x5e8   : > { %8689 = vmatpush1.bf16.msra.mxu0 %v8688_v43  ;;  %8817 = vmatpush1.bf16.msra.mxu1 %v8816_v44 }
 0x5e9   : > { %8691 = vmatprep.subr.bf16.mxu0 %v8690_v46  ;;  %8819 = vmatprep.subr.bf16.mxu1 %v8818_v32  ;;  %v3362_v46 = vld [vmem:[#allocation11 + $0x820] sm:$0xff]  ;;  %v3364_v32 = vld [vmem:[#allocation11 + $0x830] sm:$0xff] }
 0x5ec   : > { %8693 = vmatpush1.bf16.msra.mxu0 %v8692_v51  ;;  %8821 = vmatpush1.bf16.msra.mxu1 %v8820_v53  ;;  %v8836_v51 = vpack.c.bf16 %v3364_v32, %v3362_v46  ;;  %v8838_v53 = vpack.c.bf16 %v3369_v33, %v3367_v8  ;;  %v3399_v46 = vld [vmem:[#allocation11 + $0x948] sm:$0xff]  ;;  %v3401_v32 = vld [vmem:[#allocation11 + $0x958] sm:$0xff]  ;;  %v3398_v33 = vld [vmem:[#allocation11 + $0x940] sm:$0xff] }
 0x5ed   : > { %8695 = vmatprep.subr.bf16.mxu0 %v8694_v57  ;;  %8823 = vmatprep.subr.bf16.mxu1 %v8822_v59  ;;  %v3371_v57 = vld [vmem:[#allocation11 + $0x868] sm:$0xff]  ;;  %v3373_v59 = vld [vmem:[#allocation11 + $0x878] sm:$0xff]  ;;  %v8870_v8 = vpack.c.bf16 %v3401_v32, %v3399_v46  ;;  %v3430_v46 = vld [vmem:[#allocation11 + $0xa40] sm:$0xff] }
 0x5ee   : > { %v8842_v4 = vpack.c.bf16 %v3373_v59, %v3371_v57  ;;  %v3402_v57 = vld [vmem:[#allocation11 + $0x960] sm:$0xff]  ;;  %v3404_v59 = vld [vmem:[#allocation11 + $0x970] sm:$0xff] }
 0x5ef   : > { %v3432_v32 = vld [vmem:[#allocation11 + $0xa50] sm:$0xff] }
 0x5f0   : > { %8697 = vmatpush1.bf16.msra.mxu0 %v8696_v1  ;;  %8825 = vmatpush1.bf16.msra.mxu1 %v8824_v9  ;;  %v8844_v1 = vpack.c.bf16 %v3372_v35, %v3370_v7  ;;  %v8846_v9 = vpack.c.bf16 %v3377_v12, %v3375_v10  ;;  %v8876_v7 = vpack.c.bf16 %v3404_v59, %v3402_v57  ;;  %v3406_v10 = vld [vmem:[#allocation11 + $0x980] sm:$0xff]  ;;  %v3408_v12 = vld [vmem:[#allocation11 + $0x990] sm:$0xff] }
 0x5f1   : > { %8699 = vmatprep.subr.bf16.mxu0 %v8698_v18  ;;  %8827 = vmatprep.subr.bf16.mxu1 %v8826_v39  ;;  %v3376_v18 = vld [vmem:[#allocation11 + $0x890] sm:$0xff]  ;;  %v3381_v39 = vld [vmem:[#allocation11 + $0x8b8] sm:$0xff]  ;;  %v3438_v57 = vld [vmem:[#allocation11 + $0xa80] sm:$0xff] }
 0x5f2   : > { %v8848_v50 = vpack.c.bf16 %v3376_v18, %v3374_v16  ;;  %v8880_v16 = vpack.c.bf16 %v3408_v12, %v3406_v10  ;;  %v3440_v59 = vld [vmem:[#allocation11 + $0xa90] sm:$0xff]  ;;  %v3447_v10 = vld [vmem:[#allocation11 + $0xac8] sm:$0xff]  ;;  %v3449_v12 = vld [vmem:[#allocation11 + $0xad8] sm:$0xff] }
 0x5f4   : > { %8701 = vmatpush1.bf16.msra.mxu0 %v8700_v27  ;;  %8829 = vmatpush1.bf16.msra.mxu1 %v8828_v17  ;;  %v3385_v27 = vld [vmem:[#allocation11 + $0x8d8] sm:$0xff]  ;;  %v8852_v17 = vpack.c.bf16 %v3380_v14, %v3378_v22 }
 0x5f5   : > { %8831 = vmatprep.subr.bf16.mxu0 %v8830_v28  ;;  %v8854_v28 = vpack.c.bf16 %v3385_v27, %v3383_v25  ;;  %v3414_v25 = vld [vmem:[#allocation11 + $0x9c0] sm:$0xff]  ;;  %v3416_v27 = vld [vmem:[#allocation11 + $0x9d0] sm:$0xff] }
 0x613   : > { %v2435_v29 = vpop.f32.mrb[8].mxu1 }
 0x614   : > { %v2437_v30 = vpop.f32.mrb[9].mxu1 }
 0x617   : > { %v2441_v20 = vpop.f32.mrb[10].mxu1 }
 0x618   : > { %v2443_v26 = vpop.f32.mrb[11].mxu1 }
 0x61b   : > { %v2598_v21 = vpop.f32.mrb[12].mxu1 }
 0x61c   : > { %v2611_v47 = vmax.f32 %v2435_v29, %v2598_v21  ;;  %v2600_v58 = vpop.f32.mrb[13].mxu1  ;;  %v3382_v29 = vld [vmem:[#allocation11 + $0x8c0] sm:$0xff] }
 0x61d   : > { %v2612_v36 = vmax.f32 %v2437_v30, %v2600_v58  ;;  %v3384_v30 = vld [vmem:[#allocation11 + $0x8d0] sm:$0xff]  ;;  %v3386_v58 = vld [vmem:[#allocation11 + $0x8e0] sm:$0xff] }
 0x61e   : > { %v8856_v21 = vpack.c.bf16 %v3384_v30, %v3382_v29  ;;  %v8888_v29 = vpack.c.bf16 %v3416_v27, %v3414_v25  ;;  %v3455_v25 = vld [vmem:[#allocation11 + $0xb08] sm:$0xff]  ;;  %v3457_v27 = vld [vmem:[#allocation11 + $0xb18] sm:$0xff] }
 0x61f   : > { %v2604_v34 = vpop.f32.mrb[14].mxu1 }
 0x620   : > { %v2615_v63 = vmax.f32 %v2441_v20, %v2604_v34  ;;  %v2606_v6 = vpop.f32.mrb[15].mxu1  ;;  %v3387_v20 = vld [vmem:[#allocation11 + $0x8e8] sm:$0xff] }
 0x621   : > { %v2616_v37 = vmax.f32 %v2443_v26, %v2606_v6  ;;  %v3389_v26 = vld [vmem:[#allocation11 + $0x8f8] sm:$0xff]  ;;  %v3391_v34 = vld [vmem:[#allocation11 + $0x908] sm:$0xff] }
 0x623   : > { %v2769_v40 = vpop.f32.mrb[16].mxu1 }
 0x624   : > { %v12335_v41 = vmax.f32 %v2611_v47, %v2769_v40  ;;  %v2771_v43 = vpop.f32.mrb[17].mxu1  ;;  %v8858_v47 = vpack.c.bf16 %v3389_v26, %v3387_v20  ;;  %v3395_v40 = vld [vmem:[#allocation11 + $0x928] sm:$0xff]  ;;  %v3418_v20 = vld [vmem:[#allocation11 + $0x9e0] sm:$0xff]  ;;  %v3420_v26 = vld [vmem:[#allocation11 + $0x9f0] sm:$0xff] }
 0x625   : > { %v12337_v44 = vmax.f32 %v2612_v36, %v2771_v43  ;;  %v3388_v36 = vld [vmem:[#allocation11 + $0x8f0] sm:$0xff]  ;;  %v8866_v43 = vpack.c.bf16 %v3397_v23, %v3395_v40  ;;  %v3426_v40 = vld [vmem:[#allocation11 + $0xa20] sm:$0xff] }
 0x626   : > { %v8860_v6 = vpack.c.bf16 %v3388_v36, %v3386_v58  ;;  %v8892_v58 = vpack.c.bf16 %v3420_v26, %v3418_v20  ;;  %v3428_v23 = vld [vmem:[#allocation11 + $0xa30] sm:$0xff]  ;;  %v3459_v20 = vld [vmem:[#allocation11 + $0xb28] sm:$0xff]  ;;  %v3461_v26 = vld [vmem:[#allocation11 + $0xb38] sm:$0xff] }
 0x627   : > { %v2775_v52 = vpop.f32.mrb[18].mxu1  ;;  %3057 = vmatprep.mubr.f32.mxu0 %v12337_v44  ;;  %3340 = vmatprep.mubr.f32.mxu1 %v12337_v44 }
 0x628   : > { %v12341_v48 = vmax.f32 %v2615_v63, %v2775_v52  ;;  %v2777_v49 = vpop.f32.mrb[19].mxu1  ;;  %3058 = vmatmul.mubr.f32.vlgmr.msra.gmra.mrb[52].mxu0 %v12335_v41  ;;  %3341 = vmatmul.mubr.f32.vlgmr.msra.gmra.mrb[20].mxu1 %v12335_v41  ;;  %v3393_v63 = vld [vmem:[#allocation11 + $0x918] sm:$0xff] }
 0x629   : > { %v12345_v31 = vmax.f32 %v2616_v37, %v2777_v49  ;;  %8833 = vmatpush1.bf16.msra.mxu0 %v8832_v45  ;;  %v8862_v37 = vpack.c.bf16 %v3393_v63, %v3391_v34  ;;  %v3394_v45 = vld [vmem:[#allocation11 + $0x920] sm:$0xff]  ;;  %v3400_v49 = vld [vmem:[#allocation11 + $0x950] sm:$0xff] }
 0x62a   : > { %8835 = vmatprep.subr.bf16.mxu0 %v8834_v13  ;;  %v3396_v13 = vld [vmem:[#allocation11 + $0x930] sm:$0xff]  ;;  %v8872_v54 = vpack.c.bf16 %v3400_v49, %v3398_v33  ;;  %v3422_v34 = vld [vmem:[#allocation11 + $0xa00] sm:$0xff]  ;;  %v8904_v33 = vpack.c.bf16 %v3432_v32, %v3430_v46  ;;  %v3471_v46 = vld [vmem:[#allocation11 + $0xb88] sm:$0xff] }
 0x62b   : > { %3063 = vmatprep.mubr.f32.mxu0 %v12345_v31  ;;  %3346 = vmatprep.mubr.f32.mxu1 %v12345_v31  ;;  %v8868_v52 = vpack.c.bf16 %v3396_v13, %v3394_v45  ;;  %v3424_v63 = vld [vmem:[#allocation11 + $0xa10] sm:$0xff]  ;;  %v8900_v45 = vpack.c.bf16 %v3428_v23, %v3426_v40  ;;  %v3467_v40 = vld [vmem:[#allocation11 + $0xb68] sm:$0xff]  ;;  %v3469_v23 = vld [vmem:[#allocation11 + $0xb78] sm:$0xff] }
 0x62c   : > { %3064 = vmatmul.mubr.f32.gmra.mrb[54].mxu0 %v12341_v48  ;;  %3347 = vmatmul.mubr.f32.gmra.mrb[22].mxu1 %v12341_v48  ;;  %v8896_v38 = vpack.c.bf16 %v3424_v63, %v3422_v34  ;;  %v3463_v34 = vld [vmem:[#allocation11 + $0xb48] sm:$0xff]  ;;  %v3465_v63 = vld [vmem:[#allocation11 + $0xb58] sm:$0xff] }
 0x62d   : > { %8837 = vmatpush1.bf16.msra.mxu0 %v8836_v51  ;;  %3550 = vmatprep.mubr.f32.mxu0 %v12321_v2  ;;  %v8850_v2 = vpack.c.bf16 %v3381_v39, %v3379_v19  ;;  %v3403_v51 = vld [vmem:[#allocation11 + $0x968] sm:$0xff]  ;;  %v3410_v19 = vld [vmem:[#allocation11 + $0x9a0] sm:$0xff]  ;;  %v3412_v39 = vld [vmem:[#allocation11 + $0x9b0] sm:$0xff] }
 0x62e   : > { %8839 = vmatprep.subr.bf16.mxu0 %v8838_v53  ;;  %3713 = vmatprep.mubr.f32.mxu1 %v11340_v0  ;;  %v3405_v53 = vld [vmem:[#allocation11 + $0x978] sm:$0xff]  ;;  %v8884_v22 = vpack.c.bf16 %v3412_v39, %v3410_v19  ;;  %v3451_v19 = vld [vmem:[#allocation11 + $0xae8] sm:$0xff] }
 0x62f   : > { %v8874_v55 = vpack.c.bf16 %v3405_v53, %v3403_v51  ;;  %v3434_v51 = vld [vmem:[#allocation11 + $0xa60] sm:$0xff]  ;;  %v3439_v53 = vld [vmem:[#allocation11 + $0xa88] sm:$0xff]  ;;  %v3453_v39 = vld [vmem:[#allocation11 + $0xaf8] sm:$0xff] }
 0x630   : > { %v3473_v32 = vld [vmem:[#allocation11 + $0xb98] sm:$0xff] }
 0x631   : > { %8841 = vmatpush1.bf16.msra.mxu0 %v8840_v62  ;;  %v3407_v62 = vld [vmem:[#allocation11 + $0x988] sm:$0xff] }
 0x632   : > { %8843 = vmatprep.subr.bf16.mxu0 %v8842_v4  ;;  %v3409_v4 = vld [vmem:[#allocation11 + $0x998] sm:$0xff] }
 0x633   : > { %v8878_v35 = vpack.c.bf16 %v3409_v4, %v3407_v62  ;;  %v3443_v62 = vld [vmem:[#allocation11 + $0xaa8] sm:$0xff]  ;;  %v3445_v4 = vld [vmem:[#allocation11 + $0xab8] sm:$0xff] }
 0x635   : > { %8845 = vmatpush1.bf16.msra.mxu0 %v8844_v1  ;;  %v3411_v1 = vld [vmem:[#allocation11 + $0x9a8] sm:$0xff] }
 0x636   : > { %8847 = vmatprep.subr.bf16.mxu0 %v8846_v9  ;;  %v3413_v9 = vld [vmem:[#allocation11 + $0x9b8] sm:$0xff] }
 0x637   : > { %v8882_v18 = vpack.c.bf16 %v3413_v9, %v3411_v1  ;;  %v8918_v9 = vpack.c.bf16 %v3449_v12, %v3447_v10 }
 0x639   : > { %8849 = vmatpush1.bf16.msra.mxu0 %v8848_v50  ;;  %v3415_v50 = vld [vmem:[#allocation11 + $0x9c8] sm:$0xff] }
 0x63a   : > { %8851 = vmatprep.subr.bf16.mxu0 %v8850_v2  ;;  %v3417_v2 = vld [vmem:[#allocation11 + $0x9d8] sm:$0xff] }
 0x63b   : > { %v8886_v14 = vpack.c.bf16 %v3417_v2, %v3415_v50  ;;  %v8922_v2 = vpack.c.bf16 %v3453_v39, %v3451_v19 }
 0x63d   : > { %8853 = vmatpush1.bf16.msra.mxu0 %v8852_v17  ;;  %v3419_v17 = vld [vmem:[#allocation11 + $0x9e8] sm:$0xff] }
 0x63e   : > { %8855 = vmatprep.subr.bf16.mxu0 %v8854_v28  ;;  %v3421_v28 = vld [vmem:[#allocation11 + $0x9f8] sm:$0xff] }
 0x63f   : > { %v8890_v30 = vpack.c.bf16 %v3421_v28, %v3419_v17  ;;  %v8926_v28 = vpack.c.bf16 %v3457_v27, %v3455_v25 }
 0x641   : > { %8857 = vmatpush1.bf16.msra.mxu0 %v8856_v21  ;;  %v3423_v21 = vld [vmem:[#allocation11 + $0xa08] sm:$0xff] }
 0x642   : > { %8859 = vmatprep.subr.bf16.mxu0 %v8858_v47  ;;  %v3425_v47 = vld [vmem:[#allocation11 + $0xa18] sm:$0xff] }
 0x643   : > { %v8894_v36 = vpack.c.bf16 %v3425_v47, %v3423_v21  ;;  %v8930_v47 = vpack.c.bf16 %v3461_v26, %v3459_v20  ;;  %v3878_v20 = vld [vmem:[#allocation14 + $0x30] sm:$0xff] }
 0x645   : > { %8861 = vmatpush1.bf16.msra.mxu0 %v8860_v6  ;;  %v3427_v6 = vld [vmem:[#allocation11 + $0xa28] sm:$0xff] }
 0x646   : > { %8863 = vmatprep.subr.bf16.mxu0 %v8862_v37  ;;  %v3429_v37 = vld [vmem:[#allocation11 + $0xa38] sm:$0xff] }
 0x647   : > { %v8898_v56 = vpack.c.bf16 %v3429_v37, %v3427_v6  ;;  %v8934_v37 = vpack.c.bf16 %v3465_v63, %v3463_v34  ;;  %v3886_v34 = vld [vmem:[#allocation14 + $0x70] sm:$0xff] }
 0x649   : > { %8865 = vmatpush1.bf16.msra.mxu0 %v8864_v3  ;;  %v3431_v3 = vld [vmem:[#allocation11 + $0xa48] sm:$0xff] }
 0x64a   : > { %8867 = vmatprep.subr.bf16.mxu0 %v8866_v43  ;;  %v3433_v43 = vld [vmem:[#allocation11 + $0xa58] sm:$0xff] }
 0x64b   : > { %v8902_v13 = vpack.c.bf16 %v3433_v43, %v3431_v3  ;;  %v8938_v43 = vpack.c.bf16 %v3469_v23, %v3467_v40  ;;  %v3894_v40 = vld [vmem:[#allocation14 + $0xb0] sm:$0xff] }
 0x64d   : > { %8869 = vmatpush1.bf16.msra.mxu0 %v8868_v52  ;;  %v3435_v52 = vld [vmem:[#allocation11 + $0xa68] sm:$0xff] }
 0x64e   : > { %8871 = vmatprep.subr.bf16.mxu0 %v8870_v8  ;;  %v3437_v8 = vld [vmem:[#allocation11 + $0xa78] sm:$0xff] }
 0x64f   : > { %v8906_v49 = vpack.c.bf16 %v3437_v8, %v3435_v52  ;;  %v8942_v8 = vpack.c.bf16 %v3473_v32, %v3471_v46  ;;  %v3902_v46 = vld [vmem:[#allocation14 + $0xf0] sm:$0xff] }
 0x651   : > { %8873 = vmatpush1.bf16.msra.mxu0 %v8872_v54 }
 0x652   : > { %8875 = vmatprep.subr.bf16.mxu0 %v8874_v55 }
 0x655   : > { %8877 = vmatpush1.bf16.msra.mxu0 %v8876_v7  ;;  %v8914_v7 = vpack.c.bf16 %v3445_v4, %v3443_v62 }
 0x656   : > { %8879 = vmatprep.subr.bf16.mxu0 %v8878_v35  ;;  %v3444_v35 = vld [vmem:[#allocation11 + $0xab0] sm:$0xff] }
 0x659   : > { %8881 = vmatpush1.bf16.msra.mxu0 %v8880_v16  ;;  %v3446_v16 = vld [vmem:[#allocation11 + $0xac0] sm:$0xff] }
 0x65a   : > { %8883 = vmatprep.subr.bf16.mxu0 %v8882_v18  ;;  %v3448_v18 = vld [vmem:[#allocation11 + $0xad0] sm:$0xff] }
 0x65b   : > { %v8920_v50 = vpack.c.bf16 %v3448_v18, %v3446_v16 }
 0x65d   : > { %8885 = vmatpush1.bf16.msra.mxu0 %v8884_v22  ;;  %v3450_v22 = vld [vmem:[#allocation11 + $0xae0] sm:$0xff] }
 0x65e   : > { %8887 = vmatprep.subr.bf16.mxu0 %v8886_v14  ;;  %v3452_v14 = vld [vmem:[#allocation11 + $0xaf0] sm:$0xff] }
 0x65f   : > { %v8924_v17 = vpack.c.bf16 %v3452_v14, %v3450_v22 }
 0x661   : > { %8889 = vmatpush1.bf16.msra.mxu0 %v8888_v29  ;;  %v3454_v29 = vld [vmem:[#allocation11 + $0xb00] sm:$0xff] }
 0x662   : > { %8891 = vmatprep.subr.bf16.mxu0 %v8890_v30  ;;  %v3456_v30 = vld [vmem:[#allocation11 + $0xb10] sm:$0xff] }
 0x663   : > { %v8928_v21 = vpack.c.bf16 %v3456_v30, %v3454_v29  ;;  %v3874_v30 = vld [vmem:[#allocation14 + $0x10] sm:$0xff] }
 0x664   : > { %v9164_v26 = vpack.c.bf16 %v3878_v20, %v3874_v30  ;;  %v3938_v20 = vld [vmem:[#allocation14 + $0x210] sm:$0xff] }
 0x665   : > { %8893 = vmatpush1.bf16.msra.mxu0 %v8892_v58  ;;  %v3458_v58 = vld [vmem:[#allocation11 + $0xb20] sm:$0xff] }
 0x666   : > { %8895 = vmatprep.subr.bf16.mxu0 %v8894_v36  ;;  %v3460_v36 = vld [vmem:[#allocation11 + $0xb30] sm:$0xff] }
 0x667   : > { %v8932_v6 = vpack.c.bf16 %v3460_v36, %v3458_v58  ;;  %v3882_v36 = vld [vmem:[#allocation14 + $0x50] sm:$0xff] }
 0x668   : > { %3551 = vmatmul.mubr.f32.vlgmr.msra.gmra.mrb[56].mxu0 %v12319_v42  ;;  %v3436_v42 = vld [vmem:[#allocation11 + $0xa70] sm:$0xff]  ;;  %v9168_v63 = vpack.c.bf16 %v3886_v34, %v3882_v36  ;;  %v3946_v34 = vld [vmem:[#allocation14 + $0x250] sm:$0xff] }
 0x669   : > { %3556 = vmatprep.mubr.f32.mxu0 %v12329_v24  ;;  %8897 = vmatpush1.bf16.msra.mxu0 %v8896_v38  ;;  %v3441_v24 = vld [vmem:[#allocation11 + $0xa98] sm:$0xff]  ;;  %v8908_v54 = vpack.c.bf16 %v3436_v42, %v3434_v51  ;;  %v3462_v38 = vld [vmem:[#allocation11 + $0xb40] sm:$0xff]  ;;  %v3475_v51 = vld [vmem:[#allocation11 + $0xba8] sm:$0xff] }
 0x66a   : > { %8899 = vmatprep.subr.bf16.mxu0 %v8898_v56  ;;  %v8910_v55 = vpack.c.bf16 %v3441_v24, %v3439_v53  ;;  %v3464_v56 = vld [vmem:[#allocation11 + $0xb50] sm:$0xff]  ;;  %v3477_v42 = vld [vmem:[#allocation11 + $0xbb8] sm:$0xff] }
 0x66b   : > { %v8936_v3 = vpack.c.bf16 %v3464_v56, %v3462_v38  ;;  %v8946_v24 = vpack.c.bf16 %v3477_v42, %v3475_v51  ;;  %v3890_v56 = vld [vmem:[#allocation14 + $0x90] sm:$0xff] }
 0x66c   : > { %3557 = vmatmul.mubr.f32.gmra.mrb[58].mxu0 %v12325_v60  ;;  %v8912_v60 = vpack.c.bf16 %v3440_v59, %v3438_v57  ;;  %v3479_v57 = vld [vmem:[#allocation11 + $0xbc8] sm:$0xff]  ;;  %v3481_v59 = vld [vmem:[#allocation11 + $0xbd8] sm:$0xff]  ;;  %v9172_v23 = vpack.c.bf16 %v3894_v40, %v3890_v56 }
 0x66d   : > { %8901 = vmatpush1.bf16.msra.mxu0 %v8900_v45  ;;  %3627 = vmatprep.mubr.f32.mxu0 %v12337_v44  ;;  %v3442_v44 = vld [vmem:[#allocation11 + $0xaa0] sm:$0xff]  ;;  %v8950_v4 = vpack.c.bf16 %v3481_v59, %v3479_v57  ;;  %v3910_v51 = vld [vmem:[#allocation14 + $0x130] sm:$0xff] }
 0x66e   : > { %8903 = vmatprep.subr.bf16.mxu0 %v8902_v13  ;;  %v8916_v1 = vpack.c.bf16 %v3444_v35, %v3442_v44  ;;  %v3466_v45 = vld [vmem:[#allocation11 + $0xb60] sm:$0xff]  ;;  %v3468_v13 = vld [vmem:[#allocation11 + $0xb70] sm:$0xff]  ;;  %v3483_v44 = vld [vmem:[#allocation11 + $0xbe8] sm:$0xff] }
 0x66f   : > { %v8940_v52 = vpack.c.bf16 %v3468_v13, %v3466_v45  ;;  %v3485_v35 = vld [vmem:[#allocation11 + $0xbf8] sm:$0xff]  ;;  %v3898_v13 = vld [vmem:[#allocation14 + $0xd0] sm:$0xff] }
 0x670   : > { %v8954_v12 = vpack.c.bf16 %v3485_v35, %v3483_v44  ;;  %v9176_v32 = vpack.c.bf16 %v3902_v46, %v3898_v13  ;;  %v3918_v57 = vld [vmem:[#allocation14 + $0x170] sm:$0xff] }
 0x671   : > { %8905 = vmatpush1.bf16.msra.mxu0 %v8904_v33  ;;  %v3470_v33 = vld [vmem:[#allocation11 + $0xb80] sm:$0xff]  ;;  %v3926_v44 = vld [vmem:[#allocation14 + $0x1b0] sm:$0xff] }
 0x672   : > { %8907 = vmatprep.subr.bf16.mxu0 %v8906_v49  ;;  %v3472_v49 = vld [vmem:[#allocation11 + $0xb90] sm:$0xff]  ;;  %v3954_v40 = vld [vmem:[#allocation14 + $0x290] sm:$0xff] }
 0x673   : > { %v8944_v53 = vpack.c.bf16 %v3472_v49, %v3470_v33  ;;  %v3906_v49 = vld [vmem:[#allocation14 + $0x110] sm:$0xff] }
 0x674   : > { %v9180_v42 = vpack.c.bf16 %v3910_v51, %v3906_v49  ;;  %v3962_v46 = vld [vmem:[#allocation14 + $0x2d0] sm:$0xff] }
 0x675   : > { %8909 = vmatpush1.bf16.msra.mxu0 %v8908_v54  ;;  %v3474_v54 = vld [vmem:[#allocation11 + $0xba0] sm:$0xff]  ;;  %v3970_v51 = vld [vmem:[#allocation14 + $0x310] sm:$0xff] }
 0x676   : > { %8911 = vmatprep.subr.bf16.mxu0 %v8910_v55  ;;  %v3476_v55 = vld [vmem:[#allocation11 + $0xbb0] sm:$0xff] }
 0x677   : > { %v8948_v62 = vpack.c.bf16 %v3476_v55, %v3474_v54  ;;  %v3914_v55 = vld [vmem:[#allocation14 + $0x150] sm:$0xff] }
 0x678   : > { %v9184_v59 = vpack.c.bf16 %v3918_v57, %v3914_v55  ;;  %v3978_v57 = vld [vmem:[#allocation14 + $0x350] sm:$0xff] }
 0x679   : > { %8913 = vmatpush1.bf16.msra.mxu0 %v8912_v60  ;;  %v3478_v60 = vld [vmem:[#allocation11 + $0xbc0] sm:$0xff] }
 0x67a   : > { %8915 = vmatprep.subr.bf16.mxu0 %v8914_v7  ;;  %v3480_v7 = vld [vmem:[#allocation11 + $0xbd0] sm:$0xff] }
 0x67b   : > { %v8952_v10 = vpack.c.bf16 %v3480_v7, %v3478_v60  ;;  %v3922_v7 = vld [vmem:[#allocation14 + $0x190] sm:$0xff] }
 0x67c   : > { %v9188_v35 = vpack.c.bf16 %v3926_v44, %v3922_v7  ;;  %v3986_v44 = vld [vmem:[#allocation14 + $0x390] sm:$0xff] }
 0x67d   : > { %8917 = vmatpush1.bf16.msra.mxu0 %v8916_v1  ;;  %v3482_v1 = vld [vmem:[#allocation11 + $0xbe0] sm:$0xff] }
 0x67e   : > { %8919 = vmatprep.subr.bf16.mxu0 %v8918_v9  ;;  %v3484_v9 = vld [vmem:[#allocation11 + $0xbf0] sm:$0xff] }
 0x67f   : > { %v8956_v16 = vpack.c.bf16 %v3484_v9, %v3482_v1  ;;  %v3930_v9 = vld [vmem:[#allocation14 + $0x1d0] sm:$0xff] }
 0x681   : > { %8921 = vmatpush1.bf16.msra.mxu0 %v8920_v50 }
 0x682   : > { %8923 = vmatprep.subr.bf16.mxu0 %v8922_v2 }
 0x685   : > { %8925 = vmatpush1.bf16.msra.mxu0 %v8924_v17  ;;  %v3875_v17 = vld [vmem:[#allocation14 + $0x18] sm:$0xff] }
 0x686   : > { %8927 = vmatprep.subr.bf16.mxu0 %v8926_v28  ;;  %v3879_v28 = vld [vmem:[#allocation14 + $0x38] sm:$0xff] }
 0x687   : > { %v9162_v29 = vpack.c.bf16 %v3879_v28, %v3875_v17  ;;  %v3939_v28 = vld [vmem:[#allocation14 + $0x218] sm:$0xff] }
 0x689   : > { %8929 = vmatpush1.bf16.msra.mxu0 %v8928_v21  ;;  %v3883_v21 = vld [vmem:[#allocation14 + $0x58] sm:$0xff] }
 0x68a   : > { %8931 = vmatprep.subr.bf16.mxu0 %v8930_v47  ;;  %v3887_v47 = vld [vmem:[#allocation14 + $0x78] sm:$0xff] }
 0x68b   : > { %v9166_v58 = vpack.c.bf16 %v3887_v47, %v3883_v21  ;;  %v3947_v47 = vld [vmem:[#allocation14 + $0x258] sm:$0xff] }
 0x68d   : > { %8933 = vmatpush1.bf16.msra.mxu0 %v8932_v6  ;;  %v3891_v6 = vld [vmem:[#allocation14 + $0x98] sm:$0xff] }
 0x68e   : > { %8935 = vmatprep.subr.bf16.mxu0 %v8934_v37  ;;  %v3895_v37 = vld [vmem:[#allocation14 + $0xb8] sm:$0xff] }
 0x68f   : > { %v9170_v38 = vpack.c.bf16 %v3895_v37, %v3891_v6  ;;  %v3955_v37 = vld [vmem:[#allocation14 + $0x298] sm:$0xff] }
 0x691   : > { %8937 = vmatpush1.bf16.msra.mxu0 %v8936_v3  ;;  %v3899_v3 = vld [vmem:[#allocation14 + $0xd8] sm:$0xff] }
 0x692   : > { %8939 = vmatprep.subr.bf16.mxu0 %v8938_v43  ;;  %v3903_v43 = vld [vmem:[#allocation14 + $0xf8] sm:$0xff] }
 0x693   : > { %v9174_v45 = vpack.c.bf16 %v3903_v43, %v3899_v3  ;;  %v3963_v43 = vld [vmem:[#allocation14 + $0x2d8] sm:$0xff] }
 0x695   : > { %8941 = vmatpush1.bf16.msra.mxu0 %v8940_v52  ;;  %v3907_v52 = vld [vmem:[#allocation14 + $0x118] sm:$0xff] }
 0x696   : > { %8943 = vmatprep.subr.bf16.mxu0 %v8942_v8  ;;  %v3911_v8 = vld [vmem:[#allocation14 + $0x138] sm:$0xff] }
 0x697   : > { %v9178_v33 = vpack.c.bf16 %v3911_v8, %v3907_v52  ;;  %v3971_v8 = vld [vmem:[#allocation14 + $0x318] sm:$0xff] }
 0x699   : > { %8945 = vmatpush1.bf16.msra.mxu0 %v8944_v53  ;;  %v3915_v53 = vld [vmem:[#allocation14 + $0x158] sm:$0xff] }
 0x69a   : > { %8947 = vmatprep.subr.bf16.mxu0 %v8946_v24  ;;  %v3919_v24 = vld [vmem:[#allocation14 + $0x178] sm:$0xff] }
 0x69b   : > { %v9182_v54 = vpack.c.bf16 %v3919_v24, %v3915_v53  ;;  %v3979_v24 = vld [vmem:[#allocation14 + $0x358] sm:$0xff] }
 0x69d   : > { %8949 = vmatpush1.bf16.msra.mxu0 %v8948_v62  ;;  %v3923_v62 = vld [vmem:[#allocation14 + $0x198] sm:$0xff] }
 0x69e   : > { %8951 = vmatprep.subr.bf16.mxu0 %v8950_v4  ;;  %v3927_v4 = vld [vmem:[#allocation14 + $0x1b8] sm:$0xff] }
 0x69f   : > { %v9186_v60 = vpack.c.bf16 %v3927_v4, %v3923_v62  ;;  %v3987_v4 = vld [vmem:[#allocation14 + $0x398] sm:$0xff] }
 0x6a1   : > { %8953 = vmatpush1.bf16.msra.mxu0 %v8952_v10  ;;  %v3931_v10 = vld [vmem:[#allocation14 + $0x1d8] sm:$0xff] }
 0x6a2   : > { %8955 = vmatprep.subr.bf16.mxu0 %v8954_v12  ;;  %v3935_v12 = vld [vmem:[#allocation14 + $0x1f8] sm:$0xff] }
 0x6a3   : > { %v9190_v1 = vpack.c.bf16 %v3935_v12, %v3931_v10  ;;  %v3995_v12 = vld [vmem:[#allocation14 + $0x3d8] sm:$0xff] }
 0x6a5   : > { %8957 = vmatpush1.bf16.msra.mxu0 %v8956_v16  ;;  %v3934_v16 = vld [vmem:[#allocation14 + $0x1f0] sm:$0xff] }
 0x6a6   : > { %9163 = vmatprep.subr.bf16.mxu0 %v9162_v29  ;;  %v9192_v17 = vpack.c.bf16 %v3934_v16, %v3930_v9  ;;  %v3943_v29 = vld [vmem:[#allocation14 + $0x238] sm:$0xff]  ;;  %v3994_v16 = vld [vmem:[#allocation14 + $0x3d0] sm:$0xff] }
 0x6a7   : > { %v9194_v30 = vpack.c.bf16 %v3943_v29, %v3939_v28 }
 0x6a8   : > { %3628 = vmatmul.mubr.f32.vlgmr.msra.gmra.mrb[56].mxu0 %v12335_v41 }
 0x6a9   : > { %3633 = vmatprep.mubr.f32.mxu0 %v12345_v31  ;;  %9165 = vmatpush1.bf16.msra.mxu0 %v9164_v26  ;;  %v3942_v26 = vld [vmem:[#allocation14 + $0x230] sm:$0xff] }
 0x6aa   : > { %9167 = vmatprep.subr.bf16.mxu0 %v9166_v58  ;;  %v9196_v21 = vpack.c.bf16 %v3942_v26, %v3938_v20  ;;  %v3951_v58 = vld [vmem:[#allocation14 + $0x278] sm:$0xff] }
 0x6ab   : > { %v9198_v36 = vpack.c.bf16 %v3951_v58, %v3947_v47 }
 0x6ac   : > { %3634 = vmatmul.mubr.f32.gmra.mrb[58].mxu0 %v12341_v48 }
 0x6ad   : > { %9169 = vmatpush1.bf16.msra.mxu0 %v9168_v63  ;;  %v3950_v63 = vld [vmem:[#allocation14 + $0x270] sm:$0xff] }
 0x6ae   : > { %9171 = vmatprep.subr.bf16.mxu0 %v9170_v38  ;;  %v9200_v6 = vpack.c.bf16 %v3950_v63, %v3946_v34  ;;  %v3959_v38 = vld [vmem:[#allocation14 + $0x2b8] sm:$0xff] }
 0x6af   : > { %v9202_v56 = vpack.c.bf16 %v3959_v38, %v3955_v37  ;;  %v3884_v37 = vld [vmem:[#allocation14 + $0x60] sm:$0xff]  ;;  %v3889_v38 = vld [vmem:[#allocation14 + $0x88] sm:$0xff] }
 0x6b1   : > { %9173 = vmatpush1.bf16.msra.mxu0 %v9172_v23  ;;  %v3958_v23 = vld [vmem:[#allocation14 + $0x2b0] sm:$0xff] }
 0x6b2   : > { %9175 = vmatprep.subr.bf16.mxu0 %v9174_v45  ;;  %v9204_v3 = vpack.c.bf16 %v3958_v23, %v3954_v40  ;;  %v3967_v45 = vld [vmem:[#allocation14 + $0x2f8] sm:$0xff] }
 0x6b3   : > { %v9206_v13 = vpack.c.bf16 %v3967_v45, %v3963_v43  ;;  %v3892_v43 = vld [vmem:[#allocation14 + $0xa0] sm:$0xff]  ;;  %v3897_v45 = vld [vmem:[#allocation14 + $0xc8] sm:$0xff] }
 0x6b5   : > { %9177 = vmatpush1.bf16.msra.mxu0 %v9176_v32  ;;  %v3966_v32 = vld [vmem:[#allocation14 + $0x2f0] sm:$0xff] }
 0x6b6   : > { %9179 = vmatprep.subr.bf16.mxu0 %v9178_v33  ;;  %v9208_v52 = vpack.c.bf16 %v3966_v32, %v3962_v46  ;;  %v3975_v33 = vld [vmem:[#allocation14 + $0x338] sm:$0xff] }
 0x6b7   : > { %v9210_v49 = vpack.c.bf16 %v3975_v33, %v3971_v8  ;;  %v3900_v8 = vld [vmem:[#allocation14 + $0xe0] sm:$0xff]  ;;  %v3905_v33 = vld [vmem:[#allocation14 + $0x108] sm:$0xff] }
 0x6b9   : > { %9181 = vmatpush1.bf16.msra.mxu0 %v9180_v42  ;;  %v3974_v42 = vld [vmem:[#allocation14 + $0x330] sm:$0xff] }
 0x6ba   : > { %9183 = vmatprep.subr.bf16.mxu0 %v9182_v54  ;;  %v9212_v53 = vpack.c.bf16 %v3974_v42, %v3970_v51  ;;  %v3983_v54 = vld [vmem:[#allocation14 + $0x378] sm:$0xff] }
 0x6bb   : > { %v9214_v55 = vpack.c.bf16 %v3983_v54, %v3979_v24  ;;  %v3908_v24 = vld [vmem:[#allocation14 + $0x120] sm:$0xff]  ;;  %v3913_v54 = vld [vmem:[#allocation14 + $0x148] sm:$0xff] }
 0x6bd   : > { %9185 = vmatpush1.bf16.msra.mxu0 %v9184_v59  ;;  %v3982_v59 = vld [vmem:[#allocation14 + $0x370] sm:$0xff] }
 0x6be   : > { %9187 = vmatprep.subr.bf16.mxu0 %v9186_v60  ;;  %v9216_v62 = vpack.c.bf16 %v3982_v59, %v3978_v57  ;;  %v3991_v60 = vld [vmem:[#allocation14 + $0x3b8] sm:$0xff] }
 0x6bf   : > { %v9218_v7 = vpack.c.bf16 %v3991_v60, %v3987_v4  ;;  %v3916_v4 = vld [vmem:[#allocation14 + $0x160] sm:$0xff]  ;;  %v3921_v60 = vld [vmem:[#allocation14 + $0x188] sm:$0xff] }
 0x6c1   : > { %9189 = vmatpush1.bf16.msra.mxu0 %v9188_v35  ;;  %v3990_v35 = vld [vmem:[#allocation14 + $0x3b0] sm:$0xff] }
 0x6c2   : > { %9191 = vmatprep.subr.bf16.mxu0 %v9190_v1  ;;  %v9220_v10 = vpack.c.bf16 %v3990_v35, %v3986_v44  ;;  %v3999_v1 = vld [vmem:[#allocation14 + $0x3f8] sm:$0xff] }
 0x6c3   : > { %v9222_v9 = vpack.c.bf16 %v3999_v1, %v3995_v12  ;;  %v3924_v12 = vld [vmem:[#allocation14 + $0x1a0] sm:$0xff]  ;;  %v3929_v1 = vld [vmem:[#allocation14 + $0x1c8] sm:$0xff] }
 0x6c5   : > { %9193 = vmatpush1.bf16.msra.mxu0 %v9192_v17  ;;  %v3998_v17 = vld [vmem:[#allocation14 + $0x3f0] sm:$0xff] }
 0x6c6   : > { %9195 = vmatprep.subr.bf16.mxu0 %v9194_v30  ;;  %v9224_v28 = vpack.c.bf16 %v3998_v17, %v3994_v16 }
 0x6c9   : > { %9197 = vmatpush1.bf16.msra.mxu0 %v9196_v21 }
 0x6ca   : > { %9199 = vmatprep.subr.bf16.mxu0 %v9198_v36 }
 0x6cd   : > { %9201 = vmatpush1.bf16.msra.mxu0 %v9200_v6  ;;  %v3880_v6 = vld [vmem:[#allocation14 + $0x40] sm:$0xff] }
 0x6ce   : > { %9203 = vmatprep.subr.bf16.mxu0 %v9202_v56  ;;  %v3893_v56 = vld [vmem:[#allocation14 + $0xa8] sm:$0xff]  ;;  %v8976_v40 = vpack.c.bf16 %v3884_v37, %v3880_v6  ;;  %v3960_v37 = vld [vmem:[#allocation14 + $0x2c0] sm:$0xff] }
 0x6cf   : > { %v8978_v23 = vpack.c.bf16 %v3893_v56, %v3889_v38  ;;  %v3964_v38 = vld [vmem:[#allocation14 + $0x2e0] sm:$0xff]  ;;  %v3969_v56 = vld [vmem:[#allocation14 + $0x308] sm:$0xff] }
 0x6d1   : > { %9205 = vmatpush1.bf16.msra.mxu0 %v9204_v3  ;;  %v3888_v3 = vld [vmem:[#allocation14 + $0x80] sm:$0xff] }
 0x6d2   : > { %9207 = vmatprep.subr.bf16.mxu0 %v9206_v13  ;;  %v3901_v13 = vld [vmem:[#allocation14 + $0xe8] sm:$0xff]  ;;  %v8980_v46 = vpack.c.bf16 %v3892_v43, %v3888_v3  ;;  %v3968_v43 = vld [vmem:[#allocation14 + $0x300] sm:$0xff] }
 0x6d3   : > { %v8982_v32 = vpack.c.bf16 %v3901_v13, %v3897_v45  ;;  %v3972_v45 = vld [vmem:[#allocation14 + $0x320] sm:$0xff]  ;;  %v3977_v13 = vld [vmem:[#allocation14 + $0x348] sm:$0xff] }
 0x6d5   : > { %9209 = vmatpush1.bf16.msra.mxu0 %v9208_v52  ;;  %v3896_v52 = vld [vmem:[#allocation14 + $0xc0] sm:$0xff] }
 0x6d6   : > { %9211 = vmatprep.subr.bf16.mxu0 %v9210_v49  ;;  %v3909_v49 = vld [vmem:[#allocation14 + $0x128] sm:$0xff]  ;;  %v8984_v51 = vpack.c.bf16 %v3900_v8, %v3896_v52  ;;  %v3976_v8 = vld [vmem:[#allocation14 + $0x340] sm:$0xff] }
 0x6d7   : > { %v8986_v42 = vpack.c.bf16 %v3909_v49, %v3905_v33  ;;  %v3980_v33 = vld [vmem:[#allocation14 + $0x360] sm:$0xff]  ;;  %v3985_v49 = vld [vmem:[#allocation14 + $0x388] sm:$0xff] }
 0x6d9   : > { %9213 = vmatpush1.bf16.msra.mxu0 %v9212_v53  ;;  %v3904_v53 = vld [vmem:[#allocation14 + $0x100] sm:$0xff] }
 0x6da   : > { %9215 = vmatprep.subr.bf16.mxu0 %v9214_v55  ;;  %v3917_v55 = vld [vmem:[#allocation14 + $0x168] sm:$0xff]  ;;  %v8988_v57 = vpack.c.bf16 %v3908_v24, %v3904_v53  ;;  %v3984_v24 = vld [vmem:[#allocation14 + $0x380] sm:$0xff] }
 0x6db   : > { %v8990_v59 = vpack.c.bf16 %v3917_v55, %v3913_v54  ;;  %v3988_v54 = vld [vmem:[#allocation14 + $0x3a0] sm:$0xff]  ;;  %v3993_v55 = vld [vmem:[#allocation14 + $0x3c8] sm:$0xff] }
 0x6dd   : > { %9217 = vmatpush1.bf16.msra.mxu0 %v9216_v62  ;;  %v3912_v62 = vld [vmem:[#allocation14 + $0x140] sm:$0xff] }
 0x6de   : > { %9219 = vmatprep.subr.bf16.mxu0 %v9218_v7  ;;  %v3925_v7 = vld [vmem:[#allocation14 + $0x1a8] sm:$0xff]  ;;  %v8992_v44 = vpack.c.bf16 %v3916_v4, %v3912_v62  ;;  %v3992_v4 = vld [vmem:[#allocation14 + $0x3c0] sm:$0xff] }
 0x6df   : > { %v8994_v35 = vpack.c.bf16 %v3925_v7, %v3921_v60  ;;  %v3996_v60 = vld [vmem:[#allocation14 + $0x3e0] sm:$0xff] }
 0x6e0   : > { %v9032_v7 = vpack.c.bf16 %v3996_v60, %v3992_v4 }
 0x6e1   : > { %9221 = vmatpush1.bf16.msra.mxu0 %v9220_v10  ;;  %v3920_v10 = vld [vmem:[#allocation14 + $0x180] sm:$0xff] }
 0x6e2   : > { %9223 = vmatprep.subr.bf16.mxu0 %v9222_v9  ;;  %v3933_v9 = vld [vmem:[#allocation14 + $0x1e8] sm:$0xff]  ;;  %v8996_v16 = vpack.c.bf16 %v3924_v12, %v3920_v10  ;;  %v4003_v10 = vld [vmem:[#allocation14 + $0x418] sm:$0xff] }
 0x6e3   : > { %v8998_v17 = vpack.c.bf16 %v3933_v9, %v3929_v1  ;;  %v4007_v1 = vld [vmem:[#allocation14 + $0x438] sm:$0xff] }
 0x6e4   : > { %v9226_v9 = vpack.c.bf16 %v4007_v1, %v4003_v10  ;;  %v4038_v1 = vld [vmem:[#allocation14 + $0x530] sm:$0xff] }
 0x6e5   : > { %9225 = vmatpush1.bf16.msra.mxu0 %v9224_v28  ;;  %v3928_v28 = vld [vmem:[#allocation14 + $0x1c0] sm:$0xff] }
 0x6e6   : > { %9227 = vmatprep.subr.bf16.mxu0 %v9226_v9  ;;  %v4041_v9 = vld [vmem:[#allocation14 + $0x548] sm:$0xff] }
 0x6fb   : > { %v12360_v18 = vpop.f32.mrb[52].mxu0  ;;  %v12362_v19 = vpop.f32.mrb[20].mxu1 }
 0x6fc   : > { %v3353_v39 = vmax.f32 %v12360_v18, %v12362_v19  ;;  %v12366_v50 = vpop.f32.mrb[53].mxu0  ;;  %v12368_v2 = vpop.f32.mrb[21].mxu1  ;;  %v3644_v18 = vld [vmem:[#allocation13] sm:$0xff] }
 0x6fd   : > { %v3354_v22 = vmax.f32 %v12366_v50, %v12368_v2  ;;  %v3873_v19 = vld [vmem:[#allocation14 + $0x8] sm:$0xff]  ;;  %v3721_v50 = vld [vmem:[#allocation13 + $0x8] sm:$0xff] }
 0x6ff   : > { %v12372_v14 = vpop.f32.mrb[54].mxu0  ;;  %v12374_v41 = vpop.f32.mrb[22].mxu1 }
 0x700   : > { %v3355_v48 = vmax.f32 %v12372_v14, %v12374_v41  ;;  %v12378_v31 = vpop.f32.mrb[55].mxu0  ;;  %v12380_v25 = vpop.f32.mrb[23].mxu1  ;;  %v3876_v14 = vld [vmem:[#allocation14 + $0x20] sm:$0xff]  ;;  %v3881_v41 = vld [vmem:[#allocation14 + $0x48] sm:$0xff] }
 0x701   : > { %v3356_v27 = vmax.f32 %v12378_v31, %v12380_v25  ;;  %v3797_v31 = vld [vmem:[#allocation13 + $0x10] sm:$0xff] }
 0x77b   : > { %v3629_v29 = vpop.f32.mrb[56].mxu0 }
 0x77c   : > { %v3640_v30 = vmax.f32 %v3353_v39, %v3629_v29  ;;  %v3631_v20 = vpop.f32.mrb[57].mxu0  ;;  %v3877_v39 = vld [vmem:[#allocation14 + $0x28] sm:$0xff]  ;;  %v3932_v29 = vld [vmem:[#allocation14 + $0x1e0] sm:$0xff] }
 0x77d   : > { %v3641_v26 = vmax.f32 %v3354_v22, %v3631_v20  ;;  %v8970_v2 = vpack.c.bf16 %v3877_v39, %v3873_v19  ;;  %v3872_v22 = vld [vmem:[#allocation14] sm:$0xff]  ;;  %v3941_v20 = vld [vmem:[#allocation14 + $0x228] sm:$0xff] }
 0x77e   : > { %v8972_v25 = vpack.c.bf16 %v3876_v14, %v3872_v22  ;;  %v3944_v19 = vld [vmem:[#allocation14 + $0x240] sm:$0xff] }
 0x77f   : > { %v3635_v21 = vpop.f32.mrb[58].mxu0  ;;  %v3948_v39 = vld [vmem:[#allocation14 + $0x260] sm:$0xff] }
 0x780   : > { %v3642_v47 = vmax.f32 %v3355_v48, %v3635_v21  ;;  %v3637_v58 = vpop.f32.mrb[59].mxu0  ;;  %v3885_v48 = vld [vmem:[#allocation14 + $0x68] sm:$0xff]  ;;  %v9008_v22 = vpack.c.bf16 %v3948_v39, %v3944_v19 }
 0x781   : > { %v3643_v36 = vmax.f32 %v3356_v27, %v3637_v58  ;;  %v8974_v27 = vpack.c.bf16 %v3885_v48, %v3881_v41  ;;  %v3940_v58 = vld [vmem:[#allocation14 + $0x220] sm:$0xff] }
 0x782   : > { %v8960_v34 = vpack.c.bf16 %v3642_v47, %v3640_v30  ;;  %v3937_v30 = vld [vmem:[#allocation14 + $0x208] sm:$0xff]  ;;  %v3936_v47 = vld [vmem:[#allocation14 + $0x200] sm:$0xff] }
 0x783   : > { %v8958_v63 = vpack.c.bf16 %v3643_v36, %v3641_v26  ;;  %v9000_v26 = vpack.c.bf16 %v3932_v29, %v3928_v28  ;;  %v9002_v21 = vpack.c.bf16 %v3941_v20, %v3937_v30  ;;  %v3945_v36 = vld [vmem:[#allocation14 + $0x248] sm:$0xff]  ;;  %v3952_v41 = vld [vmem:[#allocation14 + $0x280] sm:$0xff]  ;;  %v4002_v28 = vld [vmem:[#allocation14 + $0x410] sm:$0xff] }
 0x784   : > { %v3956_v48 = vld [vmem:[#allocation14 + $0x2a0] sm:$0xff]  ;;  %v4006_v29 = vld [vmem:[#allocation14 + $0x430] sm:$0xff]  ;;  %v4009_v30 = vld [vmem:[#allocation14 + $0x448] sm:$0xff] }
 0x785   : > { %8959 = vmatprep.subr.bf16.mxu1 %v8958_v63  ;;  %v4013_v20 = vld [vmem:[#allocation14 + $0x468] sm:$0xff] }
 0x786   : > { %8961 = vmatpush1.bf16.msra.mxu1 %v8960_v34  ;;  %v9038_v19 = vpack.c.bf16 %v4013_v20, %v4009_v30  ;;  %v4040_v20 = vld [vmem:[#allocation14 + $0x540] sm:$0xff] }
 0x787   : > { %8963 = vmatprep.subr.bf16.mxu1 %v8958_v63 }
 0x789   : > { %7968 = vmatmul.mubr.msk.f32.vlgmr.msra.gmra.mrb[24].mxu1 %vm3645_vm2, %v3644_v18 }
 0x78a   : > { %8965 = vmatpush1.bf16.msra.mxu1 %v8960_v34  ;;  %3789 = vmatprep.mubr.f32.mxu1 %v11340_v0 }
 0x78b   : > { %8967 = vmatprep.subr.bf16.mxu1 %v8958_v63  ;;  %v9004_v63 = vpack.c.bf16 %v3940_v58, %v3936_v47 }
 0x78d   : > { %7969 = vmatmul.mubr.msk.f32.vlgmr.msra.gmra.mrb[26].mxu1 %vm3645_vm2, %v3721_v50  ;;  %v3953_v50 = vld [vmem:[#allocation14 + $0x288] sm:$0xff] }
 0x78e   : > { %8969 = vmatpush1.bf16.msra.mxu1 %v8960_v34  ;;  %3865 = vmatprep.mubr.f32.mxu1 %v11340_v0  ;;  %v3949_v34 = vld [vmem:[#allocation14 + $0x268] sm:$0xff] }
 0x78f   : > { %8971 = vmatprep.subr.bf16.mxu1 %v8970_v2  ;;  %v9006_v18 = vpack.c.bf16 %v3949_v34, %v3945_v36  ;;  %v3957_v2 = vld [vmem:[#allocation14 + $0x2a8] sm:$0xff]  ;;  %v9228_v36 = vpack.c.bf16 %v4006_v29, %v4002_v28  ;;  %v4008_v34 = vld [vmem:[#allocation14 + $0x440] sm:$0xff]  ;;  %v4047_v28 = vld [vmem:[#allocation14 + $0x578] sm:$0xff] }
 0x790   : > { %v9010_v14 = vpack.c.bf16 %v3957_v2, %v3953_v50  ;;  %v4010_v50 = vld [vmem:[#allocation14 + $0x450] sm:$0xff] }
 0x791   : > { %7970 = vmatmul.mubr.msk.f32.vlgmr.msra.gmra.mrb[28].mxu1 %vm3645_vm2, %v3797_v31  ;;  %v3961_v31 = vld [vmem:[#allocation14 + $0x2c8] sm:$0xff]  ;;  %v4014_v2 = vld [vmem:[#allocation14 + $0x470] sm:$0xff] }
 0x792   : > { %8973 = vmatpush1.bf16.msra.mxu1 %v8972_v25  ;;  %v3965_v25 = vld [vmem:[#allocation14 + $0x2e8] sm:$0xff] }
 0x793   : > { %8975 = vmatprep.subr.bf16.mxu1 %v8974_v27  ;;  %v9012_v27 = vpack.c.bf16 %v3956_v48, %v3952_v41  ;;  %v9014_v6 = vpack.c.bf16 %v3965_v25, %v3961_v31  ;;  %v4019_v41 = vld [vmem:[#allocation14 + $0x498] sm:$0xff]  ;;  %v9232_v25 = vpack.c.bf16 %v4014_v2, %v4010_v50  ;;  %v4048_v2 = vld [vmem:[#allocation14 + $0x580] sm:$0xff] }
 0x794   : > { %v4023_v48 = vld [vmem:[#allocation14 + $0x4b8] sm:$0xff] }
 0x796   : > { %8977 = vmatpush1.bf16.msra.mxu1 %v8976_v40  ;;  %v3973_v40 = vld [vmem:[#allocation14 + $0x328] sm:$0xff] }
 0x797   : > { %8979 = vmatprep.subr.bf16.mxu1 %v8978_v23  ;;  %v9016_v23 = vpack.c.bf16 %v3964_v38, %v3960_v37  ;;  %v9018_v3 = vpack.c.bf16 %v3973_v40, %v3969_v56  ;;  %v9234_v56 = vpack.c.bf16 %v4023_v48, %v4019_v41  ;;  %v4018_v40 = vld [vmem:[#allocation14 + $0x490] sm:$0xff] }
 0x798   : > { %v4050_v48 = vld [vmem:[#allocation14 + $0x590] sm:$0xff] }
 0x79a   : > { %8981 = vmatpush1.bf16.msra.mxu1 %v8980_v46  ;;  %v3981_v46 = vld [vmem:[#allocation14 + $0x368] sm:$0xff] }
 0x79b   : > { %8983 = vmatprep.subr.bf16.mxu1 %v8982_v32  ;;  %v9020_v32 = vpack.c.bf16 %v3972_v45, %v3968_v43  ;;  %v9022_v52 = vpack.c.bf16 %v3981_v46, %v3977_v13  ;;  %v4029_v45 = vld [vmem:[#allocation14 + $0x4e8] sm:$0xff]  ;;  %v4027_v13 = vld [vmem:[#allocation14 + $0x4d8] sm:$0xff] }
 0x79c   : > { %v4031_v46 = vld [vmem:[#allocation14 + $0x4f8] sm:$0xff] }
 0x79e   : > { %8985 = vmatpush1.bf16.msra.mxu1 %v8984_v51  ;;  %v3989_v51 = vld [vmem:[#allocation14 + $0x3a8] sm:$0xff] }
 0x79f   : > { %8987 = vmatprep.subr.bf16.mxu1 %v8986_v42  ;;  %v9024_v42 = vpack.c.bf16 %v3980_v33, %v3976_v8  ;;  %v9026_v53 = vpack.c.bf16 %v3989_v51, %v3985_v49  ;;  %v4024_v8 = vld [vmem:[#allocation14 + $0x4c0] sm:$0xff] }
 0x7a0   : > { %v4028_v33 = vld [vmem:[#allocation14 + $0x4e0] sm:$0xff] }
 0x7a1   : > { %v9048_v4 = vpack.c.bf16 %v4028_v33, %v4024_v8  ;;  %v4067_v8 = vld [vmem:[#allocation14 + $0x618] sm:$0xff] }
 0x7a2   : > { %8989 = vmatpush1.bf16.msra.mxu1 %v8988_v57  ;;  %v3997_v57 = vld [vmem:[#allocation14 + $0x3e8] sm:$0xff]  ;;  %v4071_v33 = vld [vmem:[#allocation14 + $0x638] sm:$0xff] }
 0x7a3   : > { %8991 = vmatprep.subr.bf16.mxu1 %v8990_v59  ;;  %v9028_v59 = vpack.c.bf16 %v3988_v54, %v3984_v24  ;;  %v9030_v62 = vpack.c.bf16 %v3997_v57, %v3993_v55  ;;  %v4030_v24 = vld [vmem:[#allocation14 + $0x4f0] sm:$0xff]  ;;  %v4033_v54 = vld [vmem:[#allocation14 + $0x508] sm:$0xff] }
 0x7a4   : > { %v4037_v57 = vld [vmem:[#allocation14 + $0x528] sm:$0xff] }
 0x7a6   : > { %8993 = vmatpush1.bf16.msra.mxu1 %v8992_v44  ;;  %v4001_v44 = vld [vmem:[#allocation14 + $0x408] sm:$0xff] }
 0x7a7   : > { %8995 = vmatprep.subr.bf16.mxu1 %v8994_v35  ;;  %v4005_v35 = vld [vmem:[#allocation14 + $0x428] sm:$0xff] }
 0x7a8   : > { %v9034_v12 = vpack.c.bf16 %v4005_v35, %v4001_v44  ;;  %v4036_v44 = vld [vmem:[#allocation14 + $0x520] sm:$0xff]  ;;  %v9050_v35 = vpack.c.bf16 %v4037_v57, %v4033_v54  ;;  %v9258_v57 = vpack.c.bf16 %v4071_v33, %v4067_v8  ;;  %v4098_v8 = vld [vmem:[#allocation14 + $0x710] sm:$0xff] }
 0x7a9   : > { %v4102_v33 = vld [vmem:[#allocation14 + $0x730] sm:$0xff] }
 0x7aa   : > { %8997 = vmatpush1.bf16.msra.mxu1 %v8996_v16  ;;  %v4000_v16 = vld [vmem:[#allocation14 + $0x400] sm:$0xff] }
 0x7ab   : > { %8999 = vmatprep.subr.bf16.mxu1 %v8998_v17  ;;  %v4004_v17 = vld [vmem:[#allocation14 + $0x420] sm:$0xff] }
 0x7ac   : > { %v9036_v58 = vpack.c.bf16 %v4004_v17, %v4000_v16  ;;  %v4045_v16 = vld [vmem:[#allocation14 + $0x568] sm:$0xff]  ;;  %v4043_v17 = vld [vmem:[#allocation14 + $0x558] sm:$0xff] }
 0x7ae   : > { %9001 = vmatpush1.bf16.msra.mxu1 %v9000_v26  ;;  %v4011_v26 = vld [vmem:[#allocation14 + $0x458] sm:$0xff] }
 0x7af   : > { %9003 = vmatprep.subr.bf16.mxu1 %v9002_v21  ;;  %v4015_v21 = vld [vmem:[#allocation14 + $0x478] sm:$0xff] }
 0x7b0   : > { %v9230_v39 = vpack.c.bf16 %v4015_v21, %v4011_v26  ;;  %v4044_v26 = vld [vmem:[#allocation14 + $0x560] sm:$0xff]  ;;  %v9054_v21 = vpack.c.bf16 %v4045_v16, %v4041_v9 }
 0x7b2   : > { %9005 = vmatpush1.bf16.msra.mxu1 %v9004_v63  ;;  %v4012_v63 = vld [vmem:[#allocation14 + $0x460] sm:$0xff] }
 0x7b3   : > { %9007 = vmatprep.subr.bf16.mxu1 %v9006_v18  ;;  %v9040_v31 = vpack.c.bf16 %v4012_v63, %v4008_v34  ;;  %v4049_v34 = vld [vmem:[#allocation14 + $0x588] sm:$0xff] }
 0x7b4   : > { %v4053_v63 = vld [vmem:[#allocation14 + $0x5a8] sm:$0xff] }
 0x7b6   : > { %9009 = vmatpush1.bf16.msra.mxu1 %v9008_v22  ;;  %v4017_v22 = vld [vmem:[#allocation14 + $0x488] sm:$0xff] }
 0x7b7   : > { %9011 = vmatprep.subr.bf16.mxu1 %v9010_v14  ;;  %v4021_v14 = vld [vmem:[#allocation14 + $0x4a8] sm:$0xff] }
 0x7b8   : > { %v9042_v38 = vpack.c.bf16 %v4021_v14, %v4017_v22  ;;  %v4052_v22 = vld [vmem:[#allocation14 + $0x5a0] sm:$0xff]  ;;  %v9058_v14 = vpack.c.bf16 %v4053_v63, %v4049_v34 }
 0x7ba   : > { %9013 = vmatpush1.bf16.msra.mxu1 %v9012_v27  ;;  %v4016_v27 = vld [vmem:[#allocation14 + $0x480] sm:$0xff] }
 0x7bb   : > { %9015 = vmatprep.subr.bf16.mxu1 %v9014_v6  ;;  %v4020_v6 = vld [vmem:[#allocation14 + $0x4a0] sm:$0xff] }
 0x7be   : > { %9017 = vmatpush1.bf16.msra.mxu1 %v9016_v23  ;;  %v4022_v23 = vld [vmem:[#allocation14 + $0x4b0] sm:$0xff] }
 0x7bf   : > { %9019 = vmatprep.subr.bf16.mxu1 %v9018_v3  ;;  %v4025_v3 = vld [vmem:[#allocation14 + $0x4c8] sm:$0xff] }
 0x7c0   : > { %v9046_v51 = vpack.c.bf16 %v4029_v45, %v4025_v3  ;;  %v4060_v3 = vld [vmem:[#allocation14 + $0x5e0] sm:$0xff] }
 0x7c2   : > { %9021 = vmatpush1.bf16.msra.mxu1 %v9020_v32  ;;  %v9044_v32 = vpack.c.bf16 %v4020_v6, %v4016_v27  ;;  %v4061_v27 = vld [vmem:[#allocation14 + $0x5e8] sm:$0xff]  ;;  %v4059_v6 = vld [vmem:[#allocation14 + $0x5d8] sm:$0xff] }
 0x7c3   : > { %9023 = vmatprep.subr.bf16.mxu1 %v9022_v52  ;;  %v9236_v52 = vpack.c.bf16 %v4022_v23, %v4018_v40  ;;  %v4056_v23 = vld [vmem:[#allocation14 + $0x5c0] sm:$0xff] }
 0x7c6   : > { %9025 = vmatpush1.bf16.msra.mxu1 %v9024_v42  ;;  %v9238_v42 = vpack.c.bf16 %v4031_v46, %v4027_v13  ;;  %v4058_v13 = vld [vmem:[#allocation14 + $0x5d0] sm:$0xff] }
 0x7c7   : > { %9027 = vmatprep.subr.bf16.mxu1 %v9026_v53  ;;  %v4026_v53 = vld [vmem:[#allocation14 + $0x4d0] sm:$0xff] }
 0x7c8   : > { %v9240_v60 = vpack.c.bf16 %v4030_v24, %v4026_v53  ;;  %v4062_v46 = vld [vmem:[#allocation14 + $0x5f0] sm:$0xff]  ;;  %v4064_v53 = vld [vmem:[#allocation14 + $0x600] sm:$0xff] }
 0x7c9   : > { %v4068_v24 = vld [vmem:[#allocation14 + $0x620] sm:$0xff] }
 0x7ca   : > { %9029 = vmatpush1.bf16.msra.mxu1 %v9028_v59  ;;  %v4035_v59 = vld [vmem:[#allocation14 + $0x518] sm:$0xff] }
 0x7cb   : > { %9031 = vmatprep.subr.bf16.mxu1 %v9030_v62  ;;  %v4039_v62 = vld [vmem:[#allocation14 + $0x538] sm:$0xff] }
 0x7cc   : > { %v9242_v10 = vpack.c.bf16 %v4039_v62, %v4035_v59  ;;  %v4066_v59 = vld [vmem:[#allocation14 + $0x610] sm:$0xff] }
 0x7cd   : > { %v4070_v62 = vld [vmem:[#allocation14 + $0x630] sm:$0xff] }
 0x7ce   : > { %9033 = vmatpush1.bf16.msra.mxu1 %v9032_v7  ;;  %v4032_v7 = vld [vmem:[#allocation14 + $0x500] sm:$0xff] }
 0x7cf   : > { %9035 = vmatprep.subr.bf16.mxu1 %v9034_v12  ;;  %v4034_v12 = vld [vmem:[#allocation14 + $0x510] sm:$0xff]  ;;  %v9052_v29 = vpack.c.bf16 %v4036_v44, %v4032_v7  ;;  %v4075_v7 = vld [vmem:[#allocation14 + $0x658] sm:$0xff] }
 0x7d0   : > { %v9244_v30 = vpack.c.bf16 %v4038_v1, %v4034_v12  ;;  %v4079_v44 = vld [vmem:[#allocation14 + $0x678] sm:$0xff]  ;;  %v4072_v12 = vld [vmem:[#allocation14 + $0x640] sm:$0xff] }
 0x7d1   : > { %v4076_v1 = vld [vmem:[#allocation14 + $0x660] sm:$0xff]  ;;  %v9262_v16 = vpack.c.bf16 %v4079_v44, %v4075_v7  ;;  %v4106_v7 = vld [vmem:[#allocation14 + $0x750] sm:$0xff] }
 0x7d2   : > { %v4110_v44 = vld [vmem:[#allocation14 + $0x770] sm:$0xff] }
 0x85c   : > { %v3715_v47 = vpop.f32.mrb[24].mxu1 }
 0x85d   : > { %v3717_v18 = vpop.f32.mrb[25].mxu1 }
 0x85e   : > { %4342 = vmatprep.mubr.f32.mxu1 %v3717_v18  ;;  %4555 = vmatprep.mubr.f32.mxu0 %v3717_v18  ;;  %v4051_v18 = vld [vmem:[#allocation14 + $0x598] sm:$0xff] }
 0x85f   : > { %4343 = vmatmul.mubr.f32.vlgmr.msra.gmra.mrb[30].mxu1 %v3715_v47  ;;  %4556 = vmatmul.mubr.f32.vlgmr.msra.gmra.mrb[60].mxu0 %v3715_v47  ;;  %v9246_v47 = vpack.c.bf16 %v4047_v28, %v4043_v17  ;;  %v4074_v17 = vld [vmem:[#allocation14 + $0x650] sm:$0xff] }
 0x860   : > { %9037 = vmatpush1.bf16.msra.mxu1 %v9036_v58  ;;  %9229 = vmatpush1.bf16.msra.mxu0 %v9228_v36  ;;  %v12401_v37 = vpop.f32.mrb[26].mxu1  ;;  %v4042_v58 = vld [vmem:[#allocation14 + $0x550] sm:$0xff] }
 0x861   : > { %9039 = vmatprep.subr.bf16.mxu1 %v9038_v19  ;;  %9231 = vmatprep.subr.bf16.mxu0 %v9230_v39  ;;  %v3793_v43 = vpop.f32.mrb[27].mxu1  ;;  %v4046_v36 = vld [vmem:[#allocation14 + $0x570] sm:$0xff]  ;;  %v4055_v19 = vld [vmem:[#allocation14 + $0x5b8] sm:$0xff]  ;;  %v9056_v39 = vpack.c.bf16 %v4044_v26, %v4040_v20 }
 0x862   : > { %4413 = vmatprep.mubr.f32.mxu1 %v3793_v43  ;;  %4626 = vmatprep.mubr.f32.mxu0 %v3793_v43  ;;  %v9248_v50 = vpack.c.bf16 %v4046_v36, %v4042_v58  ;;  %v9250_v41 = vpack.c.bf16 %v4055_v19, %v4051_v18  ;;  %v4078_v28 = vld [vmem:[#allocation14 + $0x670] sm:$0xff]  ;;  %v4083_v20 = vld [vmem:[#allocation14 + $0x698] sm:$0xff]  ;;  %v4080_v58 = vld [vmem:[#allocation14 + $0x680] sm:$0xff] }
 0x863   : > { %v4087_v26 = vld [vmem:[#allocation14 + $0x6b8] sm:$0xff]  ;;  %v4084_v36 = vld [vmem:[#allocation14 + $0x6a0] sm:$0xff]  ;;  %v4082_v18 = vld [vmem:[#allocation14 + $0x690] sm:$0xff] }
 0x864   : > { %9041 = vmatpush1.bf16.msra.mxu1 %v9040_v31  ;;  %9233 = vmatpush1.bf16.msra.mxu0 %v9232_v25  ;;  %v12403_v49 = vpop.f32.mrb[28].mxu1  ;;  %v4054_v31 = vld [vmem:[#allocation14 + $0x5b0] sm:$0xff]  ;;  %v4057_v25 = vld [vmem:[#allocation14 + $0x5c8] sm:$0xff]  ;;  %v9266_v63 = vpack.c.bf16 %v4087_v26, %v4083_v20 }
 0x865   : > { %9043 = vmatprep.subr.bf16.mxu1 %v9042_v38  ;;  %9235 = vmatprep.subr.bf16.mxu0 %v9234_v56  ;;  %v12405_v55 = vpop.f32.mrb[29].mxu1  ;;  %v4063_v38 = vld [vmem:[#allocation14 + $0x5f8] sm:$0xff]  ;;  %v9060_v56 = vpack.c.bf16 %v4052_v22, %v4048_v2  ;;  %v9252_v40 = vpack.c.bf16 %v4054_v31, %v4050_v48  ;;  %v9062_v43 = vpack.c.bf16 %v4061_v27, %v4057_v25  ;;  %v4086_v19 = vld [vmem:[#allocation14 + $0x6b0] sm:$0xff]  ;;  %v4088_v48 = vld [vmem:[#allocation14 + $0x6c0] sm:$0xff] }
 0x866   : > { %v9254_v45 = vpack.c.bf16 %v4063_v38, %v4059_v6  ;;  %v4091_v2 = vld [vmem:[#allocation14 + $0x6d8] sm:$0xff]  ;;  %v4092_v31 = vld [vmem:[#allocation14 + $0x6e0] sm:$0xff]  ;;  %v4090_v6 = vld [vmem:[#allocation14 + $0x6d0] sm:$0xff] }
 0x867   : > { %v4095_v22 = vld [vmem:[#allocation14 + $0x6f8] sm:$0xff]  ;;  %v4094_v38 = vld [vmem:[#allocation14 + $0x6f0] sm:$0xff] }
 0x868   : > { %9045 = vmatpush1.bf16.msra.mxu1 %v9044_v32  ;;  %9237 = vmatpush1.bf16.msra.mxu0 %v9236_v52  ;;  %v4065_v32 = vld [vmem:[#allocation14 + $0x608] sm:$0xff]  ;;  %v9270_v27 = vpack.c.bf16 %v4095_v22, %v4091_v2  ;;  %v4114_v20 = vld [vmem:[#allocation14 + $0x790] sm:$0xff] }
 0x869   : > { %9047 = vmatprep.subr.bf16.mxu1 %v9046_v51  ;;  %9239 = vmatprep.subr.bf16.mxu0 %v9238_v42  ;;  %v4069_v52 = vld [vmem:[#allocation14 + $0x628] sm:$0xff]  ;;  %v9064_v51 = vpack.c.bf16 %v4060_v3, %v4056_v23  ;;  %v9256_v42 = vpack.c.bf16 %v4062_v46, %v4058_v13  ;;  %v4099_v23 = vld [vmem:[#allocation14 + $0x718] sm:$0xff]  ;;  %v4096_v13 = vld [vmem:[#allocation14 + $0x700] sm:$0xff] }
 0x86a   : > { %v9066_v54 = vpack.c.bf16 %v4069_v52, %v4065_v32  ;;  %v4103_v3 = vld [vmem:[#allocation14 + $0x738] sm:$0xff]  ;;  %v4100_v46 = vld [vmem:[#allocation14 + $0x720] sm:$0xff]  ;;  %v4118_v26 = vld [vmem:[#allocation14 + $0x7b0] sm:$0xff] }
 0x86b   : > { %v9274_v52 = vpack.c.bf16 %v4103_v3, %v4099_v23  ;;  %v4122_v2 = vld [vmem:[#allocation14 + $0x7d0] sm:$0xff] }
 0x86c   : > { %9049 = vmatpush1.bf16.msra.mxu1 %v9048_v4  ;;  %9241 = vmatpush1.bf16.msra.mxu0 %v9240_v60  ;;  %v4073_v4 = vld [vmem:[#allocation14 + $0x648] sm:$0xff]  ;;  %v4126_v22 = vld [vmem:[#allocation14 + $0x7f0] sm:$0xff] }
 0x86d   : > { %9051 = vmatprep.subr.bf16.mxu1 %v9050_v35  ;;  %9243 = vmatprep.subr.bf16.mxu0 %v9242_v10  ;;  %v4077_v60 = vld [vmem:[#allocation14 + $0x668] sm:$0xff]  ;;  %v9068_v35 = vpack.c.bf16 %v4068_v24, %v4064_v53  ;;  %v9260_v10 = vpack.c.bf16 %v4070_v62, %v4066_v59  ;;  %v4107_v53 = vld [vmem:[#allocation14 + $0x758] sm:$0xff]  ;;  %v4104_v59 = vld [vmem:[#allocation14 + $0x740] sm:$0xff] }
 0x86e   : > { %v9070_v9 = vpack.c.bf16 %v4077_v60, %v4073_v4  ;;  %v4111_v24 = vld [vmem:[#allocation14 + $0x778] sm:$0xff]  ;;  %v4108_v62 = vld [vmem:[#allocation14 + $0x760] sm:$0xff]  ;;  %v4130_v23 = vld [vmem:[#allocation14 + $0x810] sm:$0xff] }
 0x86f   : > { %v9278_v60 = vpack.c.bf16 %v4111_v24, %v4107_v53  ;;  %v4134_v3 = vld [vmem:[#allocation14 + $0x830] sm:$0xff] }
 0x870   : > { %9053 = vmatpush1.bf16.msra.mxu1 %v9052_v29  ;;  %9245 = vmatpush1.bf16.msra.mxu0 %v9244_v30  ;;  %v4081_v29 = vld [vmem:[#allocation14 + $0x688] sm:$0xff]  ;;  %v4138_v53 = vld [vmem:[#allocation14 + $0x850] sm:$0xff] }
 0x871   : > { %9055 = vmatprep.subr.bf16.mxu1 %v9054_v21  ;;  %9247 = vmatprep.subr.bf16.mxu0 %v9246_v47  ;;  %v4085_v30 = vld [vmem:[#allocation14 + $0x6a8] sm:$0xff]  ;;  %v9072_v21 = vpack.c.bf16 %v4076_v1, %v4072_v12  ;;  %v9264_v47 = vpack.c.bf16 %v4078_v28, %v4074_v17  ;;  %v4115_v12 = vld [vmem:[#allocation14 + $0x798] sm:$0xff]  ;;  %v4112_v17 = vld [vmem:[#allocation14 + $0x780] sm:$0xff] }
 0x872   : > { %v9074_v34 = vpack.c.bf16 %v4085_v30, %v4081_v29  ;;  %v4119_v1 = vld [vmem:[#allocation14 + $0x7b8] sm:$0xff]  ;;  %v4116_v28 = vld [vmem:[#allocation14 + $0x7a0] sm:$0xff]  ;;  %v4142_v24 = vld [vmem:[#allocation14 + $0x870] sm:$0xff] }
 0x873   : > { %v9282_v30 = vpack.c.bf16 %v4119_v1, %v4115_v12  ;;  %v4146_v12 = vld [vmem:[#allocation14 + $0x890] sm:$0xff] }
 0x874   : > { %9057 = vmatpush1.bf16.msra.mxu1 %v9056_v39  ;;  %9249 = vmatpush1.bf16.msra.mxu0 %v9248_v50  ;;  %v4089_v39 = vld [vmem:[#allocation14 + $0x6c8] sm:$0xff]  ;;  %v4150_v1 = vld [vmem:[#allocation14 + $0x8b0] sm:$0xff] }
 0x875   : > { %9059 = vmatprep.subr.bf16.mxu1 %v9058_v14  ;;  %9251 = vmatprep.subr.bf16.mxu0 %v9250_v41  ;;  %v4093_v50 = vld [vmem:[#allocation14 + $0x6e8] sm:$0xff]  ;;  %v9076_v14 = vpack.c.bf16 %v4084_v36, %v4080_v58  ;;  %v9268_v41 = vpack.c.bf16 %v4086_v19, %v4082_v18  ;;  %v4123_v58 = vld [vmem:[#allocation14 + $0x7d8] sm:$0xff]  ;;  %v4120_v18 = vld [vmem:[#allocation14 + $0x7c0] sm:$0xff] }
 0x876   : > { %v9078_v25 = vpack.c.bf16 %v4093_v50, %v4089_v39  ;;  %v4127_v36 = vld [vmem:[#allocation14 + $0x7f8] sm:$0xff]  ;;  %v4124_v19 = vld [vmem:[#allocation14 + $0x7e0] sm:$0xff] }
 0x877   : > { %v9286_v50 = vpack.c.bf16 %v4127_v36, %v4123_v58  ;;  %v4158_v58 = vld [vmem:[#allocation14 + $0x8f0] sm:$0xff]  ;;  %v4161_v36 = vld [vmem:[#allocation14 + $0x908] sm:$0xff] }
 0x878   : > { %9061 = vmatpush1.bf16.msra.mxu1 %v9060_v56  ;;  %9253 = vmatpush1.bf16.msra.mxu0 %v9252_v40  ;;  %v4097_v56 = vld [vmem:[#allocation14 + $0x708] sm:$0xff] }
 0x879   : > { %9063 = vmatprep.subr.bf16.mxu1 %v9062_v43  ;;  %9255 = vmatprep.subr.bf16.mxu0 %v9254_v45  ;;  %v4101_v40 = vld [vmem:[#allocation14 + $0x728] sm:$0xff]  ;;  %v9080_v43 = vpack.c.bf16 %v4092_v31, %v4088_v48  ;;  %v9272_v45 = vpack.c.bf16 %v4094_v38, %v4090_v6  ;;  %v4131_v48 = vld [vmem:[#allocation14 + $0x818] sm:$0xff]  ;;  %v4128_v6 = vld [vmem:[#allocation14 + $0x800] sm:$0xff] }
 0x87a   : > { %v9082_v32 = vpack.c.bf16 %v4101_v40, %v4097_v56  ;;  %v4135_v31 = vld [vmem:[#allocation14 + $0x838] sm:$0xff]  ;;  %v4132_v38 = vld [vmem:[#allocation14 + $0x820] sm:$0xff] }
 0x87b   : > { %v9290_v40 = vpack.c.bf16 %v4135_v31, %v4131_v48  ;;  %v4169_v48 = vld [vmem:[#allocation14 + $0x948] sm:$0xff] }
 0x87c   : > { %9065 = vmatpush1.bf16.msra.mxu1 %v9064_v51  ;;  %9257 = vmatpush1.bf16.msra.mxu0 %v9256_v42  ;;  %v4105_v51 = vld [vmem:[#allocation14 + $0x748] sm:$0xff] }
 0x87d   : > { %9067 = vmatprep.subr.bf16.mxu1 %v9066_v54  ;;  %9259 = vmatprep.subr.bf16.mxu0 %v9258_v57  ;;  %v4109_v42 = vld [vmem:[#allocation14 + $0x768] sm:$0xff]  ;;  %v9084_v54 = vpack.c.bf16 %v4100_v46, %v4096_v13  ;;  %v9276_v57 = vpack.c.bf16 %v4102_v33, %v4098_v8  ;;  %v4139_v13 = vld [vmem:[#allocation14 + $0x858] sm:$0xff]  ;;  %v4136_v8 = vld [vmem:[#allocation14 + $0x840] sm:$0xff] }
 0x87e   : > { %v9086_v4 = vpack.c.bf16 %v4109_v42, %v4105_v51  ;;  %v4143_v46 = vld [vmem:[#allocation14 + $0x878] sm:$0xff]  ;;  %v4140_v33 = vld [vmem:[#allocation14 + $0x860] sm:$0xff]  ;;  %v4173_v31 = vld [vmem:[#allocation14 + $0x968] sm:$0xff] }
 0x87f   : > { %v9294_v42 = vpack.c.bf16 %v4143_v46, %v4139_v13  ;;  %v4177_v13 = vld [vmem:[#allocation14 + $0x988] sm:$0xff] }
 0x880   : > { %9069 = vmatpush1.bf16.msra.mxu1 %v9068_v35  ;;  %9261 = vmatpush1.bf16.msra.mxu0 %v9260_v10  ;;  %v4113_v35 = vld [vmem:[#allocation14 + $0x788] sm:$0xff] }
 0x881   : > { %9071 = vmatprep.subr.bf16.mxu1 %v9070_v9  ;;  %9263 = vmatprep.subr.bf16.mxu0 %v9262_v16  ;;  %v4117_v10 = vld [vmem:[#allocation14 + $0x7a8] sm:$0xff]  ;;  %v9088_v9 = vpack.c.bf16 %v4108_v62, %v4104_v59  ;;  %v9280_v16 = vpack.c.bf16 %v4110_v44, %v4106_v7  ;;  %v4147_v59 = vld [vmem:[#allocation14 + $0x898] sm:$0xff]  ;;  %v4144_v7 = vld [vmem:[#allocation14 + $0x880] sm:$0xff] }
 0x882   : > { %v9090_v29 = vpack.c.bf16 %v4117_v10, %v4113_v35  ;;  %v4151_v62 = vld [vmem:[#allocation14 + $0x8b8] sm:$0xff]  ;;  %v4148_v44 = vld [vmem:[#allocation14 + $0x8a0] sm:$0xff]  ;;  %v4181_v46 = vld [vmem:[#allocation14 + $0x9a8] sm:$0xff] }
 0x883   : > { %v9298_v10 = vpack.c.bf16 %v4151_v62, %v4147_v59  ;;  %v4185_v59 = vld [vmem:[#allocation14 + $0x9c8] sm:$0xff] }
 0x884   : > { %9073 = vmatpush1.bf16.msra.mxu1 %v9072_v21  ;;  %9265 = vmatpush1.bf16.msra.mxu0 %v9264_v47  ;;  %v4121_v21 = vld [vmem:[#allocation14 + $0x7c8] sm:$0xff] }
 0x885   : > { %9075 = vmatprep.subr.bf16.mxu1 %v9074_v34  ;;  %9267 = vmatprep.subr.bf16.mxu0 %v9266_v63  ;;  %v4125_v47 = vld [vmem:[#allocation14 + $0x7e8] sm:$0xff]  ;;  %v9092_v34 = vpack.c.bf16 %v4116_v28, %v4112_v17  ;;  %v9284_v63 = vpack.c.bf16 %v4118_v26, %v4114_v20  ;;  %v4155_v17 = vld [vmem:[#allocation14 + $0x8d8] sm:$0xff]  ;;  %v4156_v20 = vld [vmem:[#allocation14 + $0x8e0] sm:$0xff] }
 0x886   : > { %v9094_v39 = vpack.c.bf16 %v4125_v47, %v4121_v21  ;;  %v4159_v28 = vld [vmem:[#allocation14 + $0x8f8] sm:$0xff]  ;;  %v4154_v47 = vld [vmem:[#allocation14 + $0x8d0] sm:$0xff]  ;;  %v4189_v62 = vld [vmem:[#allocation14 + $0x9e8] sm:$0xff] }
 0x887   : > { %v9302_v21 = vpack.c.bf16 %v4159_v28, %v4155_v17  ;;  %v4193_v17 = vld [vmem:[#allocation14 + $0xa08] sm:$0xff] }
 0x888   : > { %9077 = vmatpush1.bf16.msra.mxu1 %v9076_v14  ;;  %9269 = vmatpush1.bf16.msra.mxu0 %v9268_v41  ;;  %v4129_v14 = vld [vmem:[#allocation14 + $0x808] sm:$0xff] }
 0x889   : > { %9079 = vmatprep.subr.bf16.mxu1 %v9078_v25  ;;  %9271 = vmatprep.subr.bf16.mxu0 %v9270_v27  ;;  %v4133_v41 = vld [vmem:[#allocation14 + $0x828] sm:$0xff]  ;;  %v9096_v25 = vpack.c.bf16 %v4124_v19, %v4120_v18  ;;  %v9288_v27 = vpack.c.bf16 %v4126_v22, %v4122_v2  ;;  %v4167_v18 = vld [vmem:[#allocation14 + $0x938] sm:$0xff] }
 0x88a   : > { %v9098_v56 = vpack.c.bf16 %v4133_v41, %v4129_v14  ;;  %v4162_v14 = vld [vmem:[#allocation14 + $0x910] sm:$0xff]  ;;  %v4197_v28 = vld [vmem:[#allocation14 + $0xa28] sm:$0xff] }
 0x88b   : > { %v4166_v41 = vld [vmem:[#allocation14 + $0x930] sm:$0xff] }
 0x88c   : > { %9081 = vmatpush1.bf16.msra.mxu1 %v9080_v43  ;;  %9273 = vmatpush1.bf16.msra.mxu0 %v9272_v45  ;;  %v4137_v43 = vld [vmem:[#allocation14 + $0x848] sm:$0xff] }
 0x88d   : > { %9083 = vmatprep.subr.bf16.mxu1 %v9082_v32  ;;  %9275 = vmatprep.subr.bf16.mxu0 %v9274_v52  ;;  %v4141_v45 = vld [vmem:[#allocation14 + $0x868] sm:$0xff]  ;;  %v9100_v32 = vpack.c.bf16 %v4132_v38, %v4128_v6  ;;  %v9292_v52 = vpack.c.bf16 %v4134_v3, %v4130_v23  ;;  %v9308_v38 = vpack.c.bf16 %v4166_v41, %v4162_v14 }
 0x88e   : > { %v9102_v51 = vpack.c.bf16 %v4141_v45, %v4137_v43  ;;  %v9118_v23 = vpack.c.bf16 %v4173_v31, %v4169_v48  ;;  %v4170_v43 = vld [vmem:[#allocation14 + $0x950] sm:$0xff] }
 0x88f   : > { %v4174_v45 = vld [vmem:[#allocation14 + $0x970] sm:$0xff] }
 0x890   : > { %9085 = vmatpush1.bf16.msra.mxu1 %v9084_v54  ;;  %9277 = vmatpush1.bf16.msra.mxu0 %v9276_v57  ;;  %v4145_v54 = vld [vmem:[#allocation14 + $0x888] sm:$0xff]  ;;  %v4202_v48 = vld [vmem:[#allocation14 + $0xa50] sm:$0xff] }
 0x891   : > { %9087 = vmatprep.subr.bf16.mxu1 %v9086_v4  ;;  %9279 = vmatprep.subr.bf16.mxu0 %v9278_v60  ;;  %v4149_v57 = vld [vmem:[#allocation14 + $0x8a8] sm:$0xff]  ;;  %v9104_v4 = vpack.c.bf16 %v4140_v33, %v4136_v8  ;;  %v9296_v60 = vpack.c.bf16 %v4142_v24, %v4138_v53  ;;  %v9312_v33 = vpack.c.bf16 %v4174_v45, %v4170_v43  ;;  %v4206_v31 = vld [vmem:[#allocation14 + $0xa70] sm:$0xff] }
 0x892   : > { %v9106_v35 = vpack.c.bf16 %v4149_v57, %v4145_v54  ;;  %v9122_v53 = vpack.c.bf16 %v4181_v46, %v4177_v13  ;;  %v4178_v54 = vld [vmem:[#allocation14 + $0x990] sm:$0xff] }
 0x893   : > { %v4182_v57 = vld [vmem:[#allocation14 + $0x9b0] sm:$0xff] }
 0x894   : > { %9089 = vmatpush1.bf16.msra.mxu1 %v9088_v9  ;;  %9281 = vmatpush1.bf16.msra.mxu0 %v9280_v16  ;;  %v4153_v9 = vld [vmem:[#allocation14 + $0x8c8] sm:$0xff]  ;;  %v4210_v13 = vld [vmem:[#allocation14 + $0xa90] sm:$0xff] }
 0x895   : > { %9091 = vmatprep.subr.bf16.mxu1 %v9090_v29  ;;  %9283 = vmatprep.subr.bf16.mxu0 %v9282_v30  ;;  %v4157_v16 = vld [vmem:[#allocation14 + $0x8e8] sm:$0xff]  ;;  %v9300_v29 = vpack.c.bf16 %v4150_v1, %v4146_v12  ;;  %v4152_v30 = vld [vmem:[#allocation14 + $0x8c0] sm:$0xff]  ;;  %v9126_v12 = vpack.c.bf16 %v4189_v62, %v4185_v59  ;;  %v4214_v46 = vld [vmem:[#allocation14 + $0xab0] sm:$0xff] }
 0x896   : > { %v9110_v26 = vpack.c.bf16 %v4157_v16, %v4153_v9  ;;  %v9112_v19 = vpack.c.bf16 %v4156_v20, %v4152_v30  ;;  %v4186_v9 = vld [vmem:[#allocation14 + $0x9d0] sm:$0xff] }
 0x897   : > { %v4190_v16 = vld [vmem:[#allocation14 + $0x9f0] sm:$0xff] }
 0x898   : > { %9093 = vmatpush1.bf16.msra.mxu1 %v9092_v34  ;;  %9285 = vmatpush1.bf16.msra.mxu0 %v9284_v63  ;;  %v4165_v34 = vld [vmem:[#allocation14 + $0x928] sm:$0xff]  ;;  %v4163_v63 = vld [vmem:[#allocation14 + $0x918] sm:$0xff]  ;;  %v9320_v20 = vpack.c.bf16 %v4190_v16, %v4186_v9  ;;  %v4218_v59 = vld [vmem:[#allocation14 + $0xad0] sm:$0xff] }
 0x899   : > { %9095 = vmatprep.subr.bf16.mxu1 %v9094_v39  ;;  %9287 = vmatprep.subr.bf16.mxu0 %v9286_v50  ;;  %v4160_v39 = vld [vmem:[#allocation14 + $0x900] sm:$0xff]  ;;  %v9114_v2 = vpack.c.bf16 %v4165_v34, %v4161_v36  ;;  %v9306_v22 = vpack.c.bf16 %v4167_v18, %v4163_v63  ;;  %v4194_v36 = vld [vmem:[#allocation14 + $0xa10] sm:$0xff]  ;;  %v4201_v63 = vld [vmem:[#allocation14 + $0xa48] sm:$0xff] }
 0x89a   : > { %v4164_v50 = vld [vmem:[#allocation14 + $0x920] sm:$0xff]  ;;  %v4198_v34 = vld [vmem:[#allocation14 + $0xa30] sm:$0xff]  ;;  %v4205_v18 = vld [vmem:[#allocation14 + $0xa68] sm:$0xff] }
 0x89b   : > { %v9116_v6 = vpack.c.bf16 %v4164_v50, %v4160_v39  ;;  %v9324_v50 = vpack.c.bf16 %v4198_v34, %v4194_v36  ;;  %v9134_v14 = vpack.c.bf16 %v4205_v18, %v4201_v63  ;;  %v4222_v62 = vld [vmem:[#allocation14 + $0xaf0] sm:$0xff] }
 0x89c   : > { %9097 = vmatpush1.bf16.msra.mxu1 %v9096_v25  ;;  %9289 = vmatpush1.bf16.msra.mxu0 %v9288_v27  ;;  %v4171_v25 = vld [vmem:[#allocation14 + $0x958] sm:$0xff]  ;;  %v4234_v63 = vld [vmem:[#allocation14 + $0xb50] sm:$0xff] }
 0x89d   : > { %9099 = vmatprep.subr.bf16.mxu1 %v9098_v56  ;;  %9291 = vmatprep.subr.bf16.mxu0 %v9290_v40  ;;  %v4175_v27 = vld [vmem:[#allocation14 + $0x978] sm:$0xff]  ;;  %v4168_v56 = vld [vmem:[#allocation14 + $0x940] sm:$0xff]  ;;  %v4238_v18 = vld [vmem:[#allocation14 + $0xb70] sm:$0xff] }
 0x89e   : > { %v4172_v40 = vld [vmem:[#allocation14 + $0x960] sm:$0xff]  ;;  %v9310_v3 = vpack.c.bf16 %v4175_v27, %v4171_v25  ;;  %v4209_v25 = vld [vmem:[#allocation14 + $0xa88] sm:$0xff] }
 0x89f   : > { %4414 = vmatmul.mubr.f32.vlgmr.msra.gmra.mrb[30].mxu1 %v12401_v37  ;;  %4627 = vmatmul.mubr.f32.vlgmr.msra.gmra.mrb[60].mxu0 %v12401_v37  ;;  %v9108_v37 = vpack.c.bf16 %v4148_v44, %v4144_v7  ;;  %v9120_v8 = vpack.c.bf16 %v4172_v40, %v4168_v56  ;;  %v9316_v44 = vpack.c.bf16 %v4182_v57, %v4178_v54  ;;  %v4213_v27 = vld [vmem:[#allocation14 + $0xaa8] sm:$0xff] }
 0x8a0   : > { %9101 = vmatpush1.bf16.msra.mxu1 %v9100_v32  ;;  %9293 = vmatpush1.bf16.msra.mxu0 %v9292_v52  ;;  %v4179_v32 = vld [vmem:[#allocation14 + $0x998] sm:$0xff]  ;;  %v9328_v40 = vpack.c.bf16 %v4206_v31, %v4202_v48  ;;  %v9138_v43 = vpack.c.bf16 %v4213_v27, %v4209_v25  ;;  %v4242_v25 = vld [vmem:[#allocation14 + $0xb90] sm:$0xff] }
 0x8a1   : > { %9103 = vmatprep.subr.bf16.mxu1 %v9102_v51  ;;  %9295 = vmatprep.subr.bf16.mxu0 %v9294_v42  ;;  %v4183_v52 = vld [vmem:[#allocation14 + $0x9b8] sm:$0xff]  ;;  %v4176_v51 = vld [vmem:[#allocation14 + $0x980] sm:$0xff]  ;;  %v4246_v27 = vld [vmem:[#allocation14 + $0xbb0] sm:$0xff] }
 0x8a2   : > { %4484 = vmatprep.mubr.f32.mxu1 %v12405_v55  ;;  %4697 = vmatprep.mubr.f32.mxu0 %v12405_v55  ;;  %v9304_v55 = vpack.c.bf16 %v4158_v58, %v4154_v47  ;;  %v4180_v42 = vld [vmem:[#allocation14 + $0x9a0] sm:$0xff]  ;;  %v9314_v24 = vpack.c.bf16 %v4183_v52, %v4179_v32  ;;  %v9130_v47 = vpack.c.bf16 %v4197_v28, %v4193_v17  ;;  %v4217_v32 = vld [vmem:[#allocation14 + $0xac8] sm:$0xff]  ;;  %v4226_v17 = vld [vmem:[#allocation14 + $0xb10] sm:$0xff] }
 0x8a3   : > { %v9124_v7 = vpack.c.bf16 %v4180_v42, %v4176_v51  ;;  %v4221_v52 = vld [vmem:[#allocation14 + $0xae8] sm:$0xff]  ;;  %v9332_v42 = vpack.c.bf16 %v4214_v46, %v4210_v13  ;;  %v4230_v28 = vld [vmem:[#allocation14 + $0xb30] sm:$0xff]  ;;  %v4252_v46 = vld [vmem:[#allocation14 + $0xbe0] sm:$0xff] }
 0x8a4   : > { %9105 = vmatpush1.bf16.msra.mxu1 %v9104_v4  ;;  %9297 = vmatpush1.bf16.msra.mxu0 %v9296_v60  ;;  %v4187_v4 = vld [vmem:[#allocation14 + $0x9d8] sm:$0xff]  ;;  %v9142_v54 = vpack.c.bf16 %v4221_v52, %v4217_v32  ;;  %v4250_v32 = vld [vmem:[#allocation14 + $0xbd0] sm:$0xff] }
 0x8a5   : > { %9107 = vmatprep.subr.bf16.mxu1 %v9106_v35  ;;  %9299 = vmatprep.subr.bf16.mxu0 %v9298_v10  ;;  %v4191_v60 = vld [vmem:[#allocation14 + $0x9f8] sm:$0xff]  ;;  %v4184_v35 = vld [vmem:[#allocation14 + $0x9c0] sm:$0xff]  ;;  %v4254_v52 = vld [vmem:[#allocation14 + $0xbf0] sm:$0xff] }
 0x8a6   : > { %v4188_v10 = vld [vmem:[#allocation14 + $0x9e0] sm:$0xff]  ;;  %v9318_v1 = vpack.c.bf16 %v4191_v60, %v4187_v4  ;;  %v4225_v4 = vld [vmem:[#allocation14 + $0xb08] sm:$0xff] }
 0x8a7   : > { %v9128_v30 = vpack.c.bf16 %v4188_v10, %v4184_v35  ;;  %v4229_v60 = vld [vmem:[#allocation14 + $0xb28] sm:$0xff]  ;;  %v9336_v10 = vpack.c.bf16 %v4222_v62, %v4218_v59  ;;  %v4941_v59 = vld [vmem:[#allocation19 + $0x38] sm:$0xff] }
 0x8a8   : > { %9109 = vmatpush1.bf16.msra.mxu1 %v9108_v37  ;;  %9301 = vmatpush1.bf16.msra.mxu0 %v9300_v29  ;;  %v4195_v37 = vld [vmem:[#allocation14 + $0xa18] sm:$0xff]  ;;  %v9146_v9 = vpack.c.bf16 %v4229_v60, %v4225_v4 }
 0x8a9   : > { %9111 = vmatprep.subr.bf16.mxu1 %v9110_v26  ;;  %9303 = vmatprep.subr.bf16.mxu0 %v9302_v21  ;;  %v4199_v29 = vld [vmem:[#allocation14 + $0xa38] sm:$0xff]  ;;  %v4192_v26 = vld [vmem:[#allocation14 + $0xa00] sm:$0xff] }
 0x8aa   : > { %v4196_v21 = vld [vmem:[#allocation14 + $0xa20] sm:$0xff]  ;;  %v9322_v58 = vpack.c.bf16 %v4199_v29, %v4195_v37  ;;  %v4233_v37 = vld [vmem:[#allocation14 + $0xb48] sm:$0xff] }
 0x8ab   : > { %v9132_v39 = vpack.c.bf16 %v4196_v21, %v4192_v26  ;;  %v4237_v29 = vld [vmem:[#allocation14 + $0xb68] sm:$0xff]  ;;  %v9340_v21 = vpack.c.bf16 %v4230_v28, %v4226_v17  ;;  %v4938_v60 = vld [vmem:[#allocation19 + $0x20] sm:$0xff] }
 0x8ac   : > { %9113 = vmatpush1.bf16.msra.mxu1 %v9112_v19  ;;  %9305 = vmatpush1.bf16.msra.mxu0 %v9304_v55  ;;  %v4203_v19 = vld [vmem:[#allocation14 + $0xa58] sm:$0xff]  ;;  %v9150_v36 = vpack.c.bf16 %v4237_v29, %v4233_v37  ;;  %v4948_v29 = vld [vmem:[#allocation19 + $0x70] sm:$0xff] }
 0x8ad   : > { %9115 = vmatprep.subr.bf16.mxu1 %v9114_v2  ;;  %9307 = vmatprep.subr.bf16.mxu0 %v9306_v22  ;;  %v4207_v55 = vld [vmem:[#allocation14 + $0xa78] sm:$0xff]  ;;  %v4200_v2 = vld [vmem:[#allocation14 + $0xa40] sm:$0xff] }
 0x8ae   : > { %v4204_v22 = vld [vmem:[#allocation14 + $0xa60] sm:$0xff]  ;;  %v9326_v41 = vpack.c.bf16 %v4207_v55, %v4203_v19  ;;  %v4241_v19 = vld [vmem:[#allocation14 + $0xb88] sm:$0xff] }
 0x8af   : > { %v9136_v56 = vpack.c.bf16 %v4204_v22, %v4200_v2  ;;  %v4245_v55 = vld [vmem:[#allocation14 + $0xba8] sm:$0xff]  ;;  %v9344_v22 = vpack.c.bf16 %v4238_v18, %v4234_v63  ;;  %v4946_v37 = vld [vmem:[#allocation19 + $0x60] sm:$0xff] }
 0x8b0   : > { %9117 = vmatpush1.bf16.msra.mxu1 %v9116_v6  ;;  %9309 = vmatpush1.bf16.msra.mxu0 %v9308_v38  ;;  %v4211_v6 = vld [vmem:[#allocation14 + $0xa98] sm:$0xff]  ;;  %v9154_v48 = vpack.c.bf16 %v4245_v55, %v4241_v19  ;;  %v4956_v55 = vld [vmem:[#allocation19 + $0xb0] sm:$0xff] }
 0x8b1   : > { %9119 = vmatprep.subr.bf16.mxu1 %v9118_v23  ;;  %9311 = vmatprep.subr.bf16.mxu0 %v9310_v3  ;;  %v4215_v38 = vld [vmem:[#allocation14 + $0xab8] sm:$0xff]  ;;  %v4208_v23 = vld [vmem:[#allocation14 + $0xa80] sm:$0xff] }
 0x8b2   : > { %v4212_v3 = vld [vmem:[#allocation14 + $0xaa0] sm:$0xff]  ;;  %v9330_v45 = vpack.c.bf16 %v4215_v38, %v4211_v6  ;;  %v4249_v6 = vld [vmem:[#allocation14 + $0xbc8] sm:$0xff] }
 0x8b3   : > { %v9140_v51 = vpack.c.bf16 %v4212_v3, %v4208_v23  ;;  %v4253_v38 = vld [vmem:[#allocation14 + $0xbe8] sm:$0xff]  ;;  %v9348_v3 = vpack.c.bf16 %v4246_v27, %v4242_v25  ;;  %v4954_v19 = vld [vmem:[#allocation19 + $0xa0] sm:$0xff] }
 0x8b4   : > { %9121 = vmatpush1.bf16.msra.mxu1 %v9120_v8  ;;  %9313 = vmatpush1.bf16.msra.mxu0 %v9312_v33  ;;  %v4219_v8 = vld [vmem:[#allocation14 + $0xad8] sm:$0xff] }
 0x8b5   : > { %9123 = vmatprep.subr.bf16.mxu1 %v9122_v53  ;;  %9315 = vmatprep.subr.bf16.mxu0 %v9314_v24  ;;  %v4223_v33 = vld [vmem:[#allocation14 + $0xaf8] sm:$0xff]  ;;  %v4216_v53 = vld [vmem:[#allocation14 + $0xac0] sm:$0xff] }
 0x8b6   : > { %v4220_v24 = vld [vmem:[#allocation14 + $0xae0] sm:$0xff]  ;;  %v9334_v57 = vpack.c.bf16 %v4223_v33, %v4219_v8  ;;  %v9352_v33 = vpack.c.bf16 %v4254_v52, %v4250_v32 }
 0x8b7   : > { %v9144_v35 = vpack.c.bf16 %v4220_v24, %v4216_v53  ;;  %v4934_v53 = vld [vmem:[#allocation19] sm:$0xff] }
 0x8b8   : > { %9125 = vmatpush1.bf16.msra.mxu1 %v9124_v7  ;;  %9317 = vmatpush1.bf16.msra.mxu0 %v9316_v44  ;;  %v4227_v7 = vld [vmem:[#allocation14 + $0xb18] sm:$0xff] }
 0x8b9   : > { %9127 = vmatprep.subr.bf16.mxu1 %v9126_v12  ;;  %9319 = vmatprep.subr.bf16.mxu0 %v9318_v1  ;;  %v4231_v44 = vld [vmem:[#allocation14 + $0xb38] sm:$0xff]  ;;  %v4224_v12 = vld [vmem:[#allocation14 + $0xb00] sm:$0xff] }
 0x8ba   : > { %v4228_v1 = vld [vmem:[#allocation14 + $0xb20] sm:$0xff]  ;;  %v9338_v16 = vpack.c.bf16 %v4231_v44, %v4227_v7  ;;  %v4940_v7 = vld [vmem:[#allocation19 + $0x30] sm:$0xff] }
 0x8bb   : > { %v9148_v26 = vpack.c.bf16 %v4228_v1, %v4224_v12  ;;  %v4943_v44 = vld [vmem:[#allocation19 + $0x48] sm:$0xff]  ;;  %v4942_v12 = vld [vmem:[#allocation19 + $0x40] sm:$0xff]  ;;  %v4944_v1 = vld [vmem:[#allocation19 + $0x50] sm:$0xff] }
 0x8bc   : > { %9129 = vmatpush1.bf16.msra.mxu1 %v9128_v30  ;;  %9321 = vmatpush1.bf16.msra.mxu0 %v9320_v20  ;;  %v4235_v30 = vld [vmem:[#allocation14 + $0xb58] sm:$0xff]  ;;  %v9364_v17 = vpack.c.bf16 %v4944_v1, %v4942_v12 }
 0x8bd   : > { %9131 = vmatprep.subr.bf16.mxu1 %v9130_v47  ;;  %9323 = vmatprep.subr.bf16.mxu0 %v9322_v58  ;;  %v4239_v20 = vld [vmem:[#allocation14 + $0xb78] sm:$0xff]  ;;  %v4232_v47 = vld [vmem:[#allocation14 + $0xb40] sm:$0xff] }
 0x8be   : > { %v4236_v58 = vld [vmem:[#allocation14 + $0xb60] sm:$0xff]  ;;  %v9342_v34 = vpack.c.bf16 %v4239_v20, %v4235_v30  ;;  %v4953_v20 = vld [vmem:[#allocation19 + $0x98] sm:$0xff] }
 0x8bf   : > { %v9152_v2 = vpack.c.bf16 %v4236_v58, %v4232_v47  ;;  %v4951_v30 = vld [vmem:[#allocation19 + $0x88] sm:$0xff]  ;;  %v4950_v47 = vld [vmem:[#allocation19 + $0x80] sm:$0xff]  ;;  %v4952_v58 = vld [vmem:[#allocation19 + $0x90] sm:$0xff] }
 0x8c0   : > { %9133 = vmatpush1.bf16.msra.mxu1 %v9132_v39  ;;  %9325 = vmatpush1.bf16.msra.mxu0 %v9324_v50  ;;  %v4243_v39 = vld [vmem:[#allocation14 + $0xb98] sm:$0xff]  ;;  %v9372_v63 = vpack.c.bf16 %v4952_v58, %v4950_v47 }
 0x8c1   : > { %9135 = vmatprep.subr.bf16.mxu1 %v9134_v14  ;;  %9327 = vmatprep.subr.bf16.mxu0 %v9326_v41  ;;  %v4247_v50 = vld [vmem:[#allocation14 + $0xbb8] sm:$0xff]  ;;  %v4240_v14 = vld [vmem:[#allocation14 + $0xb80] sm:$0xff] }
 0x8c2   : > { %v4244_v41 = vld [vmem:[#allocation14 + $0xba0] sm:$0xff]  ;;  %v9346_v31 = vpack.c.bf16 %v4247_v50, %v4243_v39  ;;  %v4961_v50 = vld [vmem:[#allocation19 + $0xd8] sm:$0xff] }
 0x8c3   : > { %v9156_v23 = vpack.c.bf16 %v4244_v41, %v4240_v14  ;;  %v4959_v39 = vld [vmem:[#allocation19 + $0xc8] sm:$0xff]  ;;  %v4958_v14 = vld [vmem:[#allocation19 + $0xc0] sm:$0xff]  ;;  %v4960_v41 = vld [vmem:[#allocation19 + $0xd0] sm:$0xff] }
 0x8c4   : > { %9137 = vmatpush1.bf16.msra.mxu1 %v9136_v56  ;;  %9329 = vmatpush1.bf16.msra.mxu0 %v9328_v40  ;;  %v4251_v56 = vld [vmem:[#allocation14 + $0xbd8] sm:$0xff]  ;;  %v9380_v25 = vpack.c.bf16 %v4960_v41, %v4958_v14 }
 0x8c5   : > { %9139 = vmatprep.subr.bf16.mxu1 %v9138_v43  ;;  %9331 = vmatprep.subr.bf16.mxu0 %v9330_v45  ;;  %v4255_v40 = vld [vmem:[#allocation14 + $0xbf8] sm:$0xff]  ;;  %v4248_v43 = vld [vmem:[#allocation14 + $0xbc0] sm:$0xff]  ;;  %v9158_v45 = vpack.c.bf16 %v4253_v38, %v4249_v6  ;;  %v4964_v38 = vld [vmem:[#allocation19 + $0xf0] sm:$0xff] }
 0x8c6   : > { %v9350_v13 = vpack.c.bf16 %v4255_v40, %v4251_v56  ;;  %v9160_v8 = vpack.c.bf16 %v4252_v46, %v4248_v43  ;;  %v4962_v6 = vld [vmem:[#allocation19 + $0xe0] sm:$0xff]  ;;  %v4967_v56 = vld [vmem:[#allocation19 + $0x108] sm:$0xff]  ;;  %v4969_v40 = vld [vmem:[#allocation19 + $0x118] sm:$0xff] }
 0x8c7   : > { %v4966_v43 = vld [vmem:[#allocation19 + $0x100] sm:$0xff]  ;;  %v4973_v46 = vld [vmem:[#allocation19 + $0x138] sm:$0xff] }
 0x8c8   : > { %9141 = vmatpush1.bf16.msra.mxu1 %v9140_v51  ;;  %9333 = vmatpush1.bf16.msra.mxu0 %v9332_v42  ;;  %v4935_v51 = vld [vmem:[#allocation19 + $0x8] sm:$0xff]  ;;  %v4937_v42 = vld [vmem:[#allocation19 + $0x18] sm:$0xff]  ;;  %v4982_v1 = vld [vmem:[#allocation19 + $0x180] sm:$0xff] }
 0x8c9   : > { %9143 = vmatprep.subr.bf16.mxu1 %v9142_v54  ;;  %9335 = vmatprep.subr.bf16.mxu0 %v9334_v57  ;;  %v9354_v24 = vpack.c.bf16 %v4937_v42, %v4935_v51  ;;  %v4936_v54 = vld [vmem:[#allocation19 + $0x10] sm:$0xff]  ;;  %v4939_v57 = vld [vmem:[#allocation19 + $0x28] sm:$0xff]  ;;  %v4977_v42 = vld [vmem:[#allocation19 + $0x158] sm:$0xff] }
 0x8ca   : > { %v9356_v62 = vpack.c.bf16 %v4936_v54, %v4934_v53  ;;  %v9358_v4 = vpack.c.bf16 %v4941_v59, %v4939_v57  ;;  %v4975_v51 = vld [vmem:[#allocation19 + $0x148] sm:$0xff]  ;;  %v4974_v54 = vld [vmem:[#allocation19 + $0x140] sm:$0xff]  ;;  %v4976_v57 = vld [vmem:[#allocation19 + $0x150] sm:$0xff] }
 0x8cb   : > { %v4979_v59 = vld [vmem:[#allocation19 + $0x168] sm:$0xff]  ;;  %v4990_v58 = vld [vmem:[#allocation19 + $0x1c0] sm:$0xff] }
 0x8cc   : > { %9145 = vmatpush1.bf16.msra.mxu1 %v9144_v35  ;;  %9337 = vmatpush1.bf16.msra.mxu0 %v9336_v10  ;;  %v4945_v35 = vld [vmem:[#allocation19 + $0x58] sm:$0xff]  ;;  %v9360_v10 = vpack.c.bf16 %v4940_v7, %v4938_v60  ;;  %v4978_v7 = vld [vmem:[#allocation19 + $0x160] sm:$0xff] }
 0x8cd   : > { %9147 = vmatprep.subr.bf16.mxu1 %v9146_v9  ;;  %9339 = vmatprep.subr.bf16.mxu0 %v9338_v16  ;;  %v4947_v9 = vld [vmem:[#allocation19 + $0x68] sm:$0xff]  ;;  %v4949_v16 = vld [vmem:[#allocation19 + $0x78] sm:$0xff] }
 0x8ce   : > { %v9366_v28 = vpack.c.bf16 %v4949_v16, %v4947_v9  ;;  %v4984_v9 = vld [vmem:[#allocation19 + $0x190] sm:$0xff]  ;;  %v4987_v16 = vld [vmem:[#allocation19 + $0x1a8] sm:$0xff] }
 0x8d0   : > { %9149 = vmatpush1.bf16.msra.mxu1 %v9148_v26  ;;  %9341 = vmatpush1.bf16.msra.mxu0 %v9340_v21  ;;  %v9368_v26 = vpack.c.bf16 %v4948_v29, %v4946_v37  ;;  %v9370_v21 = vpack.c.bf16 %v4953_v20, %v4951_v30  ;;  %v4986_v29 = vld [vmem:[#allocation19 + $0x1a0] sm:$0xff]  ;;  %v4988_v30 = vld [vmem:[#allocation19 + $0x1b0] sm:$0xff]  ;;  %v4991_v20 = vld [vmem:[#allocation19 + $0x1c8] sm:$0xff] }
 0x8d1   : > { %9151 = vmatprep.subr.bf16.mxu1 %v9150_v36  ;;  %9343 = vmatprep.subr.bf16.mxu0 %v9342_v34  ;;  %v4955_v36 = vld [vmem:[#allocation19 + $0xa8] sm:$0xff]  ;;  %v4957_v34 = vld [vmem:[#allocation19 + $0xb8] sm:$0xff] }
 0x8d2   : > { %v9374_v18 = vpack.c.bf16 %v4957_v34, %v4955_v36  ;;  %v4992_v36 = vld [vmem:[#allocation19 + $0x1d0] sm:$0xff]  ;;  %v4995_v34 = vld [vmem:[#allocation19 + $0x1e8] sm:$0xff] }
 0x8d4   : > { %9153 = vmatpush1.bf16.msra.mxu1 %v9152_v2  ;;  %9345 = vmatpush1.bf16.msra.mxu0 %v9344_v22  ;;  %v9376_v2 = vpack.c.bf16 %v4956_v55, %v4954_v19  ;;  %v9378_v22 = vpack.c.bf16 %v4961_v50, %v4959_v39  ;;  %v4994_v55 = vld [vmem:[#allocation19 + $0x1e0] sm:$0xff]  ;;  %v4996_v39 = vld [vmem:[#allocation19 + $0x1f0] sm:$0xff] }
 0x8d5   : > { %9155 = vmatprep.subr.bf16.mxu1 %v9154_v48  ;;  %9347 = vmatprep.subr.bf16.mxu0 %v9346_v31  ;;  %v4963_v48 = vld [vmem:[#allocation19 + $0xe8] sm:$0xff]  ;;  %v4965_v31 = vld [vmem:[#allocation19 + $0xf8] sm:$0xff]  ;;  %v9416_v50 = vpack.c.bf16 %v4996_v39, %v4994_v55  ;;  %v5022_v39 = vld [vmem:[#allocation19 + $0x2c0] sm:$0xff] }
 0x8d6   : > { %v9382_v27 = vpack.c.bf16 %v4965_v31, %v4963_v48 }
 0x8d8   : > { %9157 = vmatpush1.bf16.msra.mxu1 %v9156_v23  ;;  %9349 = vmatpush1.bf16.msra.mxu0 %v9348_v3  ;;  %v9384_v23 = vpack.c.bf16 %v4964_v38, %v4962_v6  ;;  %v9386_v3 = vpack.c.bf16 %v4969_v40, %v4967_v56  ;;  %v4706_v38 = vld [vmem:[#allocation17] sm:$0xff]  ;;  %v4783_v56 = vld [vmem:[#allocation17 + $0x8] sm:$0xff]  ;;  %v4859_v40 = vld [vmem:[#allocation17 + $0x10] sm:$0xff] }
 0x8d9   : > { %9159 = vmatprep.subr.bf16.mxu1 %v9158_v45  ;;  %9351 = vmatprep.subr.bf16.mxu0 %v9350_v13  ;;  %v4968_v45 = vld [vmem:[#allocation19 + $0x110] sm:$0xff]  ;;  %v4971_v13 = vld [vmem:[#allocation19 + $0x128] sm:$0xff] }
 0x8da   : > { %v9388_v32 = vpack.c.bf16 %v4968_v45, %v4966_v43  ;;  %v9390_v52 = vpack.c.bf16 %v4973_v46, %v4971_v13  ;;  %v4998_v45 = vld [vmem:[#allocation19 + $0x200] sm:$0xff]  ;;  %v5000_v13 = vld [vmem:[#allocation19 + $0x210] sm:$0xff]  ;;  %v5003_v46 = vld [vmem:[#allocation19 + $0x228] sm:$0xff] }
 0x8dc   : > { %9161 = vmatpush1.bf16.msra.mxu1 %v9160_v8  ;;  %9353 = vmatpush1.bf16.msra.mxu0 %v9352_v33  ;;  %v4970_v8 = vld [vmem:[#allocation19 + $0x120] sm:$0xff]  ;;  %v4972_v33 = vld [vmem:[#allocation19 + $0x130] sm:$0xff] }
 0x8dd   : > { %9355 = vmatprep.subr.bf16.mxu0 %v9354_v24  ;;  %v9392_v53 = vpack.c.bf16 %v4972_v33, %v4970_v8  ;;  %v9394_v24 = vpack.c.bf16 %v4977_v42, %v4975_v51  ;;  %v9420_v8 = vpack.c.bf16 %v5000_v13, %v4998_v45  ;;  %v5002_v42 = vld [vmem:[#allocation19 + $0x220] sm:$0xff] }
 0x8df   : > { %4485 = vmatmul.mubr.f32.vlgmr.msra.gmra.mrb[30].mxu1 %v12403_v49  ;;  %4698 = vmatmul.mubr.f32.vlgmr.msra.gmra.mrb[60].mxu0 %v12403_v49  ;;  %v9362_v49 = vpack.c.bf16 %v4945_v35, %v4943_v44  ;;  %v4980_v44 = vld [vmem:[#allocation19 + $0x170] sm:$0xff]  ;;  %v4983_v35 = vld [vmem:[#allocation19 + $0x188] sm:$0xff] }
 0x8e0   : > { %4775 = vmatprep.mubr.f32.mxu1 %v11340_v0  ;;  %9357 = vmatpush1.bf16.msra.mxu0 %v9356_v62  ;;  %v4981_v62 = vld [vmem:[#allocation19 + $0x178] sm:$0xff] }
 0x8e1   : > { %9359 = vmatprep.subr.bf16.mxu0 %v9358_v4  ;;  %v9396_v4 = vpack.c.bf16 %v4976_v57, %v4974_v54  ;;  %v9398_v60 = vpack.c.bf16 %v4981_v62, %v4979_v59  ;;  %v5009_v54 = vld [vmem:[#allocation19 + $0x258] sm:$0xff] }
 0x8e4   : > { %9361 = vmatpush1.bf16.msra.mxu0 %v9360_v10  ;;  %v4985_v10 = vld [vmem:[#allocation19 + $0x198] sm:$0xff] }
 0x8e5   : > { %9363 = vmatprep.subr.bf16.mxu0 %v9362_v49  ;;  %v9400_v49 = vpack.c.bf16 %v4980_v44, %v4978_v7  ;;  %v9402_v12 = vpack.c.bf16 %v4985_v10, %v4983_v35  ;;  %v5011_v44 = vld [vmem:[#allocation19 + $0x268] sm:$0xff]  ;;  %v5013_v35 = vld [vmem:[#allocation19 + $0x278] sm:$0xff] }
 0x8e8   : > { %9365 = vmatpush1.bf16.msra.mxu0 %v9364_v17  ;;  %v4989_v17 = vld [vmem:[#allocation19 + $0x1b8] sm:$0xff] }
 0x8e9   : > { %9367 = vmatprep.subr.bf16.mxu0 %v9366_v28  ;;  %v9404_v28 = vpack.c.bf16 %v4984_v9, %v4982_v1  ;;  %v9406_v37 = vpack.c.bf16 %v4989_v17, %v4987_v16  ;;  %v5010_v1 = vld [vmem:[#allocation19 + $0x260] sm:$0xff]  ;;  %v5012_v9 = vld [vmem:[#allocation19 + $0x270] sm:$0xff]  ;;  %v5015_v17 = vld [vmem:[#allocation19 + $0x288] sm:$0xff] }
 0x8ec   : > { %9369 = vmatpush1.bf16.msra.mxu0 %v9368_v26  ;;  %v4993_v26 = vld [vmem:[#allocation19 + $0x1d8] sm:$0xff] }
 0x8ed   : > { %9371 = vmatprep.subr.bf16.mxu0 %v9370_v21  ;;  %v9408_v21 = vpack.c.bf16 %v4988_v30, %v4986_v29  ;;  %v9410_v47 = vpack.c.bf16 %v4993_v26, %v4991_v20  ;;  %v5014_v30 = vld [vmem:[#allocation19 + $0x280] sm:$0xff]  ;;  %v5016_v20 = vld [vmem:[#allocation19 + $0x290] sm:$0xff]  ;;  %v5019_v26 = vld [vmem:[#allocation19 + $0x2a8] sm:$0xff] }
 0x8f0   : > { %9373 = vmatpush1.bf16.msra.mxu0 %v9372_v63  ;;  %v4997_v63 = vld [vmem:[#allocation19 + $0x1f8] sm:$0xff] }
 0x8f1   : > { %9375 = vmatprep.subr.bf16.mxu0 %v9374_v18  ;;  %v9412_v18 = vpack.c.bf16 %v4992_v36, %v4990_v58  ;;  %v9414_v19 = vpack.c.bf16 %v4997_v63, %v4995_v34  ;;  %v5018_v36 = vld [vmem:[#allocation19 + $0x2a0] sm:$0xff]  ;;  %v5020_v34 = vld [vmem:[#allocation19 + $0x2b0] sm:$0xff]  ;;  %v5023_v63 = vld [vmem:[#allocation19 + $0x2c8] sm:$0xff] }
 0x8f4   : > { %9377 = vmatpush1.bf16.msra.mxu0 %v9376_v2  ;;  %v12414_v2 = vld [vmem:[#allocation16] sm:$0xf] }
 0x8f5   : > { %9379 = vmatprep.subr.bf16.mxu0 %v9378_v22  ;;  %v4261_v22 = vrot.slane %v12414_v2, %v12252_v11  ;;  %v4265_v14 = vrot.slane %v12414_v2, %v12257_v15 }
 0x8f8   : > { %9381 = vmatpush1.bf16.msra.mxu0 %v9380_v25 }
 0x8f9   : > { %9383 = vmatprep.subr.bf16.mxu0 %v9382_v27 }
 0x8fc   : > { %9385 = vmatpush1.bf16.msra.mxu0 %v9384_v23  ;;  %v4999_v23 = vld [vmem:[#allocation19 + $0x208] sm:$0xff] }
 0x8fd   : > { %9387 = vmatprep.subr.bf16.mxu0 %v9386_v3  ;;  %v5001_v3 = vld [vmem:[#allocation19 + $0x218] sm:$0xff] }
 0x8fe   : > { %v9418_v43 = vpack.c.bf16 %v5001_v3, %v4999_v23  ;;  %v5032_v23 = vld [vmem:[#allocation19 + $0x310] sm:$0xff]  ;;  %v5035_v3 = vld [vmem:[#allocation19 + $0x328] sm:$0xff] }
 0x900   : > { %9389 = vmatpush1.bf16.msra.mxu0 %v9388_v32  ;;  %v5005_v32 = vld [vmem:[#allocation19 + $0x238] sm:$0xff] }
 0x901   : > { %9391 = vmatprep.subr.bf16.mxu0 %v9390_v52  ;;  %v9422_v51 = vpack.c.bf16 %v5005_v32, %v5003_v46  ;;  %v5034_v46 = vld [vmem:[#allocation19 + $0x320] sm:$0xff]  ;;  %v5036_v32 = vld [vmem:[#allocation19 + $0x330] sm:$0xff] }
 0x904   : > { %9393 = vmatpush1.bf16.msra.mxu0 %v9392_v53  ;;  %v5004_v53 = vld [vmem:[#allocation19 + $0x230] sm:$0xff] }
 0x905   : > { %9395 = vmatprep.subr.bf16.mxu0 %v9394_v24  ;;  %v5007_v24 = vld [vmem:[#allocation19 + $0x248] sm:$0xff]  ;;  %v9424_v57 = vpack.c.bf16 %v5004_v53, %v5002_v42  ;;  %v5038_v42 = vld [vmem:[#allocation19 + $0x340] sm:$0xff]  ;;  %v5040_v53 = vld [vmem:[#allocation19 + $0x350] sm:$0xff] }
 0x906   : > { %v9426_v62 = vpack.c.bf16 %v5009_v54, %v5007_v24  ;;  %v5043_v24 = vld [vmem:[#allocation19 + $0x368] sm:$0xff]  ;;  %v5045_v54 = vld [vmem:[#allocation19 + $0x378] sm:$0xff] }
 0x908   : > { %9397 = vmatpush1.bf16.msra.mxu0 %v9396_v4  ;;  %v5006_v4 = vld [vmem:[#allocation19 + $0x240] sm:$0xff] }
 0x909   : > { %9399 = vmatprep.subr.bf16.mxu0 %v9398_v60  ;;  %v5008_v60 = vld [vmem:[#allocation19 + $0x250] sm:$0xff] }
 0x90a   : > { %v9428_v10 = vpack.c.bf16 %v5008_v60, %v5006_v4  ;;  %v5042_v4 = vld [vmem:[#allocation19 + $0x360] sm:$0xff]  ;;  %v5044_v60 = vld [vmem:[#allocation19 + $0x370] sm:$0xff] }
 0x90c   : > { %9401 = vmatpush1.bf16.msra.mxu0 %v9400_v49 }
 0x90d   : > { %9403 = vmatprep.subr.bf16.mxu0 %v9402_v12  ;;  %v9430_v12 = vpack.c.bf16 %v5013_v35, %v5011_v44  ;;  %v5049_v44 = vld [vmem:[#allocation19 + $0x398] sm:$0xff]  ;;  %v9464_v35 = vpack.c.bf16 %v5044_v60, %v5042_v4 }
 0x90e   : > { %v5085_v4 = vld [vmem:[#allocation19 + $0x4b8] sm:$0xff] }
 0x910   : > { %9405 = vmatpush1.bf16.msra.mxu0 %v9404_v28  ;;  %v5017_v28 = vld [vmem:[#allocation19 + $0x298] sm:$0xff] }
 0x911   : > { %9407 = vmatprep.subr.bf16.mxu0 %v9406_v37  ;;  %v9432_v37 = vpack.c.bf16 %v5012_v9, %v5010_v1  ;;  %v9434_v29 = vpack.c.bf16 %v5017_v28, %v5015_v17  ;;  %v5048_v1 = vld [vmem:[#allocation19 + $0x390] sm:$0xff]  ;;  %v5051_v9 = vld [vmem:[#allocation19 + $0x3a8] sm:$0xff]  ;;  %v5053_v17 = vld [vmem:[#allocation19 + $0x3b8] sm:$0xff] }
 0x914   : > { %9409 = vmatpush1.bf16.msra.mxu0 %v9408_v21  ;;  %v5021_v21 = vld [vmem:[#allocation19 + $0x2b8] sm:$0xff] }
 0x915   : > { %9411 = vmatprep.subr.bf16.mxu0 %v9410_v47  ;;  %v9436_v47 = vpack.c.bf16 %v5016_v20, %v5014_v30  ;;  %v9438_v58 = vpack.c.bf16 %v5021_v21, %v5019_v26  ;;  %v5052_v30 = vld [vmem:[#allocation19 + $0x3b0] sm:$0xff]  ;;  %v5055_v20 = vld [vmem:[#allocation19 + $0x3c8] sm:$0xff]  ;;  %v5057_v26 = vld [vmem:[#allocation19 + $0x3d8] sm:$0xff] }
 0x918   : > { %9413 = vmatpush1.bf16.msra.mxu0 %v9412_v18  ;;  %v5025_v18 = vld [vmem:[#allocation19 + $0x2d8] sm:$0xff] }
 0x919   : > { %9415 = vmatprep.subr.bf16.mxu0 %v9414_v19  ;;  %v9440_v19 = vpack.c.bf16 %v5020_v34, %v5018_v36  ;;  %v9442_v55 = vpack.c.bf16 %v5025_v18, %v5023_v63  ;;  %v5056_v36 = vld [vmem:[#allocation19 + $0x3d0] sm:$0xff]  ;;  %v5059_v34 = vld [vmem:[#allocation19 + $0x3e8] sm:$0xff]  ;;  %v5061_v63 = vld [vmem:[#allocation19 + $0x3f8] sm:$0xff] }
 0x91c   : > { %9417 = vmatpush1.bf16.msra.mxu0 %v9416_v50  ;;  %v5024_v50 = vld [vmem:[#allocation19 + $0x2d0] sm:$0xff] }
 0x91d   : > { %9419 = vmatprep.subr.bf16.mxu0 %v9418_v43  ;;  %v5037_v43 = vld [vmem:[#allocation19 + $0x338] sm:$0xff] }
 0x91e   : > { %v9454_v13 = vpack.c.bf16 %v5037_v43, %v5035_v3  ;;  %v5073_v3 = vld [vmem:[#allocation19 + $0x458] sm:$0xff] }
 0x9b2   : > { %v4486_v41 = vpop.f32.mrb[30].mxu1 }
 0x9b3   : > { %v10242_v48 = vadd.f32 %v4486_v41, %v4261_v22  ;;  %v4488_v31 = vpop.f32.mrb[31].mxu1  ;;  %v5027_v22 = vld [vmem:[#allocation19 + $0x2e8] sm:$0xff]  ;;  %v9444_v41 = vpack.c.bf16 %v5024_v50, %v5022_v39  ;;  %v5060_v39 = vld [vmem:[#allocation19 + $0x3f0] sm:$0xff] }
 0x9b4   : > { %v10243_v25 = vadd.f32 %v4488_v31, %v4265_v14  ;;  %v5029_v14 = vld [vmem:[#allocation19 + $0x2f8] sm:$0xff]  ;;  %v5026_v31 = vld [vmem:[#allocation19 + $0x2e0] sm:$0xff]  ;;  %v5063_v50 = vld [vmem:[#allocation19 + $0x408] sm:$0xff] }
 0x9b5   : > { %v4704_v6 = vmax.f32 %v10242_v48, 0.0  ;;  %v9446_v48 = vpack.c.bf16 %v5029_v14, %v5027_v22  ;;  %v5065_v22 = vld [vmem:[#allocation19 + $0x418] sm:$0xff] }
 0x9b6   : > { %v4705_v27 = vmax.f32 %v10243_v25, 0.0  ;;  %v5028_v25 = vld [vmem:[#allocation19 + $0x2f0] sm:$0xff] }
 0x9b8   : > { %4711 = vmatprep.subr.mxu1 %v4705_v27 }
 0x9b9   : > { %4712 = vmatpush1.msra.mxu1 %v4704_v6 }
 0x9ba   : > { %7971 = vmatmul.mubr.msk.f32.vlgmr.msra.gmra.mrb[32].mxu1 %vm4707_vm3, %v4706_v38  ;;  %4787 = vmatprep.subr.mxu1 %v4705_v27  ;;  %v9448_v38 = vpack.c.bf16 %v5028_v25, %v5026_v31  ;;  %v5064_v31 = vld [vmem:[#allocation19 + $0x410] sm:$0xff]  ;;  %v5067_v25 = vld [vmem:[#allocation19 + $0x428] sm:$0xff] }
 0x9bb   : > { %4788 = vmatpush1.msra.mxu1 %v4704_v6  ;;  %4851 = vmatprep.mubr.f32.mxu1 %v11340_v0 }
 0x9bc   : > { %4863 = vmatprep.subr.mxu1 %v4705_v27  ;;  %v5031_v27 = vld [vmem:[#allocation19 + $0x308] sm:$0xff] }
 0x9be   : > { %7972 = vmatmul.mubr.msk.f32.vlgmr.msra.gmra.mrb[34].mxu1 %vm4707_vm3, %v4783_v56 }
 0x9bf   : > { %4864 = vmatpush1.msra.mxu1 %v4704_v6  ;;  %4927 = vmatprep.mubr.f32.mxu1 %v11340_v0  ;;  %v5033_v6 = vld [vmem:[#allocation19 + $0x318] sm:$0xff] }
 0x9c0   : > { %v9450_v56 = vpack.c.bf16 %v5033_v6, %v5031_v27  ;;  %v5069_v27 = vld [vmem:[#allocation19 + $0x438] sm:$0xff] }
 0x9c2   : > { %7973 = vmatmul.mubr.msk.f32.vlgmr.msra.gmra.mrb[36].mxu1 %vm4707_vm3, %v4859_v40  ;;  %v5030_v40 = vld [vmem:[#allocation19 + $0x300] sm:$0xff] }
 0x9c3   : > { %5423 = vmatprep.mubr.f32.mxu1 %v11340_v0  ;;  %v9452_v45 = vpack.c.bf16 %v5032_v23, %v5030_v40  ;;  %v5068_v40 = vld [vmem:[#allocation19 + $0x430] sm:$0xff]  ;;  %v5071_v23 = vld [vmem:[#allocation19 + $0x448] sm:$0xff] }
 0xa8d   : > { %v4777_v52 = vpop.f32.mrb[32].mxu1 }
 0xa8e   : > { %v4779_v33 = vpop.f32.mrb[33].mxu1 }
 0xa8f   : > { %5202 = vmatprep.mubr.f32.mxu0 %v4779_v33  ;;  %v9456_v33 = vpack.c.bf16 %v5036_v32, %v5034_v46  ;;  %v5072_v46 = vld [vmem:[#allocation19 + $0x450] sm:$0xff]  ;;  %v5075_v32 = vld [vmem:[#allocation19 + $0x468] sm:$0xff] }
 0xa90   : > { %5203 = vmatmul.mubr.f32.vlgmr.msra.gmra.mrb[60].mxu0 %v4777_v52  ;;  %v5039_v52 = vld [vmem:[#allocation19 + $0x348] sm:$0xff] }
 0xa91   : > { %9421 = vmatpush1.bf16.msra.mxu0 %v9420_v8  ;;  %v12426_v59 = vpop.f32.mrb[34].mxu1  ;;  %v5041_v8 = vld [vmem:[#allocation19 + $0x358] sm:$0xff] }
 0xa92   : > { %9423 = vmatprep.subr.bf16.mxu0 %v9422_v51  ;;  %v4855_v7 = vpop.f32.mrb[35].mxu1  ;;  %v9458_v51 = vpack.c.bf16 %v5041_v8, %v5039_v52  ;;  %v5077_v52 = vld [vmem:[#allocation19 + $0x478] sm:$0xff] }
 0xa93   : > { %5273 = vmatprep.mubr.f32.mxu0 %v4855_v7  ;;  %v5047_v7 = vld [vmem:[#allocation19 + $0x388] sm:$0xff] }
 0xa95   : > { %9425 = vmatpush1.bf16.msra.mxu0 %v9424_v57  ;;  %v12428_v49 = vpop.f32.mrb[36].mxu1  ;;  %v9460_v57 = vpack.c.bf16 %v5040_v53, %v5038_v42  ;;  %v5076_v42 = vld [vmem:[#allocation19 + $0x470] sm:$0xff]  ;;  %v5079_v53 = vld [vmem:[#allocation19 + $0x488] sm:$0xff] }
 0xa96   : > { %9427 = vmatprep.subr.bf16.mxu0 %v9426_v62  ;;  %v12430_v16 = vpop.f32.mrb[37].mxu1  ;;  %v9462_v62 = vpack.c.bf16 %v5045_v54, %v5043_v24  ;;  %v5081_v24 = vld [vmem:[#allocation19 + $0x498] sm:$0xff] }
 0xa97   : > { %v9498_v54 = vpack.c.bf16 %v5081_v24, %v5079_v53  ;;  %v5114_v24 = vld [vmem:[#allocation19 + $0x5a0] sm:$0xff] }
 0xa99   : > { %9429 = vmatpush1.bf16.msra.mxu0 %v9428_v10  ;;  %v9466_v10 = vpack.c.bf16 %v5049_v44, %v5047_v7  ;;  %v5082_v44 = vld [vmem:[#allocation19 + $0x4a0] sm:$0xff] }
 0xa9a   : > { %9431 = vmatprep.subr.bf16.mxu0 %v9430_v12  ;;  %v5046_v12 = vld [vmem:[#allocation19 + $0x380] sm:$0xff] }
 0xa9b   : > { %v9468_v28 = vpack.c.bf16 %v5048_v1, %v5046_v12  ;;  %v5089_v12 = vld [vmem:[#allocation19 + $0x4d8] sm:$0xff] }
 0xa9d   : > { %9433 = vmatpush1.bf16.msra.mxu0 %v9432_v37  ;;  %v9470_v37 = vpack.c.bf16 %v5053_v17, %v5051_v9  ;;  %v5086_v17 = vld [vmem:[#allocation19 + $0x4c0] sm:$0xff] }
 0xa9e   : > { %9435 = vmatprep.subr.bf16.mxu0 %v9434_v29  ;;  %v5050_v29 = vld [vmem:[#allocation19 + $0x3a0] sm:$0xff] }
 0xa9f   : > { %v9472_v21 = vpack.c.bf16 %v5052_v30, %v5050_v29  ;;  %v5093_v29 = vld [vmem:[#allocation19 + $0x4f8] sm:$0xff] }
 0xaa1   : > { %9437 = vmatpush1.bf16.msra.mxu0 %v9436_v47  ;;  %v9474_v47 = vpack.c.bf16 %v5057_v26, %v5055_v20  ;;  %v5090_v26 = vld [vmem:[#allocation19 + $0x4e0] sm:$0xff] }
 0xaa2   : > { %9439 = vmatprep.subr.bf16.mxu0 %v9438_v58  ;;  %v5054_v58 = vld [vmem:[#allocation19 + $0x3c0] sm:$0xff] }
 0xaa3   : > { %v9476_v18 = vpack.c.bf16 %v5056_v36, %v5054_v58  ;;  %v5097_v58 = vld [vmem:[#allocation19 + $0x518] sm:$0xff] }
 0xaa5   : > { %9441 = vmatpush1.bf16.msra.mxu0 %v9440_v19  ;;  %v9478_v19 = vpack.c.bf16 %v5061_v63, %v5059_v34  ;;  %v5094_v63 = vld [vmem:[#allocation19 + $0x500] sm:$0xff] }
 0xaa6   : > { %9443 = vmatprep.subr.bf16.mxu0 %v9442_v55  ;;  %v5058_v55 = vld [vmem:[#allocation19 + $0x3e0] sm:$0xff] }
 0xaa7   : > { %v9480_v14 = vpack.c.bf16 %v5060_v39, %v5058_v55  ;;  %v5101_v55 = vld [vmem:[#allocation19 + $0x538] sm:$0xff] }
 0xaa9   : > { %9445 = vmatpush1.bf16.msra.mxu0 %v9444_v41  ;;  %v9482_v41 = vpack.c.bf16 %v5065_v22, %v5063_v50  ;;  %v5098_v22 = vld [vmem:[#allocation19 + $0x520] sm:$0xff] }
 0xaaa   : > { %9447 = vmatprep.subr.bf16.mxu0 %v9446_v48  ;;  %v5062_v48 = vld [vmem:[#allocation19 + $0x400] sm:$0xff] }
 0xaab   : > { %v9484_v6 = vpack.c.bf16 %v5064_v31, %v5062_v48  ;;  %v5105_v48 = vld [vmem:[#allocation19 + $0x558] sm:$0xff] }
 0xaad   : > { %9449 = vmatpush1.bf16.msra.mxu0 %v9448_v38  ;;  %v9486_v38 = vpack.c.bf16 %v5069_v27, %v5067_v25  ;;  %v5102_v27 = vld [vmem:[#allocation19 + $0x540] sm:$0xff] }
 0xaae   : > { %9451 = vmatprep.subr.bf16.mxu0 %v9450_v56  ;;  %v5066_v56 = vld [vmem:[#allocation19 + $0x420] sm:$0xff] }
 0xaaf   : > { %v9488_v43 = vpack.c.bf16 %v5068_v40, %v5066_v56  ;;  %v5109_v56 = vld [vmem:[#allocation19 + $0x578] sm:$0xff] }
 0xab1   : > { %9453 = vmatpush1.bf16.msra.mxu0 %v9452_v45  ;;  %v9490_v45 = vpack.c.bf16 %v5073_v3, %v5071_v23  ;;  %v5106_v3 = vld [vmem:[#allocation19 + $0x560] sm:$0xff] }
 0xab2   : > { %9455 = vmatprep.subr.bf16.mxu0 %v9454_v13  ;;  %v5070_v13 = vld [vmem:[#allocation19 + $0x440] sm:$0xff] }
 0xab3   : > { %v9492_v8 = vpack.c.bf16 %v5072_v46, %v5070_v13  ;;  %v5113_v13 = vld [vmem:[#allocation19 + $0x598] sm:$0xff] }
 0xab5   : > { %9457 = vmatpush1.bf16.msra.mxu0 %v9456_v33  ;;  %v9494_v33 = vpack.c.bf16 %v5077_v52, %v5075_v32  ;;  %v5110_v52 = vld [vmem:[#allocation19 + $0x580] sm:$0xff] }
 0xab6   : > { %9459 = vmatprep.subr.bf16.mxu0 %v9458_v51  ;;  %v5074_v51 = vld [vmem:[#allocation19 + $0x460] sm:$0xff] }
 0xab9   : > { %9461 = vmatpush1.bf16.msra.mxu0 %v9460_v57  ;;  %v5078_v57 = vld [vmem:[#allocation19 + $0x480] sm:$0xff] }
 0xaba   : > { %9463 = vmatprep.subr.bf16.mxu0 %v9462_v62  ;;  %v5083_v62 = vld [vmem:[#allocation19 + $0x4a8] sm:$0xff] }
 0xabb   : > { %v9502_v7 = vpack.c.bf16 %v5085_v4, %v5083_v62  ;;  %v5118_v4 = vld [vmem:[#allocation19 + $0x5c0] sm:$0xff] }
 0xabd   : > { %9465 = vmatpush1.bf16.msra.mxu0 %v9464_v35  ;;  %v5084_v35 = vld [vmem:[#allocation19 + $0x4b0] sm:$0xff] }
 0xabe   : > { %9467 = vmatprep.subr.bf16.mxu0 %v9466_v10  ;;  %v5087_v10 = vld [vmem:[#allocation19 + $0x4c8] sm:$0xff]  ;;  %v9504_v1 = vpack.c.bf16 %v5084_v35, %v5082_v44  ;;  %v5125_v44 = vld [vmem:[#allocation19 + $0x5f8] sm:$0xff] }
 0xabf   : > { %v9506_v9 = vpack.c.bf16 %v5089_v12, %v5087_v10  ;;  %v5122_v12 = vld [vmem:[#allocation19 + $0x5e0] sm:$0xff] }
 0xac1   : > { %9469 = vmatpush1.bf16.msra.mxu0 %v9468_v28  ;;  %v5088_v28 = vld [vmem:[#allocation19 + $0x4d0] sm:$0xff] }
 0xac2   : > { %9471 = vmatprep.subr.bf16.mxu0 %v9470_v37  ;;  %v5091_v37 = vld [vmem:[#allocation19 + $0x4e8] sm:$0xff]  ;;  %v9508_v30 = vpack.c.bf16 %v5088_v28, %v5086_v17  ;;  %v5126_v17 = vld [vmem:[#allocation20] sm:$0x3]  ;;  %v4269_v28 = vrot.slane %v12414_v2, %v12293_v61 }
 0xac3   : > { %v9510_v20 = vpack.c.bf16 %v5093_v29, %v5091_v37  ;;  %v5131_v37 = vrot.slane %v5126_v17, %v12252_v11  ;;  %v4273_v29 = vrot.slane %v12414_v2, %v12296_v5  ;;  %v5431_v2 = vld [vmem:[#allocation22 + $0x8] sm:$0xff] }
 0xac5   : > { %9473 = vmatpush1.bf16.msra.mxu0 %v9472_v21  ;;  %v5092_v21 = vld [vmem:[#allocation19 + $0x4f0] sm:$0xff] }
 0xac6   : > { %9475 = vmatprep.subr.bf16.mxu0 %v9474_v47  ;;  %v5095_v47 = vld [vmem:[#allocation19 + $0x508] sm:$0xff]  ;;  %v9512_v36 = vpack.c.bf16 %v5092_v21, %v5090_v26 }
 0xac7   : > { %v9514_v34 = vpack.c.bf16 %v5097_v58, %v5095_v47 }
 0xac9   : > { %9477 = vmatpush1.bf16.msra.mxu0 %v9476_v18  ;;  %v5096_v18 = vld [vmem:[#allocation19 + $0x510] sm:$0xff] }
 0xaca   : > { %9479 = vmatprep.subr.bf16.mxu0 %v9478_v19  ;;  %v5099_v19 = vld [vmem:[#allocation19 + $0x528] sm:$0xff]  ;;  %v9516_v39 = vpack.c.bf16 %v5096_v18, %v5094_v63 }
 0xacb   : > { %v9518_v50 = vpack.c.bf16 %v5101_v55, %v5099_v19  ;;  %v5355_v63 = vld [vmem:[#allocation22] sm:$0xff] }
 0xacc   : > { %v5583_v18 = vld [vmem:[#allocation23 + $0x8] sm:$0xff] }
 0xacd   : > { %9481 = vmatpush1.bf16.msra.mxu0 %v9480_v14  ;;  %v5100_v14 = vld [vmem:[#allocation19 + $0x530] sm:$0xff]  ;;  %v5587_v19 = vld [vmem:[#allocation23 + $0x28] sm:$0xff] }
 0xace   : > { %9483 = vmatprep.subr.bf16.mxu0 %v9482_v41  ;;  %v5103_v41 = vld [vmem:[#allocation19 + $0x548] sm:$0xff]  ;;  %v9520_v31 = vpack.c.bf16 %v5100_v14, %v5098_v22  ;;  %v9546_v55 = vpack.c.bf16 %v5587_v19, %v5583_v18  ;;  %v5654_v18 = vld [vmem:[#allocation23 + $0x240] sm:$0xff] }
 0xacf   : > { %v9522_v25 = vpack.c.bf16 %v5105_v48, %v5103_v41  ;;  %v5591_v22 = vld [vmem:[#allocation23 + $0x48] sm:$0xff]  ;;  %v5507_v41 = vld [vmem:[#allocation22 + $0x10] sm:$0xff]  ;;  %v5658_v19 = vld [vmem:[#allocation23 + $0x260] sm:$0xff] }
 0xad0   : > { %5274 = vmatmul.mubr.f32.vlgmr.msra.gmra.mrb[60].mxu0 %v12426_v59  ;;  %v9496_v59 = vpack.c.bf16 %v5076_v42, %v5074_v51  ;;  %v5117_v51 = vld [vmem:[#allocation19 + $0x5b8] sm:$0xff]  ;;  %v5595_v14 = vld [vmem:[#allocation23 + $0x68] sm:$0xff] }
 0xad1   : > { %9485 = vmatpush1.bf16.msra.mxu0 %v9484_v6  ;;  %5344 = vmatprep.mubr.f32.mxu0 %v12430_v16  ;;  %v5080_v16 = vld [vmem:[#allocation19 + $0x490] sm:$0xff] }
 0xad2   : > { %9487 = vmatprep.subr.bf16.mxu0 %v9486_v38  ;;  %v9500_v60 = vpack.c.bf16 %v5080_v16, %v5078_v57  ;;  %v5104_v6 = vld [vmem:[#allocation19 + $0x550] sm:$0xff]  ;;  %v5107_v38 = vld [vmem:[#allocation19 + $0x568] sm:$0xff]  ;;  %v5121_v57 = vld [vmem:[#allocation19 + $0x5d8] sm:$0xff] }
 0xad3   : > { %v9524_v40 = vpack.c.bf16 %v5104_v6, %v5102_v27  ;;  %v9526_v23 = vpack.c.bf16 %v5109_v56, %v5107_v38  ;;  %v5594_v27 = vld [vmem:[#allocation23 + $0x60] sm:$0xff]  ;;  %v5599_v6 = vld [vmem:[#allocation23 + $0x88] sm:$0xff] }
 0xad4   : > { %v5603_v38 = vld [vmem:[#allocation23 + $0xa8] sm:$0xff] }
 0xad5   : > { %9489 = vmatpush1.bf16.msra.mxu0 %v9488_v43  ;;  %v5108_v43 = vld [vmem:[#allocation19 + $0x570] sm:$0xff] }
 0xad6   : > { %9491 = vmatprep.subr.bf16.mxu0 %v9490_v45  ;;  %v5111_v45 = vld [vmem:[#allocation19 + $0x588] sm:$0xff]  ;;  %v9528_v46 = vpack.c.bf16 %v5108_v43, %v5106_v3  ;;  %v5602_v3 = vld [vmem:[#allocation23 + $0xa0] sm:$0xff] }
 0xad7   : > { %v9530_v32 = vpack.c.bf16 %v5113_v13, %v5111_v45  ;;  %v5607_v43 = vld [vmem:[#allocation23 + $0xc8] sm:$0xff] }
 0xad8   : > { %v5611_v45 = vld [vmem:[#allocation23 + $0xe8] sm:$0xff] }
 0xad9   : > { %9493 = vmatpush1.bf16.msra.mxu0 %v9492_v8  ;;  %v5112_v8 = vld [vmem:[#allocation19 + $0x590] sm:$0xff] }
 0xada   : > { %9495 = vmatprep.subr.bf16.mxu0 %v9494_v33  ;;  %v5115_v33 = vld [vmem:[#allocation19 + $0x5a8] sm:$0xff]  ;;  %v9532_v42 = vpack.c.bf16 %v5112_v8, %v5110_v52  ;;  %v5610_v52 = vld [vmem:[#allocation23 + $0xe0] sm:$0xff] }
 0xadb   : > { %v9534_v53 = vpack.c.bf16 %v5117_v51, %v5115_v33  ;;  %v5615_v8 = vld [vmem:[#allocation23 + $0x108] sm:$0xff] }
 0xadc   : > { %v5619_v33 = vld [vmem:[#allocation23 + $0x128] sm:$0xff] }
 0xadd   : > { %9497 = vmatpush1.bf16.msra.mxu0 %v9496_v59  ;;  %v5116_v59 = vld [vmem:[#allocation19 + $0x5b0] sm:$0xff] }
 0xade   : > { %9499 = vmatprep.subr.bf16.mxu0 %v9498_v54  ;;  %v5119_v54 = vld [vmem:[#allocation19 + $0x5c8] sm:$0xff]  ;;  %v9536_v16 = vpack.c.bf16 %v5116_v59, %v5114_v24  ;;  %v5618_v24 = vld [vmem:[#allocation23 + $0x120] sm:$0xff] }
 0xadf   : > { %v9538_v62 = vpack.c.bf16 %v5121_v57, %v5119_v54  ;;  %v5623_v59 = vld [vmem:[#allocation23 + $0x148] sm:$0xff] }
 0xae0   : > { %v5627_v54 = vld [vmem:[#allocation23 + $0x168] sm:$0xff] }
 0xae1   : > { %9501 = vmatpush1.bf16.msra.mxu0 %v9500_v60  ;;  %v5120_v60 = vld [vmem:[#allocation19 + $0x5d0] sm:$0xff] }
 0xae2   : > { %9503 = vmatprep.subr.bf16.mxu0 %v9502_v7  ;;  %v5123_v7 = vld [vmem:[#allocation19 + $0x5e8] sm:$0xff]  ;;  %v9540_v35 = vpack.c.bf16 %v5120_v60, %v5118_v4  ;;  %v5626_v4 = vld [vmem:[#allocation23 + $0x160] sm:$0xff] }
 0xae3   : > { %v9542_v10 = vpack.c.bf16 %v5125_v44, %v5123_v7  ;;  %v5631_v60 = vld [vmem:[#allocation23 + $0x188] sm:$0xff] }
 0xae4   : > { %v5635_v7 = vld [vmem:[#allocation23 + $0x1a8] sm:$0xff] }
 0xae5   : > { %9505 = vmatpush1.bf16.msra.mxu0 %v9504_v1  ;;  %v5124_v1 = vld [vmem:[#allocation19 + $0x5f0] sm:$0xff] }
 0xae6   : > { %9507 = vmatprep.subr.bf16.mxu0 %v9506_v9  ;;  %v9544_v9 = vpack.c.bf16 %v5124_v1, %v5122_v12  ;;  %v5634_v12 = vld [vmem:[#allocation23 + $0x1a0] sm:$0xff]  ;;  %v5639_v1 = vld [vmem:[#allocation23 + $0x1c8] sm:$0xff] }
 0xae9   : > { %9509 = vmatpush1.bf16.msra.mxu0 %v9508_v30  ;;  %v5135_v30 = vrot.slane %v5126_v17, %v12257_v15 }
 0xaea   : > { %9511 = vmatprep.subr.bf16.mxu0 %v9510_v20  ;;  %v10244_v20 = vadd.f32 %v5131_v37, %v4269_v28  ;;  %v5638_v37 = vld [vmem:[#allocation23 + $0x1c0] sm:$0xff] }
 0xaeb   : > { %v10246_v26 = vadd.f32 %v5135_v30, %v4273_v29  ;;  %v5642_v29 = vld [vmem:[#allocation23 + $0x1e0] sm:$0xff]  ;;  %v5647_v30 = vld [vmem:[#allocation23 + $0x208] sm:$0xff] }
 0xaed   : > { %9513 = vmatpush1.bf16.msra.mxu0 %v9512_v36 }
 0xaee   : > { %9515 = vmatprep.subr.bf16.mxu0 %v9514_v34 }
 0xaf1   : > { %9517 = vmatpush1.bf16.msra.mxu0 %v9516_v39  ;;  %v5582_v39 = vld [vmem:[#allocation23] sm:$0xff] }
 0xaf2   : > { %9519 = vmatprep.subr.bf16.mxu0 %v9518_v50  ;;  %v5586_v50 = vld [vmem:[#allocation23 + $0x20] sm:$0xff] }
 0xaf3   : > { %v9548_v48 = vpack.c.bf16 %v5586_v50, %v5582_v39  ;;  %v9584_v39 = vpack.c.bf16 %v5658_v19, %v5654_v18  ;;  %v5735_v19 = vld [vmem:[#allocation23 + $0x4c8] sm:$0xff] }
 0xaf5   : > { %9521 = vmatpush1.bf16.msra.mxu0 %v9520_v31  ;;  %v9550_v31 = vpack.c.bf16 %v5595_v14, %v5591_v22  ;;  %v5662_v22 = vld [vmem:[#allocation23 + $0x280] sm:$0xff] }
 0xaf6   : > { %9523 = vmatprep.subr.bf16.mxu0 %v9522_v25  ;;  %v5590_v25 = vld [vmem:[#allocation23 + $0x40] sm:$0xff] }
 0xaf7   : > { %v9552_v56 = vpack.c.bf16 %v5594_v27, %v5590_v25  ;;  %v5666_v14 = vld [vmem:[#allocation23 + $0x2a0] sm:$0xff] }
 0xaf8   : > { %v5670_v27 = vld [vmem:[#allocation23 + $0x2c0] sm:$0xff] }
 0xaf9   : > { %9525 = vmatpush1.bf16.msra.mxu0 %v9524_v40  ;;  %v9554_v40 = vpack.c.bf16 %v5603_v38, %v5599_v6  ;;  %v5674_v6 = vld [vmem:[#allocation23 + $0x2e0] sm:$0xff]  ;;  %v5679_v38 = vld [vmem:[#allocation23 + $0x308] sm:$0xff] }
 0xafa   : > { %9527 = vmatprep.subr.bf16.mxu0 %v9526_v23  ;;  %v5598_v23 = vld [vmem:[#allocation23 + $0x80] sm:$0xff] }
 0xafb   : > { %v9556_v13 = vpack.c.bf16 %v5602_v3, %v5598_v23  ;;  %v5678_v3 = vld [vmem:[#allocation23 + $0x300] sm:$0xff] }
 0xafd   : > { %9529 = vmatpush1.bf16.msra.mxu0 %v9528_v46  ;;  %v9558_v46 = vpack.c.bf16 %v5611_v45, %v5607_v43  ;;  %v5682_v43 = vld [vmem:[#allocation23 + $0x320] sm:$0xff]  ;;  %v5687_v45 = vld [vmem:[#allocation23 + $0x348] sm:$0xff] }
 0xafe   : > { %9531 = vmatprep.subr.bf16.mxu0 %v9530_v32  ;;  %v5606_v32 = vld [vmem:[#allocation23 + $0xc0] sm:$0xff] }
 0xaff   : > { %v9560_v51 = vpack.c.bf16 %v5610_v52, %v5606_v32  ;;  %v5686_v52 = vld [vmem:[#allocation23 + $0x340] sm:$0xff] }
 0xb01   : > { %9533 = vmatpush1.bf16.msra.mxu0 %v9532_v42  ;;  %v9562_v42 = vpack.c.bf16 %v5619_v33, %v5615_v8  ;;  %v5690_v8 = vld [vmem:[#allocation23 + $0x360] sm:$0xff]  ;;  %v5695_v33 = vld [vmem:[#allocation23 + $0x388] sm:$0xff] }
 0xb02   : > { %9535 = vmatprep.subr.bf16.mxu0 %v9534_v53  ;;  %v5614_v53 = vld [vmem:[#allocation23 + $0x100] sm:$0xff] }
 0xb03   : > { %v9564_v57 = vpack.c.bf16 %v5618_v24, %v5614_v53  ;;  %v5694_v24 = vld [vmem:[#allocation23 + $0x380] sm:$0xff] }
 0xb05   : > { %9537 = vmatpush1.bf16.msra.mxu0 %v9536_v16  ;;  %v9566_v16 = vpack.c.bf16 %v5627_v54, %v5623_v59  ;;  %v5698_v59 = vld [vmem:[#allocation23 + $0x3a0] sm:$0xff]  ;;  %v5703_v54 = vld [vmem:[#allocation23 + $0x3c8] sm:$0xff] }
 0xb06   : > { %9539 = vmatprep.subr.bf16.mxu0 %v9538_v62  ;;  %v5622_v62 = vld [vmem:[#allocation23 + $0x140] sm:$0xff] }
 0xb07   : > { %v9568_v44 = vpack.c.bf16 %v5626_v4, %v5622_v62  ;;  %v5702_v4 = vld [vmem:[#allocation23 + $0x3c0] sm:$0xff] }
 0xb09   : > { %9541 = vmatpush1.bf16.msra.mxu0 %v9540_v35  ;;  %v9570_v35 = vpack.c.bf16 %v5635_v7, %v5631_v60  ;;  %v5706_v60 = vld [vmem:[#allocation23 + $0x3e0] sm:$0xff] }
 0xb0a   : > { %9543 = vmatprep.subr.bf16.mxu0 %v9542_v10  ;;  %v5630_v10 = vld [vmem:[#allocation23 + $0x180] sm:$0xff]  ;;  %v9608_v7 = vpack.c.bf16 %v5706_v60, %v5702_v4 }
 0xb0b   : > { %v9572_v17 = vpack.c.bf16 %v5634_v12, %v5630_v10  ;;  %v5710_v12 = vld [vmem:[#allocation23 + $0x400] sm:$0xff] }
 0xb0c   : > { %v5774_v60 = vld [vmem:[#allocation23 + $0x600] sm:$0xff] }
 0xb0d   : > { %9545 = vmatpush1.bf16.msra.mxu0 %v9544_v9  ;;  %v5643_v9 = vld [vmem:[#allocation23 + $0x1e8] sm:$0xff] }
 0xb0e   : > { %v9574_v28 = vpack.c.bf16 %v5643_v9, %v5639_v1  ;;  %v5714_v1 = vld [vmem:[#allocation23 + $0x420] sm:$0xff]  ;;  %v5719_v9 = vld [vmem:[#allocation23 + $0x448] sm:$0xff] }
 0xb10   : > { %5345 = vmatmul.mubr.f32.vlgmr.msra.gmra.mrb[60].mxu0 %v12428_v49 }
 0xb11   : > { %6484 = vmatprep.mubr.f32.mxu0 %v11340_v0 }
 0xbe3   : > { %v5346_v21 = vpop.f32.mrb[60].mxu0 }
 0xbe4   : > { %v10245_v47 = vadd.f32 %v10244_v20, %v5346_v21  ;;  %v5348_v58 = vpop.f32.mrb[61].mxu0  ;;  %v5651_v20 = vld [vmem:[#allocation23 + $0x228] sm:$0xff] }
 0xbe5   : > { %v10247_v36 = vadd.f32 %v10246_v26, %v5348_v58  ;;  %v9576_v26 = vpack.c.bf16 %v5642_v29, %v5638_v37  ;;  %v9578_v21 = vpack.c.bf16 %v5651_v20, %v5647_v30  ;;  %v5650_v58 = vld [vmem:[#allocation23 + $0x220] sm:$0xff]  ;;  %v9612_v37 = vpack.c.bf16 %v5714_v1, %v5710_v12 }
 0xbe6   : > { %v5353_v34 = vmax.f32 %v10245_v47, 0.0  ;;  %v5646_v47 = vld [vmem:[#allocation23 + $0x200] sm:$0xff] }
 0xbe7   : > { %v5354_v49 = vmax.f32 %v10247_v36, 0.0  ;;  %v5655_v36 = vld [vmem:[#allocation23 + $0x248] sm:$0xff]  ;;  %v5718_v20 = vld [vmem:[#allocation23 + $0x440] sm:$0xff] }
 0xbe8   : > { %v5782_v1 = vld [vmem:[#allocation23 + $0x640] sm:$0xff] }
 0xbe9   : > { %5359 = vmatprep.subr.mxu1 %v5354_v49 }
 0xbea   : > { %5360 = vmatpush1.msra.mxu1 %v5353_v34 }
 0xbeb   : > { %7974 = vmatmul.mubr.msk.f32.vlgmr.msra.gmra.mrb[38].mxu1 %vm4707_vm3, %v5355_v63  ;;  %5435 = vmatprep.subr.mxu1 %v5354_v49 }
 0xbec   : > { %5436 = vmatpush1.msra.mxu1 %v5353_v34  ;;  %5499 = vmatprep.mubr.f32.mxu1 %v11340_v0 }
 0xbed   : > { %5511 = vmatprep.subr.mxu1 %v5354_v49  ;;  %v5659_v49 = vld [vmem:[#allocation23 + $0x268] sm:$0xff] }
 0xbee   : > { %v9582_v63 = vpack.c.bf16 %v5659_v49, %v5655_v36 }
 0xbef   : > { %7975 = vmatmul.mubr.msk.f32.vlgmr.msra.gmra.mrb[40].mxu1 %vm4707_vm3, %v5431_v2  ;;  %v5663_v2 = vld [vmem:[#allocation23 + $0x288] sm:$0xff] }
 0xbf0   : > { %5512 = vmatpush1.msra.mxu1 %v5353_v34  ;;  %5575 = vmatprep.mubr.f32.mxu1 %v11340_v0  ;;  %v9580_v34 = vpack.c.bf16 %v5650_v58, %v5646_v47  ;;  %v5731_v47 = vld [vmem:[#allocation23 + $0x4a8] sm:$0xff] }
 0xbf1   : > { %9547 = vmatprep.subr.bf16.mxu1 %v9546_v55  ;;  %v5667_v55 = vld [vmem:[#allocation23 + $0x2a8] sm:$0xff] }
 0xbf2   : > { %v9586_v50 = vpack.c.bf16 %v5667_v55, %v5663_v2  ;;  %v5739_v2 = vld [vmem:[#allocation23 + $0x4e8] sm:$0xff] }
 0xbf3   : > { %7976 = vmatmul.mubr.msk.f32.vlgmr.msra.gmra.mrb[42].mxu1 %vm4707_vm3, %v5507_v41  ;;  %v5671_v41 = vld [vmem:[#allocation23 + $0x2c8] sm:$0xff] }
 0xbf4   : > { %9549 = vmatpush1.bf16.msra.mxu1 %v9548_v48  ;;  %v5675_v48 = vld [vmem:[#allocation23 + $0x2e8] sm:$0xff] }
 0xbf5   : > { %9551 = vmatprep.subr.bf16.mxu1 %v9550_v31  ;;  %v9588_v31 = vpack.c.bf16 %v5666_v14, %v5662_v22  ;;  %v9590_v25 = vpack.c.bf16 %v5675_v48, %v5671_v41  ;;  %v5734_v22 = vld [vmem:[#allocation23 + $0x4c0] sm:$0xff]  ;;  %v5743_v48 = vld [vmem:[#allocation23 + $0x508] sm:$0xff] }
 0xbf6   : > { %v5738_v14 = vld [vmem:[#allocation23 + $0x4e0] sm:$0xff] }
 0xbf8   : > { %9553 = vmatpush1.bf16.msra.mxu1 %v9552_v56  ;;  %v5683_v56 = vld [vmem:[#allocation23 + $0x328] sm:$0xff] }
 0xbf9   : > { %9555 = vmatprep.subr.bf16.mxu1 %v9554_v40  ;;  %v9592_v40 = vpack.c.bf16 %v5674_v6, %v5670_v27  ;;  %v9594_v23 = vpack.c.bf16 %v5683_v56, %v5679_v38  ;;  %v5742_v6 = vld [vmem:[#allocation23 + $0x500] sm:$0xff]  ;;  %v5751_v56 = vld [vmem:[#allocation23 + $0x548] sm:$0xff] }
 0xbfa   : > { %v5746_v38 = vld [vmem:[#allocation23 + $0x520] sm:$0xff] }
 0xbfc   : > { %9557 = vmatpush1.bf16.msra.mxu1 %v9556_v13  ;;  %v5691_v13 = vld [vmem:[#allocation23 + $0x368] sm:$0xff] }
 0xbfd   : > { %9559 = vmatprep.subr.bf16.mxu1 %v9558_v46  ;;  %v9596_v46 = vpack.c.bf16 %v5682_v43, %v5678_v3  ;;  %v9598_v32 = vpack.c.bf16 %v5691_v13, %v5687_v45  ;;  %v5750_v43 = vld [vmem:[#allocation23 + $0x540] sm:$0xff]  ;;  %v5759_v13 = vld [vmem:[#allocation23 + $0x588] sm:$0xff] }
 0xbfe   : > { %v5754_v45 = vld [vmem:[#allocation23 + $0x560] sm:$0xff] }
 0xc00   : > { %9561 = vmatpush1.bf16.msra.mxu1 %v9560_v51  ;;  %v5699_v51 = vld [vmem:[#allocation23 + $0x3a8] sm:$0xff] }
 0xc01   : > { %9563 = vmatprep.subr.bf16.mxu1 %v9562_v42  ;;  %v9600_v42 = vpack.c.bf16 %v5690_v8, %v5686_v52  ;;  %v9602_v53 = vpack.c.bf16 %v5699_v51, %v5695_v33  ;;  %v5758_v8 = vld [vmem:[#allocation23 + $0x580] sm:$0xff]  ;;  %v5767_v51 = vld [vmem:[#allocation23 + $0x5c8] sm:$0xff] }
 0xc02   : > { %v5762_v33 = vld [vmem:[#allocation23 + $0x5a0] sm:$0xff] }
 0xc04   : > { %9565 = vmatpush1.bf16.msra.mxu1 %v9564_v57  ;;  %v5707_v57 = vld [vmem:[#allocation23 + $0x3e8] sm:$0xff] }
 0xc05   : > { %9567 = vmatprep.subr.bf16.mxu1 %v9566_v16  ;;  %v9604_v16 = vpack.c.bf16 %v5698_v59, %v5694_v24  ;;  %v9606_v62 = vpack.c.bf16 %v5707_v57, %v5703_v54  ;;  %v5766_v59 = vld [vmem:[#allocation23 + $0x5c0] sm:$0xff]  ;;  %v5775_v57 = vld [vmem:[#allocation23 + $0x608] sm:$0xff] }
 0xc06   : > { %v5770_v54 = vld [vmem:[#allocation23 + $0x5e0] sm:$0xff] }
 0xc08   : > { %9569 = vmatpush1.bf16.msra.mxu1 %v9568_v44  ;;  %v5711_v44 = vld [vmem:[#allocation23 + $0x408] sm:$0xff] }
 0xc09   : > { %9571 = vmatprep.subr.bf16.mxu1 %v9570_v35  ;;  %v5715_v35 = vld [vmem:[#allocation23 + $0x428] sm:$0xff] }
 0xc0a   : > { %v9610_v10 = vpack.c.bf16 %v5715_v35, %v5711_v44  ;;  %v5783_v44 = vld [vmem:[#allocation23 + $0x648] sm:$0xff] }
 0xc0b   : > { %v5787_v35 = vld [vmem:[#allocation23 + $0x668] sm:$0xff] }
 0xc0c   : > { %9573 = vmatpush1.bf16.msra.mxu1 %v9572_v17  ;;  %v5723_v17 = vld [vmem:[#allocation23 + $0x468] sm:$0xff]  ;;  %v9646_v12 = vpack.c.bf16 %v5787_v35, %v5783_v44  ;;  %v5850_v44 = vld [vmem:[#allocation23 + $0x860] sm:$0xff] }
 0xc0d   : > { %9575 = vmatprep.subr.bf16.mxu1 %v9574_v28  ;;  %v9614_v30 = vpack.c.bf16 %v5723_v17, %v5719_v9  ;;  %v5786_v9 = vld [vmem:[#allocation23 + $0x660] sm:$0xff]  ;;  %v5791_v17 = vld [vmem:[#allocation23 + $0x688] sm:$0xff] }
 0xc0e   : > { %v5855_v35 = vld [vmem:[#allocation23 + $0x888] sm:$0xff] }
 0xc10   : > { %9577 = vmatpush1.bf16.msra.mxu1 %v9576_v26  ;;  %v5722_v26 = vld [vmem:[#allocation23 + $0x460] sm:$0xff] }
 0xc11   : > { %9579 = vmatprep.subr.bf16.mxu1 %v9578_v21  ;;  %v5727_v21 = vld [vmem:[#allocation23 + $0x488] sm:$0xff]  ;;  %v9616_v58 = vpack.c.bf16 %v5722_v26, %v5718_v20  ;;  %v5790_v26 = vld [vmem:[#allocation23 + $0x680] sm:$0xff] }
 0xc12   : > { %v9618_v49 = vpack.c.bf16 %v5731_v47, %v5727_v21  ;;  %v5794_v21 = vld [vmem:[#allocation23 + $0x6a0] sm:$0xff]  ;;  %v5799_v47 = vld [vmem:[#allocation23 + $0x6c8] sm:$0xff] }
 0xc14   : > { %9581 = vmatpush1.bf16.msra.mxu1 %v9580_v34  ;;  %v5726_v34 = vld [vmem:[#allocation23 + $0x480] sm:$0xff] }
 0xc15   : > { %9583 = vmatprep.subr.bf16.mxu1 %v9582_v63  ;;  %v5730_v63 = vld [vmem:[#allocation23 + $0x4a0] sm:$0xff] }
 0xc16   : > { %v9620_v55 = vpack.c.bf16 %v5730_v63, %v5726_v34  ;;  %v5798_v63 = vld [vmem:[#allocation23 + $0x6c0] sm:$0xff] }
 0xc18   : > { %9585 = vmatpush1.bf16.msra.mxu1 %v9584_v39 }
 0xc19   : > { %9587 = vmatprep.subr.bf16.mxu1 %v9586_v50  ;;  %v9622_v50 = vpack.c.bf16 %v5739_v2, %v5735_v19  ;;  %v5802_v19 = vld [vmem:[#allocation23 + $0x6e0] sm:$0xff]  ;;  %v5807_v2 = vld [vmem:[#allocation23 + $0x708] sm:$0xff] }
 0xc1c   : > { %9589 = vmatpush1.bf16.msra.mxu1 %v9588_v31  ;;  %v5747_v31 = vld [vmem:[#allocation23 + $0x528] sm:$0xff] }
 0xc1d   : > { %9591 = vmatprep.subr.bf16.mxu1 %v9590_v25  ;;  %v9624_v25 = vpack.c.bf16 %v5738_v14, %v5734_v22  ;;  %v9626_v27 = vpack.c.bf16 %v5747_v31, %v5743_v48  ;;  %v5806_v14 = vld [vmem:[#allocation23 + $0x700] sm:$0xff]  ;;  %v5815_v31 = vld [vmem:[#allocation23 + $0x748] sm:$0xff] }
 0xc1e   : > { %v5810_v48 = vld [vmem:[#allocation23 + $0x720] sm:$0xff] }
 0xc20   : > { %9593 = vmatpush1.bf16.msra.mxu1 %v9592_v40  ;;  %v5755_v40 = vld [vmem:[#allocation23 + $0x568] sm:$0xff] }
 0xc21   : > { %9595 = vmatprep.subr.bf16.mxu1 %v9594_v23  ;;  %v9628_v23 = vpack.c.bf16 %v5746_v38, %v5742_v6  ;;  %v9630_v3 = vpack.c.bf16 %v5755_v40, %v5751_v56  ;;  %v5814_v38 = vld [vmem:[#allocation23 + $0x740] sm:$0xff]  ;;  %v5823_v40 = vld [vmem:[#allocation23 + $0x788] sm:$0xff] }
 0xc22   : > { %v5818_v56 = vld [vmem:[#allocation23 + $0x760] sm:$0xff] }
 0xc24   : > { %9597 = vmatpush1.bf16.msra.mxu1 %v9596_v46  ;;  %v5763_v46 = vld [vmem:[#allocation23 + $0x5a8] sm:$0xff] }
 0xc25   : > { %9599 = vmatprep.subr.bf16.mxu1 %v9598_v32  ;;  %v9632_v32 = vpack.c.bf16 %v5754_v45, %v5750_v43  ;;  %v9634_v52 = vpack.c.bf16 %v5763_v46, %v5759_v13  ;;  %v5822_v45 = vld [vmem:[#allocation23 + $0x780] sm:$0xff]  ;;  %v5831_v46 = vld [vmem:[#allocation23 + $0x7c8] sm:$0xff] }
 0xc26   : > { %v5826_v13 = vld [vmem:[#allocation23 + $0x7a0] sm:$0xff] }
 0xc28   : > { %9601 = vmatpush1.bf16.msra.mxu1 %v9600_v42  ;;  %v5771_v42 = vld [vmem:[#allocation23 + $0x5e8] sm:$0xff] }
 0xc29   : > { %9603 = vmatprep.subr.bf16.mxu1 %v9602_v53  ;;  %v9636_v53 = vpack.c.bf16 %v5762_v33, %v5758_v8  ;;  %v9638_v24 = vpack.c.bf16 %v5771_v42, %v5767_v51  ;;  %v5830_v33 = vld [vmem:[#allocation23 + $0x7c0] sm:$0xff]  ;;  %v5839_v42 = vld [vmem:[#allocation23 + $0x808] sm:$0xff] }
 0xc2a   : > { %v5834_v51 = vld [vmem:[#allocation23 + $0x7e0] sm:$0xff] }
 0xc2c   : > { %9605 = vmatpush1.bf16.msra.mxu1 %v9604_v16  ;;  %v5779_v16 = vld [vmem:[#allocation23 + $0x628] sm:$0xff] }
 0xc2d   : > { %9607 = vmatprep.subr.bf16.mxu1 %v9606_v62  ;;  %v9640_v62 = vpack.c.bf16 %v5770_v54, %v5766_v59  ;;  %v9642_v4 = vpack.c.bf16 %v5779_v16, %v5775_v57  ;;  %v5838_v54 = vld [vmem:[#allocation23 + $0x800] sm:$0xff]  ;;  %v5847_v16 = vld [vmem:[#allocation23 + $0x848] sm:$0xff] }
 0xc2e   : > { %v5842_v57 = vld [vmem:[#allocation23 + $0x820] sm:$0xff] }
 0xc30   : > { %9609 = vmatpush1.bf16.msra.mxu1 %v9608_v7  ;;  %v5778_v7 = vld [vmem:[#allocation23 + $0x620] sm:$0xff] }
 0xc31   : > { %9611 = vmatprep.subr.bf16.mxu1 %v9610_v10  ;;  %v9644_v10 = vpack.c.bf16 %v5778_v7, %v5774_v60  ;;  %v5846_v7 = vld [vmem:[#allocation23 + $0x840] sm:$0xff] }
 0xcbe   : > { %v12447_v28 = vpop.f32.mrb[38].mxu1 }
 0xcbf   : > { %v12449_v29 = vpop.f32.mrb[39].mxu1 }
 0xcc0   : > { %6052 = vmatprep.mubr.f32.mxu1 %v12449_v29 }
 0xcc1   : > { %6053 = vmatmul.mubr.f32.vlgmr.msra.gmra.mrb[44].mxu1 %v12447_v28 }
 0xcc2   : > { %9613 = vmatpush1.bf16.msra.mxu1 %v9612_v37  ;;  %v12453_v36 = vpop.f32.mrb[40].mxu1  ;;  %v5795_v37 = vld [vmem:[#allocation23 + $0x6a8] sm:$0xff] }
 0xcc3   : > { %9615 = vmatprep.subr.bf16.mxu1 %v9614_v30  ;;  %v12455_v18 = vpop.f32.mrb[41].mxu1  ;;  %v9648_v30 = vpack.c.bf16 %v5786_v9, %v5782_v1  ;;  %v9650_v20 = vpack.c.bf16 %v5795_v37, %v5791_v17  ;;  %v5854_v9 = vld [vmem:[#allocation23 + $0x880] sm:$0xff]  ;;  %v5863_v37 = vld [vmem:[#allocation23 + $0x8c8] sm:$0xff] }
 0xcc4   : > { %6123 = vmatprep.mubr.f32.mxu1 %v12455_v18  ;;  %v5858_v17 = vld [vmem:[#allocation23 + $0x8a0] sm:$0xff] }
 0xcc6   : > { %9617 = vmatpush1.bf16.msra.mxu1 %v9616_v58  ;;  %v12458_v39 = vpop.f32.mrb[42].mxu1  ;;  %v5803_v58 = vld [vmem:[#allocation23 + $0x6e8] sm:$0xff] }
 0xcc7   : > { %9619 = vmatprep.subr.bf16.mxu1 %v9618_v49  ;;  %v12460_v41 = vpop.f32.mrb[43].mxu1  ;;  %v9652_v49 = vpack.c.bf16 %v5794_v21, %v5790_v26  ;;  %v9654_v34 = vpack.c.bf16 %v5803_v58, %v5799_v47  ;;  %v5862_v21 = vld [vmem:[#allocation23 + $0x8c0] sm:$0xff]  ;;  %v5871_v58 = vld [vmem:[#allocation23 + $0x908] sm:$0xff] }
 0xcc8   : > { %v5866_v47 = vld [vmem:[#allocation23 + $0x8e0] sm:$0xff] }
 0xcca   : > { %9621 = vmatpush1.bf16.msra.mxu1 %v9620_v55  ;;  %v5811_v55 = vld [vmem:[#allocation23 + $0x728] sm:$0xff] }
 0xccb   : > { %9623 = vmatprep.subr.bf16.mxu1 %v9622_v50  ;;  %v9656_v50 = vpack.c.bf16 %v5802_v19, %v5798_v63  ;;  %v9658_v22 = vpack.c.bf16 %v5811_v55, %v5807_v2  ;;  %v5870_v19 = vld [vmem:[#allocation23 + $0x900] sm:$0xff]  ;;  %v5879_v55 = vld [vmem:[#allocation23 + $0x948] sm:$0xff] }
 0xccc   : > { %v5874_v2 = vld [vmem:[#allocation23 + $0x920] sm:$0xff] }
 0xcce   : > { %9625 = vmatpush1.bf16.msra.mxu1 %v9624_v25  ;;  %v5819_v25 = vld [vmem:[#allocation23 + $0x768] sm:$0xff] }
 0xccf   : > { %9627 = vmatprep.subr.bf16.mxu1 %v9626_v27  ;;  %v9660_v27 = vpack.c.bf16 %v5810_v48, %v5806_v14  ;;  %v9662_v6 = vpack.c.bf16 %v5819_v25, %v5815_v31  ;;  %v5878_v48 = vld [vmem:[#allocation23 + $0x940] sm:$0xff]  ;;  %v5887_v25 = vld [vmem:[#allocation23 + $0x988] sm:$0xff] }
 0xcd0   : > { %v5882_v31 = vld [vmem:[#allocation23 + $0x960] sm:$0xff] }
 0xcd2   : > { %9629 = vmatpush1.bf16.msra.mxu1 %v9628_v23  ;;  %v5827_v23 = vld [vmem:[#allocation23 + $0x7a8] sm:$0xff] }
 0xcd3   : > { %9631 = vmatprep.subr.bf16.mxu1 %v9630_v3  ;;  %v9664_v3 = vpack.c.bf16 %v5818_v56, %v5814_v38  ;;  %v9666_v43 = vpack.c.bf16 %v5827_v23, %v5823_v40  ;;  %v5886_v56 = vld [vmem:[#allocation23 + $0x980] sm:$0xff]  ;;  %v5895_v23 = vld [vmem:[#allocation23 + $0x9c8] sm:$0xff] }
 0xcd4   : > { %v5890_v40 = vld [vmem:[#allocation23 + $0x9a0] sm:$0xff] }
 0xcd6   : > { %9633 = vmatpush1.bf16.msra.mxu1 %v9632_v32  ;;  %v5835_v32 = vld [vmem:[#allocation23 + $0x7e8] sm:$0xff] }
 0xcd7   : > { %9635 = vmatprep.subr.bf16.mxu1 %v9634_v52  ;;  %v9668_v52 = vpack.c.bf16 %v5826_v13, %v5822_v45  ;;  %v9670_v8 = vpack.c.bf16 %v5835_v32, %v5831_v46  ;;  %v5894_v13 = vld [vmem:[#allocation23 + $0x9c0] sm:$0xff]  ;;  %v5903_v32 = vld [vmem:[#allocation23 + $0xa08] sm:$0xff] }
 0xcd8   : > { %v5898_v46 = vld [vmem:[#allocation23 + $0x9e0] sm:$0xff] }
 0xcda   : > { %9637 = vmatpush1.bf16.msra.mxu1 %v9636_v53  ;;  %v5843_v53 = vld [vmem:[#allocation23 + $0x828] sm:$0xff] }
 0xcdb   : > { %9639 = vmatprep.subr.bf16.mxu1 %v9638_v24  ;;  %v9672_v24 = vpack.c.bf16 %v5834_v51, %v5830_v33  ;;  %v9674_v59 = vpack.c.bf16 %v5843_v53, %v5839_v42  ;;  %v5902_v51 = vld [vmem:[#allocation23 + $0xa00] sm:$0xff]  ;;  %v5911_v53 = vld [vmem:[#allocation23 + $0xa48] sm:$0xff] }
 0xcdc   : > { %v5906_v42 = vld [vmem:[#allocation23 + $0xa20] sm:$0xff] }
 0xcde   : > { %9641 = vmatpush1.bf16.msra.mxu1 %v9640_v62  ;;  %v5851_v62 = vld [vmem:[#allocation23 + $0x868] sm:$0xff] }
 0xcdf   : > { %9643 = vmatprep.subr.bf16.mxu1 %v9642_v4  ;;  %v9676_v4 = vpack.c.bf16 %v5842_v57, %v5838_v54  ;;  %v9678_v60 = vpack.c.bf16 %v5851_v62, %v5847_v16  ;;  %v5910_v57 = vld [vmem:[#allocation23 + $0xa40] sm:$0xff]  ;;  %v5919_v62 = vld [vmem:[#allocation23 + $0xa88] sm:$0xff] }
 0xce0   : > { %v5914_v16 = vld [vmem:[#allocation23 + $0xa60] sm:$0xff] }
 0xce2   : > { %9645 = vmatpush1.bf16.msra.mxu1 %v9644_v10  ;;  %v5859_v10 = vld [vmem:[#allocation23 + $0x8a8] sm:$0xff] }
 0xce3   : > { %9647 = vmatprep.subr.bf16.mxu1 %v9646_v12  ;;  %v9680_v12 = vpack.c.bf16 %v5850_v44, %v5846_v7  ;;  %v9682_v1 = vpack.c.bf16 %v5859_v10, %v5855_v35  ;;  %v5918_v44 = vld [vmem:[#allocation23 + $0xa80] sm:$0xff]  ;;  %v5927_v10 = vld [vmem:[#allocation23 + $0xac8] sm:$0xff] }
 0xce4   : > { %v5922_v35 = vld [vmem:[#allocation23 + $0xaa0] sm:$0xff] }
 0xce6   : > { %9649 = vmatpush1.bf16.msra.mxu1 %v9648_v30  ;;  %v5867_v30 = vld [vmem:[#allocation23 + $0x8e8] sm:$0xff] }
 0xce7   : > { %9651 = vmatprep.subr.bf16.mxu1 %v9650_v20  ;;  %v9684_v20 = vpack.c.bf16 %v5858_v17, %v5854_v9  ;;  %v9686_v26 = vpack.c.bf16 %v5867_v30, %v5863_v37  ;;  %v5926_v17 = vld [vmem:[#allocation23 + $0xac0] sm:$0xff]  ;;  %v5935_v30 = vld [vmem:[#allocation23 + $0xb08] sm:$0xff] }
 0xce8   : > { %v5930_v37 = vld [vmem:[#allocation23 + $0xae0] sm:$0xff] }
 0xcea   : > { %9653 = vmatpush1.bf16.msra.mxu1 %v9652_v49  ;;  %v5875_v49 = vld [vmem:[#allocation23 + $0x928] sm:$0xff] }
 0xceb   : > { %9655 = vmatprep.subr.bf16.mxu1 %v9654_v34  ;;  %v9688_v34 = vpack.c.bf16 %v5866_v47, %v5862_v21  ;;  %v9690_v63 = vpack.c.bf16 %v5875_v49, %v5871_v58  ;;  %v5934_v47 = vld [vmem:[#allocation23 + $0xb00] sm:$0xff]  ;;  %v5943_v49 = vld [vmem:[#allocation23 + $0xb48] sm:$0xff] }
 0xcec   : > { %v5938_v58 = vld [vmem:[#allocation23 + $0xb20] sm:$0xff] }
 0xcee   : > { %9657 = vmatpush1.bf16.msra.mxu1 %v9656_v50  ;;  %v5883_v50 = vld [vmem:[#allocation23 + $0x968] sm:$0xff] }
 0xcef   : > { %9659 = vmatprep.subr.bf16.mxu1 %v9658_v22  ;;  %v9692_v22 = vpack.c.bf16 %v5874_v2, %v5870_v19  ;;  %v9694_v14 = vpack.c.bf16 %v5883_v50, %v5879_v55  ;;  %v5942_v2 = vld [vmem:[#allocation23 + $0xb40] sm:$0xff]  ;;  %v5951_v50 = vld [vmem:[#allocation23 + $0xb88] sm:$0xff] }
 0xcf0   : > { %v5946_v55 = vld [vmem:[#allocation23 + $0xb60] sm:$0xff] }
 0xcf2   : > { %9661 = vmatpush1.bf16.msra.mxu1 %v9660_v27  ;;  %v5891_v27 = vld [vmem:[#allocation23 + $0x9a8] sm:$0xff] }
 0xcf3   : > { %9663 = vmatprep.subr.bf16.mxu1 %v9662_v6  ;;  %v9696_v6 = vpack.c.bf16 %v5882_v31, %v5878_v48  ;;  %v9698_v38 = vpack.c.bf16 %v5891_v27, %v5887_v25  ;;  %v5950_v31 = vld [vmem:[#allocation23 + $0xb80] sm:$0xff]  ;;  %v5959_v27 = vld [vmem:[#allocation23 + $0xbc8] sm:$0xff] }
 0xcf4   : > { %v5954_v25 = vld [vmem:[#allocation23 + $0xba0] sm:$0xff] }
 0xcf6   : > { %9665 = vmatpush1.bf16.msra.mxu1 %v9664_v3  ;;  %v5899_v3 = vld [vmem:[#allocation23 + $0x9e8] sm:$0xff] }
 0xcf7   : > { %9667 = vmatprep.subr.bf16.mxu1 %v9666_v43  ;;  %v9700_v43 = vpack.c.bf16 %v5890_v40, %v5886_v56  ;;  %v9702_v45 = vpack.c.bf16 %v5899_v3, %v5895_v23  ;;  %v5958_v40 = vld [vmem:[#allocation23 + $0xbc0] sm:$0xff]  ;;  %v5585_v3 = vld [vmem:[#allocation23 + $0x18] sm:$0xff] }
 0xcf8   : > { %v5962_v23 = vld [vmem:[#allocation23 + $0xbe0] sm:$0xff] }
 0xcfa   : > { %9669 = vmatpush1.bf16.msra.mxu1 %v9668_v52  ;;  %v5907_v52 = vld [vmem:[#allocation23 + $0xa28] sm:$0xff] }
 0xcfb   : > { %9671 = vmatprep.subr.bf16.mxu1 %v9670_v8  ;;  %v9704_v8 = vpack.c.bf16 %v5898_v46, %v5894_v13  ;;  %v9706_v33 = vpack.c.bf16 %v5907_v52, %v5903_v32  ;;  %v5584_v46 = vld [vmem:[#allocation23 + $0x10] sm:$0xff]  ;;  %v5593_v52 = vld [vmem:[#allocation23 + $0x58] sm:$0xff] }
 0xcfc   : > { %v5588_v32 = vld [vmem:[#allocation23 + $0x30] sm:$0xff] }
 0xcfe   : > { %9673 = vmatpush1.bf16.msra.mxu1 %v9672_v24  ;;  %v5915_v24 = vld [vmem:[#allocation23 + $0xa68] sm:$0xff] }
 0xcff   : > { %9675 = vmatprep.subr.bf16.mxu1 %v9674_v59  ;;  %v9708_v59 = vpack.c.bf16 %v5906_v42, %v5902_v51  ;;  %v9710_v54 = vpack.c.bf16 %v5915_v24, %v5911_v53  ;;  %v5592_v42 = vld [vmem:[#allocation23 + $0x50] sm:$0xff]  ;;  %v5601_v24 = vld [vmem:[#allocation23 + $0x98] sm:$0xff] }
 0xd00   : > { %v5596_v53 = vld [vmem:[#allocation23 + $0x70] sm:$0xff] }
 0xd01   : > { %6124 = vmatmul.mubr.f32.vlgmr.msra.gmra.mrb[44].mxu1 %v12453_v36 }
 0xd02   : > { %9677 = vmatpush1.bf16.msra.mxu1 %v9676_v4  ;;  %6194 = vmatprep.mubr.f32.mxu1 %v12460_v41  ;;  %v5923_v4 = vld [vmem:[#allocation23 + $0xaa8] sm:$0xff] }
 0xd03   : > { %9679 = vmatprep.subr.bf16.mxu1 %v9678_v60  ;;  %v9712_v60 = vpack.c.bf16 %v5914_v16, %v5910_v57  ;;  %v9714_v7 = vpack.c.bf16 %v5923_v4, %v5919_v62  ;;  %v5600_v16 = vld [vmem:[#allocation23 + $0x90] sm:$0xff]  ;;  %v5609_v4 = vld [vmem:[#allocation23 + $0xd8] sm:$0xff] }
 0xd04   : > { %v5604_v62 = vld [vmem:[#allocation23 + $0xb0] sm:$0xff] }
 0xd06   : > { %9681 = vmatpush1.bf16.msra.mxu1 %v9680_v12  ;;  %v5931_v12 = vld [vmem:[#allocation23 + $0xae8] sm:$0xff] }
 0xd07   : > { %9683 = vmatprep.subr.bf16.mxu1 %v9682_v1  ;;  %v9716_v1 = vpack.c.bf16 %v5922_v35, %v5918_v44  ;;  %v9718_v9 = vpack.c.bf16 %v5931_v12, %v5927_v10  ;;  %v5608_v35 = vld [vmem:[#allocation23 + $0xd0] sm:$0xff]  ;;  %v5617_v12 = vld [vmem:[#allocation23 + $0x118] sm:$0xff] }
 0xd08   : > { %v5612_v10 = vld [vmem:[#allocation23 + $0xf0] sm:$0xff] }
 0xd0a   : > { %9685 = vmatpush1.bf16.msra.mxu1 %v9684_v20  ;;  %v5939_v20 = vld [vmem:[#allocation23 + $0xb28] sm:$0xff] }
 0xd0b   : > { %9687 = vmatprep.subr.bf16.mxu1 %v9686_v26  ;;  %v9720_v26 = vpack.c.bf16 %v5930_v37, %v5926_v17  ;;  %v9722_v21 = vpack.c.bf16 %v5939_v20, %v5935_v30  ;;  %v5620_v37 = vld [vmem:[#allocation23 + $0x130] sm:$0xff]  ;;  %v5625_v30 = vld [vmem:[#allocation23 + $0x158] sm:$0xff] }
 0xd0c   : > { %v5629_v20 = vld [vmem:[#allocation23 + $0x178] sm:$0xff] }
 0xd0e   : > { %9689 = vmatpush1.bf16.msra.mxu1 %v9688_v34  ;;  %v5947_v34 = vld [vmem:[#allocation23 + $0xb68] sm:$0xff] }
 0xd0f   : > { %9691 = vmatprep.subr.bf16.mxu1 %v9690_v63  ;;  %v9724_v63 = vpack.c.bf16 %v5938_v58, %v5934_v47  ;;  %v9726_v19 = vpack.c.bf16 %v5947_v34, %v5943_v49  ;;  %v5624_v47 = vld [vmem:[#allocation23 + $0x150] sm:$0xff]  ;;  %v5633_v49 = vld [vmem:[#allocation23 + $0x198] sm:$0xff] }
 0xd10   : > { %v5628_v58 = vld [vmem:[#allocation23 + $0x170] sm:$0xff]  ;;  %v5637_v34 = vld [vmem:[#allocation23 + $0x1b8] sm:$0xff] }
 0xd12   : > { %9693 = vmatpush1.bf16.msra.mxu1 %v9692_v22  ;;  %v5955_v22 = vld [vmem:[#allocation23 + $0xba8] sm:$0xff] }
 0xd13   : > { %9695 = vmatprep.subr.bf16.mxu1 %v9694_v14  ;;  %v9728_v14 = vpack.c.bf16 %v5946_v55, %v5942_v2  ;;  %v9730_v48 = vpack.c.bf16 %v5955_v22, %v5951_v50  ;;  %v5632_v2 = vld [vmem:[#allocation23 + $0x190] sm:$0xff]  ;;  %v5641_v50 = vld [vmem:[#allocation23 + $0x1d8] sm:$0xff] }
 0xd14   : > { %v5636_v55 = vld [vmem:[#allocation23 + $0x1b0] sm:$0xff]  ;;  %v5645_v22 = vld [vmem:[#allocation23 + $0x1f8] sm:$0xff] }
 0xd16   : > { %9697 = vmatpush1.bf16.msra.mxu1 %v9696_v6  ;;  %v5963_v6 = vld [vmem:[#allocation23 + $0xbe8] sm:$0xff] }
 0xd17   : > { %9699 = vmatprep.subr.bf16.mxu1 %v9698_v38  ;;  %v9732_v38 = vpack.c.bf16 %v5954_v25, %v5950_v31  ;;  %v9734_v56 = vpack.c.bf16 %v5963_v6, %v5959_v27  ;;  %v5640_v31 = vld [vmem:[#allocation23 + $0x1d0] sm:$0xff]  ;;  %v5649_v27 = vld [vmem:[#allocation23 + $0x218] sm:$0xff] }
 0xd18   : > { %v5644_v25 = vld [vmem:[#allocation23 + $0x1f0] sm:$0xff]  ;;  %v5653_v6 = vld [vmem:[#allocation23 + $0x238] sm:$0xff] }
 0xd1a   : > { %9701 = vmatpush1.bf16.msra.mxu1 %v9700_v43  ;;  %v5589_v43 = vld [vmem:[#allocation23 + $0x38] sm:$0xff] }
 0xd1b   : > { %9703 = vmatprep.subr.bf16.mxu1 %v9702_v45  ;;  %v9736_v45 = vpack.c.bf16 %v5962_v23, %v5958_v40  ;;  %v9738_v13 = vpack.c.bf16 %v5589_v43, %v5585_v3  ;;  %v5648_v40 = vld [vmem:[#allocation23 + $0x210] sm:$0xff]  ;;  %v5657_v3 = vld [vmem:[#allocation23 + $0x258] sm:$0xff] }
 0xd1c   : > { %v5652_v23 = vld [vmem:[#allocation23 + $0x230] sm:$0xff]  ;;  %v5661_v43 = vld [vmem:[#allocation23 + $0x278] sm:$0xff] }
 0xd1e   : > { %9705 = vmatpush1.bf16.msra.mxu1 %v9704_v8  ;;  %v5597_v8 = vld [vmem:[#allocation23 + $0x78] sm:$0xff] }
 0xd1f   : > { %9707 = vmatprep.subr.bf16.mxu1 %v9706_v33  ;;  %v9740_v33 = vpack.c.bf16 %v5588_v32, %v5584_v46  ;;  %v9742_v51 = vpack.c.bf16 %v5597_v8, %v5593_v52  ;;  %v5656_v46 = vld [vmem:[#allocation23 + $0x250] sm:$0xff]  ;;  %v5665_v52 = vld [vmem:[#allocation23 + $0x298] sm:$0xff] }
 0xd20   : > { %v5660_v32 = vld [vmem:[#allocation23 + $0x270] sm:$0xff]  ;;  %v5669_v8 = vld [vmem:[#allocation23 + $0x2b8] sm:$0xff] }
 0xd22   : > { %9709 = vmatpush1.bf16.msra.mxu1 %v9708_v59  ;;  %v5605_v59 = vld [vmem:[#allocation23 + $0xb8] sm:$0xff] }
 0xd23   : > { %9711 = vmatprep.subr.bf16.mxu1 %v9710_v54  ;;  %v9744_v54 = vpack.c.bf16 %v5596_v53, %v5592_v42  ;;  %v9746_v57 = vpack.c.bf16 %v5605_v59, %v5601_v24  ;;  %v5664_v42 = vld [vmem:[#allocation23 + $0x290] sm:$0xff]  ;;  %v5673_v24 = vld [vmem:[#allocation23 + $0x2d8] sm:$0xff] }
 0xd24   : > { %v5668_v53 = vld [vmem:[#allocation23 + $0x2b0] sm:$0xff]  ;;  %v5677_v59 = vld [vmem:[#allocation23 + $0x2f8] sm:$0xff] }
 0xd26   : > { %9713 = vmatpush1.bf16.msra.mxu1 %v9712_v60  ;;  %v5613_v60 = vld [vmem:[#allocation23 + $0xf8] sm:$0xff] }
 0xd27   : > { %9715 = vmatprep.subr.bf16.mxu1 %v9714_v7  ;;  %v9748_v7 = vpack.c.bf16 %v5604_v62, %v5600_v16  ;;  %v9750_v44 = vpack.c.bf16 %v5613_v60, %v5609_v4  ;;  %v5672_v16 = vld [vmem:[#allocation23 + $0x2d0] sm:$0xff]  ;;  %v5681_v4 = vld [vmem:[#allocation23 + $0x318] sm:$0xff] }
 0xd28   : > { %v5676_v62 = vld [vmem:[#allocation23 + $0x2f0] sm:$0xff]  ;;  %v5685_v60 = vld [vmem:[#allocation23 + $0x338] sm:$0xff] }
 0xd2a   : > { %9717 = vmatpush1.bf16.msra.mxu1 %v9716_v1  ;;  %v5621_v1 = vld [vmem:[#allocation23 + $0x138] sm:$0xff] }
 0xd2b   : > { %9719 = vmatprep.subr.bf16.mxu1 %v9718_v9  ;;  %v9752_v9 = vpack.c.bf16 %v5612_v10, %v5608_v35  ;;  %v9754_v17 = vpack.c.bf16 %v5621_v1, %v5617_v12  ;;  %v5680_v35 = vld [vmem:[#allocation23 + $0x310] sm:$0xff]  ;;  %v5689_v12 = vld [vmem:[#allocation23 + $0x358] sm:$0xff] }
 0xd2c   : > { %v5684_v10 = vld [vmem:[#allocation23 + $0x330] sm:$0xff]  ;;  %v5693_v1 = vld [vmem:[#allocation23 + $0x378] sm:$0xff] }
 0xd2e   : > { %9721 = vmatpush1.bf16.msra.mxu1 %v9720_v26 }
 0xd2f   : > { %9723 = vmatprep.subr.bf16.mxu1 %v9722_v21  ;;  %v9758_v21 = vpack.c.bf16 %v5629_v20, %v5625_v30  ;;  %v5697_v30 = vld [vmem:[#allocation23 + $0x398] sm:$0xff] }
 0xd30   : > { %v5701_v20 = vld [vmem:[#allocation23 + $0x3b8] sm:$0xff] }
 0xd32   : > { %9725 = vmatpush1.bf16.msra.mxu1 %v9724_v63  ;;  %v9760_v63 = vpack.c.bf16 %v5628_v58, %v5624_v47  ;;  %v5696_v47 = vld [vmem:[#allocation23 + $0x390] sm:$0xff] }
 0xd33   : > { %9727 = vmatprep.subr.bf16.mxu1 %v9726_v19  ;;  %v9762_v19 = vpack.c.bf16 %v5637_v34, %v5633_v49  ;;  %v5700_v58 = vld [vmem:[#allocation23 + $0x3b0] sm:$0xff]  ;;  %v5705_v49 = vld [vmem:[#allocation23 + $0x3d8] sm:$0xff] }
 0xd34   : > { %v5709_v34 = vld [vmem:[#allocation23 + $0x3f8] sm:$0xff] }
 0xd36   : > { %9729 = vmatpush1.bf16.msra.mxu1 %v9728_v14  ;;  %v9764_v14 = vpack.c.bf16 %v5636_v55, %v5632_v2  ;;  %v5704_v2 = vld [vmem:[#allocation23 + $0x3d0] sm:$0xff] }
 0xd37   : > { %9731 = vmatprep.subr.bf16.mxu1 %v9730_v48  ;;  %v9766_v48 = vpack.c.bf16 %v5645_v22, %v5641_v50  ;;  %v5708_v55 = vld [vmem:[#allocation23 + $0x3f0] sm:$0xff]  ;;  %v5713_v50 = vld [vmem:[#allocation23 + $0x418] sm:$0xff] }
 0xd38   : > { %v5717_v22 = vld [vmem:[#allocation23 + $0x438] sm:$0xff] }
 0xd3a   : > { %9733 = vmatpush1.bf16.msra.mxu1 %v9732_v38  ;;  %v9768_v38 = vpack.c.bf16 %v5644_v25, %v5640_v31  ;;  %v5712_v31 = vld [vmem:[#allocation23 + $0x410] sm:$0xff] }
 0xd3b   : > { %9735 = vmatprep.subr.bf16.mxu1 %v9734_v56  ;;  %v9770_v56 = vpack.c.bf16 %v5653_v6, %v5649_v27  ;;  %v5716_v25 = vld [vmem:[#allocation23 + $0x430] sm:$0xff]  ;;  %v5721_v27 = vld [vmem:[#allocation23 + $0x458] sm:$0xff] }
 0xd3c   : > { %v5725_v6 = vld [vmem:[#allocation23 + $0x478] sm:$0xff] }
 0xd3e   : > { %9737 = vmatpush1.bf16.msra.mxu1 %v9736_v45  ;;  %v9772_v45 = vpack.c.bf16 %v5652_v23, %v5648_v40  ;;  %v5720_v40 = vld [vmem:[#allocation23 + $0x450] sm:$0xff] }
 0xd3f   : > { %9739 = vmatprep.subr.bf16.mxu1 %v9738_v13  ;;  %v9774_v13 = vpack.c.bf16 %v5661_v43, %v5657_v3  ;;  %v5724_v23 = vld [vmem:[#allocation23 + $0x470] sm:$0xff]  ;;  %v5729_v3 = vld [vmem:[#allocation23 + $0x498] sm:$0xff] }
 0xd40   : > { %v5733_v43 = vld [vmem:[#allocation23 + $0x4b8] sm:$0xff] }
 0xd41   : > { %6195 = vmatmul.mubr.f32.vlgmr.msra.gmra.mrb[44].mxu1 %v12458_v39 }
 0xd42   : > { %9741 = vmatpush1.bf16.msra.mxu1 %v9740_v33  ;;  %6265 = vmatprep.mubr.f32.mxu1 %v12449_v29  ;;  %v5616_v29 = vld [vmem:[#allocation23 + $0x110] sm:$0xff]  ;;  %v9776_v33 = vpack.c.bf16 %v5660_v32, %v5656_v46 }
 0xd43   : > { %9743 = vmatprep.subr.bf16.mxu1 %v9742_v51  ;;  %v9756_v26 = vpack.c.bf16 %v5620_v37, %v5616_v29  ;;  %v9778_v51 = vpack.c.bf16 %v5669_v8, %v5665_v52  ;;  %v5688_v29 = vld [vmem:[#allocation23 + $0x350] sm:$0xff]  ;;  %v5737_v52 = vld [vmem:[#allocation23 + $0x4d8] sm:$0xff] }
 0xd44   : > { %v5692_v37 = vld [vmem:[#allocation23 + $0x370] sm:$0xff]  ;;  %v5741_v8 = vld [vmem:[#allocation23 + $0x4f8] sm:$0xff] }
 0xd45   : > { %v5728_v46 = vld [vmem:[#allocation23 + $0x490] sm:$0xff] }
 0xd46   : > { %9745 = vmatpush1.bf16.msra.mxu1 %v9744_v54  ;;  %v9780_v54 = vpack.c.bf16 %v5668_v53, %v5664_v42  ;;  %v5732_v32 = vld [vmem:[#allocation23 + $0x4b0] sm:$0xff] }
 0xd47   : > { %9747 = vmatprep.subr.bf16.mxu1 %v9746_v57  ;;  %v9782_v57 = vpack.c.bf16 %v5677_v59, %v5673_v24  ;;  %v5736_v42 = vld [vmem:[#allocation23 + $0x4d0] sm:$0xff]  ;;  %v5745_v24 = vld [vmem:[#allocation23 + $0x518] sm:$0xff] }
 0xd48   : > { %v5740_v53 = vld [vmem:[#allocation23 + $0x4f0] sm:$0xff]  ;;  %v5749_v59 = vld [vmem:[#allocation23 + $0x538] sm:$0xff] }
 0xd4a   : > { %9749 = vmatpush1.bf16.msra.mxu1 %v9748_v7  ;;  %v9784_v7 = vpack.c.bf16 %v5676_v62, %v5672_v16  ;;  %v5753_v16 = vld [vmem:[#allocation23 + $0x558] sm:$0xff] }
 0xd4b   : > { %9751 = vmatprep.subr.bf16.mxu1 %v9750_v44  ;;  %v9786_v44 = vpack.c.bf16 %v5685_v60, %v5681_v4  ;;  %v5757_v62 = vld [vmem:[#allocation23 + $0x578] sm:$0xff] }
 0xd4c   : > { %v9822_v60 = vpack.c.bf16 %v5757_v62, %v5753_v16 }
 0xd4e   : > { %9753 = vmatpush1.bf16.msra.mxu1 %v9752_v9  ;;  %v9788_v9 = vpack.c.bf16 %v5684_v10, %v5680_v35  ;;  %v5761_v35 = vld [vmem:[#allocation23 + $0x598] sm:$0xff] }
 0xd4f   : > { %9755 = vmatprep.subr.bf16.mxu1 %v9754_v17  ;;  %v9790_v17 = vpack.c.bf16 %v5693_v1, %v5689_v12  ;;  %v5765_v10 = vld [vmem:[#allocation23 + $0x5b8] sm:$0xff] }
 0xd50   : > { %v9826_v1 = vpack.c.bf16 %v5765_v10, %v5761_v35 }
 0xd52   : > { %9757 = vmatpush1.bf16.msra.mxu1 %v9756_v26  ;;  %v9792_v26 = vpack.c.bf16 %v5692_v37, %v5688_v29  ;;  %v5769_v29 = vld [vmem:[#allocation23 + $0x5d8] sm:$0xff] }
 0xd53   : > { %9759 = vmatprep.subr.bf16.mxu1 %v9758_v21  ;;  %v9794_v21 = vpack.c.bf16 %v5701_v20, %v5697_v30  ;;  %v5773_v37 = vld [vmem:[#allocation23 + $0x5f8] sm:$0xff] }
 0xd54   : > { %v9830_v20 = vpack.c.bf16 %v5773_v37, %v5769_v29 }
 0xd56   : > { %9761 = vmatpush1.bf16.msra.mxu1 %v9760_v63  ;;  %v9796_v63 = vpack.c.bf16 %v5700_v58, %v5696_v47  ;;  %v5777_v47 = vld [vmem:[#allocation23 + $0x618] sm:$0xff] }
 0xd57   : > { %9763 = vmatprep.subr.bf16.mxu1 %v9762_v19  ;;  %v9798_v19 = vpack.c.bf16 %v5709_v34, %v5705_v49  ;;  %v5781_v58 = vld [vmem:[#allocation23 + $0x638] sm:$0xff] }
 0xd58   : > { %v9834_v34 = vpack.c.bf16 %v5781_v58, %v5777_v47 }
 0xd5a   : > { %9765 = vmatpush1.bf16.msra.mxu1 %v9764_v14  ;;  %v9800_v14 = vpack.c.bf16 %v5708_v55, %v5704_v2  ;;  %v5785_v2 = vld [vmem:[#allocation23 + $0x658] sm:$0xff] }
 0xd5b   : > { %9767 = vmatprep.subr.bf16.mxu1 %v9766_v48  ;;  %v9802_v48 = vpack.c.bf16 %v5717_v22, %v5713_v50  ;;  %v5789_v55 = vld [vmem:[#allocation23 + $0x678] sm:$0xff] }
 0xd5c   : > { %v9838_v22 = vpack.c.bf16 %v5789_v55, %v5785_v2 }
 0xd5e   : > { %9769 = vmatpush1.bf16.msra.mxu1 %v9768_v38  ;;  %v9804_v38 = vpack.c.bf16 %v5716_v25, %v5712_v31  ;;  %v5793_v31 = vld [vmem:[#allocation23 + $0x698] sm:$0xff] }
 0xd5f   : > { %9771 = vmatprep.subr.bf16.mxu1 %v9770_v56  ;;  %v9806_v56 = vpack.c.bf16 %v5725_v6, %v5721_v27  ;;  %v5797_v25 = vld [vmem:[#allocation23 + $0x6b8] sm:$0xff] }
 0xd60   : > { %v9842_v6 = vpack.c.bf16 %v5797_v25, %v5793_v31 }
 0xd62   : > { %9773 = vmatpush1.bf16.msra.mxu1 %v9772_v45  ;;  %v9808_v45 = vpack.c.bf16 %v5724_v23, %v5720_v40  ;;  %v5801_v40 = vld [vmem:[#allocation23 + $0x6d8] sm:$0xff] }
 0xd63   : > { %9775 = vmatprep.subr.bf16.mxu1 %v9774_v13  ;;  %v9810_v13 = vpack.c.bf16 %v5733_v43, %v5729_v3  ;;  %v5805_v23 = vld [vmem:[#allocation23 + $0x6f8] sm:$0xff] }
 0xd64   : > { %v9846_v43 = vpack.c.bf16 %v5805_v23, %v5801_v40  ;;  %v5876_v23 = vld [vmem:[#allocation23 + $0x930] sm:$0xff] }
 0xd66   : > { %9777 = vmatpush1.bf16.msra.mxu1 %v9776_v33  ;;  %v9812_v33 = vpack.c.bf16 %v5732_v32, %v5728_v46  ;;  %v5809_v46 = vld [vmem:[#allocation23 + $0x718] sm:$0xff] }
 0xd67   : > { %9779 = vmatprep.subr.bf16.mxu1 %v9778_v51  ;;  %v9814_v51 = vpack.c.bf16 %v5741_v8, %v5737_v52  ;;  %v5813_v32 = vld [vmem:[#allocation23 + $0x738] sm:$0xff] }
 0xd68   : > { %v9850_v8 = vpack.c.bf16 %v5813_v32, %v5809_v46  ;;  %v5880_v46 = vld [vmem:[#allocation23 + $0x950] sm:$0xff] }
 0xd69   : > { %v5884_v32 = vld [vmem:[#allocation23 + $0x970] sm:$0xff] }
 0xd6a   : > { %9781 = vmatpush1.bf16.msra.mxu1 %v9780_v54  ;;  %v9818_v54 = vpack.c.bf16 %v5749_v59, %v5745_v24 }
 0xd6b   : > { %9783 = vmatprep.subr.bf16.mxu1 %v9782_v57  ;;  %v5748_v57 = vld [vmem:[#allocation23 + $0x530] sm:$0xff] }
 0xd6e   : > { %9785 = vmatpush1.bf16.msra.mxu1 %v9784_v7  ;;  %v5752_v7 = vld [vmem:[#allocation23 + $0x550] sm:$0xff] }
 0xd6f   : > { %9787 = vmatprep.subr.bf16.mxu1 %v9786_v44  ;;  %v5756_v44 = vld [vmem:[#allocation23 + $0x570] sm:$0xff] }
 0xd70   : > { %v9824_v12 = vpack.c.bf16 %v5756_v44, %v5752_v7  ;;  %v5833_v7 = vld [vmem:[#allocation23 + $0x7d8] sm:$0xff] }
 0xd71   : > { %v5837_v44 = vld [vmem:[#allocation23 + $0x7f8] sm:$0xff] }
 0xd72   : > { %9789 = vmatpush1.bf16.msra.mxu1 %v9788_v9  ;;  %v5760_v9 = vld [vmem:[#allocation23 + $0x590] sm:$0xff]  ;;  %v9862_v10 = vpack.c.bf16 %v5837_v44, %v5833_v7 }
 0xd73   : > { %9791 = vmatprep.subr.bf16.mxu1 %v9790_v17  ;;  %v5764_v17 = vld [vmem:[#allocation23 + $0x5b0] sm:$0xff] }
 0xd74   : > { %v9828_v30 = vpack.c.bf16 %v5764_v17, %v5760_v9  ;;  %v5841_v9 = vld [vmem:[#allocation23 + $0x818] sm:$0xff]  ;;  %v5904_v7 = vld [vmem:[#allocation23 + $0xa10] sm:$0xff] }
 0xd75   : > { %v5845_v17 = vld [vmem:[#allocation23 + $0x838] sm:$0xff]  ;;  %v5908_v44 = vld [vmem:[#allocation23 + $0xa30] sm:$0xff] }
 0xd76   : > { %9793 = vmatpush1.bf16.msra.mxu1 %v9792_v26  ;;  %v5768_v26 = vld [vmem:[#allocation23 + $0x5d0] sm:$0xff]  ;;  %v9866_v37 = vpack.c.bf16 %v5845_v17, %v5841_v9 }
 0xd77   : > { %9795 = vmatprep.subr.bf16.mxu1 %v9794_v21  ;;  %v5772_v21 = vld [vmem:[#allocation23 + $0x5f0] sm:$0xff] }
 0xd78   : > { %v9832_v49 = vpack.c.bf16 %v5772_v21, %v5768_v26  ;;  %v5849_v26 = vld [vmem:[#allocation23 + $0x858] sm:$0xff]  ;;  %v5912_v9 = vld [vmem:[#allocation23 + $0xa50] sm:$0xff] }
 0xd79   : > { %v5853_v21 = vld [vmem:[#allocation23 + $0x878] sm:$0xff]  ;;  %v5916_v17 = vld [vmem:[#allocation23 + $0xa70] sm:$0xff] }
 0xd7a   : > { %9797 = vmatpush1.bf16.msra.mxu1 %v9796_v63  ;;  %v5776_v63 = vld [vmem:[#allocation23 + $0x610] sm:$0xff]  ;;  %v9870_v58 = vpack.c.bf16 %v5853_v21, %v5849_v26 }
 0xd7b   : > { %9799 = vmatprep.subr.bf16.mxu1 %v9798_v19  ;;  %v5780_v19 = vld [vmem:[#allocation23 + $0x630] sm:$0xff] }
 0xd7c   : > { %v9836_v50 = vpack.c.bf16 %v5780_v19, %v5776_v63  ;;  %v5857_v63 = vld [vmem:[#allocation23 + $0x898] sm:$0xff]  ;;  %v5920_v26 = vld [vmem:[#allocation23 + $0xa90] sm:$0xff] }
 0xd7d   : > { %v5861_v19 = vld [vmem:[#allocation23 + $0x8b8] sm:$0xff]  ;;  %v5924_v21 = vld [vmem:[#allocation23 + $0xab0] sm:$0xff] }
 0xd7e   : > { %9801 = vmatpush1.bf16.msra.mxu1 %v9800_v14  ;;  %v5784_v14 = vld [vmem:[#allocation23 + $0x650] sm:$0xff]  ;;  %v9874_v55 = vpack.c.bf16 %v5861_v19, %v5857_v63 }
 0xd7f   : > { %9803 = vmatprep.subr.bf16.mxu1 %v9802_v48  ;;  %v5788_v48 = vld [vmem:[#allocation23 + $0x670] sm:$0xff] }
 0xd80   : > { %v9840_v27 = vpack.c.bf16 %v5788_v48, %v5784_v14  ;;  %v5865_v14 = vld [vmem:[#allocation23 + $0x8d8] sm:$0xff]  ;;  %v5928_v63 = vld [vmem:[#allocation23 + $0xad0] sm:$0xff] }
 0xd81   : > { %6266 = vmatmul.mubr.f32.vlgmr.msra.gmra.mrb[46].mxu1 %v12447_v28  ;;  %v9816_v28 = vpack.c.bf16 %v5740_v53, %v5736_v42  ;;  %v5817_v42 = vld [vmem:[#allocation23 + $0x758] sm:$0xff]  ;;  %v5932_v19 = vld [vmem:[#allocation23 + $0xaf0] sm:$0xff] }
 0xd82   : > { %9805 = vmatpush1.bf16.msra.mxu1 %v9804_v38  ;;  %6336 = vmatprep.mubr.f32.mxu1 %v12455_v18  ;;  %v5744_v18 = vld [vmem:[#allocation23 + $0x510] sm:$0xff]  ;;  %v5821_v53 = vld [vmem:[#allocation23 + $0x778] sm:$0xff] }
 0xd83   : > { %9807 = vmatprep.subr.bf16.mxu1 %v9806_v56  ;;  %v9820_v4 = vpack.c.bf16 %v5748_v57, %v5744_v18  ;;  %v5792_v38 = vld [vmem:[#allocation23 + $0x690] sm:$0xff]  ;;  %v9854_v59 = vpack.c.bf16 %v5821_v53, %v5817_v42  ;;  %v5825_v18 = vld [vmem:[#allocation23 + $0x798] sm:$0xff] }
 0xd84   : > { %v5796_v56 = vld [vmem:[#allocation23 + $0x6b0] sm:$0xff]  ;;  %v5829_v57 = vld [vmem:[#allocation23 + $0x7b8] sm:$0xff] }
 0xd85   : > { %v9844_v3 = vpack.c.bf16 %v5796_v56, %v5792_v38  ;;  %v9858_v62 = vpack.c.bf16 %v5829_v57, %v5825_v18  ;;  %v5869_v48 = vld [vmem:[#allocation23 + $0x8f8] sm:$0xff]  ;;  %v5888_v42 = vld [vmem:[#allocation23 + $0x990] sm:$0xff] }
 0xd86   : > { %9809 = vmatpush1.bf16.msra.mxu1 %v9808_v45  ;;  %v5800_v45 = vld [vmem:[#allocation23 + $0x6d0] sm:$0xff]  ;;  %v9878_v25 = vpack.c.bf16 %v5869_v48, %v5865_v14  ;;  %v5873_v38 = vld [vmem:[#allocation23 + $0x918] sm:$0xff] }
 0xd87   : > { %9811 = vmatprep.subr.bf16.mxu1 %v9810_v13  ;;  %v5804_v13 = vld [vmem:[#allocation23 + $0x6f0] sm:$0xff]  ;;  %v5877_v56 = vld [vmem:[#allocation23 + $0x938] sm:$0xff] }
 0xd88   : > { %v9848_v52 = vpack.c.bf16 %v5804_v13, %v5800_v45  ;;  %v9882_v40 = vpack.c.bf16 %v5877_v56, %v5873_v38  ;;  %v5892_v53 = vld [vmem:[#allocation23 + $0x9b0] sm:$0xff] }
 0xd89   : > { %v5896_v18 = vld [vmem:[#allocation23 + $0x9d0] sm:$0xff] }
 0xd8a   : > { %9813 = vmatpush1.bf16.msra.mxu1 %v9812_v33  ;;  %v5808_v33 = vld [vmem:[#allocation23 + $0x710] sm:$0xff] }
 0xd8b   : > { %9815 = vmatprep.subr.bf16.mxu1 %v9814_v51  ;;  %v5812_v51 = vld [vmem:[#allocation23 + $0x730] sm:$0xff] }
 0xd8c   : > { %v9852_v24 = vpack.c.bf16 %v5812_v51, %v5808_v33  ;;  %v9888_v33 = vpack.c.bf16 %v5884_v32, %v5880_v46  ;;  %v5900_v57 = vld [vmem:[#allocation23 + $0x9f0] sm:$0xff] }
 0xd8d   : > { %v5936_v14 = vld [vmem:[#allocation23 + $0xb10] sm:$0xff] }
 0xd8e   : > { %9817 = vmatpush1.bf16.msra.mxu1 %v9816_v28  ;;  %v5816_v28 = vld [vmem:[#allocation23 + $0x750] sm:$0xff] }
 0xd8f   : > { %9819 = vmatprep.subr.bf16.mxu1 %v9818_v54  ;;  %v5820_v54 = vld [vmem:[#allocation23 + $0x770] sm:$0xff] }
 0xd90   : > { %v9856_v16 = vpack.c.bf16 %v5820_v54, %v5816_v28  ;;  %v9892_v28 = vpack.c.bf16 %v5892_v53, %v5888_v42  ;;  %v5940_v48 = vld [vmem:[#allocation23 + $0xb30] sm:$0xff] }
 0xd91   : > { %v5944_v38 = vld [vmem:[#allocation23 + $0xb50] sm:$0xff] }
 0xd92   : > { %9821 = vmatpush1.bf16.msra.mxu1 %v9820_v4  ;;  %v5824_v4 = vld [vmem:[#allocation23 + $0x790] sm:$0xff] }
 0xd93   : > { %9823 = vmatprep.subr.bf16.mxu1 %v9822_v60  ;;  %v5828_v60 = vld [vmem:[#allocation23 + $0x7b0] sm:$0xff] }
 0xd94   : > { %v9860_v35 = vpack.c.bf16 %v5828_v60, %v5824_v4  ;;  %v9896_v4 = vpack.c.bf16 %v5900_v57, %v5896_v18  ;;  %v5948_v56 = vld [vmem:[#allocation23 + $0xb70] sm:$0xff] }
 0xd96   : > { %9825 = vmatpush1.bf16.msra.mxu1 %v9824_v12  ;;  %v5832_v12 = vld [vmem:[#allocation23 + $0x7d0] sm:$0xff] }
 0xd97   : > { %9827 = vmatprep.subr.bf16.mxu1 %v9826_v1  ;;  %v5836_v1 = vld [vmem:[#allocation23 + $0x7f0] sm:$0xff] }
 0xd98   : > { %v9864_v29 = vpack.c.bf16 %v5836_v1, %v5832_v12  ;;  %v9900_v12 = vpack.c.bf16 %v5908_v44, %v5904_v7 }
 0xd9a   : > { %9829 = vmatpush1.bf16.msra.mxu1 %v9828_v30  ;;  %v5840_v30 = vld [vmem:[#allocation23 + $0x810] sm:$0xff] }
 0xd9b   : > { %9831 = vmatprep.subr.bf16.mxu1 %v9830_v20  ;;  %v5844_v20 = vld [vmem:[#allocation23 + $0x830] sm:$0xff] }
 0xd9c   : > { %v9868_v47 = vpack.c.bf16 %v5844_v20, %v5840_v30  ;;  %v9904_v30 = vpack.c.bf16 %v5916_v17, %v5912_v9 }
 0xd9e   : > { %9833 = vmatpush1.bf16.msra.mxu1 %v9832_v49  ;;  %v5848_v49 = vld [vmem:[#allocation23 + $0x850] sm:$0xff] }
 0xd9f   : > { %9835 = vmatprep.subr.bf16.mxu1 %v9834_v34  ;;  %v5852_v34 = vld [vmem:[#allocation23 + $0x870] sm:$0xff] }
 0xda0   : > { %v9872_v2 = vpack.c.bf16 %v5852_v34, %v5848_v49  ;;  %v9908_v49 = vpack.c.bf16 %v5924_v21, %v5920_v26  ;;  %v6659_v21 = vld [vmem:[#allocation28 + $0x80] sm:$0xff] }
 0xda2   : > { %9837 = vmatpush1.bf16.msra.mxu1 %v9836_v50  ;;  %v5856_v50 = vld [vmem:[#allocation23 + $0x890] sm:$0xff] }
 0xda3   : > { %9839 = vmatprep.subr.bf16.mxu1 %v9838_v22  ;;  %v5860_v22 = vld [vmem:[#allocation23 + $0x8b0] sm:$0xff] }
 0xda4   : > { %v9876_v31 = vpack.c.bf16 %v5860_v22, %v5856_v50  ;;  %v9912_v50 = vpack.c.bf16 %v5932_v19, %v5928_v63 }
 0xda6   : > { %9841 = vmatpush1.bf16.msra.mxu1 %v9840_v27  ;;  %v5864_v27 = vld [vmem:[#allocation23 + $0x8d0] sm:$0xff] }
 0xda7   : > { %9843 = vmatprep.subr.bf16.mxu1 %v9842_v6  ;;  %v5868_v6 = vld [vmem:[#allocation23 + $0x8f0] sm:$0xff] }
 0xdaa   : > { %9845 = vmatpush1.bf16.msra.mxu1 %v9844_v3  ;;  %v5881_v3 = vld [vmem:[#allocation23 + $0x958] sm:$0xff] }
 0xdab   : > { %9847 = vmatprep.subr.bf16.mxu1 %v9846_v43  ;;  %v5885_v43 = vld [vmem:[#allocation23 + $0x978] sm:$0xff] }
 0xdac   : > { %v9886_v13 = vpack.c.bf16 %v5885_v43, %v5881_v3  ;;  %v5952_v3 = vld [vmem:[#allocation23 + $0xb90] sm:$0xff] }
 0xdad   : > { %v5956_v43 = vld [vmem:[#allocation23 + $0xbb0] sm:$0xff] }
 0xdae   : > { %9849 = vmatpush1.bf16.msra.mxu1 %v9848_v52  ;;  %v5889_v52 = vld [vmem:[#allocation23 + $0x998] sm:$0xff]  ;;  %v9924_v46 = vpack.c.bf16 %v5956_v43, %v5952_v3 }
 0xdaf   : > { %9851 = vmatprep.subr.bf16.mxu1 %v9850_v8  ;;  %v5893_v8 = vld [vmem:[#allocation23 + $0x9b8] sm:$0xff] }
 0xdb0   : > { %v9890_v51 = vpack.c.bf16 %v5893_v8, %v5889_v52  ;;  %v5960_v52 = vld [vmem:[#allocation23 + $0xbd0] sm:$0xff] }
 0xdb1   : > { %v5964_v8 = vld [vmem:[#allocation23 + $0xbf0] sm:$0xff] }
 0xdb2   : > { %9853 = vmatpush1.bf16.msra.mxu1 %v9852_v24  ;;  %v5897_v24 = vld [vmem:[#allocation23 + $0x9d8] sm:$0xff]  ;;  %v9928_v42 = vpack.c.bf16 %v5964_v8, %v5960_v52 }
 0xdb3   : > { %9855 = vmatprep.subr.bf16.mxu1 %v9854_v59  ;;  %v5901_v59 = vld [vmem:[#allocation23 + $0x9f8] sm:$0xff] }
 0xdb4   : > { %v9894_v54 = vpack.c.bf16 %v5901_v59, %v5897_v24  ;;  %v6643_v24 = vld [vmem:[#allocation28] sm:$0xff]  ;;  %v6645_v59 = vld [vmem:[#allocation28 + $0x10] sm:$0xff]  ;;  %v6678_v52 = vld [vmem:[#allocation28 + $0x118] sm:$0xff] }
 0xdb5   : > { %v9932_v18 = vpack.c.bf16 %v6645_v59, %v6643_v24  ;;  %v6677_v24 = vld [vmem:[#allocation28 + $0x110] sm:$0xff]  ;;  %v6680_v59 = vld [vmem:[#allocation28 + $0x128] sm:$0xff] }
 0xdb6   : > { %9857 = vmatpush1.bf16.msra.mxu1 %v9856_v16  ;;  %v5905_v16 = vld [vmem:[#allocation23 + $0xa18] sm:$0xff] }
 0xdb7   : > { %9859 = vmatprep.subr.bf16.mxu1 %v9858_v62  ;;  %v5909_v62 = vld [vmem:[#allocation23 + $0xa38] sm:$0xff] }
 0xdb8   : > { %v9898_v60 = vpack.c.bf16 %v5909_v62, %v5905_v16  ;;  %v6647_v16 = vld [vmem:[#allocation28 + $0x20] sm:$0xff]  ;;  %v6649_v62 = vld [vmem:[#allocation28 + $0x30] sm:$0xff] }
 0xdb9   : > { %v9936_v7 = vpack.c.bf16 %v6649_v62, %v6647_v16  ;;  %v6679_v16 = vld [vmem:[#allocation28 + $0x120] sm:$0xff]  ;;  %v6681_v62 = vld [vmem:[#allocation28 + $0x130] sm:$0xff] }
 0xdba   : > { %9861 = vmatpush1.bf16.msra.mxu1 %v9860_v35  ;;  %v5913_v35 = vld [vmem:[#allocation23 + $0xa58] sm:$0xff] }
 0xdbb   : > { %9863 = vmatprep.subr.bf16.mxu1 %v9862_v10  ;;  %v5917_v10 = vld [vmem:[#allocation23 + $0xa78] sm:$0xff] }
 0xdbc   : > { %v9902_v1 = vpack.c.bf16 %v5917_v10, %v5913_v35  ;;  %v6651_v35 = vld [vmem:[#allocation28 + $0x40] sm:$0xff]  ;;  %v6653_v10 = vld [vmem:[#allocation28 + $0x50] sm:$0xff] }
 0xdbd   : > { %v9940_v9 = vpack.c.bf16 %v6653_v10, %v6651_v35  ;;  %v6683_v10 = vld [vmem:[#allocation28 + $0x140] sm:$0xff] }
 0xdbe   : > { %9865 = vmatpush1.bf16.msra.mxu1 %v9864_v29  ;;  %v5921_v29 = vld [vmem:[#allocation23 + $0xa98] sm:$0xff] }
 0xdbf   : > { %9867 = vmatprep.subr.bf16.mxu1 %v9866_v37  ;;  %v5925_v37 = vld [vmem:[#allocation23 + $0xab8] sm:$0xff] }
 0xdc0   : > { %v9906_v20 = vpack.c.bf16 %v5925_v37, %v5921_v29  ;;  %v6655_v29 = vld [vmem:[#allocation28 + $0x60] sm:$0xff]  ;;  %v6657_v37 = vld [vmem:[#allocation28 + $0x70] sm:$0xff] }
 0xdc1   : > { %6337 = vmatmul.mubr.f32.vlgmr.msra.gmra.mrb[46].mxu1 %v12453_v36  ;;  %v9880_v36 = vpack.c.bf16 %v5868_v6, %v5864_v27  ;;  %v9916_v27 = vpack.c.bf16 %v5940_v48, %v5936_v14  ;;  %v9944_v26 = vpack.c.bf16 %v6657_v37, %v6655_v29  ;;  %v6687_v37 = vld [vmem:[#allocation28 + $0x160] sm:$0xff] }
 0xdc2   : > { %9869 = vmatpush1.bf16.msra.mxu1 %v9868_v47  ;;  %6407 = vmatprep.mubr.f32.mxu1 %v12460_v41  ;;  %v5872_v41 = vld [vmem:[#allocation23 + $0x910] sm:$0xff]  ;;  %v5929_v47 = vld [vmem:[#allocation23 + $0xad8] sm:$0xff] }
 0xdc3   : > { %9871 = vmatprep.subr.bf16.mxu1 %v9870_v58  ;;  %v9884_v45 = vpack.c.bf16 %v5876_v23, %v5872_v41  ;;  %v5933_v58 = vld [vmem:[#allocation23 + $0xaf8] sm:$0xff]  ;;  %v9920_v41 = vpack.c.bf16 %v5948_v56, %v5944_v38  ;;  %v6672_v56 = vld [vmem:[#allocation28 + $0xe8] sm:$0xff] }
 0xdc4   : > { %v9910_v34 = vpack.c.bf16 %v5933_v58, %v5929_v47  ;;  %v6661_v47 = vld [vmem:[#allocation28 + $0x90] sm:$0xff]  ;;  %v6664_v58 = vld [vmem:[#allocation28 + $0xa8] sm:$0xff] }
 0xdc5   : > { %v9948_v63 = vpack.c.bf16 %v6661_v47, %v6659_v21  ;;  %v6691_v47 = vld [vmem:[#allocation28 + $0x180] sm:$0xff] }
 0xdc6   : > { %9873 = vmatpush1.bf16.msra.mxu1 %v9872_v2  ;;  %v5937_v2 = vld [vmem:[#allocation23 + $0xb18] sm:$0xff] }
 0xdc7   : > { %9875 = vmatprep.subr.bf16.mxu1 %v9874_v55  ;;  %v5941_v55 = vld [vmem:[#allocation23 + $0xb38] sm:$0xff] }
 0xdc8   : > { %v9914_v22 = vpack.c.bf16 %v5941_v55, %v5937_v2  ;;  %v6663_v2 = vld [vmem:[#allocation28 + $0xa0] sm:$0xff]  ;;  %v6665_v55 = vld [vmem:[#allocation28 + $0xb0] sm:$0xff] }
 0xdca   : > { %9877 = vmatpush1.bf16.msra.mxu1 %v9876_v31  ;;  %v5945_v31 = vld [vmem:[#allocation23 + $0xb58] sm:$0xff] }
 0xdcb   : > { %9879 = vmatprep.subr.bf16.mxu1 %v9878_v25  ;;  %v5949_v25 = vld [vmem:[#allocation23 + $0xb78] sm:$0xff] }
 0xdcc   : > { %v9918_v6 = vpack.c.bf16 %v5949_v25, %v5945_v31  ;;  %v9952_v31 = vpack.c.bf16 %v6665_v55, %v6663_v2  ;;  %v6695_v55 = vld [vmem:[#allocation28 + $0x1a0] sm:$0xff] }
 0xdce   : > { %9881 = vmatpush1.bf16.msra.mxu1 %v9880_v36  ;;  %v5953_v36 = vld [vmem:[#allocation23 + $0xb98] sm:$0xff] }
 0xdcf   : > { %9883 = vmatprep.subr.bf16.mxu1 %v9882_v40  ;;  %v5957_v40 = vld [vmem:[#allocation23 + $0xbb8] sm:$0xff] }
 0xdd0   : > { %v9922_v23 = vpack.c.bf16 %v5957_v40, %v5953_v36  ;;  %v6674_v36 = vld [vmem:[#allocation28 + $0xf8] sm:$0xff] }
 0xdd1   : > { %v9958_v43 = vpack.c.bf16 %v6674_v36, %v6672_v56 }
 0xdd2   : > { %9885 = vmatpush1.bf16.msra.mxu1 %v9884_v45  ;;  %v5961_v45 = vld [vmem:[#allocation23 + $0xbd8] sm:$0xff] }
 0xdd3   : > { %9887 = vmatprep.subr.bf16.mxu1 %v9886_v13  ;;  %v5965_v13 = vld [vmem:[#allocation23 + $0xbf8] sm:$0xff] }
 0xdd4   : > { %v9926_v32 = vpack.c.bf16 %v5965_v13, %v5961_v45  ;;  %v6671_v45 = vld [vmem:[#allocation28 + $0xe0] sm:$0xff]  ;;  %v6673_v13 = vld [vmem:[#allocation28 + $0xf0] sm:$0xff] }
 0xdd6   : > { %9889 = vmatpush1.bf16.msra.mxu1 %v9888_v33  ;;  %v6644_v33 = vld [vmem:[#allocation28 + $0x8] sm:$0xff] }
 0xdd7   : > { %9891 = vmatprep.subr.bf16.mxu1 %v9890_v51  ;;  %v6646_v51 = vld [vmem:[#allocation28 + $0x18] sm:$0xff] }
 0xdd8   : > { %v9930_v53 = vpack.c.bf16 %v6646_v51, %v6644_v33  ;;  %v6416_v33 = vld [vmem:[#allocation26] sm:$0xff]  ;;  %v9960_v51 = vpack.c.bf16 %v6673_v13, %v6671_v45  ;;  %v6707_v13 = vld [vmem:[#allocation28 + $0x200] sm:$0xff] }
 0xdda   : > { %9893 = vmatpush1.bf16.msra.mxu1 %v9892_v28  ;;  %v6648_v28 = vld [vmem:[#allocation28 + $0x28] sm:$0xff] }
 0xddb   : > { %9895 = vmatprep.subr.bf16.mxu1 %v9894_v54  ;;  %v6650_v54 = vld [vmem:[#allocation28 + $0x38] sm:$0xff] }
 0xddc   : > { %v9934_v57 = vpack.c.bf16 %v6650_v54, %v6648_v28  ;;  %v6682_v28 = vld [vmem:[#allocation28 + $0x138] sm:$0xff]  ;;  %v6492_v54 = vld [vmem:[#allocation26 + $0x8] sm:$0xff] }
 0xdde   : > { %9897 = vmatpush1.bf16.msra.mxu1 %v9896_v4  ;;  %v6652_v4 = vld [vmem:[#allocation28 + $0x48] sm:$0xff] }
 0xddf   : > { %9899 = vmatprep.subr.bf16.mxu1 %v9898_v60  ;;  %v6654_v60 = vld [vmem:[#allocation28 + $0x58] sm:$0xff] }
 0xde0   : > { %v9938_v44 = vpack.c.bf16 %v6654_v60, %v6652_v4  ;;  %v6684_v4 = vld [vmem:[#allocation28 + $0x148] sm:$0xff]  ;;  %v6686_v60 = vld [vmem:[#allocation28 + $0x158] sm:$0xff] }
 0xde1   : > { %v9970_v35 = vpack.c.bf16 %v6686_v60, %v6684_v4  ;;  %v6720_v60 = vld [vmem:[#allocation28 + $0x268] sm:$0xff] }
 0xde2   : > { %9901 = vmatpush1.bf16.msra.mxu1 %v9900_v12  ;;  %v6656_v12 = vld [vmem:[#allocation28 + $0x68] sm:$0xff] }
 0xde3   : > { %9903 = vmatprep.subr.bf16.mxu1 %v9902_v1  ;;  %v6658_v1 = vld [vmem:[#allocation28 + $0x78] sm:$0xff] }
 0xde4   : > { %v9942_v17 = vpack.c.bf16 %v6658_v1, %v6656_v12  ;;  %v6685_v12 = vld [vmem:[#allocation28 + $0x150] sm:$0xff]  ;;  %v6688_v1 = vld [vmem:[#allocation28 + $0x168] sm:$0xff] }
 0xde6   : > { %9905 = vmatpush1.bf16.msra.mxu1 %v9904_v30  ;;  %v6660_v30 = vld [vmem:[#allocation28 + $0x88] sm:$0xff] }
 0xde7   : > { %9907 = vmatprep.subr.bf16.mxu1 %v9906_v20  ;;  %v6662_v20 = vld [vmem:[#allocation28 + $0x98] sm:$0xff] }
 0xdea   : > { %9909 = vmatpush1.bf16.msra.mxu1 %v9908_v49  ;;  %v6666_v49 = vld [vmem:[#allocation28 + $0xb8] sm:$0xff] }
 0xdeb   : > { %9911 = vmatprep.subr.bf16.mxu1 %v9910_v34  ;;  %v12471_v34 = vld [vmem:[#allocation25] sm:$0xf]  ;;  %v9950_v19 = vpack.c.bf16 %v6666_v49, %v6664_v58  ;;  %v6693_v58 = vld [vmem:[#allocation28 + $0x190] sm:$0xff]  ;;  %v6696_v49 = vld [vmem:[#allocation28 + $0x1a8] sm:$0xff] }
 0xdec   : > { %v5971_v14 = vrot.slane %v12471_v34, %v12252_v11  ;;  %v5975_v48 = vrot.slane %v12471_v34, %v12257_v15 }
 0xdee   : > { %9913 = vmatpush1.bf16.msra.mxu1 %v9912_v50  ;;  %v6668_v50 = vld [vmem:[#allocation28 + $0xc8] sm:$0xff] }
 0xdef   : > { %9915 = vmatprep.subr.bf16.mxu1 %v9914_v22  ;;  %v6670_v22 = vld [vmem:[#allocation28 + $0xd8] sm:$0xff] }
 0xdf0   : > { %v9954_v25 = vpack.c.bf16 %v6670_v22, %v6668_v50  ;;  %v6697_v50 = vld [vmem:[#allocation28 + $0x1b0] sm:$0xff]  ;;  %v6700_v22 = vld [vmem:[#allocation28 + $0x1c8] sm:$0xff] }
 0xdf2   : > { %9917 = vmatpush1.bf16.msra.mxu1 %v9916_v27  ;;  %v6667_v27 = vld [vmem:[#allocation28 + $0xc0] sm:$0xff] }
 0xdf3   : > { %9919 = vmatprep.subr.bf16.mxu1 %v9918_v6  ;;  %v6669_v6 = vld [vmem:[#allocation28 + $0xd0] sm:$0xff] }
 0xdf4   : > { %v9956_v3 = vpack.c.bf16 %v6669_v6, %v6667_v27  ;;  %v6701_v27 = vld [vmem:[#allocation28 + $0x1d0] sm:$0xff]  ;;  %v6704_v6 = vld [vmem:[#allocation28 + $0x1e8] sm:$0xff] }
 0xdf6   : > { %9921 = vmatpush1.bf16.msra.mxu1 %v9920_v41 }
 0xdf7   : > { %9923 = vmatprep.subr.bf16.mxu1 %v9922_v23 }
 0xdfa   : > { %9925 = vmatpush1.bf16.msra.mxu1 %v9924_v46 }
 0xdfb   : > { %9927 = vmatprep.subr.bf16.mxu1 %v9926_v32  ;;  %v6676_v32 = vld [vmem:[#allocation28 + $0x108] sm:$0xff] }
 0xdfe   : > { %9929 = vmatpush1.bf16.msra.mxu1 %v9928_v42  ;;  %v9962_v42 = vpack.c.bf16 %v6678_v52, %v6676_v32  ;;  %v6712_v32 = vld [vmem:[#allocation28 + $0x228] sm:$0xff]  ;;  %v6714_v52 = vld [vmem:[#allocation28 + $0x238] sm:$0xff] }
 0xdff   : > { %9931 = vmatprep.subr.bf16.mxu1 %v9930_v53  ;;  %v6675_v53 = vld [vmem:[#allocation28 + $0x100] sm:$0xff] }
 0xe01   : > { %6408 = vmatmul.mubr.f32.vlgmr.msra.gmra.mrb[46].mxu1 %v12458_v39  ;;  %v9946_v39 = vpack.c.bf16 %v6662_v20, %v6660_v30  ;;  %v6689_v30 = vld [vmem:[#allocation28 + $0x170] sm:$0xff]  ;;  %v6692_v20 = vld [vmem:[#allocation28 + $0x188] sm:$0xff] }
 0xe02   : > { %9933 = vmatpush1.bf16.msra.mxu1 %v9932_v18  ;;  %v9964_v18 = vpack.c.bf16 %v6677_v24, %v6675_v53  ;;  %v6711_v53 = vld [vmem:[#allocation28 + $0x220] sm:$0xff]  ;;  %v6713_v24 = vld [vmem:[#allocation28 + $0x230] sm:$0xff] }
 0xe03   : > { %9935 = vmatprep.subr.bf16.mxu1 %v9934_v57  ;;  %v9966_v57 = vpack.c.bf16 %v6682_v28, %v6680_v59  ;;  %v6716_v59 = vld [vmem:[#allocation28 + $0x248] sm:$0xff]  ;;  %v6718_v28 = vld [vmem:[#allocation28 + $0x258] sm:$0xff] }
 0xe06   : > { %9937 = vmatpush1.bf16.msra.mxu1 %v9936_v7  ;;  %v6568_v7 = vld [vmem:[#allocation26 + $0x10] sm:$0xff] }
 0xe07   : > { %9939 = vmatprep.subr.bf16.mxu1 %v9938_v44  ;;  %v9968_v44 = vpack.c.bf16 %v6681_v62, %v6679_v16  ;;  %v6715_v16 = vld [vmem:[#allocation28 + $0x240] sm:$0xff]  ;;  %v6717_v62 = vld [vmem:[#allocation28 + $0x250] sm:$0xff] }
 0xe0a   : > { %9941 = vmatpush1.bf16.msra.mxu1 %v9940_v9  ;;  %v6690_v9 = vld [vmem:[#allocation28 + $0x178] sm:$0xff] }
 0xe0b   : > { %9943 = vmatprep.subr.bf16.mxu1 %v9942_v17  ;;  %v9972_v17 = vpack.c.bf16 %v6685_v12, %v6683_v10  ;;  %v9974_v29 = vpack.c.bf16 %v6690_v9, %v6688_v1  ;;  %v6719_v12 = vld [vmem:[#allocation28 + $0x260] sm:$0xff]  ;;  %v6721_v1 = vld [vmem:[#allocation28 + $0x270] sm:$0xff] }
 0xe0e   : > { %9945 = vmatpush1.bf16.msra.mxu1 %v9944_v26  ;;  %v6694_v26 = vld [vmem:[#allocation28 + $0x198] sm:$0xff] }
 0xe0f   : > { %9947 = vmatprep.subr.bf16.mxu1 %v9946_v39  ;;  %v9976_v39 = vpack.c.bf16 %v6689_v30, %v6687_v37  ;;  %v9978_v21 = vpack.c.bf16 %v6694_v26, %v6692_v20  ;;  %v10008_v37 = vpack.c.bf16 %v6721_v1, %v6719_v12  ;;  %v6723_v20 = vld [vmem:[#allocation28 + $0x280] sm:$0xff]  ;;  %v6725_v26 = vld [vmem:[#allocation28 + $0x290] sm:$0xff]  ;;  %v6760_v1 = vld [vmem:[#allocation28 + $0x3a8] sm:$0xff] }
 0xe10   : > { %v6757_v12 = vld [vmem:[#allocation28 + $0x390] sm:$0xff] }
 0xe12   : > { %9949 = vmatpush1.bf16.msra.mxu1 %v9948_v63  ;;  %v6698_v63 = vld [vmem:[#allocation28 + $0x1b8] sm:$0xff] }
 0xe13   : > { %9951 = vmatprep.subr.bf16.mxu1 %v9950_v19  ;;  %v9980_v19 = vpack.c.bf16 %v6693_v58, %v6691_v47  ;;  %v9982_v2 = vpack.c.bf16 %v6698_v63, %v6696_v49  ;;  %v10012_v47 = vpack.c.bf16 %v6725_v26, %v6723_v20  ;;  %v6727_v49 = vld [vmem:[#allocation28 + $0x2a0] sm:$0xff]  ;;  %v6729_v63 = vld [vmem:[#allocation28 + $0x2b0] sm:$0xff]  ;;  %v6764_v26 = vld [vmem:[#allocation28 + $0x3c8] sm:$0xff] }
 0xe14   : > { %v6196_v38 = vpop.f32.mrb[44].mxu1  ;;  %v6761_v20 = vld [vmem:[#allocation28 + $0x3b0] sm:$0xff] }
 0xe15   : > { %v10248_v40 = vadd.f32 %v6196_v38, %v5971_v14  ;;  %v6198_v41 = vpop.f32.mrb[45].mxu1  ;;  %v6702_v14 = vld [vmem:[#allocation28 + $0x1d8] sm:$0xff] }
 0xe16   : > { %v10249_v23 = vadd.f32 %v6198_v41, %v5975_v48  ;;  %9953 = vmatpush1.bf16.msra.mxu1 %v9952_v31  ;;  %v9984_v48 = vpack.c.bf16 %v6697_v50, %v6695_v55  ;;  %v9986_v31 = vpack.c.bf16 %v6702_v14, %v6700_v22  ;;  %v6706_v38 = vld [vmem:[#allocation28 + $0x1f8] sm:$0xff]  ;;  %v6705_v41 = vld [vmem:[#allocation28 + $0x1f0] sm:$0xff]  ;;  %v10016_v55 = vpack.c.bf16 %v6729_v63, %v6727_v49  ;;  %v6731_v22 = vld [vmem:[#allocation28 + $0x2c0] sm:$0xff] }
 0xe17   : > { %9955 = vmatprep.subr.bf16.mxu1 %v9954_v25  ;;  %v6414_v8 = vmax.f32 %v10248_v40, 0.0  ;;  %v6699_v25 = vld [vmem:[#allocation28 + $0x1c0] sm:$0xff]  ;;  %v9990_v36 = vpack.c.bf16 %v6706_v38, %v6704_v6  ;;  %v6733_v14 = vld [vmem:[#allocation28 + $0x2d0] sm:$0xff]  ;;  %v6768_v63 = vld [vmem:[#allocation28 + $0x3e8] sm:$0xff] }
 0xe18   : > { %v6415_v46 = vmax.f32 %v10249_v23, 0.0  ;;  %v9988_v56 = vpack.c.bf16 %v6701_v27, %v6699_v25  ;;  %v6703_v40 = vld [vmem:[#allocation28 + $0x1e0] sm:$0xff]  ;;  %v10020_v25 = vpack.c.bf16 %v6733_v14, %v6731_v22  ;;  %v6737_v38 = vld [vmem:[#allocation28 + $0x2f0] sm:$0xff]  ;;  %v6772_v14 = vld [vmem:[#allocation28 + $0x408] sm:$0xff] }
 0xe19   : > { %v9992_v23 = vpack.c.bf16 %v6705_v41, %v6703_v40  ;;  %v6735_v6 = vld [vmem:[#allocation28 + $0x2e0] sm:$0xff]  ;;  %v6765_v49 = vld [vmem:[#allocation28 + $0x3d0] sm:$0xff] }
 0xe1a   : > { %6420 = vmatprep.subr.mxu0 %v6415_v46  ;;  %9957 = vmatpush1.bf16.msra.mxu1 %v9956_v3  ;;  %v6708_v3 = vld [vmem:[#allocation28 + $0x208] sm:$0xff]  ;;  %v10024_v40 = vpack.c.bf16 %v6737_v38, %v6735_v6  ;;  %v6769_v22 = vld [vmem:[#allocation28 + $0x3f0] sm:$0xff] }
 0xe1b   : > { %6421 = vmatpush1.msra.mxu0 %v6414_v8  ;;  %9959 = vmatprep.subr.bf16.mxu1 %v9958_v43  ;;  %v6710_v43 = vld [vmem:[#allocation28 + $0x218] sm:$0xff]  ;;  %v6773_v6 = vld [vmem:[#allocation28 + $0x410] sm:$0xff]  ;;  %v6776_v38 = vld [vmem:[#allocation28 + $0x428] sm:$0xff] }
 0xe1c   : > { %7977 = vmatmul.mubr.msk.f32.vlgmr.msra.gmra.mrb[62].mxu0 %vm4707_vm3, %v6416_v33  ;;  %6496 = vmatprep.subr.mxu0 %v6415_v46  ;;  %v9994_v45 = vpack.c.bf16 %v6710_v43, %v6708_v3  ;;  %v6741_v3 = vld [vmem:[#allocation28 + $0x310] sm:$0xff]  ;;  %v6744_v43 = vld [vmem:[#allocation28 + $0x328] sm:$0xff] }
 0xe1d   : > { %6497 = vmatpush1.msra.mxu0 %v6414_v8  ;;  %6560 = vmatprep.mubr.f32.mxu0 %v11340_v0 }
 0xe1e   : > { %6572 = vmatprep.subr.mxu0 %v6415_v46  ;;  %9961 = vmatpush1.bf16.msra.mxu1 %v9960_v51  ;;  %v6709_v46 = vld [vmem:[#allocation28 + $0x210] sm:$0xff] }
 0xe1f   : > { %9963 = vmatprep.subr.bf16.mxu1 %v9962_v42  ;;  %v9996_v33 = vpack.c.bf16 %v6709_v46, %v6707_v13  ;;  %v9998_v42 = vpack.c.bf16 %v6714_v52, %v6712_v32  ;;  %v6743_v32 = vld [vmem:[#allocation28 + $0x320] sm:$0xff]  ;;  %v6745_v52 = vld [vmem:[#allocation28 + $0x330] sm:$0xff] }
 0xe20   : > { %7978 = vmatmul.mubr.msk.f32.vlgmr.msra.gmra.mrb[64].mxu0 %vm4707_vm3, %v6492_v54  ;;  %v10000_v54 = vpack.c.bf16 %v6713_v24, %v6711_v53  ;;  %v6747_v53 = vld [vmem:[#allocation28 + $0x340] sm:$0xff]  ;;  %v6749_v24 = vld [vmem:[#allocation28 + $0x350] sm:$0xff] }
 0xe21   : > { %6573 = vmatpush1.msra.mxu0 %v6414_v8  ;;  %6636 = vmatprep.mubr.f32.mxu0 %v11340_v0 }
 0xe22   : > { %9965 = vmatpush1.bf16.msra.mxu1 %v9964_v18 }
 0xe23   : > { %9967 = vmatprep.subr.bf16.mxu1 %v9966_v57  ;;  %v10002_v57 = vpack.c.bf16 %v6718_v28, %v6716_v59  ;;  %v6752_v59 = vld [vmem:[#allocation28 + $0x368] sm:$0xff]  ;;  %v6754_v28 = vld [vmem:[#allocation28 + $0x378] sm:$0xff] }
 0xe24   : > { %7979 = vmatmul.mubr.msk.f32.vlgmr.msra.gmra.mrb[66].mxu0 %vm4707_vm3, %v6568_v7  ;;  %v6722_v7 = vld [vmem:[#allocation28 + $0x278] sm:$0xff] }
 0xe25   : > { %7132 = vmatprep.mubr.f32.mxu0 %v11340_v0  ;;  %v10006_v10 = vpack.c.bf16 %v6722_v7, %v6720_v60  ;;  %v6758_v60 = vld [vmem:[#allocation28 + $0x398] sm:$0xff] }
 0xe26   : > { %9969 = vmatpush1.bf16.msra.mxu1 %v9968_v44  ;;  %v10004_v44 = vpack.c.bf16 %v6717_v62, %v6715_v16  ;;  %v6751_v16 = vld [vmem:[#allocation28 + $0x360] sm:$0xff]  ;;  %v6753_v62 = vld [vmem:[#allocation28 + $0x370] sm:$0xff] }
 0xe27   : > { %9971 = vmatprep.subr.bf16.mxu1 %v9970_v35  ;;  %v10040_v7 = vpack.c.bf16 %v6753_v62, %v6751_v16  ;;  %v6794_v16 = vld [vmem:[#allocation28 + $0x4b8] sm:$0xff] }
 0xe2a   : > { %9973 = vmatpush1.bf16.msra.mxu1 %v9972_v17  ;;  %v6724_v17 = vld [vmem:[#allocation28 + $0x288] sm:$0xff] }
 0xe2b   : > { %9975 = vmatprep.subr.bf16.mxu1 %v9974_v29  ;;  %v6726_v29 = vld [vmem:[#allocation28 + $0x298] sm:$0xff] }
 0xe2c   : > { %v10010_v30 = vpack.c.bf16 %v6726_v29, %v6724_v17  ;;  %v6762_v17 = vld [vmem:[#allocation28 + $0x3b8] sm:$0xff] }
 0xe2e   : > { %9977 = vmatpush1.bf16.msra.mxu1 %v9976_v39  ;;  %v6728_v39 = vld [vmem:[#allocation28 + $0x2a8] sm:$0xff] }
 0xe2f   : > { %9979 = vmatprep.subr.bf16.mxu1 %v9978_v21  ;;  %v6730_v21 = vld [vmem:[#allocation28 + $0x2b8] sm:$0xff] }
 0xe30   : > { %v10014_v58 = vpack.c.bf16 %v6730_v21, %v6728_v39  ;;  %v6766_v39 = vld [vmem:[#allocation28 + $0x3d8] sm:$0xff] }
 0xe32   : > { %9981 = vmatpush1.bf16.msra.mxu1 %v9980_v19  ;;  %v6732_v19 = vld [vmem:[#allocation28 + $0x2c8] sm:$0xff] }
 0xe33   : > { %9983 = vmatprep.subr.bf16.mxu1 %v9982_v2  ;;  %v6734_v2 = vld [vmem:[#allocation28 + $0x2d8] sm:$0xff] }
 0xe34   : > { %v10018_v50 = vpack.c.bf16 %v6734_v2, %v6732_v19  ;;  %v6770_v19 = vld [vmem:[#allocation28 + $0x3f8] sm:$0xff] }
 0xe36   : > { %9985 = vmatpush1.bf16.msra.mxu1 %v9984_v48  ;;  %v6736_v48 = vld [vmem:[#allocation28 + $0x2e8] sm:$0xff] }
 0xe37   : > { %9987 = vmatprep.subr.bf16.mxu1 %v9986_v31  ;;  %v6738_v31 = vld [vmem:[#allocation28 + $0x2f8] sm:$0xff] }
 0xe38   : > { %v10022_v27 = vpack.c.bf16 %v6738_v31, %v6736_v48  ;;  %v6774_v48 = vld [vmem:[#allocation28 + $0x418] sm:$0xff] }
 0xe3a   : > { %9989 = vmatpush1.bf16.msra.mxu1 %v9988_v56  ;;  %v6740_v56 = vld [vmem:[#allocation28 + $0x308] sm:$0xff] }
 0xe3b   : > { %9991 = vmatprep.subr.bf16.mxu1 %v9990_v36  ;;  %v6742_v36 = vld [vmem:[#allocation28 + $0x318] sm:$0xff] }
 0xe3c   : > { %v10026_v41 = vpack.c.bf16 %v6742_v36, %v6740_v56  ;;  %v6778_v56 = vld [vmem:[#allocation28 + $0x438] sm:$0xff] }
 0xe3e   : > { %9993 = vmatpush1.bf16.msra.mxu1 %v9992_v23  ;;  %v6739_v23 = vld [vmem:[#allocation28 + $0x300] sm:$0xff] }
 0xe3f   : > { %9995 = vmatprep.subr.bf16.mxu1 %v9994_v45  ;;  %v6746_v45 = vld [vmem:[#allocation28 + $0x338] sm:$0xff]  ;;  %v10028_v13 = vpack.c.bf16 %v6741_v3, %v6739_v23  ;;  %v6777_v23 = vld [vmem:[#allocation28 + $0x430] sm:$0xff]  ;;  %v6780_v3 = vld [vmem:[#allocation28 + $0x448] sm:$0xff] }
 0xe40   : > { %v10030_v46 = vpack.c.bf16 %v6746_v45, %v6744_v43  ;;  %v6782_v43 = vld [vmem:[#allocation28 + $0x458] sm:$0xff] }
 0xeef   : > { %v6486_v8 = vpop.f32.mrb[62].mxu0 }
 0xef0   : > { %v6488_v51 = vpop.f32.mrb[63].mxu0 }
 0xef1   : > { %6911 = vmatprep.mubr.f32.mxu1 %v6488_v51  ;;  %v10032_v51 = vpack.c.bf16 %v6745_v52, %v6743_v32  ;;  %v6781_v32 = vld [vmem:[#allocation28 + $0x450] sm:$0xff]  ;;  %v6784_v52 = vld [vmem:[#allocation28 + $0x468] sm:$0xff] }
 0xef2   : > { %6912 = vmatmul.mubr.f32.vlgmr.msra.gmra.mrb[46].mxu1 %v6486_v8  ;;  %v6748_v8 = vld [vmem:[#allocation28 + $0x348] sm:$0xff] }
 0xef3   : > { %9997 = vmatpush1.bf16.msra.mxu1 %v9996_v33  ;;  %v12483_v18 = vpop.f32.mrb[64].mxu0  ;;  %v6750_v33 = vld [vmem:[#allocation28 + $0x358] sm:$0xff] }
 0xef4   : > { %9999 = vmatprep.subr.bf16.mxu1 %v9998_v42  ;;  %v6564_v4 = vpop.f32.mrb[65].mxu0  ;;  %v10034_v42 = vpack.c.bf16 %v6750_v33, %v6748_v8  ;;  %v6786_v8 = vld [vmem:[#allocation28 + $0x478] sm:$0xff] }
 0xef5   : > { %6982 = vmatprep.mubr.f32.mxu1 %v6564_v4  ;;  %v6756_v4 = vld [vmem:[#allocation28 + $0x388] sm:$0xff] }
 0xef7   : > { %10001 = vmatpush1.bf16.msra.mxu1 %v10000_v54  ;;  %v12485_v35 = vpop.f32.mrb[66].mxu0  ;;  %v10036_v54 = vpack.c.bf16 %v6749_v24, %v6747_v53  ;;  %v6785_v53 = vld [vmem:[#allocation28 + $0x470] sm:$0xff]  ;;  %v6788_v24 = vld [vmem:[#allocation28 + $0x488] sm:$0xff] }
 0xef8   : > { %10003 = vmatprep.subr.bf16.mxu1 %v10002_v57  ;;  %v12487_v9 = vpop.f32.mrb[67].mxu0  ;;  %v10038_v57 = vpack.c.bf16 %v6754_v28, %v6752_v59  ;;  %v6790_v59 = vld [vmem:[#allocation28 + $0x498] sm:$0xff] }
 0xef9   : > { %v10074_v28 = vpack.c.bf16 %v6790_v59, %v6788_v24  ;;  %v6823_v59 = vld [vmem:[#allocation28 + $0x5a0] sm:$0xff] }
 0xefb   : > { %10005 = vmatpush1.bf16.msra.mxu1 %v10004_v44  ;;  %v10042_v44 = vpack.c.bf16 %v6758_v60, %v6756_v4  ;;  %v6791_v60 = vld [vmem:[#allocation28 + $0x4a0] sm:$0xff] }
 0xefc   : > { %10007 = vmatprep.subr.bf16.mxu1 %v10006_v10  ;;  %v6755_v10 = vld [vmem:[#allocation28 + $0x380] sm:$0xff] }
 0xefd   : > { %v10044_v29 = vpack.c.bf16 %v6757_v12, %v6755_v10  ;;  %v6798_v10 = vld [vmem:[#allocation28 + $0x4d8] sm:$0xff] }
 0xeff   : > { %10009 = vmatpush1.bf16.msra.mxu1 %v10008_v37  ;;  %v10046_v37 = vpack.c.bf16 %v6762_v17, %v6760_v1  ;;  %v6795_v17 = vld [vmem:[#allocation28 + $0x4c0] sm:$0xff] }
 0xf00   : > { %10011 = vmatprep.subr.bf16.mxu1 %v10010_v30  ;;  %v6759_v30 = vld [vmem:[#allocation28 + $0x3a0] sm:$0xff] }
 0xf01   : > { %v10048_v21 = vpack.c.bf16 %v6761_v20, %v6759_v30  ;;  %v6802_v30 = vld [vmem:[#allocation28 + $0x4f8] sm:$0xff] }
 0xf03   : > { %10013 = vmatpush1.bf16.msra.mxu1 %v10012_v47  ;;  %v10050_v47 = vpack.c.bf16 %v6766_v39, %v6764_v26  ;;  %v6799_v39 = vld [vmem:[#allocation28 + $0x4e0] sm:$0xff] }
 0xf04   : > { %10015 = vmatprep.subr.bf16.mxu1 %v10014_v58  ;;  %v6763_v58 = vld [vmem:[#allocation28 + $0x3c0] sm:$0xff] }
 0xf05   : > { %v10052_v2 = vpack.c.bf16 %v6765_v49, %v6763_v58  ;;  %v6806_v58 = vld [vmem:[#allocation28 + $0x518] sm:$0xff] }
 0xf07   : > { %10017 = vmatpush1.bf16.msra.mxu1 %v10016_v55  ;;  %v10054_v55 = vpack.c.bf16 %v6770_v19, %v6768_v63  ;;  %v6803_v19 = vld [vmem:[#allocation28 + $0x500] sm:$0xff] }
 0xf08   : > { %10019 = vmatprep.subr.bf16.mxu1 %v10018_v50  ;;  %v6767_v50 = vld [vmem:[#allocation28 + $0x3e0] sm:$0xff] }
 0xf09   : > { %v10056_v31 = vpack.c.bf16 %v6769_v22, %v6767_v50  ;;  %v6810_v50 = vld [vmem:[#allocation28 + $0x538] sm:$0xff] }
 0xf0b   : > { %10021 = vmatpush1.bf16.msra.mxu1 %v10020_v25  ;;  %v10058_v25 = vpack.c.bf16 %v6774_v48, %v6772_v14  ;;  %v6807_v48 = vld [vmem:[#allocation28 + $0x520] sm:$0xff] }
 0xf0c   : > { %10023 = vmatprep.subr.bf16.mxu1 %v10022_v27  ;;  %v6771_v27 = vld [vmem:[#allocation28 + $0x400] sm:$0xff] }
 0xf0d   : > { %v10060_v36 = vpack.c.bf16 %v6773_v6, %v6771_v27  ;;  %v6814_v27 = vld [vmem:[#allocation28 + $0x558] sm:$0xff] }
 0xf0f   : > { %10025 = vmatpush1.bf16.msra.mxu1 %v10024_v40  ;;  %v10062_v40 = vpack.c.bf16 %v6778_v56, %v6776_v38  ;;  %v6811_v56 = vld [vmem:[#allocation28 + $0x540] sm:$0xff] }
 0xf10   : > { %10027 = vmatprep.subr.bf16.mxu1 %v10026_v41  ;;  %v6775_v41 = vld [vmem:[#allocation28 + $0x420] sm:$0xff] }
 0xf11   : > { %v10064_v45 = vpack.c.bf16 %v6777_v23, %v6775_v41  ;;  %v6818_v41 = vld [vmem:[#allocation28 + $0x578] sm:$0xff] }
 0xf13   : > { %10029 = vmatpush1.bf16.msra.mxu1 %v10028_v13  ;;  %v10066_v13 = vpack.c.bf16 %v6782_v43, %v6780_v3  ;;  %v6815_v43 = vld [vmem:[#allocation28 + $0x560] sm:$0xff] }
 0xf14   : > { %10031 = vmatprep.subr.bf16.mxu1 %v10030_v46  ;;  %v6779_v46 = vld [vmem:[#allocation28 + $0x440] sm:$0xff] }
 0xf15   : > { %v10068_v33 = vpack.c.bf16 %v6781_v32, %v6779_v46  ;;  %v6822_v46 = vld [vmem:[#allocation28 + $0x598] sm:$0xff] }
 0xf17   : > { %10033 = vmatpush1.bf16.msra.mxu1 %v10032_v51  ;;  %v10070_v51 = vpack.c.bf16 %v6786_v8, %v6784_v52  ;;  %v6819_v8 = vld [vmem:[#allocation28 + $0x580] sm:$0xff] }
 0xf18   : > { %10035 = vmatprep.subr.bf16.mxu1 %v10034_v42  ;;  %v6783_v42 = vld [vmem:[#allocation28 + $0x460] sm:$0xff] }
 0xf1b   : > { %10037 = vmatpush1.bf16.msra.mxu1 %v10036_v54  ;;  %v6787_v54 = vld [vmem:[#allocation28 + $0x480] sm:$0xff] }
 0xf1c   : > { %10039 = vmatprep.subr.bf16.mxu1 %v10038_v57  ;;  %v6792_v57 = vld [vmem:[#allocation28 + $0x4a8] sm:$0xff] }
 0xf1d   : > { %v10078_v4 = vpack.c.bf16 %v6794_v16, %v6792_v57  ;;  %v6827_v16 = vld [vmem:[#allocation28 + $0x5c0] sm:$0xff] }
 0xf1f   : > { %10041 = vmatpush1.bf16.msra.mxu1 %v10040_v7  ;;  %v6793_v7 = vld [vmem:[#allocation28 + $0x4b0] sm:$0xff] }
 0xf20   : > { %10043 = vmatprep.subr.bf16.mxu1 %v10042_v44  ;;  %v6796_v44 = vld [vmem:[#allocation28 + $0x4c8] sm:$0xff]  ;;  %v10080_v12 = vpack.c.bf16 %v6793_v7, %v6791_v60  ;;  %v6834_v60 = vld [vmem:[#allocation28 + $0x5f8] sm:$0xff] }
 0xf21   : > { %v10082_v1 = vpack.c.bf16 %v6798_v10, %v6796_v44  ;;  %v6831_v10 = vld [vmem:[#allocation28 + $0x5e0] sm:$0xff] }
 0xf23   : > { %10045 = vmatpush1.bf16.msra.mxu1 %v10044_v29  ;;  %v6797_v29 = vld [vmem:[#allocation28 + $0x4d0] sm:$0xff] }
 0xf24   : > { %10047 = vmatprep.subr.bf16.mxu1 %v10046_v37  ;;  %v6800_v37 = vld [vmem:[#allocation28 + $0x4e8] sm:$0xff]  ;;  %v10084_v20 = vpack.c.bf16 %v6797_v29, %v6795_v17  ;;  %v6835_v17 = vld [vmem:[#allocation29] sm:$0x3]  ;;  %v5979_v29 = vrot.slane %v12471_v34, %v12293_v61 }
 0xf25   : > { %v10086_v26 = vpack.c.bf16 %v6802_v30, %v6800_v37  ;;  %v6840_v37 = vrot.slane %v6835_v17, %v12252_v11  ;;  %v5983_v30 = vrot.slane %v12471_v34, %v12296_v5  ;;  %v7308_v61 = vld [vmem:[#allocation32 + $0x88] sm:$0xff]  ;;  %v7140_v11 = vld [vmem:[#allocation31 + $0x8] sm:$0xff]  ;;  %v7291_v5 = vld [vmem:[#allocation32] sm:$0xff] }
 0xf26   : > { %v7292_v34 = vld [vmem:[#allocation32 + $0x8] sm:$0xff] }
 0xf27   : > { %10049 = vmatpush1.bf16.msra.mxu1 %v10048_v21  ;;  %v6801_v21 = vld [vmem:[#allocation28 + $0x4f0] sm:$0xff] }
 0xf28   : > { %10051 = vmatprep.subr.bf16.mxu1 %v10050_v47  ;;  %v6804_v47 = vld [vmem:[#allocation28 + $0x508] sm:$0xff]  ;;  %v10088_v49 = vpack.c.bf16 %v6801_v21, %v6799_v39 }
 0xf29   : > { %v10090_v63 = vpack.c.bf16 %v6806_v58, %v6804_v47 }
 0xf2b   : > { %10053 = vmatpush1.bf16.msra.mxu1 %v10052_v2  ;;  %v6805_v2 = vld [vmem:[#allocation28 + $0x510] sm:$0xff] }
 0xf2c   : > { %10055 = vmatprep.subr.bf16.mxu1 %v10054_v55  ;;  %v6808_v55 = vld [vmem:[#allocation28 + $0x528] sm:$0xff]  ;;  %v10092_v22 = vpack.c.bf16 %v6805_v2, %v6803_v19  ;;  %v7307_v2 = vld [vmem:[#allocation32 + $0x80] sm:$0xff] }
 0xf2d   : > { %v10094_v14 = vpack.c.bf16 %v6810_v50, %v6808_v55  ;;  %v7309_v55 = vld [vmem:[#allocation32 + $0x90] sm:$0xff]  ;;  %v7310_v50 = vld [vmem:[#allocation32 + $0x98] sm:$0xff] }
 0xf2f   : > { %10057 = vmatpush1.bf16.msra.mxu1 %v10056_v31  ;;  %v6809_v31 = vld [vmem:[#allocation28 + $0x530] sm:$0xff] }
 0xf30   : > { %10059 = vmatprep.subr.bf16.mxu1 %v10058_v25  ;;  %v6812_v25 = vld [vmem:[#allocation28 + $0x548] sm:$0xff]  ;;  %v10096_v6 = vpack.c.bf16 %v6809_v31, %v6807_v48  ;;  %v10126_v48 = vpack.c.bf16 %v7310_v50, %v7309_v55 }
 0xf31   : > { %v10098_v38 = vpack.c.bf16 %v6814_v27, %v6812_v25  ;;  %v7293_v31 = vld [vmem:[#allocation32 + $0x10] sm:$0xff]  ;;  %v7294_v25 = vld [vmem:[#allocation32 + $0x18] sm:$0xff]  ;;  %v7311_v27 = vld [vmem:[#allocation32 + $0xa0] sm:$0xff] }
 0xf32   : > { %6983 = vmatmul.mubr.f32.vlgmr.msra.gmra.mrb[46].mxu1 %v12483_v18  ;;  %v10072_v18 = vpack.c.bf16 %v6785_v53, %v6783_v42  ;;  %v6826_v42 = vld [vmem:[#allocation28 + $0x5b8] sm:$0xff]  ;;  %v7345_v50 = vld [vmem:[#allocation32 + $0x1b0] sm:$0xff] }
 0xf33   : > { %10061 = vmatpush1.bf16.msra.mxu1 %v10060_v36  ;;  %7053 = vmatprep.mubr.f32.mxu1 %v12487_v9  ;;  %v6789_v9 = vld [vmem:[#allocation28 + $0x490] sm:$0xff] }
 0xf34   : > { %10063 = vmatprep.subr.bf16.mxu1 %v10062_v40  ;;  %v10076_v62 = vpack.c.bf16 %v6789_v9, %v6787_v54  ;;  %v6813_v36 = vld [vmem:[#allocation28 + $0x550] sm:$0xff]  ;;  %v6816_v40 = vld [vmem:[#allocation28 + $0x568] sm:$0xff]  ;;  %v6830_v54 = vld [vmem:[#allocation28 + $0x5d8] sm:$0xff] }
 0xf35   : > { %v10100_v23 = vpack.c.bf16 %v6813_v36, %v6811_v56  ;;  %v10102_v3 = vpack.c.bf16 %v6818_v41, %v6816_v40  ;;  %v7295_v36 = vld [vmem:[#allocation32 + $0x20] sm:$0xff]  ;;  %v7296_v40 = vld [vmem:[#allocation32 + $0x28] sm:$0xff]  ;;  %v7313_v41 = vld [vmem:[#allocation32 + $0xb0] sm:$0xff] }
 0xf37   : > { %10065 = vmatpush1.bf16.msra.mxu1 %v10064_v45  ;;  %v6817_v45 = vld [vmem:[#allocation28 + $0x570] sm:$0xff] }
 0xf38   : > { %10067 = vmatprep.subr.bf16.mxu1 %v10066_v13  ;;  %v6820_v13 = vld [vmem:[#allocation28 + $0x588] sm:$0xff]  ;;  %v10104_v32 = vpack.c.bf16 %v6817_v45, %v6815_v43  ;;  %v7298_v45 = vld [vmem:[#allocation32 + $0x38] sm:$0xff] }
 0xf39   : > { %v10106_v52 = vpack.c.bf16 %v6822_v46, %v6820_v13  ;;  %v7297_v43 = vld [vmem:[#allocation32 + $0x30] sm:$0xff]  ;;  %v7315_v13 = vld [vmem:[#allocation32 + $0xc0] sm:$0xff]  ;;  %v7316_v46 = vld [vmem:[#allocation32 + $0xc8] sm:$0xff] }
 0xf3b   : > { %10069 = vmatpush1.bf16.msra.mxu1 %v10068_v33  ;;  %v6821_v33 = vld [vmem:[#allocation28 + $0x590] sm:$0xff] }
 0xf3c   : > { %10071 = vmatprep.subr.bf16.mxu1 %v10070_v51  ;;  %v6824_v51 = vld [vmem:[#allocation28 + $0x5a8] sm:$0xff]  ;;  %v10108_v53 = vpack.c.bf16 %v6821_v33, %v6819_v8  ;;  %v7299_v8 = vld [vmem:[#allocation32 + $0x40] sm:$0xff] }
 0xf3d   : > { %v10110_v24 = vpack.c.bf16 %v6826_v42, %v6824_v51  ;;  %v7300_v33 = vld [vmem:[#allocation32 + $0x48] sm:$0xff]  ;;  %v7317_v51 = vld [vmem:[#allocation32 + $0xd0] sm:$0xff]  ;;  %v7318_v42 = vld [vmem:[#allocation32 + $0xd8] sm:$0xff] }
 0xf3f   : > { %10073 = vmatpush1.bf16.msra.mxu1 %v10072_v18  ;;  %v6825_v18 = vld [vmem:[#allocation28 + $0x5b0] sm:$0xff] }
 0xf40   : > { %10075 = vmatprep.subr.bf16.mxu1 %v10074_v28  ;;  %v6828_v28 = vld [vmem:[#allocation28 + $0x5c8] sm:$0xff]  ;;  %v10112_v9 = vpack.c.bf16 %v6825_v18, %v6823_v59  ;;  %v7302_v18 = vld [vmem:[#allocation32 + $0x58] sm:$0xff] }
 0xf41   : > { %v10114_v57 = vpack.c.bf16 %v6830_v54, %v6828_v28  ;;  %v7301_v59 = vld [vmem:[#allocation32 + $0x50] sm:$0xff]  ;;  %v7319_v28 = vld [vmem:[#allocation32 + $0xe0] sm:$0xff]  ;;  %v7320_v54 = vld [vmem:[#allocation32 + $0xe8] sm:$0xff] }
 0xf43   : > { %10077 = vmatpush1.bf16.msra.mxu1 %v10076_v62  ;;  %v6829_v62 = vld [vmem:[#allocation28 + $0x5d0] sm:$0xff] }
 0xf44   : > { %10079 = vmatprep.subr.bf16.mxu1 %v10078_v4  ;;  %v6832_v4 = vld [vmem:[#allocation28 + $0x5e8] sm:$0xff]  ;;  %v10116_v7 = vpack.c.bf16 %v6829_v62, %v6827_v16  ;;  %v7303_v16 = vld [vmem:[#allocation32 + $0x60] sm:$0xff] }
 0xf45   : > { %v10118_v44 = vpack.c.bf16 %v6834_v60, %v6832_v4  ;;  %v7304_v62 = vld [vmem:[#allocation32 + $0x68] sm:$0xff]  ;;  %v7321_v4 = vld [vmem:[#allocation32 + $0xf0] sm:$0xff]  ;;  %v7322_v60 = vld [vmem:[#allocation32 + $0xf8] sm:$0xff] }
 0xf47   : > { %10081 = vmatpush1.bf16.msra.mxu1 %v10080_v12  ;;  %v6833_v12 = vld [vmem:[#allocation28 + $0x5f0] sm:$0xff] }
 0xf48   : > { %10083 = vmatprep.subr.bf16.mxu1 %v10082_v1  ;;  %v10120_v1 = vpack.c.bf16 %v6833_v12, %v6831_v10  ;;  %v7305_v10 = vld [vmem:[#allocation32 + $0x70] sm:$0xff]  ;;  %v7306_v12 = vld [vmem:[#allocation32 + $0x78] sm:$0xff] }
 0xf4b   : > { %10085 = vmatpush1.bf16.msra.mxu1 %v10084_v20  ;;  %v6844_v20 = vrot.slane %v6835_v17, %v12257_v15  ;;  %v10122_v15 = vpack.c.bf16 %v7308_v61, %v7307_v2  ;;  %v7339_v17 = vld [vmem:[#allocation32 + $0x180] sm:$0xff]  ;;  %v7344_v2 = vld [vmem:[#allocation32 + $0x1a8] sm:$0xff] }
 0xf4c   : > { %10087 = vmatprep.subr.bf16.mxu1 %v10086_v26  ;;  %v10250_v26 = vadd.f32 %v6840_v37, %v5979_v29  ;;  %v7340_v29 = vld [vmem:[#allocation32 + $0x188] sm:$0xff] }
 0xf4d   : > { %v10252_v39 = vadd.f32 %v6844_v20, %v5983_v30  ;;  %v10154_v37 = vpack.c.bf16 %v7340_v29, %v7339_v17  ;;  %v7323_v30 = vld [vmem:[#allocation32 + $0x100] sm:$0xff]  ;;  %v7324_v20 = vld [vmem:[#allocation32 + $0x108] sm:$0xff]  ;;  %v7358_v17 = vld [vmem:[#allocation32 + $0x218] sm:$0xff] }
 0xf4e   : > { %v7375_v29 = vld [vmem:[#allocation32 + $0x2a0] sm:$0xff] }
 0xf4f   : > { %10089 = vmatpush1.bf16.msra.mxu1 %v10088_v49 }
 0xf50   : > { %10091 = vmatprep.subr.bf16.mxu1 %v10090_v63 }
 0xf53   : > { %10093 = vmatpush1.bf16.msra.mxu1 %v10092_v22  ;;  %v7216_v22 = vld [vmem:[#allocation31 + $0x10] sm:$0xff] }
 0xf54   : > { %10095 = vmatprep.subr.bf16.mxu1 %v10094_v14  ;;  %v10124_v14 = vpack.c.bf16 %v7292_v34, %v7291_v5  ;;  %v7327_v5 = vld [vmem:[#allocation32 + $0x120] sm:$0xff]  ;;  %v7328_v34 = vld [vmem:[#allocation32 + $0x128] sm:$0xff] }
 0xf57   : > { %10097 = vmatpush1.bf16.msra.mxu1 %v10096_v6  ;;  %v7312_v6 = vld [vmem:[#allocation32 + $0xa8] sm:$0xff] }
 0xf58   : > { %10099 = vmatprep.subr.bf16.mxu1 %v10098_v38  ;;  %v10128_v38 = vpack.c.bf16 %v7294_v25, %v7293_v31  ;;  %v10130_v56 = vpack.c.bf16 %v7312_v6, %v7311_v27  ;;  %v7329_v25 = vld [vmem:[#allocation32 + $0x130] sm:$0xff]  ;;  %v7330_v27 = vld [vmem:[#allocation32 + $0x138] sm:$0xff] }
 0xf5b   : > { %10101 = vmatpush1.bf16.msra.mxu1 %v10100_v23  ;;  %v7314_v23 = vld [vmem:[#allocation32 + $0xb8] sm:$0xff] }
 0xf5c   : > { %10103 = vmatprep.subr.bf16.mxu1 %v10102_v3  ;;  %v10134_v3 = vpack.c.bf16 %v7314_v23, %v7313_v41  ;;  %v7331_v41 = vld [vmem:[#allocation32 + $0x140] sm:$0xff]  ;;  %v7332_v23 = vld [vmem:[#allocation32 + $0x148] sm:$0xff] }
 0xf5f   : > { %10105 = vmatpush1.bf16.msra.mxu1 %v10104_v32  ;;  %v10136_v32 = vpack.c.bf16 %v7298_v45, %v7297_v43  ;;  %v10172_v43 = vpack.c.bf16 %v7332_v23, %v7331_v41  ;;  %v7386_v41 = vld [vmem:[#allocation32 + $0x2f8] sm:$0xff] }
 0xf60   : > { %10107 = vmatprep.subr.bf16.mxu1 %v10106_v52  ;;  %v10138_v52 = vpack.c.bf16 %v7316_v46, %v7315_v13  ;;  %v7333_v13 = vld [vmem:[#allocation32 + $0x150] sm:$0xff]  ;;  %v7334_v46 = vld [vmem:[#allocation32 + $0x158] sm:$0xff] }
 0xf63   : > { %10109 = vmatpush1.bf16.msra.mxu1 %v10108_v53  ;;  %v10140_v53 = vpack.c.bf16 %v7300_v33, %v7299_v8  ;;  %v10176_v8 = vpack.c.bf16 %v7334_v46, %v7333_v13 }
 0xf64   : > { %10111 = vmatprep.subr.bf16.mxu1 %v10110_v24  ;;  %v10142_v24 = vpack.c.bf16 %v7318_v42, %v7317_v51  ;;  %v7335_v51 = vld [vmem:[#allocation32 + $0x160] sm:$0xff]  ;;  %v7336_v42 = vld [vmem:[#allocation32 + $0x168] sm:$0xff] }
 0xf67   : > { %10113 = vmatpush1.bf16.msra.mxu1 %v10112_v9  ;;  %v10144_v9 = vpack.c.bf16 %v7302_v18, %v7301_v59  ;;  %v10180_v59 = vpack.c.bf16 %v7336_v42, %v7335_v51 }
 0xf68   : > { %10115 = vmatprep.subr.bf16.mxu1 %v10114_v57  ;;  %v10146_v57 = vpack.c.bf16 %v7320_v54, %v7319_v28  ;;  %v7337_v28 = vld [vmem:[#allocation32 + $0x170] sm:$0xff]  ;;  %v7338_v54 = vld [vmem:[#allocation32 + $0x178] sm:$0xff] }
 0xf6b   : > { %10117 = vmatpush1.bf16.msra.mxu1 %v10116_v7  ;;  %v10148_v7 = vpack.c.bf16 %v7304_v62, %v7303_v16  ;;  %v10184_v16 = vpack.c.bf16 %v7338_v54, %v7337_v28  ;;  %v7604_v28 = vld [vmem:[#allocation35] sm:$0xff] }
 0xf6c   : > { %10119 = vmatprep.subr.bf16.mxu1 %v10118_v44  ;;  %v10150_v44 = vpack.c.bf16 %v7322_v60, %v7321_v4  ;;  %v7355_v4 = vld [vmem:[#allocation32 + $0x200] sm:$0xff]  ;;  %v7356_v60 = vld [vmem:[#allocation32 + $0x208] sm:$0xff]  ;;  %vm7605_vm4 = vcmp.gt.f32.partialorder %v7604_v28, 0.5 }
 0xf6f   : > { %10121 = vmatpush1.bf16.msra.mxu1 %v10120_v1  ;;  %v10152_v1 = vpack.c.bf16 %v7306_v12, %v7305_v10  ;;  %v10188_v10 = vpack.c.bf16 %v7356_v60, %v7355_v4 }
 0xf72   : > { %7054 = vmatmul.mubr.f32.vlgmr.msra.gmra.mrb[46].mxu1 %v12485_v35  ;;  %v7064_v35 = vld [vmem:[#allocation31] sm:$0xff] }
0x1045   : > { %v7055_v21 = vpop.f32.mrb[46].mxu1 }
0x1046   : > { %v10251_v47 = vadd.f32 %v10250_v26, %v7055_v21  ;;  %v7057_v58 = vpop.f32.mrb[47].mxu1  ;;  %v7341_v26 = vld [vmem:[#allocation32 + $0x190] sm:$0xff] }
0x1047   : > { %v10253_v49 = vadd.f32 %v10252_v39, %v7057_v58  ;;  %v7342_v39 = vld [vmem:[#allocation32 + $0x198] sm:$0xff] }
0x1048   : > { %v7062_v19 = vmax.f32 %v10251_v47, 0.0  ;;  %v10156_v47 = vpack.c.bf16 %v7324_v20, %v7323_v30 }
0x1049   : > { %v7063_v63 = vmax.f32 %v10253_v49, 0.0  ;;  %v10158_v49 = vpack.c.bf16 %v7342_v39, %v7341_v26  ;;  %v7359_v26 = vld [vmem:[#allocation32 + $0x220] sm:$0xff]  ;;  %v7360_v39 = vld [vmem:[#allocation32 + $0x228] sm:$0xff] }
0x104b   : > { %7068 = vmatprep.subr.mxu0 %v7063_v63 }
0x104c   : > { %7069 = vmatpush1.msra.mxu0 %v7062_v19 }
0x104d   : > { %7980 = vmatmul.mubr.msk.f32.vlgmr.msra.gmra.mrb[68].mxu0 %vm4707_vm3, %v7064_v35  ;;  %7144 = vmatprep.subr.mxu0 %v7063_v63  ;;  %v7343_v35 = vld [vmem:[#allocation32 + $0x1a0] sm:$0xff] }
0x104e   : > { %7145 = vmatpush1.msra.mxu0 %v7062_v19  ;;  %7208 = vmatprep.mubr.f32.mxu0 %v11340_v0 }
0x104f   : > { %7220 = vmatprep.subr.mxu0 %v7063_v63  ;;  %v7325_v63 = vld [vmem:[#allocation32 + $0x110] sm:$0xff] }
0x1051   : > { %7981 = vmatmul.mubr.msk.f32.vlgmr.msra.gmra.mrb[70].mxu0 %vm4707_vm3, %v7140_v11 }
0x1052   : > { %7221 = vmatpush1.msra.mxu0 %v7062_v19  ;;  %7284 = vmatprep.mubr.f32.mxu0 %v11340_v0  ;;  %v10132_v0 = vpack.c.bf16 %v7296_v40, %v7295_v36  ;;  %v7326_v19 = vld [vmem:[#allocation32 + $0x118] sm:$0xff]  ;;  %v10168_v36 = vpack.c.bf16 %v7330_v27, %v7329_v25  ;;  %v7383_v25 = vld [vmem:[#allocation32 + $0x2e0] sm:$0xff]  ;;  %v7384_v27 = vld [vmem:[#allocation32 + $0x2e8] sm:$0xff] }
0x1053   : > { %10123 = vmatprep.subr.bf16.mxu0 %v10122_v15  ;;  %v10160_v61 = vpack.c.bf16 %v7326_v19, %v7325_v63  ;;  %v10162_v15 = vpack.c.bf16 %v7344_v2, %v7343_v35  ;;  %v7361_v63 = vld [vmem:[#allocation32 + $0x230] sm:$0xff]  ;;  %v7362_v19 = vld [vmem:[#allocation32 + $0x238] sm:$0xff]  ;;  %v7379_v35 = vld [vmem:[#allocation32 + $0x2c0] sm:$0xff] }
0x1054   : > { %v7380_v2 = vld [vmem:[#allocation32 + $0x2c8] sm:$0xff] }
0x1055   : > { %7982 = vmatmul.mubr.msk.f32.vlgmr.msra.gmra.mrb[72].mxu0 %vm4707_vm3, %v7216_v22  ;;  %v7346_v22 = vld [vmem:[#allocation32 + $0x1b8] sm:$0xff] }
0x1056   : > { %10125 = vmatpush3.bf16.msra.mxu0 %v10124_v14  ;;  %v10164_v14 = vpack.c.bf16 %v7328_v34, %v7327_v5  ;;  %v10166_v31 = vpack.c.bf16 %v7346_v22, %v7345_v50  ;;  %v7364_v5 = vld [vmem:[#allocation32 + $0x248] sm:$0xff]  ;;  %v7381_v34 = vld [vmem:[#allocation32 + $0x2d0] sm:$0xff] }
0x1057   : > { %10127 = vmatprep.subr.bf16.mxu0 %v10126_v48 }
0x105a   : > { %10129 = vmatpush3.bf16.msra.mxu0 %v10128_v38  ;;  %v7347_v38 = vld [vmem:[#allocation32 + $0x1c0] sm:$0xff] }
0x105b   : > { %10131 = vmatprep.subr.bf16.mxu0 %v10130_v56  ;;  %v7348_v56 = vld [vmem:[#allocation32 + $0x1c8] sm:$0xff] }
0x105c   : > { %v10170_v40 = vpack.c.bf16 %v7348_v56, %v7347_v38  ;;  %v10210_v38 = vpack.c.bf16 %v7384_v27, %v7383_v25  ;;  %v7367_v56 = vld [vmem:[#allocation32 + $0x260] sm:$0xff] }
0x105e   : > { %10133 = vmatpush3.bf16.msra.mxu0 %v10132_v0  ;;  %v7349_v0 = vld [vmem:[#allocation32 + $0x1d0] sm:$0xff] }
0x105f   : > { %10135 = vmatprep.subr.bf16.mxu0 %v10134_v3  ;;  %v7350_v3 = vld [vmem:[#allocation32 + $0x1d8] sm:$0xff] }
0x1060   : > { %v10174_v45 = vpack.c.bf16 %v7350_v3, %v7349_v0  ;;  %v7369_v3 = vld [vmem:[#allocation32 + $0x270] sm:$0xff] }
0x1062   : > { %10137 = vmatpush3.bf16.msra.mxu0 %v10136_v32  ;;  %v7351_v32 = vld [vmem:[#allocation32 + $0x1e0] sm:$0xff] }
0x1063   : > { %10139 = vmatprep.subr.bf16.mxu0 %v10138_v52  ;;  %v7352_v52 = vld [vmem:[#allocation32 + $0x1e8] sm:$0xff] }
0x1064   : > { %v10178_v33 = vpack.c.bf16 %v7352_v52, %v7351_v32  ;;  %v7983_v52 = vld [vmem:[#allocation34] ss:$0 sm:$0xff] }
0x1066   : > { %10141 = vmatpush3.bf16.msra.mxu0 %v10140_v53  ;;  %v7353_v53 = vld [vmem:[#allocation32 + $0x1f0] sm:$0xff] }
0x1067   : > { %10143 = vmatprep.subr.bf16.mxu0 %v10142_v24  ;;  %v7354_v24 = vld [vmem:[#allocation32 + $0x1f8] sm:$0xff] }
0x1068   : > { %v10182_v18 = vpack.c.bf16 %v7354_v24, %v7353_v53 }
0x106a   : > { %10145 = vmatpush3.bf16.msra.mxu0 %v10144_v9  ;;  %v7371_v9 = vld [vmem:[#allocation32 + $0x280] sm:$0xff] }
0x106b   : > { %10147 = vmatprep.subr.bf16.mxu0 %v10146_v57  ;;  %v7372_v57 = vld [vmem:[#allocation32 + $0x288] sm:$0xff] }
0x106c   : > { %v10186_v62 = vpack.c.bf16 %v7372_v57, %v7371_v9 }
0x106e   : > { %10149 = vmatpush3.bf16.msra.mxu0 %v10148_v7  ;;  %v7373_v7 = vld [vmem:[#allocation32 + $0x290] sm:$0xff] }
0x106f   : > { %10151 = vmatprep.subr.bf16.mxu0 %v10150_v44  ;;  %v7374_v44 = vld [vmem:[#allocation32 + $0x298] sm:$0xff] }
0x1070   : > { %v10190_v12 = vpack.c.bf16 %v7374_v44, %v7373_v7 }
0x1072   : > { %10153 = vmatpush3.bf16.msra.mxu0 %v10152_v1  ;;  %v7357_v1 = vld [vmem:[#allocation32 + $0x210] sm:$0xff] }
0x1073   : > { %10155 = vmatprep.subr.bf16.mxu0 %v10154_v37  ;;  %v7376_v37 = vld [vmem:[#allocation32 + $0x2a8] sm:$0xff]  ;;  %v10192_v30 = vpack.c.bf16 %v7358_v17, %v7357_v1 }
0x1074   : > { %v10194_v20 = vpack.c.bf16 %v7376_v37, %v7375_v29 }
0x1120   : > { %v7134_v21 = vpop.f32.mrb[68].mxu0 }
0x1121   : > { %v7136_v58 = vpop.f32.mrb[69].mxu0 }
0x1122   : > { %7458 = vmatprep.mubr.f32.mxu0 %v7136_v58  ;;  %v10196_v58 = vpack.c.bf16 %v7360_v39, %v7359_v26 }
0x1123   : > { %7459 = vmatmul.mubr.f32.vlgmr.msra.gmra.mrb[74].mxu0 %v7134_v21  ;;  %v7377_v21 = vld [vmem:[#allocation32 + $0x2b0] sm:$0xff] }
0x1124   : > { %10157 = vmatpush3.bf16.msra.mxu0 %v10156_v47  ;;  %v12503_v11 = vpop.f32.mrb[70].mxu0  ;;  %v7378_v47 = vld [vmem:[#allocation32 + $0x2b8] sm:$0xff] }
0x1125   : > { %10159 = vmatprep.subr.bf16.mxu0 %v10158_v49  ;;  %v7212_v55 = vpop.f32.mrb[71].mxu0  ;;  %v10198_v49 = vpack.c.bf16 %v7378_v47, %v7377_v21 }
0x1126   : > { %7528 = vmatprep.mubr.f32.mxu0 %v7212_v55  ;;  %v7382_v55 = vld [vmem:[#allocation32 + $0x2d8] sm:$0xff] }
0x1127   : > { %v10206_v22 = vpack.c.bf16 %v7382_v55, %v7381_v34 }
0x1128   : > { %10161 = vmatpush3.bf16.msra.mxu0 %v10160_v61  ;;  %v12505_v48 = vpop.f32.mrb[72].mxu0  ;;  %v10200_v61 = vpack.c.bf16 %v7362_v19, %v7361_v63 }
0x1129   : > { %10163 = vmatprep.subr.bf16.mxu0 %v10162_v15  ;;  %v7288_v6 = vpop.f32.mrb[73].mxu0  ;;  %v7363_v15 = vld [vmem:[#allocation32 + $0x240] sm:$0xff] }
0x112a   : > { %v10204_v50 = vpack.c.bf16 %v7364_v5, %v7363_v15 }
0x112c   : > { %10165 = vmatpush3.bf16.msra.mxu0 %v10164_v14  ;;  %v7365_v14 = vld [vmem:[#allocation32 + $0x250] sm:$0xff] }
0x112d   : > { %10167 = vmatprep.subr.bf16.mxu0 %v10166_v31  ;;  %v7366_v31 = vld [vmem:[#allocation32 + $0x258] sm:$0xff] }
0x1130   : > { %10169 = vmatpush3.bf16.msra.mxu0 %v10168_v36  ;;  %v7368_v36 = vld [vmem:[#allocation32 + $0x268] sm:$0xff] }
0x1131   : > { %10171 = vmatprep.subr.bf16.mxu0 %v10170_v40  ;;  %v7385_v40 = vld [vmem:[#allocation32 + $0x2f0] sm:$0xff]  ;;  %v10212_v23 = vpack.c.bf16 %v7368_v36, %v7367_v56 }
0x1132   : > { %v10214_v0 = vpack.c.bf16 %v7386_v41, %v7385_v40 }
0x1134   : > { %10173 = vmatpush3.bf16.msra.mxu0 %v10172_v43  ;;  %v7370_v43 = vld [vmem:[#allocation32 + $0x278] sm:$0xff] }
0x1135   : > { %10175 = vmatprep.subr.bf16.mxu0 %v10174_v45  ;;  %v10216_v45 = vpack.c.bf16 %v7370_v43, %v7369_v3 }
0x1138   : > { %10177 = vmatpush3.bf16.msra.mxu0 %v10176_v8 }
0x1139   : > { %10179 = vmatprep.subr.bf16.mxu0 %v10178_v33 }
0x113c   : > { %10181 = vmatpush3.bf16.msra.mxu0 %v10180_v59 }
0x113d   : > { %10183 = vmatprep.subr.bf16.mxu0 %v10182_v18 }
0x1140   : > { %10185 = vmatpush3.bf16.msra.mxu0 %v10184_v16 }
0x1141   : > { %10187 = vmatprep.subr.bf16.mxu0 %v10186_v62 }
0x1143   : > { %7529 = vmatmul.mubr.f32.vlgmr.msra.gmra.mrb[76].mxu0 %v12503_v11  ;;  %v10202_v11 = vpack.c.bf16 %v7380_v2, %v7379_v35 }
0x1144   : > { %10189 = vmatpush3.bf16.msra.mxu0 %v10188_v10  ;;  %7598 = vmatprep.mubr.f32.mxu0 %v7288_v6  ;;  %v10208_v6 = vpack.c.bf16 %v7366_v31, %v7365_v14 }
0x1145   : > { %10191 = vmatprep.subr.bf16.mxu0 %v10190_v12 }
0x1148   : > { %10193 = vmatpush3.bf16.msra.mxu0 %v10192_v30 }
0x1149   : > { %10195 = vmatprep.subr.bf16.mxu0 %v10194_v20 }
0x114c   : > { %10197 = vmatpush3.bf16.msra.mxu0 %v10196_v58 }
0x114d   : > { %10199 = vmatprep.subr.bf16.mxu0 %v10198_v49 }
0x1150   : > { %10201 = vmatpush3.bf16.msra.mxu0 %v10200_v61 }
0x1151   : > { %10203 = vmatprep.subr.bf16.mxu0 %v10202_v11 }
0x1154   : > { %10205 = vmatpush3.bf16.msra.mxu0 %v10204_v50 }
0x1155   : > { %10207 = vmatprep.subr.bf16.mxu0 %v10206_v22 }
0x1158   : > { %10209 = vmatpush3.bf16.msra.mxu0 %v10208_v6 }
0x1159   : > { %10211 = vmatprep.subr.bf16.mxu0 %v10210_v38 }
0x115c   : > { %10213 = vmatpush3.bf16.msra.mxu0 %v10212_v23 }
0x115d   : > { %10215 = vmatprep.subr.bf16.mxu0 %v10214_v0 }
0x1160   : > { %10217 = vmatpush3.bf16.msra.mxu0 %v10216_v45 }
0x1163   : > { %7599 = vmatmul.mubr.f32.vlgmr.msra.gmra.mrb[78].mxu0 %v12505_v48 }
0x11f6   : > { %v8021_v13 = vpop.f32.mrb[74].mxu0 }
0x11f7   : > { %v8022_v46 = vpop.f32.mrb[75].mxu0 }
0x11f8   : > { %v8023_v32 = vadd.f32 %v8022_v46, %v8021_v13 }
0x11fa   : > { %v7461_v51 = vadd.f32 %v8023_v32, %v7983_v52 }
0x1216   : > { %v8056_v8 = vpop.f32.mrb[76].mxu0 }
0x1217   : > { %v8057_v33 = vpop.f32.mrb[77].mxu0 }
0x1218   : > { %v8058_v42 = vadd.f32 %v8057_v33, %v8056_v8 }
0x121a   : > { %v7531_v53 = vadd.f32 %v8058_v42, %v7461_v51 }
0x1236   : > { %v8091_v24 = vpop.f32.mrb[78].mxu0 }
0x1237   : > { %v8092_v59 = vpop.f32.mrb[79].mxu0 }
0x1238   : > { %v8093_v18 = vadd.f32 %v8092_v59, %v8091_v24 }
0x123a   : > { %v7601_v54 = vadd.f32 %v8093_v18, %v7531_v53 }
0x123c   : > { %v7606_v48 = vmax.f32 %v7601_v54, 0.0 }
0x123e   : > { %v7607_v9 = vsel %vm7605_vm4, %v7606_v48, %v7601_v54 }
0x123f   : > { %7608 = vst [vmem:[%s992_s0] sm:$0xff] %v7607_v9 }
0x1240   : > { %11213 = shalt.err (!%p11210_p10)
}
0x1241   : > { %s11214_s1 = scalar_lea.hbm %s12514_s7, 128  ;;  %s11218_s0 = scalar_lea.hbm %s12700_s5, 256 }
0x1242   : > { %p11215_p11 = scmp.ne.s32.totalorder %s12514_s7, %s11214_s1  ;;  %p11219_p9 = scmp.lt.u32.totalorder %s12514_s7, %s12700_s5 }
0x1243   : > { %p11220_p7 = scmp.lt.u32.totalorder %s11218_s0, %s11214_s1  ;;  %p11222_p12 = scmp.lt.u32.totalorder %s11214_s1, %s12514_s7 }
0x1244   : > { %p11216_p3 = pnand %p11215_p11, %p12701_p1 }
0x1245   : > { %p11221_p4 = por %p11220_p7, %p11219_p9 }
0x1246   : > { %p11217_p5 = pneg %p11216_p3 }
0x1247   : > { %p11223_p13 = por %p11222_p12, %p11221_p4 }
0x1249   : > { %p11224_p0 = pnand %p11223_p13, %p11217_p5 }
0x124b   : > { %11227 = shalt.err (!%p11224_p0)
}
0x124c   : > { %10404 = dma.vmem_to_hbm [thread:$0]  (%p12701_p1), %s12516_s9, 128, %s12514_s7, %s7610_s30  }
0x124d PF: > { %s12702_s3 = sld [smem:[#allocation51_spill]]  ;;  %s12703_s22 = sld [smem:[#allocation54_spill]] }
0x124e   : > { %p12704_p2 = scmp.ne.s32.totalorder %s12671_s20, 0 }
0x1253   : > { %s7635_s2 = sand.u32 1, %s12702_s3   ;;  %p12705_p8 = scmp.ge.s32.totalorder %s12703_s22, 2 }
0x1254   : > { %s7636_s28 = scalar_lea.sflag [#allocation4], %s7635_s2 }
0x1255   : > { %p10475_p6 = pnand %p12705_p8, %p12704_p2 }
0x1257   : > { %11293 = dma.done.wait (!%p10475_p6), %s7636_s28, 128  }
0x1258   : > { %11295 = vsyncadd (!%p10475_p6), %s7636_s28, 4294967168  ;;  %s12706_s3 = sld [smem:[#allocation52_spill]]  ;;  %s12707_s28 = sld [smem:[#allocation53_spill]] }
0x1259   : > { %p46_p10 = scmp.ge.s32.totalorder %s11945_s6, 4   ;;  %s12708_s30 = smov %s11945_s6 }
0x125b   :  { %48 = sbr.rel (!%p46_p10) target bundleno = 32 (0x20), region = 253 }
0x1262   :  { %7641 = vsyncpa [#allocation3], 1 }
0x1263   :  { %7643 = vsyncpa [#allocation3 + $0x1], 1 }
0x1264   :  { %7644 = vsyncpa [#allocation6], 1 }
0x1265   :  { %7645 = vsyncpa [#allocation9], 1 }
0x1266   :  { %7646 = vsyncpa [#allocation12], 1 }
0x1267   :  { %7647 = vsyncpa [#allocation15], 1 }
0x1268   :  { %7648 = vsyncpa [#allocation18], 1 }
0x1269   :  { %7649 = vsyncpa [#allocation21], 1 }
0x126a   :  { %7650 = vsyncpa [#allocation24], 1 }
0x126b   :  { %7651 = vsyncpa [#allocation27], 1 }
0x126c   :  { %7652 = vsyncpa [#allocation30], 1 }
0x126d   :  { %7653 = vsyncpa [#allocation33], 1 }
0x126e   :  { %7654 = vsyncpa [#allocation36], 1 }
0x126f   :  { %7655 = vsyncpa [#allocation4], 1 }
0x1270   :  { %7657 = vsyncpa [#allocation4 + $0x1], 1 }

</bundles_post_ra>
